<compile_context>
chip_gen: v7x
topology: tpu7x:2x2x1
jax: 0.10.0
libtpu: 0.0.40
codegen_flags: <defaults>
</compile_context>

<pallas_src>
import jax
import jax.numpy as jnp
import numpy as np
from jax.experimental import pallas as pl
from jax.experimental.pallas import tpu as pltpu

LANES = 128          # lane-dense channel / feature padding
IMG_BLOCK_1 = 4      # images per grid step for kernel 1
IMG_BLOCK_2 = 8      # images per grid step for kernel 2 (batch padded to mult. of 8)


def _round_up(x, m):
    return (x + m - 1) // m * m


# ---------------------------------------------------------------------------
# Pallas kernels
# ---------------------------------------------------------------------------
def conv_relu_pool_kernel(x4_ref, w_ref, b_ref, o_ref):
    # x4: (4, bm, K) im2col patches for the 4 pool offsets; w: (K, 128); b: (1, 128)
    s, bm, k = x4_ref.shape
    c = w_ref.shape[1]
    # One contiguous MXU stream for all 4 offsets instead of 4 small matmuls.
    y = jnp.dot(x4_ref[...].reshape(s * bm, k), w_ref[...],
                preferred_element_type=jnp.float32)
    y = y.reshape(s, bm, c)
    m = jnp.maximum(jnp.maximum(y[0], y[1]), jnp.maximum(y[2], y[3]))
    # bias once, AFTER the max (max(z_s)+b == max(z_s+b)); relu/max commute.
    o_ref[...] = jnp.maximum(m + b_ref[...], 0.0)


def conv_pool_mlp_kernel(x4_ref, w2_ref, b2_ref, wf1_ref, bf1_ref,
                         wf2_ref, bf2_ref, wf3_ref, bf3_ref, o_ref):
    # x4: (4, 25, bn, K2); w2: (K2, 128); wf1: (25, 128, 128); other fc params (*, 128)
    s, npos, bn, k = x4_ref.shape
    c = w2_ref.shape[1]
    # conv2 over all 4 pool offsets and all 25 pooled positions as one matmul.
    y = jnp.dot(x4_ref[...].reshape(s * npos * bn, k), w2_ref[...],
                preferred_element_type=jnp.float32)
    y = y.reshape(s, npos, bn, c)
    y = jnp.maximum(jnp.maximum(y[0], y[1]), jnp.maximum(y[2], y[3]))  # (25, bn, 128)
    y = jnp.maximum(y + b2_ref[...], 0.0)                              # conv2 relu
    # fc1: NCHW-flatten ordering is absorbed into wf1's (pos, cin, cout) layout,
    # so we just accumulate one matmul per pooled position (no transpose/reshape).
    h = jnp.zeros((bn, c), jnp.float32)
    for pos in range(npos):                                            # unrolled (25)
        h = h + jnp.dot(y[pos], wf1_ref[pos], preferred_element_type=jnp.float32)
    h = jnp.maximum(h + bf1_ref[...], 0.0)
    h = jnp.maximum(jnp.dot(h, wf2_ref[...], preferred_element_type=jnp.float32)
                    + bf2_ref[...], 0.0)
    o_ref[...] = jnp.dot(h, wf3_ref[...], preferred_element_type=jnp.float32) + bf3_ref[...]


def conv1_relu_pool(x4, w, b, *, bm):
    S, M, K = x4.shape
    C = w.shape[1]
    return pl.pallas_call(
        conv_relu_pool_kernel,
        out_shape=jax.ShapeDtypeStruct((M, C), jnp.float32),
        grid_spec=pltpu.PrefetchScalarGridSpec(
            num_scalar_prefetch=0,
            grid=(M // bm,),
            in_specs=[
                pl.BlockSpec((S, bm, K), lambda i: (0, i, 0)),
                pl.BlockSpec((K, C), lambda i: (0, 0)),   # weights stay VMEM-resident
                pl.BlockSpec((1, C), lambda i: (0, 0)),
            ],
            out_specs=pl.BlockSpec((bm, C), lambda i: (i, 0)),
        ),
        compiler_params=pltpu.CompilerParams(
            dimension_semantics=("parallel",),
            vmem_limit_bytes=48 * 1024 * 1024),
    )(x4, w, b)


def conv2_pool_mlp(x4b, w2, b2, wf1, bf1, wf2, bf2, wf3, bf3, *, bn):
    S, P, Npad, K = x4b.shape
    C = w2.shape[1]
    return pl.pallas_call(
        conv_pool_mlp_kernel,
        out_shape=jax.ShapeDtypeStruct((Npad, C), jnp.float32),
        grid_spec=pltpu.PrefetchScalarGridSpec(
            num_scalar_prefetch=0,
            grid=(Npad // bn,),
            in_specs=[
                pl.BlockSpec((S, P, bn, K), lambda i: (0, 0, i, 0)),
                pl.BlockSpec((K, C), lambda i: (0, 0)),
                pl.BlockSpec((1, C), lambda i: (0, 0)),
                pl.BlockSpec((P, C, C), lambda i: (0, 0, 0)),
                pl.BlockSpec((1, C), lambda i: (0, 0)),
                pl.BlockSpec((C, C), lambda i: (0, 0)),
                pl.BlockSpec((1, C), lambda i: (0, 0)),
                pl.BlockSpec((C, C), lambda i: (0, 0)),
                pl.BlockSpec((1, C), lambda i: (0, 0)),
            ],
            out_specs=pl.BlockSpec((bn, C), lambda i: (i, 0)),
        ),
        compiler_params=pltpu.CompilerParams(
            dimension_semantics=("parallel",),
            vmem_limit_bytes=48 * 1024 * 1024),
    )(x4b, w2, b2, wf1, bf1, wf2, bf2, wf3, bf3)


# ---------------------------------------------------------------------------
# Glue (pure-JAX layout / gather; no heavy compute)
# ---------------------------------------------------------------------------
def im2col_pooled(x_nhwc, kh, kw):
    """Patches for a VALID (kh,kw) conv followed by 2x2/stride-2 max pool.
    Returns (4, N, OH2, OW2, kh*kw*Cin); axis 0 enumerates the 4 pool offsets."""
    N, H, W, Cin = x_nhwc.shape
    OH, OW = H - kh + 1, W - kw + 1
    OH2, OW2 = OH // 2, OW // 2
    offsets = []
    for dh in range(2):
        for dw in range(2):
            patches = []
            for ih in range(kh):
                for iw in range(kw):
                    sl = x_nhwc[:,
                                dh + ih: dh + ih + 2 * OH2: 2,
                                dw + iw: dw + iw + 2 * OW2: 2,
                                :]                      # (N, OH2, OW2, Cin)
                    patches.append(sl)
            p = jnp.stack(patches, axis=3)              # (N, OH2, OW2, kh*kw, Cin)
            offsets.append(p.reshape(N, OH2, OW2, kh * kw * Cin))
    return jnp.stack(offsets, axis=0)


def prepare_params(params):
    """Pad all output widths to 128 lanes and pre-permute fc1 to absorb the
    NCHW flatten ordering (done once, outside the hot path)."""
    (w1c, b1c, w2c, b2c, wf1, bf1, wf2, bf2, wf3, bf3) = params
    C = LANES

    def padc(a):
        return jnp.pad(a, [(0, 0)] * (a.ndim - 1) + [(0, C - a.shape[-1])])

    w1 = padc(w1c.reshape(5 * 5 * 3, 6))                 # (75, 128)
    b1 = padc(b1c.reshape(1, 6))                         # (1, 128)
    w2 = padc(w2c.reshape(5 * 5 * 6, 16))                # (150, 128)
    b2 = padc(b2c.reshape(1, 16))                        # (1, 128)
    # fc1 rows reordered from NCHW-flat (c*25 + pos) to (pos, c), then padded.
    wf1_pcf = wf1.reshape(16, 25, 120).transpose(1, 0, 2)        # (25, 16, 120)
    wf1_pcf = jnp.pad(wf1_pcf, ((0, 0), (0, C - 16), (0, C - 120)))  # (25, 128, 128)
    bf1p = padc(bf1.reshape(1, 120))
    wf2p = jnp.pad(wf2, ((0, C - 120), (0, C - 84)))
    bf2p = padc(bf2.reshape(1, 84))
    wf3p = jnp.pad(wf3, ((0, C - 84), (0, C - 10)))
    bf3p = padc(bf3.reshape(1, 10))
    return (w1, b1, w2, b2, wf1_pcf, bf1p, wf2p, bf2p, wf3p, bf3p)


def net_forward(x_nchw, prepped):
    (w1, b1, w2, b2, wf1, bf1, wf2, bf2, wf3, bf3) = prepped
    N = x_nchw.shape[0]
    N_pad = _round_up(N, IMG_BLOCK_2)

    x = jnp.transpose(x_nchw, (0, 2, 3, 1))              # NCHW -> NHWC
    x = jnp.pad(x, ((0, N_pad - N), (0, 0), (0, 0), (0, 0)))

    # ---- conv1 (3->6, 5x5) + relu + 2x2 maxpool, lane-padded to 128 channels
    x4 = im2col_pooled(x, 5, 5)                          # (4, N_pad, 14, 14, 75)
    x4 = x4.reshape(4, N_pad * 14 * 14, 75)              # rows ordered (n, h, w)
    y1 = conv1_relu_pool(x4, w1, b1, bm=IMG_BLOCK_1 * 14 * 14)  # (N_pad*196, 128)
    y1 = y1.reshape(N_pad, 14, 14, LANES)[..., :6]       # keep the 6 real channels

    # ---- conv2 + relu + pool + flatten + fc1/fc2/fc3, fully fused
    x4b = im2col_pooled(y1, 5, 5)                        # (4, N_pad, 5, 5, 150)
    x4b = x4b.transpose(0, 2, 3, 1, 4).reshape(4, 25, N_pad, 150)  # pos-major
    out = conv2_pool_mlp(x4b, w2, b2, wf1, bf1, wf2, bf2, wf3, bf3,
                         bn=IMG_BLOCK_2)                 # (N_pad, 128)
    return out[:N, :10]                                  # drop lane/batch padding


# ---------------------------------------------------------------------------
# Deterministic synthetic parameters + pure-JAX reference for validation
# ---------------------------------------------------------------------------
def init_params(key):
    ks = jax.random.split(key, 10)

    def w(k, shape, fan_in):
        return (jax.random.normal(k, shape, jnp.float32) / np.sqrt(fan_in)).astype(jnp.float32)

    w1c, b1c = w(ks[0], (5, 5, 3, 6), 75),   w(ks[1], (6,), 75)
    w2c, b2c = w(ks[2], (5, 5, 6, 16), 150), w(ks[3], (16,), 150)
    wf1, bf1 = w(ks[4], (400, 120), 400),    w(ks[5], (120,), 400)
    wf2, bf2 = w(ks[6], (120, 84), 120),     w(ks[7], (84,), 120)
    wf3, bf3 = w(ks[8], (84, 10), 84),       w(ks[9], (10,), 84)
    return (w1c, b1c, w2c, b2c, wf1, bf1, wf2, bf2, wf3, bf3)


def reference_forward(x_nchw, params):
    (w1c, b1c, w2c, b2c, wf1, bf1, wf2, bf2, wf3, bf3) = params
    x = jnp.transpose(x_nchw, (0, 2, 3, 1))

    def conv(x, w, b):
        y = jax.lax.conv_general_dilated(
            x, w, (1, 1), 'VALID', dimension_numbers=('NHWC', 'HWIO', 'NHWC'))
        return jax.nn.relu(y + b)

    def pool(x):
        return jax.lax.reduce_window(x, -jnp.inf, jax.lax.max,
                                     (1, 2, 2, 1), (1, 2, 2, 1), 'VALID')

    y = pool(conv(x, w1c, b1c))
    y = pool(conv(y, w2c, b2c))
    N = y.shape[0]
    flat = jnp.transpose(y, (0, 3, 1, 2)).reshape(N, -1)
    h = jax.nn.relu(flat @ wf1 + bf1)
    h = jax.nn.relu(h @ wf2 + bf2)
    return h @ wf3 + bf3


if __name__ == "__main__":
    key = jax.random.PRNGKey(0)
    kx, kp = jax.random.split(key)
    x = jax.random.normal(kx, (2, 3, 32, 32), jnp.float32)  # NCHW, like PyTorch
    params = init_params(kp)
    prepped = prepare_params(params)

    out = jax.jit(net_forward)(x, prepped)
    out = jax.block_until_ready(out)

    ref = reference_forward(x, params)
    np.testing.assert_allclose(np.asarray(out), np.asarray(ref), rtol=2e-3, atol=2e-3)
    assert out.shape == (2, 10) and out.dtype == jnp.float32

    print("KERNEL_OK")
</pallas_src>

<mosaic_0001>
module attributes {stable_mosaic.version = 11 : i64} {
  func.func @conv_relu_pool_kernel(%arg0: i32, %arg1: memref<4x784x75xf32, #tpu.memory_space<vmem>>, %arg2: memref<75x128xf32, #tpu.memory_space<vmem>>, %arg3: memref<1x128xf32, #tpu.memory_space<vmem>>, %arg4: memref<784x128xf32, #tpu.memory_space<vmem>>) attributes {dimension_semantics = [#tpu.dimension_semantics<parallel>], iteration_bounds = array<i64: 2>, scalar_prefetch = 0 : i64, scratch_operands = 0 : i64, tpu.core_type = #tpu.core_type<tc>, window_params = [{transform_indices = @transform_0, window_bounds = array<i64: 4, 784, 75>}, {pipeline_mode = #tpu.pipeline_mode<synchronous>, transform_indices = @transform_1, window_bounds = array<i64: 75, 128>}, {pipeline_mode = #tpu.pipeline_mode<synchronous>, transform_indices = @transform_2, window_bounds = array<i64: 1, 128>}, {transform_indices = @transform_3, window_bounds = array<i64: 784, 128>}]} {
    %c0 = arith.constant 0 : index
    %c0_0 = arith.constant 0 : index
    %c0_1 = arith.constant 0 : index
    %0 = vector.load %arg1[%c0, %c0_0, %c0_1] : memref<4x784x75xf32, #tpu.memory_space<vmem>>, vector<4x784x75xf32>
    %1 = vector.shape_cast %0 : vector<4x784x75xf32> to vector<3136x75xf32>
    %c0_2 = arith.constant 0 : index
    %c0_3 = arith.constant 0 : index
    %2 = vector.load %arg2[%c0_2, %c0_3] : memref<75x128xf32, #tpu.memory_space<vmem>>, vector<75x128xf32>
    %cst = arith.constant dense<0.000000e+00> : vector<3136x128xf32>
    %3 = tpu.matmul %1, %2, %cst {dimension_numbers = #tpu.dot_dimension_numbers<[1], [0], [0], [1], [0, 0, 1, 1], [], []>} : vector<3136x75xf32>, vector<75x128xf32>, vector<3136x128xf32> -> vector<3136x128xf32>
    %4 = vector.shape_cast %3 : vector<3136x128xf32> to vector<4x784x128xf32>
    %5 = vector.extract_strided_slice %4 {offsets = [0, 0, 0], sizes = [1, 784, 128], strides = [1, 1, 1]} : vector<4x784x128xf32> to vector<1x784x128xf32>
    %6 = vector.shape_cast %5 : vector<1x784x128xf32> to vector<784x128xf32>
    %7 = vector.extract_strided_slice %4 {offsets = [1, 0, 0], sizes = [1, 784, 128], strides = [1, 1, 1]} : vector<4x784x128xf32> to vector<1x784x128xf32>
    %8 = vector.shape_cast %7 : vector<1x784x128xf32> to vector<784x128xf32>
    %9 = arith.maximumf %6, %8 : vector<784x128xf32>
    %10 = vector.extract_strided_slice %4 {offsets = [2, 0, 0], sizes = [1, 784, 128], strides = [1, 1, 1]} : vector<4x784x128xf32> to vector<1x784x128xf32>
    %11 = vector.shape_cast %10 : vector<1x784x128xf32> to vector<784x128xf32>
    %12 = vector.extract_strided_slice %4 {offsets = [3, 0, 0], sizes = [1, 784, 128], strides = [1, 1, 1]} : vector<4x784x128xf32> to vector<1x784x128xf32>
    %13 = vector.shape_cast %12 : vector<1x784x128xf32> to vector<784x128xf32>
    %14 = arith.maximumf %11, %13 : vector<784x128xf32>
    %15 = arith.maximumf %9, %14 : vector<784x128xf32>
    %c0_4 = arith.constant 0 : index
    %c0_5 = arith.constant 0 : index
    %16 = vector.load %arg3[%c0_4, %c0_5] : memref<1x128xf32, #tpu.memory_space<vmem>>, vector<1x128xf32>
    %17 = vector.broadcast %16 : vector<1x128xf32> to vector<784x128xf32>
    %18 = arith.addf %15, %17 : vector<784x128xf32>
    %cst_6 = arith.constant 0.000000e+00 : f32
    %19 = vector.broadcast %cst_6 : f32 to vector<784x128xf32>
    %20 = arith.maximumf %18, %19 : vector<784x128xf32>
    %c0_7 = arith.constant 0 : index
    %c0_8 = arith.constant 0 : index
    %21 = vector.load %arg4[%c0_7, %c0_8] : memref<784x128xf32, #tpu.memory_space<vmem>>, vector<784x128xf32>
    tpu.vector_store %arg4[%c0_7, %c0_8], %20 {strides = array<i32>} : memref<784x128xf32, #tpu.memory_space<vmem>>, vector<784x128xf32>,
    return
  }
  func.func @transform_0(%arg0: i32) -> (i32, i32, i32) {
    %c0_i32 = arith.constant 0 : i32
    %c0_i32_0 = arith.constant 0 : i32
    %c0_i32_1 = arith.constant 0 : i32
    return %c0_i32, %arg0, %c0_i32_0 : i32, i32, i32
  }
  func.func @transform_1(%arg0: i32) -> (i32, i32) {
    %c0_i32 = arith.constant 0 : i32
    %c0_i32_0 = arith.constant 0 : i32
    %c0_i32_1 = arith.constant 0 : i32
    return %c0_i32, %c0_i32_0 : i32, i32
  }
  func.func @transform_2(%arg0: i32) -> (i32, i32) {
    %c0_i32 = arith.constant 0 : i32
    %c0_i32_0 = arith.constant 0 : i32
    %c0_i32_1 = arith.constant 0 : i32
    return %c0_i32, %c0_i32_0 : i32, i32
  }
  func.func @transform_3(%arg0: i32) -> (i32, i32) {
    %c0_i32 = arith.constant 0 : i32
    %c0_i32_0 = arith.constant 0 : i32
    return %arg0, %c0_i32 : i32, i32
  }
}

module attributes {stable_mosaic.version = 11 : i64} {
  func.func @conv_pool_mlp_kernel(%arg0: i32, %arg1: memref<4x25x8x150xf32, #tpu.memory_space<vmem>>, %arg2: memref<150x128xf32, #tpu.memory_space<vmem>>, %arg3: memref<1x128xf32, #tpu.memory_space<vmem>>, %arg4: memref<25x128x128xf32, #tpu.memory_space<vmem>>, %arg5: memref<1x128xf32, #tpu.memory_space<vmem>>, %arg6: memref<128x128xf32, #tpu.memory_space<vmem>>, %arg7: memref<1x128xf32, #tpu.memory_space<vmem>>, %arg8: memref<128x128xf32, #tpu.memory_space<vmem>>, %arg9: memref<1x128xf32, #tpu.memory_space<vmem>>, %arg10: memref<8x128xf32, #tpu.memory_space<vmem>>) attributes {dimension_semantics = [#tpu.dimension_semantics<parallel>], iteration_bounds = array<i64: 1>, scalar_prefetch = 0 : i64, scratch_operands = 0 : i64, tpu.core_type = #tpu.core_type<tc>, window_params = [{transform_indices = @transform_0, window_bounds = array<i64: 4, 25, 8, 150>}, {pipeline_mode = #tpu.pipeline_mode<synchronous>, transform_indices = @transform_1, window_bounds = array<i64: 150, 128>}, {pipeline_mode = #tpu.pipeline_mode<synchronous>, transform_indices = @transform_2, window_bounds = array<i64: 1, 128>}, {pipeline_mode = #tpu.pipeline_mode<synchronous>, transform_indices = @transform_3, window_bounds = array<i64: 25, 128, 128>}, {pipeline_mode = #tpu.pipeline_mode<synchronous>, transform_indices = @transform_4, window_bounds = array<i64: 1, 128>}, {pipeline_mode = #tpu.pipeline_mode<synchronous>, transform_indices = @transform_5, window_bounds = array<i64: 128, 128>}, {pipeline_mode = #tpu.pipeline_mode<synchronous>, transform_indices = @transform_6, window_bounds = array<i64: 1, 128>}, {pipeline_mode = #tpu.pipeline_mode<synchronous>, transform_indices = @transform_7, window_bounds = array<i64: 128, 128>}, {pipeline_mode = #tpu.pipeline_mode<synchronous>, transform_indices = @transform_8, window_bounds = array<i64: 1, 128>}, {transform_indices = @transform_9, window_bounds = array<i64: 8, 128>}]} {
    %c0 = arith.constant 0 : index
    %c0_0 = arith.constant 0 : index
    %c0_1 = arith.constant 0 : index
    %c0_2 = arith.constant 0 : index
    %0 = vector.load %arg1[%c0, %c0_0, %c0_1, %c0_2] : memref<4x25x8x150xf32, #tpu.memory_space<vmem>>, vector<4x25x8x150xf32>
    %1 = vector.shape_cast %0 : vector<4x25x8x150xf32> to vector<800x150xf32>
    %c0_3 = arith.constant 0 : index
    %c0_4 = arith.constant 0 : index
    %2 = vector.load %arg2[%c0_3, %c0_4] : memref<150x128xf32, #tpu.memory_space<vmem>>, vector<150x128xf32>
    %cst = arith.constant dense<0.000000e+00> : vector<800x128xf32>
    %3 = tpu.matmul %1, %2, %cst {dimension_numbers = #tpu.dot_dimension_numbers<[1], [0], [0], [1], [0, 0, 1, 1], [], []>} : vector<800x150xf32>, vector<150x128xf32>, vector<800x128xf32> -> vector<800x128xf32>
    %4 = vector.shape_cast %3 : vector<800x128xf32> to vector<4x25x8x128xf32>
    %5 = vector.extract_strided_slice %4 {offsets = [0, 0, 0, 0], sizes = [1, 25, 8, 128], strides = [1, 1, 1, 1]} : vector<4x25x8x128xf32> to vector<1x25x8x128xf32>
    %6 = vector.shape_cast %5 : vector<1x25x8x128xf32> to vector<25x8x128xf32>
    %7 = vector.extract_strided_slice %4 {offsets = [1, 0, 0, 0], sizes = [1, 25, 8, 128], strides = [1, 1, 1, 1]} : vector<4x25x8x128xf32> to vector<1x25x8x128xf32>
    %8 = vector.shape_cast %7 : vector<1x25x8x128xf32> to vector<25x8x128xf32>
    %9 = arith.maximumf %6, %8 : vector<25x8x128xf32>
    %10 = vector.extract_strided_slice %4 {offsets = [2, 0, 0, 0], sizes = [1, 25, 8, 128], strides = [1, 1, 1, 1]} : vector<4x25x8x128xf32> to vector<1x25x8x128xf32>
    %11 = vector.shape_cast %10 : vector<1x25x8x128xf32> to vector<25x8x128xf32>
    %12 = vector.extract_strided_slice %4 {offsets = [3, 0, 0, 0], sizes = [1, 25, 8, 128], strides = [1, 1, 1, 1]} : vector<4x25x8x128xf32> to vector<1x25x8x128xf32>
    %13 = vector.shape_cast %12 : vector<1x25x8x128xf32> to vector<25x8x128xf32>
    %14 = arith.maximumf %11, %13 : vector<25x8x128xf32>
    %15 = arith.maximumf %9, %14 : vector<25x8x128xf32>
    %c0_5 = arith.constant 0 : index
    %c0_6 = arith.constant 0 : index
    %16 = vector.load %arg3[%c0_5, %c0_6] : memref<1x128xf32, #tpu.memory_space<vmem>>, vector<1x128xf32>
    %17 = vector.shape_cast %16 : vector<1x128xf32> to vector<1x1x128xf32>
    %18 = vector.broadcast %17 : vector<1x1x128xf32> to vector<25x8x128xf32>
    %19 = arith.addf %15, %18 : vector<25x8x128xf32>
    %cst_7 = arith.constant 0.000000e+00 : f32
    %20 = vector.broadcast %cst_7 : f32 to vector<25x8x128xf32>
    %21 = arith.maximumf %19, %20 : vector<25x8x128xf32>
    %cst_8 = arith.constant 0.000000e+00 : f32
    %22 = vector.broadcast %cst_8 : f32 to vector<8x128xf32>
    %23 = vector.extract_strided_slice %21 {offsets = [0, 0, 0], sizes = [1, 8, 128], strides = [1, 1, 1]} : vector<25x8x128xf32> to vector<1x8x128xf32>
    %24 = vector.shape_cast %23 : vector<1x8x128xf32> to vector<8x128xf32>
    %c0_9 = arith.constant 0 : index
    %c0_10 = arith.constant 0 : index
    %c0_11 = arith.constant 0 : index
    %25 = vector.load %arg4[%c0_9, %c0_10, %c0_11] : memref<25x128x128xf32, #tpu.memory_space<vmem>>, vector<1x128x128xf32>
    %26 = vector.shape_cast %25 : vector<1x128x128xf32> to vector<128x128xf32>
    %cst_12 = arith.constant dense<0.000000e+00> : vector<8x128xf32>
    %27 = tpu.matmul %24, %26, %cst_12 {dimension_numbers = #tpu.dot_dimension_numbers<[1], [0], [0], [1], [0, 0, 1, 1], [], []>} : vector<8x128xf32>, vector<128x128xf32>, vector<8x128xf32> -> vector<8x128xf32>
    %28 = arith.addf %22, %27 : vector<8x128xf32>
    %29 = vector.extract_strided_slice %21 {offsets = [1, 0, 0], sizes = [1, 8, 128], strides = [1, 1, 1]} : vector<25x8x128xf32> to vector<1x8x128xf32>
    %30 = vector.shape_cast %29 : vector<1x8x128xf32> to vector<8x128xf32>
    %c1 = arith.constant 1 : index
    %c0_13 = arith.constant 0 : index
    %c0_14 = arith.constant 0 : index
    %31 = vector.load %arg4[%c1, %c0_13, %c0_14] : memref<25x128x128xf32, #tpu.memory_space<vmem>>, vector<1x128x128xf32>
    %32 = vector.shape_cast %31 : vector<1x128x128xf32> to vector<128x128xf32>
    %cst_15 = arith.constant dense<0.000000e+00> : vector<8x128xf32>
    %33 = tpu.matmul %30, %32, %cst_15 {dimension_numbers = #tpu.dot_dimension_numbers<[1], [0], [0], [1], [0, 0, 1, 1], [], []>} : vector<8x128xf32>, vector<128x128xf32>, vector<8x128xf32> -> vector<8x128xf32>
    %34 = arith.addf %28, %33 : vector<8x128xf32>
    %35 = vector.extract_strided_slice %21 {offsets = [2, 0, 0], sizes = [1, 8, 128], strides = [1, 1, 1]} : vector<25x8x128xf32> to vector<1x8x128xf32>
    %36 = vector.shape_cast %35 : vector<1x8x128xf32> to vector<8x128xf32>
    %c2 = arith.constant 2 : index
    %c0_16 = arith.constant 0 : index
    %c0_17 = arith.constant 0 : index
    %37 = vector.load %arg4[%c2, %c0_16, %c0_17] : memref<25x128x128xf32, #tpu.memory_space<vmem>>, vector<1x128x128xf32>
    %38 = vector.shape_cast %37 : vector<1x128x128xf32> to vector<128x128xf32>
    %cst_18 = arith.constant dense<0.000000e+00> : vector<8x128xf32>
    %39 = tpu.matmul %36, %38, %cst_18 {dimension_numbers = #tpu.dot_dimension_numbers<[1], [0], [0], [1], [0, 0, 1, 1], [], []>} : vector<8x128xf32>, vector<128x128xf32>, vector<8x128xf32> -> vector<8x128xf32>
    %40 = arith.addf %34, %39 : vector<8x128xf32>
    %41 = vector.extract_strided_slice %21 {offsets = [3, 0, 0], sizes = [1, 8, 128], strides = [1, 1, 1]} : vector<25x8x128xf32> to vector<1x8x128xf32>
    %42 = vector.shape_cast %41 : vector<1x8x128xf32> to vector<8x128xf32>
    %c3 = arith.constant 3 : index
    %c0_19 = arith.constant 0 : index
    %c0_20 = arith.constant 0 : index
    %43 = vector.load %arg4[%c3, %c0_19, %c0_20] : memref<25x128x128xf32, #tpu.memory_space<vmem>>, vector<1x128x128xf32>
    %44 = vector.shape_cast %43 : vector<1x128x128xf32> to vector<128x128xf32>
    %cst_21 = arith.constant dense<0.000000e+00> : vector<8x128xf32>
    %45 = tpu.matmul %42, %44, %cst_21 {dimension_numbers = #tpu.dot_dimension_numbers<[1], [0], [0], [1], [0, 0, 1, 1], [], []>} : vector<8x128xf32>, vector<128x128xf32>, vector<8x128xf32> -> vector<8x128xf32>
    %46 = arith.addf %40, %45 : vector<8x128xf32>
    %47 = vector.extract_strided_slice %21 {offsets = [4, 0, 0], sizes = [1, 8, 128], strides = [1, 1, 1]} : vector<25x8x128xf32> to vector<1x8x128xf32>
    %48 = vector.shape_cast %47 : vector<1x8x128xf32> to vector<8x128xf32>
    %c4 = arith.constant 4 : index
    %c0_22 = arith.constant 0 : index
    %c0_23 = arith.constant 0 : index
    %49 = vector.load %arg4[%c4, %c0_22, %c0_23] : memref<25x128x128xf32, #tpu.memory_space<vmem>>, vector<1x128x128xf32>
    %50 = vector.shape_cast %49 : vector<1x128x128xf32> to vector<128x128xf32>
    %cst_24 = arith.constant dense<0.000000e+00> : vector<8x128xf32>
    %51 = tpu.matmul %48, %50, %cst_24 {dimension_numbers = #tpu.dot_dimension_numbers<[1], [0], [0], [1], [0, 0, 1, 1], [], []>} : vector<8x128xf32>, vector<128x128xf32>, vector<8x128xf32> -> vector<8x128xf32>
    %52 = arith.addf %46, %51 : vector<8x128xf32>
    %53 = vector.extract_strided_slice %21 {offsets = [5, 0, 0], sizes = [1, 8, 128], strides = [1, 1, 1]} : vector<25x8x128xf32> to vector<1x8x128xf32>
    %54 = vector.shape_cast %53 : vector<1x8x128xf32> to vector<8x128xf32>
    %c5 = arith.constant 5 : index
    %c0_25 = arith.constant 0 : index
    %c0_26 = arith.constant 0 : index
    %55 = vector.load %arg4[%c5, %c0_25, %c0_26] : memref<25x128x128xf32, #tpu.memory_space<vmem>>, vector<1x128x128xf32>
    %56 = vector.shape_cast %55 : vector<1x128x128xf32> to vector<128x128xf32>
    %cst_27 = arith.constant dense<0.000000e+00> : vector<8x128xf32>
    %57 = tpu.matmul %54, %56, %cst_27 {dimension_numbers = #tpu.dot_dimension_numbers<[1], [0], [0], [1], [0, 0, 1, 1], [], []>} : vector<8x128xf32>, vector<128x128xf32>, vector<8x128xf32> -> vector<8x128xf32>
    %58 = arith.addf %52, %57 : vector<8x128xf32>
    %59 = vector.extract_strided_slice %21 {offsets = [6, 0, 0], sizes = [1, 8, 128], strides = [1, 1, 1]} : vector<25x8x128xf32> to vector<1x8x128xf32>
    %60 = vector.shape_cast %59 : vector<1x8x128xf32> to vector<8x128xf32>
    %c6 = arith.constant 6 : index
    %c0_28 = arith.constant 0 : index
    %c0_29 = arith.constant 0 : index
    %61 = vector.load %arg4[%c6, %c0_28, %c0_29] : memref<25x128x128xf32, #tpu.memory_space<vmem>>, vector<1x128x128xf32>
    %62 = vector.shape_cast %61 : vector<1x128x128xf32> to vector<128x128xf32>
    %cst_30 = arith.constant dense<0.000000e+00> : vector<8x128xf32>
    %63 = tpu.matmul %60, %62, %cst_30 {dimension_numbers = #tpu.dot_dimension_numbers<[1], [0], [0], [1], [0, 0, 1, 1], [], []>} : vector<8x128xf32>, vector<128x128xf32>, vector<8x128xf32> -> vector<8x128xf32>
    %64 = arith.addf %58, %63 : vector<8x128xf32>
    %65 = vector.extract_strided_slice %21 {offsets = [7, 0, 0], sizes = [1, 8, 128], strides = [1, 1, 1]} : vector<25x8x128xf32> to vector<1x8x128xf32>
    %66 = vector.shape_cast %65 : vector<1x8x128xf32> to vector<8x128xf32>
    %c7 = arith.constant 7 : index
    %c0_31 = arith.constant 0 : index
    %c0_32 = arith.constant 0 : index
    %67 = vector.load %arg4[%c7, %c0_31, %c0_32] : memref<25x128x128xf32, #tpu.memory_space<vmem>>, vector<1x128x128xf32>
    %68 = vector.shape_cast %67 : vector<1x128x128xf32> to vector<128x128xf32>
    %cst_33 = arith.constant dense<0.000000e+00> : vector<8x128xf32>
    %69 = tpu.matmul %66, %68, %cst_33 {dimension_numbers = #tpu.dot_dimension_numbers<[1], [0], [0], [1], [0, 0, 1, 1], [], []>} : vector<8x128xf32>, vector<128x128xf32>, vector<8x128xf32> -> vector<8x128xf32>
    %70 = arith.addf %64, %69 : vector<8x128xf32>
    %71 = vector.extract_strided_slice %21 {offsets = [8, 0, 0], sizes = [1, 8, 128], strides = [1, 1, 1]} : vector<25x8x128xf32> to vector<1x8x128xf32>
    %72 = vector.shape_cast %71 : vector<1x8x128xf32> to vector<8x128xf32>
    %c8 = arith.constant 8 : index
    %c0_34 = arith.constant 0 : index
    %c0_35 = arith.constant 0 : index
    %73 = vector.load %arg4[%c8, %c0_34, %c0_35] : memref<25x128x128xf32, #tpu.memory_space<vmem>>, vector<1x128x128xf32>
    %74 = vector.shape_cast %73 : vector<1x128x128xf32> to vector<128x128xf32>
    %cst_36 = arith.constant dense<0.000000e+00> : vector<8x128xf32>
    %75 = tpu.matmul %72, %74, %cst_36 {dimension_numbers = #tpu.dot_dimension_numbers<[1], [0], [0], [1], [0, 0, 1, 1], [], []>} : vector<8x128xf32>, vector<128x128xf32>, vector<8x128xf32> -> vector<8x128xf32>
    %76 = arith.addf %70, %75 : vector<8x128xf32>
    %77 = vector.extract_strided_slice %21 {offsets = [9, 0, 0], sizes = [1, 8, 128], strides = [1, 1, 1]} : vector<25x8x128xf32> to vector<1x8x128xf32>
    %78 = vector.shape_cast %77 : vector<1x8x128xf32> to vector<8x128xf32>
    %c9 = arith.constant 9 : index
    %c0_37 = arith.constant 0 : index
    %c0_38 = arith.constant 0 : index
    %79 = vector.load %arg4[%c9, %c0_37, %c0_38] : memref<25x128x128xf32, #tpu.memory_space<vmem>>, vector<1x128x128xf32>
    %80 = vector.shape_cast %79 : vector<1x128x128xf32> to vector<128x128xf32>
    %cst_39 = arith.constant dense<0.000000e+00> : vector<8x128xf32>
    %81 = tpu.matmul %78, %80, %cst_39 {dimension_numbers = #tpu.dot_dimension_numbers<[1], [0], [0], [1], [0, 0, 1, 1], [], []>} : vector<8x128xf32>, vector<128x128xf32>, vector<8x128xf32> -> vector<8x128xf32>
    %82 = arith.addf %76, %81 : vector<8x128xf32>
    %83 = vector.extract_strided_slice %21 {offsets = [10, 0, 0], sizes = [1, 8, 128], strides = [1, 1, 1]} : vector<25x8x128xf32> to vector<1x8x128xf32>
    %84 = vector.shape_cast %83 : vector<1x8x128xf32> to vector<8x128xf32>
    %c10 = arith.constant 10 : index
    %c0_40 = arith.constant 0 : index
    %c0_41 = arith.constant 0 : index
    %85 = vector.load %arg4[%c10, %c0_40, %c0_41] : memref<25x128x128xf32, #tpu.memory_space<vmem>>, vector<1x128x128xf32>
    %86 = vector.shape_cast %85 : vector<1x128x128xf32> to vector<128x128xf32>
    %cst_42 = arith.constant dense<0.000000e+00> : vector<8x128xf32>
    %87 = tpu.matmul %84, %86, %cst_42 {dimension_numbers = #tpu.dot_dimension_numbers<[1], [0], [0], [1], [0, 0, 1, 1], [], []>} : vector<8x128xf32>, vector<128x128xf32>, vector<8x128xf32> -> vector<8x128xf32>
    %88 = arith.addf %82, %87 : vector<8x128xf32>
    %89 = vector.extract_strided_slice %21 {offsets = [11, 0, 0], sizes = [1, 8, 128], strides = [1, 1, 1]} : vector<25x8x128xf32> to vector<1x8x128xf32>
    %90 = vector.shape_cast %89 : vector<1x8x128xf32> to vector<8x128xf32>
    %c11 = arith.constant 11 : index
    %c0_43 = arith.constant 0 : index
    %c0_44 = arith.constant 0 : index
    %91 = vector.load %arg4[%c11, %c0_43, %c0_44] : memref<25x128x128xf32, #tpu.memory_space<vmem>>, vector<1x128x128xf32>
    %92 = vector.shape_cast %91 : vector<1x128x128xf32> to vector<128x128xf32>
    %cst_45 = arith.constant dense<0.000000e+00> : vector<8x128xf32>
    %93 = tpu.matmul %90, %92, %cst_45 {dimension_numbers = #tpu.dot_dimension_numbers<[1], [0], [0], [1], [0, 0, 1, 1], [], []>} : vector<8x128xf32>, vector<128x128xf32>, vector<8x128xf32> -> vector<8x128xf32>
    %94 = arith.addf %88, %93 : vector<8x128xf32>
    %95 = vector.extract_strided_slice %21 {offsets = [12, 0, 0], sizes = [1, 8, 128], strides = [1, 1, 1]} : vector<25x8x128xf32> to vector<1x8x128xf32>
    %96 = vector.shape_cast %95 : vector<1x8x128xf32> to vector<8x128xf32>
    %c12 = arith.constant 12 : index
    %c0_46 = arith.constant 0 : index
    %c0_47 = arith.constant 0 : index
    %97 = vector.load %arg4[%c12, %c0_46, %c0_47] : memref<25x128x128xf32, #tpu.memory_space<vmem>>, vector<1x128x128xf32>
    %98 = vector.shape_cast %97 : vector<1x128x128xf32> to vector<128x128xf32>
    %cst_48 = arith.constant dense<0.000000e+00> : vector<8x128xf32>
    %99 = tpu.matmul %96, %98, %cst_48 {dimension_numbers = #tpu.dot_dimension_numbers<[1], [0], [0], [1], [0, 0, 1, 1], [], []>} : vector<8x128xf32>, vector<128x128xf32>, vector<8x128xf32> -> vector<8x128xf32>
    %100 = arith.addf %94, %99 : vector<8x128xf32>
    %101 = vector.extract_strided_slice %21 {offsets = [13, 0, 0], sizes = [1, 8, 128], strides = [1, 1, 1]} : vector<25x8x128xf32> to vector<1x8x128xf32>
    %102 = vector.shape_cast %101 : vector<1x8x128xf32> to vector<8x128xf32>
    %c13 = arith.constant 13 : index
    %c0_49 = arith.constant 0 : index
    %c0_50 = arith.constant 0 : index
    %103 = vector.load %arg4[%c13, %c0_49, %c0_50] : memref<25x128x128xf32, #tpu.memory_space<vmem>>, vector<1x128x128xf32>
    %104 = vector.shape_cast %103 : vector<1x128x128xf32> to vector<128x128xf32>
    %cst_51 = arith.constant dense<0.000000e+00> : vector<8x128xf32>
    %105 = tpu.matmul %102, %104, %cst_51 {dimension_numbers = #tpu.dot_dimension_numbers<[1], [0], [0], [1], [0, 0, 1, 1], [], []>} : vector<8x128xf32>, vector<128x128xf32>, vector<8x128xf32> -> vector<8x128xf32>
    %106 = arith.addf %100, %105 : vector<8x128xf32>
    %107 = vector.extract_strided_slice %21 {offsets = [14, 0, 0], sizes = [1, 8, 128], strides = [1, 1, 1]} : vector<25x8x128xf32> to vector<1x8x128xf32>
    %108 = vector.shape_cast %107 : vector<1x8x128xf32> to vector<8x128xf32>
    %c14 = arith.constant 14 : index
    %c0_52 = arith.constant 0 : index
    %c0_53 = arith.constant 0 : index
    %109 = vector.load %arg4[%c14, %c0_52, %c0_53] : memref<25x128x128xf32, #tpu.memory_space<vmem>>, vector<1x128x128xf32>
    %110 = vector.shape_cast %109 : vector<1x128x128xf32> to vector<128x128xf32>
    %cst_54 = arith.constant dense<0.000000e+00> : vector<8x128xf32>
    %111 = tpu.matmul %108, %110, %cst_54 {dimension_numbers = #tpu.dot_dimension_numbers<[1], [0], [0], [1], [0, 0, 1, 1], [], []>} : vector<8x128xf32>, vector<128x128xf32>, vector<8x128xf32> -> vector<8x128xf32>
    %112 = arith.addf %106, %111 : vector<8x128xf32>
    %113 = vector.extract_strided_slice %21 {offsets = [15, 0, 0], sizes = [1, 8, 128], strides = [1, 1, 1]} : vector<25x8x128xf32> to vector<1x8x128xf32>
    %114 = vector.shape_cast %113 : vector<1x8x128xf32> to vector<8x128xf32>
    %c15 = arith.constant 15 : index
    %c0_55 = arith.constant 0 : index
    %c0_56 = arith.constant 0 : index
    %115 = vector.load %arg4[%c15, %c0_55, %c0_56] : memref<25x128x128xf32, #tpu.memory_space<vmem>>, vector<1x128x128xf32>
    %116 = vector.shape_cast %115 : vector<1x128x128xf32> to vector<128x128xf32>
    %cst_57 = arith.constant dense<0.000000e+00> : vector<8x128xf32>
    %117 = tpu.matmul %114, %116, %cst_57 {dimension_numbers = #tpu.dot_dimension_numbers<[1], [0], [0], [1], [0, 0, 1, 1], [], []>} : vector<8x128xf32>, vector<128x128xf32>, vector<8x128xf32> -> vector<8x128xf32>
    %118 = arith.addf %112, %117 : vector<8x128xf32>
    %119 = vector.extract_strided_slice %21 {offsets = [16, 0, 0], sizes = [1, 8, 128], strides = [1, 1, 1]} : vector<25x8x128xf32> to vector<1x8x128xf32>
    %120 = vector.shape_cast %119 : vector<1x8x128xf32> to vector<8x128xf32>
    %c16 = arith.constant 16 : index
    %c0_58 = arith.constant 0 : index
    %c0_59 = arith.constant 0 : index
    %121 = vector.load %arg4[%c16, %c0_58, %c0_59] : memref<25x128x128xf32, #tpu.memory_space<vmem>>, vector<1x128x128xf32>
    %122 = vector.shape_cast %121 : vector<1x128x128xf32> to vector<128x128xf32>
    %cst_60 = arith.constant dense<0.000000e+00> : vector<8x128xf32>
    %123 = tpu.matmul %120, %122, %cst_60 {dimension_numbers = #tpu.dot_dimension_numbers<[1], [0], [0], [1], [0, 0, 1, 1], [], []>} : vector<8x128xf32>, vector<128x128xf32>, vector<8x128xf32> -> vector<8x128xf32>
    %124 = arith.addf %118, %123 : vector<8x128xf32>
    %125 = vector.extract_strided_slice %21 {offsets = [17, 0, 0], sizes = [1, 8, 128], strides = [1, 1, 1]} : vector<25x8x128xf32> to vector<1x8x128xf32>
    %126 = vector.shape_cast %125 : vector<1x8x128xf32> to vector<8x128xf32>
    %c17 = arith.constant 17 : index
    %c0_61 = arith.constant 0 : index
    %c0_62 = arith.constant 0 : index
    %127 = vector.load %arg4[%c17, %c0_61, %c0_62] : memref<25x128x128xf32, #tpu.memory_space<vmem>>, vector<1x128x128xf32>
    %128 = vector.shape_cast %127 : vector<1x128x128xf32> to vector<128x128xf32>
    %cst_63 = arith.constant dense<0.000000e+00> : vector<8x128xf32>
    %129 = tpu.matmul %126, %128, %cst_63 {dimension_numbers = #tpu.dot_dimension_numbers<[1], [0], [0], [1], [0, 0, 1, 1], [], []>} : vector<8x128xf32>, vector<128x128xf32>, vector<8x128xf32> -> vector<8x128xf32>
    %130 = arith.addf %124, %129 : vector<8x128xf32>
    %131 = vector.extract_strided_slice %21 {offsets = [18, 0, 0], sizes = [1, 8, 128], strides = [1, 1, 1]} : vector<25x8x128xf32> to vector<1x8x128xf32>
    %132 = vector.shape_cast %131 : vector<1x8x128xf32> to vector<8x128xf32>
    %c18 = arith.constant 18 : index
    %c0_64 = arith.constant 0 : index
    %c0_65 = arith.constant 0 : index
    %133 = vector.load %arg4[%c18, %c0_64, %c0_65] : memref<25x128x128xf32, #tpu.memory_space<vmem>>, vector<1x128x128xf32>
    %134 = vector.shape_cast %133 : vector<1x128x128xf32> to vector<128x128xf32>
    %cst_66 = arith.constant dense<0.000000e+00> : vector<8x128xf32>
    %135 = tpu.matmul %132, %134, %cst_66 {dimension_numbers = #tpu.dot_dimension_numbers<[1], [0], [0], [1], [0, 0, 1, 1], [], []>} : vector<8x128xf32>, vector<128x128xf32>, vector<8x128xf32> -> vector<8x128xf32>
    %136 = arith.addf %130, %135 : vector<8x128xf32>
    %137 = vector.extract_strided_slice %21 {offsets = [19, 0, 0], sizes = [1, 8, 128], strides = [1, 1, 1]} : vector<25x8x128xf32> to vector<1x8x128xf32>
    %138 = vector.shape_cast %137 : vector<1x8x128xf32> to vector<8x128xf32>
    %c19 = arith.constant 19 : index
    %c0_67 = arith.constant 0 : index
    %c0_68 = arith.constant 0 : index
    %139 = vector.load %arg4[%c19, %c0_67, %c0_68] : memref<25x128x128xf32, #tpu.memory_space<vmem>>, vector<1x128x128xf32>
    %140 = vector.shape_cast %139 : vector<1x128x128xf32> to vector<128x128xf32>
    %cst_69 = arith.constant dense<0.000000e+00> : vector<8x128xf32>
    %141 = tpu.matmul %138, %140, %cst_69 {dimension_numbers = #tpu.dot_dimension_numbers<[1], [0], [0], [1], [0, 0, 1, 1], [], []>} : vector<8x128xf32>, vector<128x128xf32>, vector<8x128xf32> -> vector<8x128xf32>
    %142 = arith.addf %136, %141 : vector<8x128xf32>
    %143 = vector.extract_strided_slice %21 {offsets = [20, 0, 0], sizes = [1, 8, 128], strides = [1, 1, 1]} : vector<25x8x128xf32> to vector<1x8x128xf32>
    %144 = vector.shape_cast %143 : vector<1x8x128xf32> to vector<8x128xf32>
    %c20 = arith.constant 20 : index
    %c0_70 = arith.constant 0 : index
    %c0_71 = arith.constant 0 : index
    %145 = vector.load %arg4[%c20, %c0_70, %c0_71] : memref<25x128x128xf32, #tpu.memory_space<vmem>>, vector<1x128x128xf32>
    %146 = vector.shape_cast %145 : vector<1x128x128xf32> to vector<128x128xf32>
    %cst_72 = arith.constant dense<0.000000e+00> : vector<8x128xf32>
    %147 = tpu.matmul %144, %146, %cst_72 {dimension_numbers = #tpu.dot_dimension_numbers<[1], [0], [0], [1], [0, 0, 1, 1], [], []>} : vector<8x128xf32>, vector<128x128xf32>, vector<8x128xf32> -> vector<8x128xf32>
    %148 = arith.addf %142, %147 : vector<8x128xf32>
    %149 = vector.extract_strided_slice %21 {offsets = [21, 0, 0], sizes = [1, 8, 128], strides = [1, 1, 1]} : vector<25x8x128xf32> to vector<1x8x128xf32>
    %150 = vector.shape_cast %149 : vector<1x8x128xf32> to vector<8x128xf32>
    %c21 = arith.constant 21 : index
    %c0_73 = arith.constant 0 : index
    %c0_74 = arith.constant 0 : index
    %151 = vector.load %arg4[%c21, %c0_73, %c0_74] : memref<25x128x128xf32, #tpu.memory_space<vmem>>, vector<1x128x128xf32>
    %152 = vector.shape_cast %151 : vector<1x128x128xf32> to vector<128x128xf32>
    %cst_75 = arith.constant dense<0.000000e+00> : vector<8x128xf32>
    %153 = tpu.matmul %150, %152, %cst_75 {dimension_numbers = #tpu.dot_dimension_numbers<[1], [0], [0], [1], [0, 0, 1, 1], [], []>} : vector<8x128xf32>, vector<128x128xf32>, vector<8x128xf32> -> vector<8x128xf32>
    %154 = arith.addf %148, %153 : vector<8x128xf32>
    %155 = vector.extract_strided_slice %21 {offsets = [22, 0, 0], sizes = [1, 8, 128], strides = [1, 1, 1]} : vector<25x8x128xf32> to vector<1x8x128xf32>
    %156 = vector.shape_cast %155 : vector<1x8x128xf32> to vector<8x128xf32>
    %c22 = arith.constant 22 : index
    %c0_76 = arith.constant 0 : index
    %c0_77 = arith.constant 0 : index
    %157 = vector.load %arg4[%c22, %c0_76, %c0_77] : memref<25x128x128xf32, #tpu.memory_space<vmem>>, vector<1x128x128xf32>
    %158 = vector.shape_cast %157 : vector<1x128x128xf32> to vector<128x128xf32>
    %cst_78 = arith.constant dense<0.000000e+00> : vector<8x128xf32>
    %159 = tpu.matmul %156, %158, %cst_78 {dimension_numbers = #tpu.dot_dimension_numbers<[1], [0], [0], [1], [0, 0, 1, 1], [], []>} : vector<8x128xf32>, vector<128x128xf32>, vector<8x128xf32> -> vector<8x128xf32>
    %160 = arith.addf %154, %159 : vector<8x128xf32>
    %161 = vector.extract_strided_slice %21 {offsets = [23, 0, 0], sizes = [1, 8, 128], strides = [1, 1, 1]} : vector<25x8x128xf32> to vector<1x8x128xf32>
    %162 = vector.shape_cast %161 : vector<1x8x128xf32> to vector<8x128xf32>
    %c23 = arith.constant 23 : index
    %c0_79 = arith.constant 0 : index
    %c0_80 = arith.constant 0 : index
    %163 = vector.load %arg4[%c23, %c0_79, %c0_80] : memref<25x128x128xf32, #tpu.memory_space<vmem>>, vector<1x128x128xf32>
    %164 = vector.shape_cast %163 : vector<1x128x128xf32> to vector<128x128xf32>
    %cst_81 = arith.constant dense<0.000000e+00> : vector<8x128xf32>
    %165 = tpu.matmul %162, %164, %cst_81 {dimension_numbers = #tpu.dot_dimension_numbers<[1], [0], [0], [1], [0, 0, 1, 1], [], []>} : vector<8x128xf32>, vector<128x128xf32>, vector<8x128xf32> -> vector<8x128xf32>
    %166 = arith.addf %160, %165 : vector<8x128xf32>
    %167 = vector.extract_strided_slice %21 {offsets = [24, 0, 0], sizes = [1, 8, 128], strides = [1, 1, 1]} : vector<25x8x128xf32> to vector<1x8x128xf32>
    %168 = vector.shape_cast %167 : vector<1x8x128xf32> to vector<8x128xf32>
    %c24 = arith.constant 24 : index
    %c0_82 = arith.constant 0 : index
    %c0_83 = arith.constant 0 : index
    %169 = vector.load %arg4[%c24, %c0_82, %c0_83] : memref<25x128x128xf32, #tpu.memory_space<vmem>>, vector<1x128x128xf32>
    %170 = vector.shape_cast %169 : vector<1x128x128xf32> to vector<128x128xf32>
    %cst_84 = arith.constant dense<0.000000e+00> : vector<8x128xf32>
    %171 = tpu.matmul %168, %170, %cst_84 {dimension_numbers = #tpu.dot_dimension_numbers<[1], [0], [0], [1], [0, 0, 1, 1], [], []>} : vector<8x128xf32>, vector<128x128xf32>, vector<8x128xf32> -> vector<8x128xf32>
    %172 = arith.addf %166, %171 : vector<8x128xf32>
    %c0_85 = arith.constant 0 : index
    %c0_86 = arith.constant 0 : index
    %173 = vector.load %arg5[%c0_85, %c0_86] : memref<1x128xf32, #tpu.memory_space<vmem>>, vector<1x128xf32>
    %174 = vector.broadcast %173 : vector<1x128xf32> to vector<8x128xf32>
    %175 = arith.addf %172, %174 : vector<8x128xf32>
    %cst_87 = arith.constant 0.000000e+00 : f32
    %176 = vector.broadcast %cst_87 : f32 to vector<8x128xf32>
    %177 = arith.maximumf %175, %176 : vector<8x128xf32>
    %c0_88 = arith.constant 0 : index
    %c0_89 = arith.constant 0 : index
    %178 = vector.load %arg6[%c0_88, %c0_89] : memref<128x128xf32, #tpu.memory_space<vmem>>, vector<128x128xf32>
    %cst_90 = arith.constant dense<0.000000e+00> : vector<8x128xf32>
    %179 = tpu.matmul %177, %178, %cst_90 {dimension_numbers = #tpu.dot_dimension_numbers<[1], [0], [0], [1], [0, 0, 1, 1], [], []>} : vector<8x128xf32>, vector<128x128xf32>, vector<8x128xf32> -> vector<8x128xf32>
    %c0_91 = arith.constant 0 : index
    %c0_92 = arith.constant 0 : index
    %180 = vector.load %arg7[%c0_91, %c0_92] : memref<1x128xf32, #tpu.memory_space<vmem>>, vector<1x128xf32>
    %181 = vector.broadcast %180 : vector<1x128xf32> to vector<8x128xf32>
    %182 = arith.addf %179, %181 : vector<8x128xf32>
    %cst_93 = arith.constant 0.000000e+00 : f32
    %183 = vector.broadcast %cst_93 : f32 to vector<8x128xf32>
    %184 = arith.maximumf %182, %183 : vector<8x128xf32>
    %c0_94 = arith.constant 0 : index
    %c0_95 = arith.constant 0 : index
    %185 = vector.load %arg8[%c0_94, %c0_95] : memref<128x128xf32, #tpu.memory_space<vmem>>, vector<128x128xf32>
    %cst_96 = arith.constant dense<0.000000e+00> : vector<8x128xf32>
    %186 = tpu.matmul %184, %185, %cst_96 {dimension_numbers = #tpu.dot_dimension_numbers<[1], [0], [0], [1], [0, 0, 1, 1], [], []>} : vector<8x128xf32>, vector<128x128xf32>, vector<8x128xf32> -> vector<8x128xf32>
    %c0_97 = arith.constant 0 : index
    %c0_98 = arith.constant 0 : index
    %187 = vector.load %arg9[%c0_97, %c0_98] : memref<1x128xf32, #tpu.memory_space<vmem>>, vector<1x128xf32>
    %188 = vector.broadcast %187 : vector<1x128xf32> to vector<8x128xf32>
    %189 = arith.addf %186, %188 : vector<8x128xf32>
    %c0_99 = arith.constant 0 : index
    %c0_100 = arith.constant 0 : index
    %190 = vector.load %arg10[%c0_99, %c0_100] : memref<8x128xf32, #tpu.memory_space<vmem>>, vector<8x128xf32>
    tpu.vector_store %arg10[%c0_99, %c0_100], %189 {strides = array<i32>} : memref<8x128xf32, #tpu.memory_space<vmem>>, vector<8x128xf32>,
    return
  }
  func.func @transform_0(%arg0: i32) -> (i32, i32, i32, i32) {
    %c0_i32 = arith.constant 0 : i32
    %c0_i32_0 = arith.constant 0 : i32
    %c0_i32_1 = arith.constant 0 : i32
    %c0_i32_2 = arith.constant 0 : i32
    return %c0_i32, %c0_i32_0, %arg0, %c0_i32_1 : i32, i32, i32, i32
  }
  func.func @transform_1(%arg0: i32) -> (i32, i32) {
    %c0_i32 = arith.constant 0 : i32
    %c0_i32_0 = arith.constant 0 : i32
    %c0_i32_1 = arith.constant 0 : i32
    return %c0_i32, %c0_i32_0 : i32, i32
  }
  func.func @transform_2(%arg0: i32) -> (i32, i32) {
    %c0_i32 = arith.constant 0 : i32
    %c0_i32_0 = arith.constant 0 : i32
    %c0_i32_1 = arith.constant 0 : i32
    return %c0_i32, %c0_i32_0 : i32, i32
  }
  func.func @transform_3(%arg0: i32) -> (i32, i32, i32) {
    %c0_i32 = arith.constant 0 : i32
    %c0_i32_0 = arith.constant 0 : i32
    %c0_i32_1 = arith.constant 0 : i32
    %c0_i32_2 = arith.constant 0 : i32
    return %c0_i32, %c0_i32_0, %c0_i32_1 : i32, i32, i32
  }
  func.func @transform_4(%arg0: i32) -> (i32, i32) {
    %c0_i32 = arith.constant 0 : i32
    %c0_i32_0 = arith.constant 0 : i32
    %c0_i32_1 = arith.constant 0 : i32
    return %c0_i32, %c0_i32_0 : i32, i32
  }
  func.func @transform_5(%arg0: i32) -> (i32, i32) {
    %c0_i32 = arith.constant 0 : i32
    %c0_i32_0 = arith.constant 0 : i32
    %c0_i32_1 = arith.constant 0 : i32
    return %c0_i32, %c0_i32_0 : i32, i32
  }
  func.func @transform_6(%arg0: i32) -> (i32, i32) {
    %c0_i32 = arith.constant 0 : i32
    %c0_i32_0 = arith.constant 0 : i32
    %c0_i32_1 = arith.constant 0 : i32
    return %c0_i32, %c0_i32_0 : i32, i32
  }
  func.func @transform_7(%arg0: i32) -> (i32, i32) {
    %c0_i32 = arith.constant 0 : i32
    %c0_i32_0 = arith.constant 0 : i32
    %c0_i32_1 = arith.constant 0 : i32
    return %c0_i32, %c0_i32_0 : i32, i32
  }
  func.func @transform_8(%arg0: i32) -> (i32, i32) {
    %c0_i32 = arith.constant 0 : i32
    %c0_i32_0 = arith.constant 0 : i32
    %c0_i32_1 = arith.constant 0 : i32
    return %c0_i32, %c0_i32_0 : i32, i32
  }
  func.func @transform_9(%arg0: i32) -> (i32, i32) {
    %c0_i32 = arith.constant 0 : i32
    %c0_i32_0 = arith.constant 0 : i32
    return %arg0, %c0_i32 : i32, i32
  }
}

</mosaic_0001>

<bundles_post_ra>
// kernel: net_forward.2
= control target key start
LH: loop header
LB: loop body
LE: loop exit
PB: predicated region body
PF: predicated region fallthrough
CT: control target
= control target key end

     0   :  { %s7556_s12 = smov 0   ;;  %s7558_s13 = smov 0   ;;  %s10008_s0 = inlined_call_operand.vmem [shape: f32[4,1568,75], index: 0, kind: input, shape index: {}]   ;;  %s10009_s1 = inlined_call_operand.vmem [shape: f32[75,128], index: 1, kind: input, shape index: {}]   ;;  %s10010_s2 = inlined_call_operand.vmem [shape: f32[1,128], index: 2, kind: input, shape index: {}]   ;;  %s10011_s3 = inlined_call_operand.vmem [shape: f32[1568,128], index: 3, kind: output, shape index: {}]  }
   0x1   :  { %s7560_s14 = smov 0  }
   0x2 LB: > { %s6037_s15 = sadd.s32 4294967295, %s7533_s14   ;;  %s7573_s16 = sadd.s32 1, %s7533_s14   ;;  %s7533_s14 = sphi %s7560_s14, %s10306_s14   ;;  %s7529_s13 = sphi %s7558_s13, %s10305_s13   ;;  %s7525_s12 = sphi %s7556_s12, %s10304_s12  }
   0x3   : > { %s17_s17 = ssub.s32 %s7533_s14, %s7573_s16  ;;  %s20_s18 = sadd.s32 1, %s7529_s13 }
   0x4   : > { %p18_p0 = scmp.eq.s32.totalorder %s17_s17, 0  ;;  %p27_p1 = scmp.ne.s32.totalorder %s7529_s13, %s7525_s12 }
   0x5   : > { %p28_p2 = scmp.eq.s32.totalorder %s7533_s14, 0  ;;  %p6040_p4 = scmp.ge.s32.totalorder %s7533_s14, 2 }
   0x6   : > { %s7582_s19 = scalar_select %p18_p0, %s7529_s13, %s20_s18  }
   0x7   : > { %p29_p3 = por %p28_p2, %p27_p1  ;;  %127 = sbr.rel (%p6040_p4) target bundleno = 215 (0xd7), region = 24 }
   0xe   : > { %130 = sbr.rel (!%p29_p3) target bundleno = 215 (0xd7), region = 28  ;;  %s132_s20 = sand.u32 (%p29_p3), 1, %s7529_s13  }
   0xf   : > { %s6440_s21 = smul.u32 (%p29_p3), 784, %s7533_s14 }
  0x10   : > { %s7483_s22 = smul.u32 (%p29_p3), 3136, %s132_s20 }
  0x11   : > { %s7590_s25 = scalar_lea.vmem (%p29_p3), %s10008_s0, %s6440_s21 }
  0x12   : > { %v947_v0 = vld [vmem:[%s7590_s25] sm:$0xff] (%p29_p3)  ;;  %v949_v1 = vld [vmem:[%s7590_s25 + $0x8] sm:$0xff] (%p29_p3)  ;;  %v951_v2 = vld [vmem:[%s7590_s25 + $0x10] sm:$0xff] (%p29_p3)  ;;  %s7595_s26 = scalar_lea.vmem (%p29_p3), [#allocation2], %s7483_s22 }
  0x13   : > { %948 = vst [vmem:[%s7595_s26] sm:$0xff] (%p29_p3), %v947_v0  ;;  %950 = vst [vmem:[%s7595_s26 + $0x8] sm:$0xff] (%p29_p3), %v949_v1  ;;  %v953_v3 = vld [vmem:[%s7590_s25 + $0x18] sm:$0xff] (%p29_p3)  ;;  %v955_v4 = vld [vmem:[%s7590_s25 + $0x20] sm:$0xff] (%p29_p3) }
  0x14   : > { %952 = vst [vmem:[%s7595_s26 + $0x10] sm:$0xff] (%p29_p3), %v951_v2  ;;  %v957_v5 = vld [vmem:[%s7590_s25 + $0x28] sm:$0xff] (%p29_p3)  ;;  %954 = vst [vmem:[%s7595_s26 + $0x18] sm:$0xff] (%p29_p3), %v953_v3  ;;  %v959_v6 = vld [vmem:[%s7590_s25 + $0x30] sm:$0xff] (%p29_p3) }
  0x15   : > { %956 = vst [vmem:[%s7595_s26 + $0x20] sm:$0xff] %v955_v4  ;;  %958 = vst [vmem:[%s7595_s26 + $0x28] sm:$0xff] %v957_v5  ;;  %v961_v7 = vld [vmem:[%s7590_s25 + $0x38] sm:$0xff]  ;;  %v963_v8 = vld [vmem:[%s7590_s25 + $0x40] sm:$0xff] }
  0x16   : > { %960 = vst [vmem:[%s7595_s26 + $0x30] sm:$0xff] %v959_v6  ;;  %962 = vst [vmem:[%s7595_s26 + $0x38] sm:$0xff] %v961_v7  ;;  %v965_v9 = vld [vmem:[%s7590_s25 + $0x48] sm:$0xff]  ;;  %v967_v10 = vld [vmem:[%s7590_s25 + $0x50] sm:$0xff] }
  0x17   : > { %964 = vst [vmem:[%s7595_s26 + $0x40] sm:$0xff] %v963_v8  ;;  %v969_v11 = vld [vmem:[%s7590_s25 + $0x58] sm:$0xff]  ;;  %966 = vst [vmem:[%s7595_s26 + $0x48] sm:$0xff] %v965_v9  ;;  %v971_v12 = vld [vmem:[%s7590_s25 + $0x60] sm:$0xff] }
  0x18   : > { %968 = vst [vmem:[%s7595_s26 + $0x50] sm:$0xff] %v967_v10  ;;  %970 = vst [vmem:[%s7595_s26 + $0x58] sm:$0xff] %v969_v11  ;;  %v973_v13 = vld [vmem:[%s7590_s25 + $0x68] sm:$0xff]  ;;  %v975_v14 = vld [vmem:[%s7590_s25 + $0x70] sm:$0xff] }
  0x19   : > { %972 = vst [vmem:[%s7595_s26 + $0x60] sm:$0xff] %v971_v12  ;;  %974 = vst [vmem:[%s7595_s26 + $0x68] sm:$0xff] %v973_v13  ;;  %v977_v15 = vld [vmem:[%s7590_s25 + $0x78] sm:$0xff]  ;;  %v979_v16 = vld [vmem:[%s7590_s25 + $0x80] sm:$0xff] }
  0x1a   : > { %976 = vst [vmem:[%s7595_s26 + $0x70] sm:$0xff] %v975_v14  ;;  %v981_v17 = vld [vmem:[%s7590_s25 + $0x88] sm:$0xff]  ;;  %978 = vst [vmem:[%s7595_s26 + $0x78] sm:$0xff] %v977_v15  ;;  %v983_v18 = vld [vmem:[%s7590_s25 + $0x90] sm:$0xff] }
  0x1b   : > { %980 = vst [vmem:[%s7595_s26 + $0x80] sm:$0xff] %v979_v16  ;;  %982 = vst [vmem:[%s7595_s26 + $0x88] sm:$0xff] %v981_v17  ;;  %v985_v19 = vld [vmem:[%s7590_s25 + $0x98] sm:$0xff]  ;;  %v987_v20 = vld [vmem:[%s7590_s25 + $0xa0] sm:$0xff] }
  0x1c   : > { %984 = vst [vmem:[%s7595_s26 + $0x90] sm:$0xff] %v983_v18  ;;  %986 = vst [vmem:[%s7595_s26 + $0x98] sm:$0xff] %v985_v19  ;;  %v989_v21 = vld [vmem:[%s7590_s25 + $0xa8] sm:$0xff]  ;;  %v991_v22 = vld [vmem:[%s7590_s25 + $0xb0] sm:$0xff] }
  0x1d   : > { %988 = vst [vmem:[%s7595_s26 + $0xa0] sm:$0xff] %v987_v20  ;;  %v993_v23 = vld [vmem:[%s7590_s25 + $0xb8] sm:$0xff]  ;;  %990 = vst [vmem:[%s7595_s26 + $0xa8] sm:$0xff] %v989_v21  ;;  %v995_v24 = vld [vmem:[%s7590_s25 + $0xc0] sm:$0xff] }
  0x1e   : > { %992 = vst [vmem:[%s7595_s26 + $0xb0] sm:$0xff] %v991_v22  ;;  %994 = vst [vmem:[%s7595_s26 + $0xb8] sm:$0xff] %v993_v23  ;;  %v997_v25 = vld [vmem:[%s7590_s25 + $0xc8] sm:$0xff]  ;;  %v999_v26 = vld [vmem:[%s7590_s25 + $0xd0] sm:$0xff] }
  0x1f   : > { %996 = vst [vmem:[%s7595_s26 + $0xc0] sm:$0xff] %v995_v24  ;;  %998 = vst [vmem:[%s7595_s26 + $0xc8] sm:$0xff] %v997_v25  ;;  %v1001_v27 = vld [vmem:[%s7590_s25 + $0xd8] sm:$0xff]  ;;  %v1003_v28 = vld [vmem:[%s7590_s25 + $0xe0] sm:$0xff] }
  0x20   : > { %1000 = vst [vmem:[%s7595_s26 + $0xd0] sm:$0xff] %v999_v26  ;;  %v1005_v29 = vld [vmem:[%s7590_s25 + $0xe8] sm:$0xff]  ;;  %1002 = vst [vmem:[%s7595_s26 + $0xd8] sm:$0xff] %v1001_v27  ;;  %v1007_v30 = vld [vmem:[%s7590_s25 + $0xf0] sm:$0xff] }
  0x21   : > { %1004 = vst [vmem:[%s7595_s26 + $0xe0] sm:$0xff] %v1003_v28  ;;  %1006 = vst [vmem:[%s7595_s26 + $0xe8] sm:$0xff] %v1005_v29  ;;  %v1009_v31 = vld [vmem:[%s7590_s25 + $0xf8] sm:$0xff]  ;;  %v1011_v32 = vld [vmem:[%s7590_s25 + $0x100] sm:$0xff] }
  0x22   : > { %1008 = vst [vmem:[%s7595_s26 + $0xf0] sm:$0xff] %v1007_v30  ;;  %1010 = vst [vmem:[%s7595_s26 + $0xf8] sm:$0xff] %v1009_v31  ;;  %v1013_v33 = vld [vmem:[%s7590_s25 + $0x108] sm:$0xff]  ;;  %v1015_v34 = vld [vmem:[%s7590_s25 + $0x110] sm:$0xff] }
  0x23   : > { %1012 = vst [vmem:[%s7595_s26 + $0x100] sm:$0xff] %v1011_v32  ;;  %v1017_v35 = vld [vmem:[%s7590_s25 + $0x118] sm:$0xff]  ;;  %1014 = vst [vmem:[%s7595_s26 + $0x108] sm:$0xff] %v1013_v33  ;;  %v1019_v36 = vld [vmem:[%s7590_s25 + $0x120] sm:$0xff] }
  0x24   : > { %1016 = vst [vmem:[%s7595_s26 + $0x110] sm:$0xff] %v1015_v34  ;;  %1018 = vst [vmem:[%s7595_s26 + $0x118] sm:$0xff] %v1017_v35  ;;  %v1021_v37 = vld [vmem:[%s7590_s25 + $0x128] sm:$0xff]  ;;  %v1023_v38 = vld [vmem:[%s7590_s25 + $0x130] sm:$0xff] }
  0x25   : > { %1020 = vst [vmem:[%s7595_s26 + $0x120] sm:$0xff] %v1019_v36  ;;  %1022 = vst [vmem:[%s7595_s26 + $0x128] sm:$0xff] %v1021_v37  ;;  %v1025_v39 = vld [vmem:[%s7590_s25 + $0x138] sm:$0xff]  ;;  %v1027_v40 = vld [vmem:[%s7590_s25 + $0x140] sm:$0xff] }
  0x26   : > { %1024 = vst [vmem:[%s7595_s26 + $0x130] sm:$0xff] %v1023_v38  ;;  %v1029_v41 = vld [vmem:[%s7590_s25 + $0x148] sm:$0xff]  ;;  %1026 = vst [vmem:[%s7595_s26 + $0x138] sm:$0xff] %v1025_v39  ;;  %v1031_v42 = vld [vmem:[%s7590_s25 + $0x150] sm:$0xff] }
  0x27   : > { %1028 = vst [vmem:[%s7595_s26 + $0x140] sm:$0xff] %v1027_v40  ;;  %1030 = vst [vmem:[%s7595_s26 + $0x148] sm:$0xff] %v1029_v41  ;;  %v1033_v43 = vld [vmem:[%s7590_s25 + $0x158] sm:$0xff]  ;;  %v1035_v44 = vld [vmem:[%s7590_s25 + $0x160] sm:$0xff] }
  0x28   : > { %1032 = vst [vmem:[%s7595_s26 + $0x150] sm:$0xff] %v1031_v42  ;;  %1034 = vst [vmem:[%s7595_s26 + $0x158] sm:$0xff] %v1033_v43  ;;  %v1037_v45 = vld [vmem:[%s7590_s25 + $0x168] sm:$0xff]  ;;  %v1039_v46 = vld [vmem:[%s7590_s25 + $0x170] sm:$0xff] }
  0x29   : > { %1036 = vst [vmem:[%s7595_s26 + $0x160] sm:$0xff] %v1035_v44  ;;  %v1041_v47 = vld [vmem:[%s7590_s25 + $0x178] sm:$0xff]  ;;  %1038 = vst [vmem:[%s7595_s26 + $0x168] sm:$0xff] %v1037_v45  ;;  %v1043_v48 = vld [vmem:[%s7590_s25 + $0x180] sm:$0xff] }
  0x2a   : > { %1040 = vst [vmem:[%s7595_s26 + $0x170] sm:$0xff] %v1039_v46  ;;  %1042 = vst [vmem:[%s7595_s26 + $0x178] sm:$0xff] %v1041_v47  ;;  %v1045_v49 = vld [vmem:[%s7590_s25 + $0x188] sm:$0xff]  ;;  %v1047_v50 = vld [vmem:[%s7590_s25 + $0x190] sm:$0xff] }
  0x2b   : > { %1044 = vst [vmem:[%s7595_s26 + $0x180] sm:$0xff] %v1043_v48  ;;  %1046 = vst [vmem:[%s7595_s26 + $0x188] sm:$0xff] %v1045_v49  ;;  %v1049_v51 = vld [vmem:[%s7590_s25 + $0x198] sm:$0xff]  ;;  %v1051_v52 = vld [vmem:[%s7590_s25 + $0x1a0] sm:$0xff] }
  0x2c   : > { %1048 = vst [vmem:[%s7595_s26 + $0x190] sm:$0xff] %v1047_v50  ;;  %v1053_v53 = vld [vmem:[%s7590_s25 + $0x1a8] sm:$0xff]  ;;  %1050 = vst [vmem:[%s7595_s26 + $0x198] sm:$0xff] %v1049_v51  ;;  %v1055_v54 = vld [vmem:[%s7590_s25 + $0x1b0] sm:$0xff] }
  0x2d   : > { %1052 = vst [vmem:[%s7595_s26 + $0x1a0] sm:$0xff] %v1051_v52  ;;  %1054 = vst [vmem:[%s7595_s26 + $0x1a8] sm:$0xff] %v1053_v53  ;;  %v1057_v55 = vld [vmem:[%s7590_s25 + $0x1b8] sm:$0xff]  ;;  %v1059_v56 = vld [vmem:[%s7590_s25 + $0x1c0] sm:$0xff] }
  0x2e   : > { %1056 = vst [vmem:[%s7595_s26 + $0x1b0] sm:$0xff] %v1055_v54  ;;  %1058 = vst [vmem:[%s7595_s26 + $0x1b8] sm:$0xff] %v1057_v55  ;;  %v1061_v57 = vld [vmem:[%s7590_s25 + $0x1c8] sm:$0xff]  ;;  %v1063_v58 = vld [vmem:[%s7590_s25 + $0x1d0] sm:$0xff] }
  0x2f   : > { %1060 = vst [vmem:[%s7595_s26 + $0x1c0] sm:$0xff] %v1059_v56  ;;  %v1065_v59 = vld [vmem:[%s7590_s25 + $0x1d8] sm:$0xff]  ;;  %1062 = vst [vmem:[%s7595_s26 + $0x1c8] sm:$0xff] %v1061_v57  ;;  %v1067_v60 = vld [vmem:[%s7590_s25 + $0x1e0] sm:$0xff] }
  0x30   : > { %1064 = vst [vmem:[%s7595_s26 + $0x1d0] sm:$0xff] %v1063_v58  ;;  %1066 = vst [vmem:[%s7595_s26 + $0x1d8] sm:$0xff] %v1065_v59  ;;  %v1069_v61 = vld [vmem:[%s7590_s25 + $0x1e8] sm:$0xff]  ;;  %v1071_v62 = vld [vmem:[%s7590_s25 + $0x1f0] sm:$0xff] }
  0x31   : > { %1068 = vst [vmem:[%s7595_s26 + $0x1e0] sm:$0xff] %v1067_v60  ;;  %1070 = vst [vmem:[%s7595_s26 + $0x1e8] sm:$0xff] %v1069_v61  ;;  %v1073_v63 = vld [vmem:[%s7590_s25 + $0x1f8] sm:$0xff]  ;;  %v1075_v0 = vld [vmem:[%s7590_s25 + $0x200] sm:$0xff] }
  0x32   : > { %1072 = vst [vmem:[%s7595_s26 + $0x1f0] sm:$0xff] %v1071_v62  ;;  %v1077_v1 = vld [vmem:[%s7590_s25 + $0x208] sm:$0xff]  ;;  %1074 = vst [vmem:[%s7595_s26 + $0x1f8] sm:$0xff] %v1073_v63  ;;  %v1079_v2 = vld [vmem:[%s7590_s25 + $0x210] sm:$0xff] }
  0x33   : > { %1076 = vst [vmem:[%s7595_s26 + $0x200] sm:$0xff] %v1075_v0  ;;  %1078 = vst [vmem:[%s7595_s26 + $0x208] sm:$0xff] %v1077_v1  ;;  %v1081_v3 = vld [vmem:[%s7590_s25 + $0x218] sm:$0xff]  ;;  %v1083_v4 = vld [vmem:[%s7590_s25 + $0x220] sm:$0xff] }
  0x34   : > { %1080 = vst [vmem:[%s7595_s26 + $0x210] sm:$0xff] %v1079_v2  ;;  %1082 = vst [vmem:[%s7595_s26 + $0x218] sm:$0xff] %v1081_v3  ;;  %v1085_v5 = vld [vmem:[%s7590_s25 + $0x228] sm:$0xff]  ;;  %v1087_v6 = vld [vmem:[%s7590_s25 + $0x230] sm:$0xff] }
  0x35   : > { %1084 = vst [vmem:[%s7595_s26 + $0x220] sm:$0xff] %v1083_v4  ;;  %v1089_v7 = vld [vmem:[%s7590_s25 + $0x238] sm:$0xff]  ;;  %1086 = vst [vmem:[%s7595_s26 + $0x228] sm:$0xff] %v1085_v5  ;;  %v1091_v8 = vld [vmem:[%s7590_s25 + $0x240] sm:$0xff] }
  0x36   : > { %1088 = vst [vmem:[%s7595_s26 + $0x230] sm:$0xff] %v1087_v6  ;;  %1090 = vst [vmem:[%s7595_s26 + $0x238] sm:$0xff] %v1089_v7  ;;  %v1093_v9 = vld [vmem:[%s7590_s25 + $0x248] sm:$0xff]  ;;  %v1095_v10 = vld [vmem:[%s7590_s25 + $0x250] sm:$0xff] }
  0x37   : > { %1092 = vst [vmem:[%s7595_s26 + $0x240] sm:$0xff] %v1091_v8  ;;  %1094 = vst [vmem:[%s7595_s26 + $0x248] sm:$0xff] %v1093_v9  ;;  %v1097_v11 = vld [vmem:[%s7590_s25 + $0x258] sm:$0xff]  ;;  %v1099_v12 = vld [vmem:[%s7590_s25 + $0x260] sm:$0xff] }
  0x38   : > { %1096 = vst [vmem:[%s7595_s26 + $0x250] sm:$0xff] %v1095_v10  ;;  %v1101_v13 = vld [vmem:[%s7590_s25 + $0x268] sm:$0xff]  ;;  %1098 = vst [vmem:[%s7595_s26 + $0x258] sm:$0xff] %v1097_v11  ;;  %v1103_v14 = vld [vmem:[%s7590_s25 + $0x270] sm:$0xff] }
  0x39   : > { %1100 = vst [vmem:[%s7595_s26 + $0x260] sm:$0xff] %v1099_v12  ;;  %1102 = vst [vmem:[%s7595_s26 + $0x268] sm:$0xff] %v1101_v13  ;;  %v1105_v15 = vld [vmem:[%s7590_s25 + $0x278] sm:$0xff]  ;;  %v1107_v16 = vld [vmem:[%s7590_s25 + $0x280] sm:$0xff] }
  0x3a   : > { %1104 = vst [vmem:[%s7595_s26 + $0x270] sm:$0xff] %v1103_v14  ;;  %1106 = vst [vmem:[%s7595_s26 + $0x278] sm:$0xff] %v1105_v15  ;;  %v1109_v17 = vld [vmem:[%s7590_s25 + $0x288] sm:$0xff]  ;;  %v1111_v18 = vld [vmem:[%s7590_s25 + $0x290] sm:$0xff] }
  0x3b   : > { %1108 = vst [vmem:[%s7595_s26 + $0x280] sm:$0xff] %v1107_v16  ;;  %v1113_v19 = vld [vmem:[%s7590_s25 + $0x298] sm:$0xff]  ;;  %1110 = vst [vmem:[%s7595_s26 + $0x288] sm:$0xff] %v1109_v17  ;;  %v1115_v20 = vld [vmem:[%s7590_s25 + $0x2a0] sm:$0xff] }
  0x3c   : > { %1112 = vst [vmem:[%s7595_s26 + $0x290] sm:$0xff] %v1111_v18  ;;  %1114 = vst [vmem:[%s7595_s26 + $0x298] sm:$0xff] %v1113_v19  ;;  %v1117_v21 = vld [vmem:[%s7590_s25 + $0x2a8] sm:$0xff]  ;;  %v1119_v22 = vld [vmem:[%s7590_s25 + $0x2b0] sm:$0xff] }
  0x3d   : > { %1116 = vst [vmem:[%s7595_s26 + $0x2a0] sm:$0xff] %v1115_v20  ;;  %1118 = vst [vmem:[%s7595_s26 + $0x2a8] sm:$0xff] %v1117_v21  ;;  %v1121_v23 = vld [vmem:[%s7590_s25 + $0x2b8] sm:$0xff]  ;;  %v1123_v24 = vld [vmem:[%s7590_s25 + $0x2c0] sm:$0xff] }
  0x3e   : > { %1120 = vst [vmem:[%s7595_s26 + $0x2b0] sm:$0xff] %v1119_v22  ;;  %v1125_v25 = vld [vmem:[%s7590_s25 + $0x2c8] sm:$0xff]  ;;  %1122 = vst [vmem:[%s7595_s26 + $0x2b8] sm:$0xff] %v1121_v23  ;;  %v1127_v26 = vld [vmem:[%s7590_s25 + $0x2d0] sm:$0xff] }
  0x3f   : > { %1124 = vst [vmem:[%s7595_s26 + $0x2c0] sm:$0xff] %v1123_v24  ;;  %1126 = vst [vmem:[%s7595_s26 + $0x2c8] sm:$0xff] %v1125_v25  ;;  %v1129_v27 = vld [vmem:[%s7590_s25 + $0x2d8] sm:$0xff]  ;;  %v1131_v28 = vld [vmem:[%s7590_s25 + $0x2e0] sm:$0xff] }
  0x40   : > { %1128 = vst [vmem:[%s7595_s26 + $0x2d0] sm:$0xff] %v1127_v26  ;;  %1130 = vst [vmem:[%s7595_s26 + $0x2d8] sm:$0xff] %v1129_v27  ;;  %v1133_v29 = vld [vmem:[%s7590_s25 + $0x2e8] sm:$0xff]  ;;  %v1135_v30 = vld [vmem:[%s7590_s25 + $0x2f0] sm:$0xff] }
  0x41   : > { %1132 = vst [vmem:[%s7595_s26 + $0x2e0] sm:$0xff] %v1131_v28  ;;  %v1137_v31 = vld [vmem:[%s7590_s25 + $0x2f8] sm:$0xff]  ;;  %1134 = vst [vmem:[%s7595_s26 + $0x2e8] sm:$0xff] %v1133_v29  ;;  %v1139_v32 = vld [vmem:[%s7590_s25 + $0x300] sm:$0xff] }
  0x42   : > { %1136 = vst [vmem:[%s7595_s26 + $0x2f0] sm:$0xff] %v1135_v30  ;;  %1138 = vst [vmem:[%s7595_s26 + $0x2f8] sm:$0xff] %v1137_v31  ;;  %v1141_v33 = vld [vmem:[%s7590_s25 + $0x308] sm:$0xff]  ;;  %v1143_v34 = vld [vmem:[%s7590_s25 + $0x620] sm:$0xff] }
  0x43   : > { %1140 = vst [vmem:[%s7595_s26 + $0x300] sm:$0xff] %v1139_v32  ;;  %1142 = vst [vmem:[%s7595_s26 + $0x308] sm:$0xff] %v1141_v33  ;;  %v1145_v35 = vld [vmem:[%s7590_s25 + $0x628] sm:$0xff]  ;;  %v1147_v36 = vld [vmem:[%s7590_s25 + $0x630] sm:$0xff] }
  0x44   : > { %1144 = vst [vmem:[%s7595_s26 + $0x310] sm:$0xff] %v1143_v34  ;;  %v1149_v37 = vld [vmem:[%s7590_s25 + $0x638] sm:$0xff]  ;;  %1146 = vst [vmem:[%s7595_s26 + $0x318] sm:$0xff] %v1145_v35  ;;  %v1151_v38 = vld [vmem:[%s7590_s25 + $0x640] sm:$0xff] }
  0x45   : > { %1148 = vst [vmem:[%s7595_s26 + $0x320] sm:$0xff] %v1147_v36  ;;  %1150 = vst [vmem:[%s7595_s26 + $0x328] sm:$0xff] %v1149_v37  ;;  %v1153_v39 = vld [vmem:[%s7590_s25 + $0x648] sm:$0xff]  ;;  %v1155_v40 = vld [vmem:[%s7590_s25 + $0x650] sm:$0xff] }
  0x46   : > { %1152 = vst [vmem:[%s7595_s26 + $0x330] sm:$0xff] %v1151_v38  ;;  %1154 = vst [vmem:[%s7595_s26 + $0x338] sm:$0xff] %v1153_v39  ;;  %v1157_v41 = vld [vmem:[%s7590_s25 + $0x658] sm:$0xff]  ;;  %v1159_v42 = vld [vmem:[%s7590_s25 + $0x660] sm:$0xff] }
  0x47   : > { %1156 = vst [vmem:[%s7595_s26 + $0x340] sm:$0xff] %v1155_v40  ;;  %v1161_v43 = vld [vmem:[%s7590_s25 + $0x668] sm:$0xff]  ;;  %1158 = vst [vmem:[%s7595_s26 + $0x348] sm:$0xff] %v1157_v41  ;;  %v1163_v44 = vld [vmem:[%s7590_s25 + $0x670] sm:$0xff] }
  0x48   : > { %1160 = vst [vmem:[%s7595_s26 + $0x350] sm:$0xff] %v1159_v42  ;;  %1162 = vst [vmem:[%s7595_s26 + $0x358] sm:$0xff] %v1161_v43  ;;  %v1165_v45 = vld [vmem:[%s7590_s25 + $0x678] sm:$0xff]  ;;  %v1167_v46 = vld [vmem:[%s7590_s25 + $0x680] sm:$0xff] }
  0x49   : > { %1164 = vst [vmem:[%s7595_s26 + $0x360] sm:$0xff] %v1163_v44  ;;  %1166 = vst [vmem:[%s7595_s26 + $0x368] sm:$0xff] %v1165_v45  ;;  %v1169_v47 = vld [vmem:[%s7590_s25 + $0x688] sm:$0xff]  ;;  %v1171_v48 = vld [vmem:[%s7590_s25 + $0x690] sm:$0xff] }
  0x4a   : > { %1168 = vst [vmem:[%s7595_s26 + $0x370] sm:$0xff] %v1167_v46  ;;  %v1173_v49 = vld [vmem:[%s7590_s25 + $0x698] sm:$0xff]  ;;  %1170 = vst [vmem:[%s7595_s26 + $0x378] sm:$0xff] %v1169_v47  ;;  %v1175_v50 = vld [vmem:[%s7590_s25 + $0x6a0] sm:$0xff] }
  0x4b   : > { %1172 = vst [vmem:[%s7595_s26 + $0x380] sm:$0xff] %v1171_v48  ;;  %1174 = vst [vmem:[%s7595_s26 + $0x388] sm:$0xff] %v1173_v49  ;;  %v1177_v51 = vld [vmem:[%s7590_s25 + $0x6a8] sm:$0xff]  ;;  %v1179_v52 = vld [vmem:[%s7590_s25 + $0x6b0] sm:$0xff] }
  0x4c   : > { %1176 = vst [vmem:[%s7595_s26 + $0x390] sm:$0xff] %v1175_v50  ;;  %1178 = vst [vmem:[%s7595_s26 + $0x398] sm:$0xff] %v1177_v51  ;;  %v1181_v53 = vld [vmem:[%s7590_s25 + $0x6b8] sm:$0xff]  ;;  %v1183_v54 = vld [vmem:[%s7590_s25 + $0x6c0] sm:$0xff] }
  0x4d   : > { %1180 = vst [vmem:[%s7595_s26 + $0x3a0] sm:$0xff] %v1179_v52  ;;  %v1185_v55 = vld [vmem:[%s7590_s25 + $0x6c8] sm:$0xff]  ;;  %1182 = vst [vmem:[%s7595_s26 + $0x3a8] sm:$0xff] %v1181_v53  ;;  %v1187_v56 = vld [vmem:[%s7590_s25 + $0x6d0] sm:$0xff] }
  0x4e   : > { %1184 = vst [vmem:[%s7595_s26 + $0x3b0] sm:$0xff] %v1183_v54  ;;  %1186 = vst [vmem:[%s7595_s26 + $0x3b8] sm:$0xff] %v1185_v55  ;;  %v1189_v57 = vld [vmem:[%s7590_s25 + $0x6d8] sm:$0xff]  ;;  %v1191_v58 = vld [vmem:[%s7590_s25 + $0x6e0] sm:$0xff] }
  0x4f   : > { %1188 = vst [vmem:[%s7595_s26 + $0x3c0] sm:$0xff] %v1187_v56  ;;  %1190 = vst [vmem:[%s7595_s26 + $0x3c8] sm:$0xff] %v1189_v57  ;;  %v1193_v59 = vld [vmem:[%s7590_s25 + $0x6e8] sm:$0xff]  ;;  %v1195_v60 = vld [vmem:[%s7590_s25 + $0x6f0] sm:$0xff] }
  0x50   : > { %1192 = vst [vmem:[%s7595_s26 + $0x3d0] sm:$0xff] %v1191_v58  ;;  %v1197_v61 = vld [vmem:[%s7590_s25 + $0x6f8] sm:$0xff]  ;;  %1194 = vst [vmem:[%s7595_s26 + $0x3d8] sm:$0xff] %v1193_v59  ;;  %v1199_v62 = vld [vmem:[%s7590_s25 + $0x700] sm:$0xff] }
  0x51   : > { %1196 = vst [vmem:[%s7595_s26 + $0x3e0] sm:$0xff] %v1195_v60  ;;  %1198 = vst [vmem:[%s7595_s26 + $0x3e8] sm:$0xff] %v1197_v61  ;;  %v1201_v63 = vld [vmem:[%s7590_s25 + $0x708] sm:$0xff]  ;;  %v1203_v0 = vld [vmem:[%s7590_s25 + $0x710] sm:$0xff] }
  0x52   : > { %1200 = vst [vmem:[%s7595_s26 + $0x3f0] sm:$0xff] %v1199_v62  ;;  %1202 = vst [vmem:[%s7595_s26 + $0x3f8] sm:$0xff] %v1201_v63  ;;  %v1205_v1 = vld [vmem:[%s7590_s25 + $0x718] sm:$0xff]  ;;  %v1207_v2 = vld [vmem:[%s7590_s25 + $0x720] sm:$0xff] }
  0x53   : > { %1204 = vst [vmem:[%s7595_s26 + $0x400] sm:$0xff] %v1203_v0  ;;  %v1209_v3 = vld [vmem:[%s7590_s25 + $0x728] sm:$0xff]  ;;  %1206 = vst [vmem:[%s7595_s26 + $0x408] sm:$0xff] %v1205_v1  ;;  %v1211_v4 = vld [vmem:[%s7590_s25 + $0x730] sm:$0xff] }
  0x54   : > { %1208 = vst [vmem:[%s7595_s26 + $0x410] sm:$0xff] %v1207_v2  ;;  %1210 = vst [vmem:[%s7595_s26 + $0x418] sm:$0xff] %v1209_v3  ;;  %v1213_v5 = vld [vmem:[%s7590_s25 + $0x738] sm:$0xff]  ;;  %v1215_v6 = vld [vmem:[%s7590_s25 + $0x740] sm:$0xff] }
  0x55   : > { %1212 = vst [vmem:[%s7595_s26 + $0x420] sm:$0xff] %v1211_v4  ;;  %1214 = vst [vmem:[%s7595_s26 + $0x428] sm:$0xff] %v1213_v5  ;;  %v1217_v7 = vld [vmem:[%s7590_s25 + $0x748] sm:$0xff]  ;;  %v1219_v8 = vld [vmem:[%s7590_s25 + $0x750] sm:$0xff] }
  0x56   : > { %1216 = vst [vmem:[%s7595_s26 + $0x430] sm:$0xff] %v1215_v6  ;;  %v1221_v9 = vld [vmem:[%s7590_s25 + $0x758] sm:$0xff]  ;;  %1218 = vst [vmem:[%s7595_s26 + $0x438] sm:$0xff] %v1217_v7  ;;  %v1223_v10 = vld [vmem:[%s7590_s25 + $0x760] sm:$0xff] }
  0x57   : > { %1220 = vst [vmem:[%s7595_s26 + $0x440] sm:$0xff] %v1219_v8  ;;  %1222 = vst [vmem:[%s7595_s26 + $0x448] sm:$0xff] %v1221_v9  ;;  %v1225_v11 = vld [vmem:[%s7590_s25 + $0x768] sm:$0xff]  ;;  %v1227_v12 = vld [vmem:[%s7590_s25 + $0x770] sm:$0xff] }
  0x58   : > { %1224 = vst [vmem:[%s7595_s26 + $0x450] sm:$0xff] %v1223_v10  ;;  %1226 = vst [vmem:[%s7595_s26 + $0x458] sm:$0xff] %v1225_v11  ;;  %v1229_v13 = vld [vmem:[%s7590_s25 + $0x778] sm:$0xff]  ;;  %v1231_v14 = vld [vmem:[%s7590_s25 + $0x780] sm:$0xff] }
  0x59   : > { %1228 = vst [vmem:[%s7595_s26 + $0x460] sm:$0xff] %v1227_v12  ;;  %v1233_v15 = vld [vmem:[%s7590_s25 + $0x788] sm:$0xff]  ;;  %1230 = vst [vmem:[%s7595_s26 + $0x468] sm:$0xff] %v1229_v13  ;;  %v1235_v16 = vld [vmem:[%s7590_s25 + $0x790] sm:$0xff] }
  0x5a   : > { %1232 = vst [vmem:[%s7595_s26 + $0x470] sm:$0xff] %v1231_v14  ;;  %1234 = vst [vmem:[%s7595_s26 + $0x478] sm:$0xff] %v1233_v15  ;;  %v1237_v17 = vld [vmem:[%s7590_s25 + $0x798] sm:$0xff]  ;;  %v1239_v18 = vld [vmem:[%s7590_s25 + $0x7a0] sm:$0xff] }
  0x5b   : > { %1236 = vst [vmem:[%s7595_s26 + $0x480] sm:$0xff] %v1235_v16  ;;  %1238 = vst [vmem:[%s7595_s26 + $0x488] sm:$0xff] %v1237_v17  ;;  %v1241_v19 = vld [vmem:[%s7590_s25 + $0x7a8] sm:$0xff]  ;;  %v1243_v20 = vld [vmem:[%s7590_s25 + $0x7b0] sm:$0xff] }
  0x5c   : > { %1240 = vst [vmem:[%s7595_s26 + $0x490] sm:$0xff] %v1239_v18  ;;  %v1245_v21 = vld [vmem:[%s7590_s25 + $0x7b8] sm:$0xff]  ;;  %1242 = vst [vmem:[%s7595_s26 + $0x498] sm:$0xff] %v1241_v19  ;;  %v1247_v22 = vld [vmem:[%s7590_s25 + $0x7c0] sm:$0xff] }
  0x5d   : > { %1244 = vst [vmem:[%s7595_s26 + $0x4a0] sm:$0xff] %v1243_v20  ;;  %1246 = vst [vmem:[%s7595_s26 + $0x4a8] sm:$0xff] %v1245_v21  ;;  %v1249_v23 = vld [vmem:[%s7590_s25 + $0x7c8] sm:$0xff]  ;;  %v1251_v24 = vld [vmem:[%s7590_s25 + $0x7d0] sm:$0xff] }
  0x5e   : > { %1248 = vst [vmem:[%s7595_s26 + $0x4b0] sm:$0xff] %v1247_v22  ;;  %1250 = vst [vmem:[%s7595_s26 + $0x4b8] sm:$0xff] %v1249_v23  ;;  %v1253_v25 = vld [vmem:[%s7590_s25 + $0x7d8] sm:$0xff]  ;;  %v1255_v26 = vld [vmem:[%s7590_s25 + $0x7e0] sm:$0xff] }
  0x5f   : > { %1252 = vst [vmem:[%s7595_s26 + $0x4c0] sm:$0xff] %v1251_v24  ;;  %v1257_v27 = vld [vmem:[%s7590_s25 + $0x7e8] sm:$0xff]  ;;  %1254 = vst [vmem:[%s7595_s26 + $0x4c8] sm:$0xff] %v1253_v25  ;;  %v1259_v28 = vld [vmem:[%s7590_s25 + $0x7f0] sm:$0xff] }
  0x60   : > { %1256 = vst [vmem:[%s7595_s26 + $0x4d0] sm:$0xff] %v1255_v26  ;;  %1258 = vst [vmem:[%s7595_s26 + $0x4d8] sm:$0xff] %v1257_v27  ;;  %v1261_v29 = vld [vmem:[%s7590_s25 + $0x7f8] sm:$0xff]  ;;  %v1263_v30 = vld [vmem:[%s7590_s25 + $0x800] sm:$0xff] }
  0x61   : > { %1260 = vst [vmem:[%s7595_s26 + $0x4e0] sm:$0xff] %v1259_v28  ;;  %1262 = vst [vmem:[%s7595_s26 + $0x4e8] sm:$0xff] %v1261_v29  ;;  %v1265_v31 = vld [vmem:[%s7590_s25 + $0x808] sm:$0xff]  ;;  %v1267_v32 = vld [vmem:[%s7590_s25 + $0x810] sm:$0xff] }
  0x62   : > { %1264 = vst [vmem:[%s7595_s26 + $0x4f0] sm:$0xff] %v1263_v30  ;;  %v1269_v33 = vld [vmem:[%s7590_s25 + $0x818] sm:$0xff]  ;;  %1266 = vst [vmem:[%s7595_s26 + $0x4f8] sm:$0xff] %v1265_v31  ;;  %v1271_v34 = vld [vmem:[%s7590_s25 + $0x820] sm:$0xff] }
  0x63   : > { %1268 = vst [vmem:[%s7595_s26 + $0x500] sm:$0xff] %v1267_v32  ;;  %1270 = vst [vmem:[%s7595_s26 + $0x508] sm:$0xff] %v1269_v33  ;;  %v1273_v35 = vld [vmem:[%s7590_s25 + $0x828] sm:$0xff]  ;;  %v1275_v36 = vld [vmem:[%s7590_s25 + $0x830] sm:$0xff] }
  0x64   : > { %1272 = vst [vmem:[%s7595_s26 + $0x510] sm:$0xff] %v1271_v34  ;;  %1274 = vst [vmem:[%s7595_s26 + $0x518] sm:$0xff] %v1273_v35  ;;  %v1277_v37 = vld [vmem:[%s7590_s25 + $0x838] sm:$0xff]  ;;  %v1279_v38 = vld [vmem:[%s7590_s25 + $0x840] sm:$0xff] }
  0x65   : > { %1276 = vst [vmem:[%s7595_s26 + $0x520] sm:$0xff] %v1275_v36  ;;  %v1281_v39 = vld [vmem:[%s7590_s25 + $0x848] sm:$0xff]  ;;  %1278 = vst [vmem:[%s7595_s26 + $0x528] sm:$0xff] %v1277_v37  ;;  %v1283_v40 = vld [vmem:[%s7590_s25 + $0x850] sm:$0xff] }
  0x66   : > { %1280 = vst [vmem:[%s7595_s26 + $0x530] sm:$0xff] %v1279_v38  ;;  %1282 = vst [vmem:[%s7595_s26 + $0x538] sm:$0xff] %v1281_v39  ;;  %v1285_v41 = vld [vmem:[%s7590_s25 + $0x858] sm:$0xff]  ;;  %v1287_v42 = vld [vmem:[%s7590_s25 + $0x860] sm:$0xff] }
  0x67   : > { %1284 = vst [vmem:[%s7595_s26 + $0x540] sm:$0xff] %v1283_v40  ;;  %1286 = vst [vmem:[%s7595_s26 + $0x548] sm:$0xff] %v1285_v41  ;;  %v1289_v43 = vld [vmem:[%s7590_s25 + $0x868] sm:$0xff]  ;;  %v1291_v44 = vld [vmem:[%s7590_s25 + $0x870] sm:$0xff] }
  0x68   : > { %1288 = vst [vmem:[%s7595_s26 + $0x550] sm:$0xff] %v1287_v42  ;;  %v1293_v45 = vld [vmem:[%s7590_s25 + $0x878] sm:$0xff]  ;;  %1290 = vst [vmem:[%s7595_s26 + $0x558] sm:$0xff] %v1289_v43  ;;  %v1295_v46 = vld [vmem:[%s7590_s25 + $0x880] sm:$0xff] }
  0x69   : > { %1292 = vst [vmem:[%s7595_s26 + $0x560] sm:$0xff] %v1291_v44  ;;  %1294 = vst [vmem:[%s7595_s26 + $0x568] sm:$0xff] %v1293_v45  ;;  %v1297_v47 = vld [vmem:[%s7590_s25 + $0x888] sm:$0xff]  ;;  %v1299_v48 = vld [vmem:[%s7590_s25 + $0x890] sm:$0xff] }
  0x6a   : > { %1296 = vst [vmem:[%s7595_s26 + $0x570] sm:$0xff] %v1295_v46  ;;  %1298 = vst [vmem:[%s7595_s26 + $0x578] sm:$0xff] %v1297_v47  ;;  %v1301_v49 = vld [vmem:[%s7590_s25 + $0x898] sm:$0xff]  ;;  %v1303_v50 = vld [vmem:[%s7590_s25 + $0x8a0] sm:$0xff] }
  0x6b   : > { %1300 = vst [vmem:[%s7595_s26 + $0x580] sm:$0xff] %v1299_v48  ;;  %v1305_v51 = vld [vmem:[%s7590_s25 + $0x8a8] sm:$0xff]  ;;  %1302 = vst [vmem:[%s7595_s26 + $0x588] sm:$0xff] %v1301_v49  ;;  %v1307_v52 = vld [vmem:[%s7590_s25 + $0x8b0] sm:$0xff] }
  0x6c   : > { %1304 = vst [vmem:[%s7595_s26 + $0x590] sm:$0xff] %v1303_v50  ;;  %1306 = vst [vmem:[%s7595_s26 + $0x598] sm:$0xff] %v1305_v51  ;;  %v1309_v53 = vld [vmem:[%s7590_s25 + $0x8b8] sm:$0xff]  ;;  %v1311_v54 = vld [vmem:[%s7590_s25 + $0x8c0] sm:$0xff] }
  0x6d   : > { %1308 = vst [vmem:[%s7595_s26 + $0x5a0] sm:$0xff] %v1307_v52  ;;  %1310 = vst [vmem:[%s7595_s26 + $0x5a8] sm:$0xff] %v1309_v53  ;;  %v1313_v55 = vld [vmem:[%s7590_s25 + $0x8c8] sm:$0xff]  ;;  %v1315_v56 = vld [vmem:[%s7590_s25 + $0x8d0] sm:$0xff] }
  0x6e   : > { %1312 = vst [vmem:[%s7595_s26 + $0x5b0] sm:$0xff] %v1311_v54  ;;  %v1317_v57 = vld [vmem:[%s7590_s25 + $0x8d8] sm:$0xff]  ;;  %1314 = vst [vmem:[%s7595_s26 + $0x5b8] sm:$0xff] %v1313_v55  ;;  %v1319_v58 = vld [vmem:[%s7590_s25 + $0x8e0] sm:$0xff] }
  0x6f   : > { %1316 = vst [vmem:[%s7595_s26 + $0x5c0] sm:$0xff] %v1315_v56  ;;  %1318 = vst [vmem:[%s7595_s26 + $0x5c8] sm:$0xff] %v1317_v57  ;;  %v1321_v59 = vld [vmem:[%s7590_s25 + $0x8e8] sm:$0xff]  ;;  %v1323_v60 = vld [vmem:[%s7590_s25 + $0x8f0] sm:$0xff] }
  0x70   : > { %1320 = vst [vmem:[%s7595_s26 + $0x5d0] sm:$0xff] %v1319_v58  ;;  %1322 = vst [vmem:[%s7595_s26 + $0x5d8] sm:$0xff] %v1321_v59  ;;  %v1325_v61 = vld [vmem:[%s7590_s25 + $0x8f8] sm:$0xff]  ;;  %v1327_v62 = vld [vmem:[%s7590_s25 + $0x900] sm:$0xff] }
  0x71   : > { %1324 = vst [vmem:[%s7595_s26 + $0x5e0] sm:$0xff] %v1323_v60  ;;  %v1329_v63 = vld [vmem:[%s7590_s25 + $0x908] sm:$0xff]  ;;  %1326 = vst [vmem:[%s7595_s26 + $0x5e8] sm:$0xff] %v1325_v61  ;;  %v1331_v0 = vld [vmem:[%s7590_s25 + $0x910] sm:$0xff] }
  0x72   : > { %1328 = vst [vmem:[%s7595_s26 + $0x5f0] sm:$0xff] %v1327_v62  ;;  %1330 = vst [vmem:[%s7595_s26 + $0x5f8] sm:$0xff] %v1329_v63  ;;  %v1333_v1 = vld [vmem:[%s7590_s25 + $0x918] sm:$0xff]  ;;  %v1335_v2 = vld [vmem:[%s7590_s25 + $0x920] sm:$0xff] }
  0x73   : > { %1332 = vst [vmem:[%s7595_s26 + $0x600] sm:$0xff] %v1331_v0  ;;  %1334 = vst [vmem:[%s7595_s26 + $0x608] sm:$0xff] %v1333_v1  ;;  %v1337_v3 = vld [vmem:[%s7590_s25 + $0x928] sm:$0xff]  ;;  %v1339_v4 = vld [vmem:[%s7590_s25 + $0xc40] sm:$0xff] }
  0x74   : > { %1336 = vst [vmem:[%s7595_s26 + $0x610] sm:$0xff] %v1335_v2  ;;  %v1341_v5 = vld [vmem:[%s7590_s25 + $0xc48] sm:$0xff]  ;;  %1338 = vst [vmem:[%s7595_s26 + $0x618] sm:$0xff] %v1337_v3  ;;  %v1343_v6 = vld [vmem:[%s7590_s25 + $0xc50] sm:$0xff] }
  0x75   : > { %1340 = vst [vmem:[%s7595_s26 + $0x620] sm:$0xff] %v1339_v4  ;;  %1342 = vst [vmem:[%s7595_s26 + $0x628] sm:$0xff] %v1341_v5  ;;  %v1345_v7 = vld [vmem:[%s7590_s25 + $0xc58] sm:$0xff]  ;;  %v1347_v8 = vld [vmem:[%s7590_s25 + $0xc60] sm:$0xff] }
  0x76   : > { %1344 = vst [vmem:[%s7595_s26 + $0x630] sm:$0xff] %v1343_v6  ;;  %1346 = vst [vmem:[%s7595_s26 + $0x638] sm:$0xff] %v1345_v7  ;;  %v1349_v9 = vld [vmem:[%s7590_s25 + $0xc68] sm:$0xff]  ;;  %v1351_v10 = vld [vmem:[%s7590_s25 + $0xc70] sm:$0xff] }
  0x77   : > { %1348 = vst [vmem:[%s7595_s26 + $0x640] sm:$0xff] %v1347_v8  ;;  %v1353_v11 = vld [vmem:[%s7590_s25 + $0xc78] sm:$0xff]  ;;  %1350 = vst [vmem:[%s7595_s26 + $0x648] sm:$0xff] %v1349_v9  ;;  %v1355_v12 = vld [vmem:[%s7590_s25 + $0xc80] sm:$0xff] }
  0x78   : > { %1352 = vst [vmem:[%s7595_s26 + $0x650] sm:$0xff] %v1351_v10  ;;  %1354 = vst [vmem:[%s7595_s26 + $0x658] sm:$0xff] %v1353_v11  ;;  %v1357_v13 = vld [vmem:[%s7590_s25 + $0xc88] sm:$0xff]  ;;  %v1359_v14 = vld [vmem:[%s7590_s25 + $0xc90] sm:$0xff] }
  0x79   : > { %1356 = vst [vmem:[%s7595_s26 + $0x660] sm:$0xff] %v1355_v12  ;;  %1358 = vst [vmem:[%s7595_s26 + $0x668] sm:$0xff] %v1357_v13  ;;  %v1361_v15 = vld [vmem:[%s7590_s25 + $0xc98] sm:$0xff]  ;;  %v1363_v16 = vld [vmem:[%s7590_s25 + $0xca0] sm:$0xff] }
  0x7a   : > { %1360 = vst [vmem:[%s7595_s26 + $0x670] sm:$0xff] %v1359_v14  ;;  %v1365_v17 = vld [vmem:[%s7590_s25 + $0xca8] sm:$0xff]  ;;  %1362 = vst [vmem:[%s7595_s26 + $0x678] sm:$0xff] %v1361_v15  ;;  %v1367_v18 = vld [vmem:[%s7590_s25 + $0xcb0] sm:$0xff] }
  0x7b   : > { %1364 = vst [vmem:[%s7595_s26 + $0x680] sm:$0xff] %v1363_v16  ;;  %1366 = vst [vmem:[%s7595_s26 + $0x688] sm:$0xff] %v1365_v17  ;;  %v1369_v19 = vld [vmem:[%s7590_s25 + $0xcb8] sm:$0xff]  ;;  %v1371_v20 = vld [vmem:[%s7590_s25 + $0xcc0] sm:$0xff] }
  0x7c   : > { %1368 = vst [vmem:[%s7595_s26 + $0x690] sm:$0xff] %v1367_v18  ;;  %1370 = vst [vmem:[%s7595_s26 + $0x698] sm:$0xff] %v1369_v19  ;;  %v1373_v21 = vld [vmem:[%s7590_s25 + $0xcc8] sm:$0xff]  ;;  %v1375_v22 = vld [vmem:[%s7590_s25 + $0xcd0] sm:$0xff] }
  0x7d   : > { %1372 = vst [vmem:[%s7595_s26 + $0x6a0] sm:$0xff] %v1371_v20  ;;  %v1377_v23 = vld [vmem:[%s7590_s25 + $0xcd8] sm:$0xff]  ;;  %1374 = vst [vmem:[%s7595_s26 + $0x6a8] sm:$0xff] %v1373_v21  ;;  %v1379_v24 = vld [vmem:[%s7590_s25 + $0xce0] sm:$0xff] }
  0x7e   : > { %1376 = vst [vmem:[%s7595_s26 + $0x6b0] sm:$0xff] %v1375_v22  ;;  %1378 = vst [vmem:[%s7595_s26 + $0x6b8] sm:$0xff] %v1377_v23  ;;  %v1381_v25 = vld [vmem:[%s7590_s25 + $0xce8] sm:$0xff]  ;;  %v1383_v26 = vld [vmem:[%s7590_s25 + $0xcf0] sm:$0xff] }
  0x7f   : > { %1380 = vst [vmem:[%s7595_s26 + $0x6c0] sm:$0xff] %v1379_v24  ;;  %1382 = vst [vmem:[%s7595_s26 + $0x6c8] sm:$0xff] %v1381_v25  ;;  %v1385_v27 = vld [vmem:[%s7590_s25 + $0xcf8] sm:$0xff]  ;;  %v1387_v28 = vld [vmem:[%s7590_s25 + $0xd00] sm:$0xff] }
  0x80   : > { %1384 = vst [vmem:[%s7595_s26 + $0x6d0] sm:$0xff] %v1383_v26  ;;  %v1389_v29 = vld [vmem:[%s7590_s25 + $0xd08] sm:$0xff]  ;;  %1386 = vst [vmem:[%s7595_s26 + $0x6d8] sm:$0xff] %v1385_v27  ;;  %v1391_v30 = vld [vmem:[%s7590_s25 + $0xd10] sm:$0xff] }
  0x81   : > { %1388 = vst [vmem:[%s7595_s26 + $0x6e0] sm:$0xff] %v1387_v28  ;;  %1390 = vst [vmem:[%s7595_s26 + $0x6e8] sm:$0xff] %v1389_v29  ;;  %v1393_v31 = vld [vmem:[%s7590_s25 + $0xd18] sm:$0xff]  ;;  %v1395_v32 = vld [vmem:[%s7590_s25 + $0xd20] sm:$0xff] }
  0x82   : > { %1392 = vst [vmem:[%s7595_s26 + $0x6f0] sm:$0xff] %v1391_v30  ;;  %1394 = vst [vmem:[%s7595_s26 + $0x6f8] sm:$0xff] %v1393_v31  ;;  %v1397_v33 = vld [vmem:[%s7590_s25 + $0xd28] sm:$0xff]  ;;  %v1399_v34 = vld [vmem:[%s7590_s25 + $0xd30] sm:$0xff] }
  0x83   : > { %1396 = vst [vmem:[%s7595_s26 + $0x700] sm:$0xff] %v1395_v32  ;;  %v1401_v35 = vld [vmem:[%s7590_s25 + $0xd38] sm:$0xff]  ;;  %1398 = vst [vmem:[%s7595_s26 + $0x708] sm:$0xff] %v1397_v33  ;;  %v1403_v36 = vld [vmem:[%s7590_s25 + $0xd40] sm:$0xff] }
  0x84   : > { %1400 = vst [vmem:[%s7595_s26 + $0x710] sm:$0xff] %v1399_v34  ;;  %1402 = vst [vmem:[%s7595_s26 + $0x718] sm:$0xff] %v1401_v35  ;;  %v1405_v37 = vld [vmem:[%s7590_s25 + $0xd48] sm:$0xff]  ;;  %v1407_v38 = vld [vmem:[%s7590_s25 + $0xd50] sm:$0xff] }
  0x85   : > { %1404 = vst [vmem:[%s7595_s26 + $0x720] sm:$0xff] %v1403_v36  ;;  %1406 = vst [vmem:[%s7595_s26 + $0x728] sm:$0xff] %v1405_v37  ;;  %v1409_v39 = vld [vmem:[%s7590_s25 + $0xd58] sm:$0xff]  ;;  %v1411_v40 = vld [vmem:[%s7590_s25 + $0xd60] sm:$0xff] }
  0x86   : > { %1408 = vst [vmem:[%s7595_s26 + $0x730] sm:$0xff] %v1407_v38  ;;  %v1413_v41 = vld [vmem:[%s7590_s25 + $0xd68] sm:$0xff]  ;;  %1410 = vst [vmem:[%s7595_s26 + $0x738] sm:$0xff] %v1409_v39  ;;  %v1415_v42 = vld [vmem:[%s7590_s25 + $0xd70] sm:$0xff] }
  0x87   : > { %1412 = vst [vmem:[%s7595_s26 + $0x740] sm:$0xff] %v1411_v40  ;;  %1414 = vst [vmem:[%s7595_s26 + $0x748] sm:$0xff] %v1413_v41  ;;  %v1417_v43 = vld [vmem:[%s7590_s25 + $0xd78] sm:$0xff]  ;;  %v1419_v44 = vld [vmem:[%s7590_s25 + $0xd80] sm:$0xff] }
  0x88   : > { %1416 = vst [vmem:[%s7595_s26 + $0x750] sm:$0xff] %v1415_v42  ;;  %1418 = vst [vmem:[%s7595_s26 + $0x758] sm:$0xff] %v1417_v43  ;;  %v1421_v45 = vld [vmem:[%s7590_s25 + $0xd88] sm:$0xff]  ;;  %v1423_v46 = vld [vmem:[%s7590_s25 + $0xd90] sm:$0xff] }
  0x89   : > { %1420 = vst [vmem:[%s7595_s26 + $0x760] sm:$0xff] %v1419_v44  ;;  %v1425_v47 = vld [vmem:[%s7590_s25 + $0xd98] sm:$0xff]  ;;  %1422 = vst [vmem:[%s7595_s26 + $0x768] sm:$0xff] %v1421_v45  ;;  %v1427_v48 = vld [vmem:[%s7590_s25 + $0xda0] sm:$0xff] }
  0x8a   : > { %1424 = vst [vmem:[%s7595_s26 + $0x770] sm:$0xff] %v1423_v46  ;;  %1426 = vst [vmem:[%s7595_s26 + $0x778] sm:$0xff] %v1425_v47  ;;  %v1429_v49 = vld [vmem:[%s7590_s25 + $0xda8] sm:$0xff]  ;;  %v1431_v50 = vld [vmem:[%s7590_s25 + $0xdb0] sm:$0xff] }
  0x8b   : > { %1428 = vst [vmem:[%s7595_s26 + $0x780] sm:$0xff] %v1427_v48  ;;  %1430 = vst [vmem:[%s7595_s26 + $0x788] sm:$0xff] %v1429_v49  ;;  %v1433_v51 = vld [vmem:[%s7590_s25 + $0xdb8] sm:$0xff]  ;;  %v1435_v52 = vld [vmem:[%s7590_s25 + $0xdc0] sm:$0xff] }
  0x8c   : > { %1432 = vst [vmem:[%s7595_s26 + $0x790] sm:$0xff] %v1431_v50  ;;  %v1437_v53 = vld [vmem:[%s7590_s25 + $0xdc8] sm:$0xff]  ;;  %1434 = vst [vmem:[%s7595_s26 + $0x798] sm:$0xff] %v1433_v51  ;;  %v1439_v54 = vld [vmem:[%s7590_s25 + $0xdd0] sm:$0xff] }
  0x8d   : > { %1436 = vst [vmem:[%s7595_s26 + $0x7a0] sm:$0xff] %v1435_v52  ;;  %1438 = vst [vmem:[%s7595_s26 + $0x7a8] sm:$0xff] %v1437_v53  ;;  %v1441_v55 = vld [vmem:[%s7590_s25 + $0xdd8] sm:$0xff]  ;;  %v1443_v56 = vld [vmem:[%s7590_s25 + $0xde0] sm:$0xff] }
  0x8e   : > { %1440 = vst [vmem:[%s7595_s26 + $0x7b0] sm:$0xff] %v1439_v54  ;;  %1442 = vst [vmem:[%s7595_s26 + $0x7b8] sm:$0xff] %v1441_v55  ;;  %v1445_v57 = vld [vmem:[%s7590_s25 + $0xde8] sm:$0xff]  ;;  %v1447_v58 = vld [vmem:[%s7590_s25 + $0xdf0] sm:$0xff] }
  0x8f   : > { %1444 = vst [vmem:[%s7595_s26 + $0x7c0] sm:$0xff] %v1443_v56  ;;  %v1449_v59 = vld [vmem:[%s7590_s25 + $0xdf8] sm:$0xff]  ;;  %1446 = vst [vmem:[%s7595_s26 + $0x7c8] sm:$0xff] %v1445_v57  ;;  %v1451_v60 = vld [vmem:[%s7590_s25 + $0xe00] sm:$0xff] }
  0x90   : > { %1448 = vst [vmem:[%s7595_s26 + $0x7d0] sm:$0xff] %v1447_v58  ;;  %1450 = vst [vmem:[%s7595_s26 + $0x7d8] sm:$0xff] %v1449_v59  ;;  %v1453_v61 = vld [vmem:[%s7590_s25 + $0xe08] sm:$0xff]  ;;  %v1455_v62 = vld [vmem:[%s7590_s25 + $0xe10] sm:$0xff] }
  0x91   : > { %1452 = vst [vmem:[%s7595_s26 + $0x7e0] sm:$0xff] %v1451_v60  ;;  %1454 = vst [vmem:[%s7595_s26 + $0x7e8] sm:$0xff] %v1453_v61  ;;  %v1457_v63 = vld [vmem:[%s7590_s25 + $0xe18] sm:$0xff]  ;;  %v1459_v0 = vld [vmem:[%s7590_s25 + $0xe20] sm:$0xff] }
  0x92   : > { %1456 = vst [vmem:[%s7595_s26 + $0x7f0] sm:$0xff] %v1455_v62  ;;  %v1461_v1 = vld [vmem:[%s7590_s25 + $0xe28] sm:$0xff]  ;;  %1458 = vst [vmem:[%s7595_s26 + $0x7f8] sm:$0xff] %v1457_v63  ;;  %v1463_v2 = vld [vmem:[%s7590_s25 + $0xe30] sm:$0xff] }
  0x93   : > { %1460 = vst [vmem:[%s7595_s26 + $0x800] sm:$0xff] %v1459_v0  ;;  %1462 = vst [vmem:[%s7595_s26 + $0x808] sm:$0xff] %v1461_v1  ;;  %v1465_v3 = vld [vmem:[%s7590_s25 + $0xe38] sm:$0xff]  ;;  %v1467_v4 = vld [vmem:[%s7590_s25 + $0xe40] sm:$0xff] }
  0x94   : > { %1464 = vst [vmem:[%s7595_s26 + $0x810] sm:$0xff] %v1463_v2  ;;  %1466 = vst [vmem:[%s7595_s26 + $0x818] sm:$0xff] %v1465_v3  ;;  %v1469_v5 = vld [vmem:[%s7590_s25 + $0xe48] sm:$0xff]  ;;  %v1471_v6 = vld [vmem:[%s7590_s25 + $0xe50] sm:$0xff] }
  0x95   : > { %1468 = vst [vmem:[%s7595_s26 + $0x820] sm:$0xff] %v1467_v4  ;;  %v1473_v7 = vld [vmem:[%s7590_s25 + $0xe58] sm:$0xff]  ;;  %1470 = vst [vmem:[%s7595_s26 + $0x828] sm:$0xff] %v1469_v5  ;;  %v1475_v8 = vld [vmem:[%s7590_s25 + $0xe60] sm:$0xff] }
  0x96   : > { %1472 = vst [vmem:[%s7595_s26 + $0x830] sm:$0xff] %v1471_v6  ;;  %1474 = vst [vmem:[%s7595_s26 + $0x838] sm:$0xff] %v1473_v7  ;;  %v1477_v9 = vld [vmem:[%s7590_s25 + $0xe68] sm:$0xff]  ;;  %v1479_v10 = vld [vmem:[%s7590_s25 + $0xe70] sm:$0xff] }
  0x97   : > { %1476 = vst [vmem:[%s7595_s26 + $0x840] sm:$0xff] %v1475_v8  ;;  %1478 = vst [vmem:[%s7595_s26 + $0x848] sm:$0xff] %v1477_v9  ;;  %v1481_v11 = vld [vmem:[%s7590_s25 + $0xe78] sm:$0xff]  ;;  %v1483_v12 = vld [vmem:[%s7590_s25 + $0xe80] sm:$0xff] }
  0x98   : > { %1480 = vst [vmem:[%s7595_s26 + $0x850] sm:$0xff] %v1479_v10  ;;  %v1485_v13 = vld [vmem:[%s7590_s25 + $0xe88] sm:$0xff]  ;;  %1482 = vst [vmem:[%s7595_s26 + $0x858] sm:$0xff] %v1481_v11  ;;  %v1487_v14 = vld [vmem:[%s7590_s25 + $0xe90] sm:$0xff] }
  0x99   : > { %1484 = vst [vmem:[%s7595_s26 + $0x860] sm:$0xff] %v1483_v12  ;;  %1486 = vst [vmem:[%s7595_s26 + $0x868] sm:$0xff] %v1485_v13  ;;  %v1489_v15 = vld [vmem:[%s7590_s25 + $0xe98] sm:$0xff]  ;;  %v1491_v16 = vld [vmem:[%s7590_s25 + $0xea0] sm:$0xff] }
  0x9a   : > { %1488 = vst [vmem:[%s7595_s26 + $0x870] sm:$0xff] %v1487_v14  ;;  %1490 = vst [vmem:[%s7595_s26 + $0x878] sm:$0xff] %v1489_v15  ;;  %v1493_v17 = vld [vmem:[%s7590_s25 + $0xea8] sm:$0xff]  ;;  %v1495_v18 = vld [vmem:[%s7590_s25 + $0xeb0] sm:$0xff] }
  0x9b   : > { %1492 = vst [vmem:[%s7595_s26 + $0x880] sm:$0xff] %v1491_v16  ;;  %v1497_v19 = vld [vmem:[%s7590_s25 + $0xeb8] sm:$0xff]  ;;  %1494 = vst [vmem:[%s7595_s26 + $0x888] sm:$0xff] %v1493_v17  ;;  %v1499_v20 = vld [vmem:[%s7590_s25 + $0xec0] sm:$0xff] }
  0x9c   : > { %1496 = vst [vmem:[%s7595_s26 + $0x890] sm:$0xff] %v1495_v18  ;;  %1498 = vst [vmem:[%s7595_s26 + $0x898] sm:$0xff] %v1497_v19  ;;  %v1501_v21 = vld [vmem:[%s7590_s25 + $0xec8] sm:$0xff]  ;;  %v1503_v22 = vld [vmem:[%s7590_s25 + $0xed0] sm:$0xff] }
  0x9d   : > { %1500 = vst [vmem:[%s7595_s26 + $0x8a0] sm:$0xff] %v1499_v20  ;;  %1502 = vst [vmem:[%s7595_s26 + $0x8a8] sm:$0xff] %v1501_v21  ;;  %v1505_v23 = vld [vmem:[%s7590_s25 + $0xed8] sm:$0xff]  ;;  %v1507_v24 = vld [vmem:[%s7590_s25 + $0xee0] sm:$0xff] }
  0x9e   : > { %1504 = vst [vmem:[%s7595_s26 + $0x8b0] sm:$0xff] %v1503_v22  ;;  %v1509_v25 = vld [vmem:[%s7590_s25 + $0xee8] sm:$0xff]  ;;  %1506 = vst [vmem:[%s7595_s26 + $0x8b8] sm:$0xff] %v1505_v23  ;;  %v1511_v26 = vld [vmem:[%s7590_s25 + $0xef0] sm:$0xff] }
  0x9f   : > { %1508 = vst [vmem:[%s7595_s26 + $0x8c0] sm:$0xff] %v1507_v24  ;;  %1510 = vst [vmem:[%s7595_s26 + $0x8c8] sm:$0xff] %v1509_v25  ;;  %v1513_v27 = vld [vmem:[%s7590_s25 + $0xef8] sm:$0xff]  ;;  %v1515_v28 = vld [vmem:[%s7590_s25 + $0xf00] sm:$0xff] }
  0xa0   : > { %1512 = vst [vmem:[%s7595_s26 + $0x8d0] sm:$0xff] %v1511_v26  ;;  %1514 = vst [vmem:[%s7595_s26 + $0x8d8] sm:$0xff] %v1513_v27  ;;  %v1517_v29 = vld [vmem:[%s7590_s25 + $0xf08] sm:$0xff]  ;;  %v1519_v30 = vld [vmem:[%s7590_s25 + $0xf10] sm:$0xff] }
  0xa1   : > { %1516 = vst [vmem:[%s7595_s26 + $0x8e0] sm:$0xff] %v1515_v28  ;;  %v1521_v31 = vld [vmem:[%s7590_s25 + $0xf18] sm:$0xff]  ;;  %1518 = vst [vmem:[%s7595_s26 + $0x8e8] sm:$0xff] %v1517_v29  ;;  %v1523_v32 = vld [vmem:[%s7590_s25 + $0xf20] sm:$0xff] }
  0xa2   : > { %1520 = vst [vmem:[%s7595_s26 + $0x8f0] sm:$0xff] %v1519_v30  ;;  %1522 = vst [vmem:[%s7595_s26 + $0x8f8] sm:$0xff] %v1521_v31  ;;  %v1525_v33 = vld [vmem:[%s7590_s25 + $0xf28] sm:$0xff]  ;;  %v1527_v34 = vld [vmem:[%s7590_s25 + $0xf30] sm:$0xff] }
  0xa3   : > { %1524 = vst [vmem:[%s7595_s26 + $0x900] sm:$0xff] %v1523_v32  ;;  %1526 = vst [vmem:[%s7595_s26 + $0x908] sm:$0xff] %v1525_v33  ;;  %v1529_v35 = vld [vmem:[%s7590_s25 + $0xf38] sm:$0xff]  ;;  %v1531_v36 = vld [vmem:[%s7590_s25 + $0xf40] sm:$0xff] }
  0xa4   : > { %1528 = vst [vmem:[%s7595_s26 + $0x910] sm:$0xff] %v1527_v34  ;;  %v1533_v37 = vld [vmem:[%s7590_s25 + $0xf48] sm:$0xff]  ;;  %1530 = vst [vmem:[%s7595_s26 + $0x918] sm:$0xff] %v1529_v35  ;;  %v1535_v38 = vld [vmem:[%s7590_s25 + $0x1260] sm:$0xff] }
  0xa5   : > { %1532 = vst [vmem:[%s7595_s26 + $0x920] sm:$0xff] %v1531_v36  ;;  %1534 = vst [vmem:[%s7595_s26 + $0x928] sm:$0xff] %v1533_v37  ;;  %v1537_v39 = vld [vmem:[%s7590_s25 + $0x1268] sm:$0xff]  ;;  %v1539_v40 = vld [vmem:[%s7590_s25 + $0x1270] sm:$0xff] }
  0xa6   : > { %1536 = vst [vmem:[%s7595_s26 + $0x930] sm:$0xff] %v1535_v38  ;;  %1538 = vst [vmem:[%s7595_s26 + $0x938] sm:$0xff] %v1537_v39  ;;  %v1541_v41 = vld [vmem:[%s7590_s25 + $0x1278] sm:$0xff]  ;;  %v1543_v42 = vld [vmem:[%s7590_s25 + $0x1280] sm:$0xff] }
  0xa7   : > { %1540 = vst [vmem:[%s7595_s26 + $0x940] sm:$0xff] %v1539_v40  ;;  %v1545_v43 = vld [vmem:[%s7590_s25 + $0x1288] sm:$0xff]  ;;  %1542 = vst [vmem:[%s7595_s26 + $0x948] sm:$0xff] %v1541_v41  ;;  %v1547_v44 = vld [vmem:[%s7590_s25 + $0x1290] sm:$0xff] }
  0xa8   : > { %1544 = vst [vmem:[%s7595_s26 + $0x950] sm:$0xff] %v1543_v42  ;;  %1546 = vst [vmem:[%s7595_s26 + $0x958] sm:$0xff] %v1545_v43  ;;  %v1549_v45 = vld [vmem:[%s7590_s25 + $0x1298] sm:$0xff]  ;;  %v1551_v46 = vld [vmem:[%s7590_s25 + $0x12a0] sm:$0xff] }
  0xa9   : > { %1548 = vst [vmem:[%s7595_s26 + $0x960] sm:$0xff] %v1547_v44  ;;  %1550 = vst [vmem:[%s7595_s26 + $0x968] sm:$0xff] %v1549_v45  ;;  %v1553_v47 = vld [vmem:[%s7590_s25 + $0x12a8] sm:$0xff]  ;;  %v1555_v48 = vld [vmem:[%s7590_s25 + $0x12b0] sm:$0xff] }
  0xaa   : > { %1552 = vst [vmem:[%s7595_s26 + $0x970] sm:$0xff] %v1551_v46  ;;  %v1557_v49 = vld [vmem:[%s7590_s25 + $0x12b8] sm:$0xff]  ;;  %1554 = vst [vmem:[%s7595_s26 + $0x978] sm:$0xff] %v1553_v47  ;;  %v1559_v50 = vld [vmem:[%s7590_s25 + $0x12c0] sm:$0xff] }
  0xab   : > { %1556 = vst [vmem:[%s7595_s26 + $0x980] sm:$0xff] %v1555_v48  ;;  %1558 = vst [vmem:[%s7595_s26 + $0x988] sm:$0xff] %v1557_v49  ;;  %v1561_v51 = vld [vmem:[%s7590_s25 + $0x12c8] sm:$0xff]  ;;  %v1563_v52 = vld [vmem:[%s7590_s25 + $0x12d0] sm:$0xff] }
  0xac   : > { %1560 = vst [vmem:[%s7595_s26 + $0x990] sm:$0xff] %v1559_v50  ;;  %1562 = vst [vmem:[%s7595_s26 + $0x998] sm:$0xff] %v1561_v51  ;;  %v1565_v53 = vld [vmem:[%s7590_s25 + $0x12d8] sm:$0xff]  ;;  %v1567_v54 = vld [vmem:[%s7590_s25 + $0x12e0] sm:$0xff] }
  0xad   : > { %1564 = vst [vmem:[%s7595_s26 + $0x9a0] sm:$0xff] %v1563_v52  ;;  %v1569_v55 = vld [vmem:[%s7590_s25 + $0x12e8] sm:$0xff]  ;;  %1566 = vst [vmem:[%s7595_s26 + $0x9a8] sm:$0xff] %v1565_v53  ;;  %v1571_v56 = vld [vmem:[%s7590_s25 + $0x12f0] sm:$0xff] }
  0xae   : > { %1568 = vst [vmem:[%s7595_s26 + $0x9b0] sm:$0xff] %v1567_v54  ;;  %1570 = vst [vmem:[%s7595_s26 + $0x9b8] sm:$0xff] %v1569_v55  ;;  %v1573_v57 = vld [vmem:[%s7590_s25 + $0x12f8] sm:$0xff]  ;;  %v1575_v58 = vld [vmem:[%s7590_s25 + $0x1300] sm:$0xff] }
  0xaf   : > { %1572 = vst [vmem:[%s7595_s26 + $0x9c0] sm:$0xff] %v1571_v56  ;;  %1574 = vst [vmem:[%s7595_s26 + $0x9c8] sm:$0xff] %v1573_v57  ;;  %v1577_v59 = vld [vmem:[%s7590_s25 + $0x1308] sm:$0xff]  ;;  %v1579_v60 = vld [vmem:[%s7590_s25 + $0x1310] sm:$0xff] }
  0xb0   : > { %1576 = vst [vmem:[%s7595_s26 + $0x9d0] sm:$0xff] %v1575_v58  ;;  %v1581_v61 = vld [vmem:[%s7590_s25 + $0x1318] sm:$0xff]  ;;  %1578 = vst [vmem:[%s7595_s26 + $0x9d8] sm:$0xff] %v1577_v59  ;;  %v1583_v62 = vld [vmem:[%s7590_s25 + $0x1320] sm:$0xff] }
  0xb1   : > { %1580 = vst [vmem:[%s7595_s26 + $0x9e0] sm:$0xff] %v1579_v60  ;;  %1582 = vst [vmem:[%s7595_s26 + $0x9e8] sm:$0xff] %v1581_v61  ;;  %v1585_v63 = vld [vmem:[%s7590_s25 + $0x1328] sm:$0xff]  ;;  %v1587_v0 = vld [vmem:[%s7590_s25 + $0x1330] sm:$0xff] }
  0xb2   : > { %1584 = vst [vmem:[%s7595_s26 + $0x9f0] sm:$0xff] %v1583_v62  ;;  %1586 = vst [vmem:[%s7595_s26 + $0x9f8] sm:$0xff] %v1585_v63  ;;  %v1589_v1 = vld [vmem:[%s7590_s25 + $0x1338] sm:$0xff]  ;;  %v1591_v2 = vld [vmem:[%s7590_s25 + $0x1340] sm:$0xff] }
  0xb3   : > { %1588 = vst [vmem:[%s7595_s26 + $0xa00] sm:$0xff] %v1587_v0  ;;  %v1593_v3 = vld [vmem:[%s7590_s25 + $0x1348] sm:$0xff]  ;;  %1590 = vst [vmem:[%s7595_s26 + $0xa08] sm:$0xff] %v1589_v1  ;;  %v1595_v4 = vld [vmem:[%s7590_s25 + $0x1350] sm:$0xff] }
  0xb4   : > { %1592 = vst [vmem:[%s7595_s26 + $0xa10] sm:$0xff] %v1591_v2  ;;  %1594 = vst [vmem:[%s7595_s26 + $0xa18] sm:$0xff] %v1593_v3  ;;  %v1597_v5 = vld [vmem:[%s7590_s25 + $0x1358] sm:$0xff]  ;;  %v1599_v6 = vld [vmem:[%s7590_s25 + $0x1360] sm:$0xff] }
  0xb5   : > { %1596 = vst [vmem:[%s7595_s26 + $0xa20] sm:$0xff] %v1595_v4  ;;  %1598 = vst [vmem:[%s7595_s26 + $0xa28] sm:$0xff] %v1597_v5  ;;  %v1601_v7 = vld [vmem:[%s7590_s25 + $0x1368] sm:$0xff]  ;;  %v1603_v8 = vld [vmem:[%s7590_s25 + $0x1370] sm:$0xff] }
  0xb6   : > { %1600 = vst [vmem:[%s7595_s26 + $0xa30] sm:$0xff] %v1599_v6  ;;  %v1605_v9 = vld [vmem:[%s7590_s25 + $0x1378] sm:$0xff]  ;;  %1602 = vst [vmem:[%s7595_s26 + $0xa38] sm:$0xff] %v1601_v7  ;;  %v1607_v10 = vld [vmem:[%s7590_s25 + $0x1380] sm:$0xff] }
  0xb7   : > { %1604 = vst [vmem:[%s7595_s26 + $0xa40] sm:$0xff] %v1603_v8  ;;  %1606 = vst [vmem:[%s7595_s26 + $0xa48] sm:$0xff] %v1605_v9  ;;  %v1609_v11 = vld [vmem:[%s7590_s25 + $0x1388] sm:$0xff]  ;;  %v1611_v12 = vld [vmem:[%s7590_s25 + $0x1390] sm:$0xff] }
  0xb8   : > { %1608 = vst [vmem:[%s7595_s26 + $0xa50] sm:$0xff] %v1607_v10  ;;  %1610 = vst [vmem:[%s7595_s26 + $0xa58] sm:$0xff] %v1609_v11  ;;  %v1613_v13 = vld [vmem:[%s7590_s25 + $0x1398] sm:$0xff]  ;;  %v1615_v14 = vld [vmem:[%s7590_s25 + $0x13a0] sm:$0xff] }
  0xb9   : > { %1612 = vst [vmem:[%s7595_s26 + $0xa60] sm:$0xff] %v1611_v12  ;;  %v1617_v15 = vld [vmem:[%s7590_s25 + $0x13a8] sm:$0xff]  ;;  %1614 = vst [vmem:[%s7595_s26 + $0xa68] sm:$0xff] %v1613_v13  ;;  %v1619_v16 = vld [vmem:[%s7590_s25 + $0x13b0] sm:$0xff] }
  0xba   : > { %1616 = vst [vmem:[%s7595_s26 + $0xa70] sm:$0xff] %v1615_v14  ;;  %1618 = vst [vmem:[%s7595_s26 + $0xa78] sm:$0xff] %v1617_v15  ;;  %v1621_v17 = vld [vmem:[%s7590_s25 + $0x13b8] sm:$0xff]  ;;  %v1623_v18 = vld [vmem:[%s7590_s25 + $0x13c0] sm:$0xff] }
  0xbb   : > { %1620 = vst [vmem:[%s7595_s26 + $0xa80] sm:$0xff] %v1619_v16  ;;  %1622 = vst [vmem:[%s7595_s26 + $0xa88] sm:$0xff] %v1621_v17  ;;  %v1625_v19 = vld [vmem:[%s7590_s25 + $0x13c8] sm:$0xff]  ;;  %v1627_v20 = vld [vmem:[%s7590_s25 + $0x13d0] sm:$0xff] }
  0xbc   : > { %1624 = vst [vmem:[%s7595_s26 + $0xa90] sm:$0xff] %v1623_v18  ;;  %v1629_v21 = vld [vmem:[%s7590_s25 + $0x13d8] sm:$0xff]  ;;  %1626 = vst [vmem:[%s7595_s26 + $0xa98] sm:$0xff] %v1625_v19  ;;  %v1631_v22 = vld [vmem:[%s7590_s25 + $0x13e0] sm:$0xff] }
  0xbd   : > { %1628 = vst [vmem:[%s7595_s26 + $0xaa0] sm:$0xff] %v1627_v20  ;;  %1630 = vst [vmem:[%s7595_s26 + $0xaa8] sm:$0xff] %v1629_v21  ;;  %v1633_v23 = vld [vmem:[%s7590_s25 + $0x13e8] sm:$0xff]  ;;  %v1635_v24 = vld [vmem:[%s7590_s25 + $0x13f0] sm:$0xff] }
  0xbe   : > { %1632 = vst [vmem:[%s7595_s26 + $0xab0] sm:$0xff] %v1631_v22  ;;  %1634 = vst [vmem:[%s7595_s26 + $0xab8] sm:$0xff] %v1633_v23  ;;  %v1637_v25 = vld [vmem:[%s7590_s25 + $0x13f8] sm:$0xff]  ;;  %v1639_v26 = vld [vmem:[%s7590_s25 + $0x1400] sm:$0xff] }
  0xbf   : > { %1636 = vst [vmem:[%s7595_s26 + $0xac0] sm:$0xff] %v1635_v24  ;;  %v1641_v27 = vld [vmem:[%s7590_s25 + $0x1408] sm:$0xff]  ;;  %1638 = vst [vmem:[%s7595_s26 + $0xac8] sm:$0xff] %v1637_v25  ;;  %v1643_v28 = vld [vmem:[%s7590_s25 + $0x1410] sm:$0xff] }
  0xc0   : > { %1640 = vst [vmem:[%s7595_s26 + $0xad0] sm:$0xff] %v1639_v26  ;;  %1642 = vst [vmem:[%s7595_s26 + $0xad8] sm:$0xff] %v1641_v27  ;;  %v1645_v29 = vld [vmem:[%s7590_s25 + $0x1418] sm:$0xff]  ;;  %v1647_v30 = vld [vmem:[%s7590_s25 + $0x1420] sm:$0xff] }
  0xc1   : > { %1644 = vst [vmem:[%s7595_s26 + $0xae0] sm:$0xff] %v1643_v28  ;;  %1646 = vst [vmem:[%s7595_s26 + $0xae8] sm:$0xff] %v1645_v29  ;;  %v1649_v31 = vld [vmem:[%s7590_s25 + $0x1428] sm:$0xff]  ;;  %v1651_v32 = vld [vmem:[%s7590_s25 + $0x1430] sm:$0xff] }
  0xc2   : > { %1648 = vst [vmem:[%s7595_s26 + $0xaf0] sm:$0xff] %v1647_v30  ;;  %v1653_v33 = vld [vmem:[%s7590_s25 + $0x1438] sm:$0xff]  ;;  %1650 = vst [vmem:[%s7595_s26 + $0xaf8] sm:$0xff] %v1649_v31  ;;  %v1655_v34 = vld [vmem:[%s7590_s25 + $0x1440] sm:$0xff] }
  0xc3   : > { %1652 = vst [vmem:[%s7595_s26 + $0xb00] sm:$0xff] %v1651_v32  ;;  %1654 = vst [vmem:[%s7595_s26 + $0xb08] sm:$0xff] %v1653_v33  ;;  %v1657_v35 = vld [vmem:[%s7590_s25 + $0x1448] sm:$0xff]  ;;  %v1659_v36 = vld [vmem:[%s7590_s25 + $0x1450] sm:$0xff] }
  0xc4   : > { %1656 = vst [vmem:[%s7595_s26 + $0xb10] sm:$0xff] %v1655_v34  ;;  %1658 = vst [vmem:[%s7595_s26 + $0xb18] sm:$0xff] %v1657_v35  ;;  %v1661_v37 = vld [vmem:[%s7590_s25 + $0x1458] sm:$0xff]  ;;  %v1663_v38 = vld [vmem:[%s7590_s25 + $0x1460] sm:$0xff] }
  0xc5   : > { %1660 = vst [vmem:[%s7595_s26 + $0xb20] sm:$0xff] %v1659_v36  ;;  %v1665_v39 = vld [vmem:[%s7590_s25 + $0x1468] sm:$0xff]  ;;  %1662 = vst [vmem:[%s7595_s26 + $0xb28] sm:$0xff] %v1661_v37  ;;  %v1667_v40 = vld [vmem:[%s7590_s25 + $0x1470] sm:$0xff] }
  0xc6   : > { %1664 = vst [vmem:[%s7595_s26 + $0xb30] sm:$0xff] %v1663_v38  ;;  %1666 = vst [vmem:[%s7595_s26 + $0xb38] sm:$0xff] %v1665_v39  ;;  %v1669_v41 = vld [vmem:[%s7590_s25 + $0x1478] sm:$0xff]  ;;  %v1671_v42 = vld [vmem:[%s7590_s25 + $0x1480] sm:$0xff] }
  0xc7   : > { %1668 = vst [vmem:[%s7595_s26 + $0xb40] sm:$0xff] %v1667_v40  ;;  %1670 = vst [vmem:[%s7595_s26 + $0xb48] sm:$0xff] %v1669_v41  ;;  %v1673_v43 = vld [vmem:[%s7590_s25 + $0x1488] sm:$0xff]  ;;  %v1675_v44 = vld [vmem:[%s7590_s25 + $0x1490] sm:$0xff] }
  0xc8   : > { %1672 = vst [vmem:[%s7595_s26 + $0xb50] sm:$0xff] %v1671_v42  ;;  %v1677_v45 = vld [vmem:[%s7590_s25 + $0x1498] sm:$0xff]  ;;  %1674 = vst [vmem:[%s7595_s26 + $0xb58] sm:$0xff] %v1673_v43  ;;  %v1679_v46 = vld [vmem:[%s7590_s25 + $0x14a0] sm:$0xff] }
  0xc9   : > { %1676 = vst [vmem:[%s7595_s26 + $0xb60] sm:$0xff] %v1675_v44  ;;  %1678 = vst [vmem:[%s7595_s26 + $0xb68] sm:$0xff] %v1677_v45  ;;  %v1681_v47 = vld [vmem:[%s7590_s25 + $0x14a8] sm:$0xff]  ;;  %v1683_v48 = vld [vmem:[%s7590_s25 + $0x14b0] sm:$0xff] }
  0xca   : > { %1680 = vst [vmem:[%s7595_s26 + $0xb70] sm:$0xff] %v1679_v46  ;;  %1682 = vst [vmem:[%s7595_s26 + $0xb78] sm:$0xff] %v1681_v47  ;;  %v1685_v49 = vld [vmem:[%s7590_s25 + $0x14b8] sm:$0xff]  ;;  %v1687_v50 = vld [vmem:[%s7590_s25 + $0x14c0] sm:$0xff] }
  0xcb   : > { %1684 = vst [vmem:[%s7595_s26 + $0xb80] sm:$0xff] %v1683_v48  ;;  %v1689_v51 = vld [vmem:[%s7590_s25 + $0x14c8] sm:$0xff]  ;;  %1686 = vst [vmem:[%s7595_s26 + $0xb88] sm:$0xff] %v1685_v49  ;;  %v1691_v52 = vld [vmem:[%s7590_s25 + $0x14d0] sm:$0xff] }
  0xcc   : > { %1688 = vst [vmem:[%s7595_s26 + $0xb90] sm:$0xff] %v1687_v50  ;;  %1690 = vst [vmem:[%s7595_s26 + $0xb98] sm:$0xff] %v1689_v51  ;;  %v1693_v53 = vld [vmem:[%s7590_s25 + $0x14d8] sm:$0xff]  ;;  %v1695_v54 = vld [vmem:[%s7590_s25 + $0x14e0] sm:$0xff] }
  0xcd   : > { %1692 = vst [vmem:[%s7595_s26 + $0xba0] sm:$0xff] %v1691_v52  ;;  %1694 = vst [vmem:[%s7595_s26 + $0xba8] sm:$0xff] %v1693_v53  ;;  %v1697_v55 = vld [vmem:[%s7590_s25 + $0x14e8] sm:$0xff]  ;;  %v1699_v56 = vld [vmem:[%s7590_s25 + $0x14f0] sm:$0xff] }
  0xce   : > { %1696 = vst [vmem:[%s7595_s26 + $0xbb0] sm:$0xff] %v1695_v54  ;;  %v1701_v57 = vld [vmem:[%s7590_s25 + $0x14f8] sm:$0xff]  ;;  %1698 = vst [vmem:[%s7595_s26 + $0xbb8] sm:$0xff] %v1697_v55  ;;  %v1703_v58 = vld [vmem:[%s7590_s25 + $0x1500] sm:$0xff] }
  0xcf   : > { %1700 = vst [vmem:[%s7595_s26 + $0xbc0] sm:$0xff] %v1699_v56  ;;  %1702 = vst [vmem:[%s7595_s26 + $0xbc8] sm:$0xff] %v1701_v57  ;;  %v1705_v59 = vld [vmem:[%s7590_s25 + $0x1508] sm:$0xff]  ;;  %v1707_v60 = vld [vmem:[%s7590_s25 + $0x1510] sm:$0xff] }
  0xd0   : > { %1704 = vst [vmem:[%s7595_s26 + $0xbd0] sm:$0xff] %v1703_v58  ;;  %1706 = vst [vmem:[%s7595_s26 + $0xbd8] sm:$0xff] %v1705_v59  ;;  %v1709_v61 = vld [vmem:[%s7590_s25 + $0x1518] sm:$0xff]  ;;  %v1711_v62 = vld [vmem:[%s7590_s25 + $0x1520] sm:$0xff] }
  0xd1   : > { %1708 = vst [vmem:[%s7595_s26 + $0xbe0] sm:$0xff] %v1707_v60  ;;  %v1713_v63 = vld [vmem:[%s7590_s25 + $0x1528] sm:$0xff]  ;;  %1710 = vst [vmem:[%s7595_s26 + $0xbe8] sm:$0xff] %v1709_v61  ;;  %v1715_v0 = vld [vmem:[%s7590_s25 + $0x1530] sm:$0xff] }
  0xd2   : > { %1712 = vst [vmem:[%s7595_s26 + $0xbf0] sm:$0xff] %v1711_v62  ;;  %1714 = vst [vmem:[%s7595_s26 + $0xbf8] sm:$0xff] %v1713_v63  ;;  %v1717_v1 = vld [vmem:[%s7590_s25 + $0x1538] sm:$0xff]  ;;  %v1719_v2 = vld [vmem:[%s7590_s25 + $0x1540] sm:$0xff] }
  0xd3   : > { %1716 = vst [vmem:[%s7595_s26 + $0xc00] sm:$0xff] %v1715_v0  ;;  %1718 = vst [vmem:[%s7595_s26 + $0xc08] sm:$0xff] %v1717_v1  ;;  %v1721_v3 = vld [vmem:[%s7590_s25 + $0x1548] sm:$0xff]  ;;  %v1723_v4 = vld [vmem:[%s7590_s25 + $0x1550] sm:$0xff] }
  0xd4   : > { %1720 = vst [vmem:[%s7595_s26 + $0xc10] sm:$0xff] %v1719_v2  ;;  %v1725_v5 = vld [vmem:[%s7590_s25 + $0x1558] sm:$0xff]  ;;  %1722 = vst [vmem:[%s7595_s26 + $0xc18] sm:$0xff] %v1721_v3  ;;  %v1727_v6 = vld [vmem:[%s7590_s25 + $0x1560] sm:$0xff] }
  0xd5   : > { %1724 = vst [vmem:[%s7595_s26 + $0xc20] sm:$0xff] %v1723_v4  ;;  %1726 = vst [vmem:[%s7595_s26 + $0xc28] sm:$0xff] %v1725_v5  ;;  %v1729_v7 = vld [vmem:[%s7590_s25 + $0x1568] sm:$0xff] }
  0xd6   : > { %1728 = vst [vmem:[%s7595_s26 + $0xc30] sm:$0xff] %v1727_v6  ;;  %1730 = vst [vmem:[%s7595_s26 + $0xc38] sm:$0xff] %v1729_v7 }
  0xd7 PF: > { %p6042_p5 = scmp.ge.s32.totalorder %s7533_s14, 1  ;;  %p1735_p6 = scmp.lt.s32.totalorder %s7533_s14, 3 }
  0xd9   : > { %p1736_p7 = pnand %p6042_p5, %p1735_p6 }
  0xdb   : > { %1739 = sbr.rel (%p1736_p7) target bundleno = 859 (0x35b), region = 66 }
  0xe2   : > { %v2164_v8 = vld [vmem:[%s10009_s1] sm:$0xff]  ;;  %v2165_v9 = vld [vmem:[%s10009_s1 + $0x8] sm:$0xff]  ;;  %v2166_v10 = vld [vmem:[%s10009_s1 + $0x10] sm:$0xff]  ;;  %s1742_s6 = sand.u32 1, %s7525_s12   ;;  %vm2174_vm0 = vcmask 613376   ;;  %vm3351_vm1 = vcmask 1042432  }
  0xe3   : > { %v7451_v11 = vpack.c.bf16 %v2165_v9, %v2164_v8  ;;  %v2167_v12 = vld [vmem:[%s10009_s1 + $0x18] sm:$0xff]  ;;  %s7484_s9 = smul.u32 3136, %s1742_s6  ;;  %v2168_v14 = vld [vmem:[%s10009_s1 + $0x20] sm:$0xff]  ;;  %v2169_v15 = vld [vmem:[%s10009_s1 + $0x28] sm:$0xff]  ;;  %vm7535_vm2 = vmmov 1  }
  0xe4   : > { %v7455_v13 = vpack.c.bf16 %v2167_v12, %v2166_v10  ;;  %v7459_v18 = vpack.c.bf16 %v2169_v15, %v2168_v14  ;;  %v2170_v19 = vld [vmem:[%s10009_s1 + $0x30] sm:$0xff]  ;;  %v2171_v20 = vld [vmem:[%s10009_s1 + $0x38] sm:$0xff]  ;;  %v2172_v22 = vld [vmem:[%s10009_s1 + $0x40] sm:$0xff]  ;;  %s1766_s28 = smul.u32 98, %s6037_s15 }
  0xe5   : > { %7452 = vmatprep.subr.bf16.mxu0 %v7451_v11  ;;  %7473 = vmatprep.subr.bf16.mxu1 %v7451_v11  ;;  %s8399_s12 = scalar_lea.vmem [#allocation2], %s7484_s9  ;;  %v7463_v21 = vpack.c.bf16 %v2171_v20, %v2170_v19  ;;  %v2173_v23 = vld [vmem:[%s10009_s1 + $0x48] sm:$0x7]  ;;  %vm7468_vm3 = vmpackc.low %vm3351_vm1, %vm7535_vm2 }
  0xe6   : > { %7454 = vmatpush3.bf16.msra.mxu0 %v7451_v11  ;;  %7478 = vmatpush3.bf16.msra.mxu1 %v7451_v11  ;;  %v1772_v16 = vld [vmem:[%s8399_s12] sm:$0xff]  ;;  %v7467_v24 = vpack.c.bf16 %v2173_v23, %v2172_v22  ;;  %v1773_v25 = vld [vmem:[%s8399_s12 + $0x8] sm:$0xff]  ;;  %v1774_v27 = vld [vmem:[%s8399_s12 + $0x10] sm:$0xff]  ;;  %p1767_p8 = scmp.lt.s32.totalorder %s1766_s28, 195 }
  0xe7   : > { %v1968_v17 = vld [vmem:[%s8399_s12 + $0x620] sm:$0xff]  ;;  %7456 = vmatprep.subr.bf16.mxu0 %v7455_v13  ;;  %7474 = vmatprep.subr.bf16.mxu1 %v7455_v13  ;;  %v1969_v26 = vld [vmem:[%s8399_s12 + $0x628] sm:$0xff]  ;;  %v1970_v28 = vld [vmem:[%s8399_s12 + $0x630] sm:$0xff] }
  0xe8   : > { %6863 = vmatprep.mubr.msk.f32.mxu0 %vm2174_vm0, %v1772_v16  ;;  %7157 = vmatprep.mubr.msk.f32.mxu1 %vm2174_vm0, %v1968_v17  ;;  %v1775_v29 = vld [vmem:[%s8399_s12 + $0x18] sm:$0xff]  ;;  %v1776_v31 = vld [vmem:[%s8399_s12 + $0x20] sm:$0xff]  ;;  %v1777_v33 = vld [vmem:[%s8399_s12 + $0x28] sm:$0xff]  ;;  %s10308_s28 = smov (!%p1767_p8, %s1766_s28), 195 }
  0xe9   : > { %v1971_v30 = vld [vmem:[%s8399_s12 + $0x638] sm:$0xff]  ;;  %v1972_v32 = vld [vmem:[%s8399_s12 + $0x640] sm:$0xff]  ;;  %v1973_v34 = vld [vmem:[%s8399_s12 + $0x648] sm:$0xff]  ;;  %s6043_s29 = sshll.u32 %s10308_s28, 3 }
  0xea   : > { %7458 = vmatpush3.bf16.msra.mxu0 %v7455_v13  ;;  %7479 = vmatpush3.bf16.msra.mxu1 %v7455_v13  ;;  %v1778_v35 = vld [vmem:[%s8399_s12 + $0x30] sm:$0xff]  ;;  %v1779_v37 = vld [vmem:[%s8399_s12 + $0x38] sm:$0xff]  ;;  %v1780_v39 = vld [vmem:[%s8399_s12 + $0x40] sm:$0xff]  ;;  %s9606_s5 = scalar_lea.vmem %s10011_s3, %s6043_s29 }
  0xeb   : > { %7460 = vmatprep.subr.bf16.mxu0 %v7459_v18  ;;  %7475 = vmatprep.subr.bf16.mxu1 %v7459_v18  ;;  %v1974_v36 = vld [vmem:[%s8399_s12 + $0x650] sm:$0xff]  ;;  %v1975_v38 = vld [vmem:[%s8399_s12 + $0x658] sm:$0xff]  ;;  %v1976_v40 = vld [vmem:[%s8399_s12 + $0x660] sm:$0xff] }
  0xec   : > { %v1781_v41 = vld [vmem:[%s8399_s12 + $0x48] sm:$0xff]  ;;  %v1782_v43 = vld [vmem:[%s8399_s12 + $0x50] sm:$0xff]  ;;  %v1783_v45 = vld [vmem:[%s8399_s12 + $0x58] sm:$0xff] }
  0xed   : > { %v1977_v42 = vld [vmem:[%s8399_s12 + $0x668] sm:$0xff]  ;;  %v1978_v44 = vld [vmem:[%s8399_s12 + $0x670] sm:$0xff]  ;;  %v1979_v46 = vld [vmem:[%s8399_s12 + $0x678] sm:$0xff] }
  0xee   : > { %7462 = vmatpush3.bf16.msra.mxu0 %v7459_v18  ;;  %7480 = vmatpush3.bf16.msra.mxu1 %v7459_v18  ;;  %v1784_v47 = vld [vmem:[%s8399_s12 + $0x60] sm:$0xff]  ;;  %v1785_v49 = vld [vmem:[%s8399_s12 + $0x68] sm:$0xff]  ;;  %v1786_v51 = vld [vmem:[%s8399_s12 + $0x70] sm:$0xff] }
  0xef   : > { %7464 = vmatprep.subr.bf16.mxu0 %v7463_v21  ;;  %7476 = vmatprep.subr.bf16.mxu1 %v7463_v21  ;;  %v1980_v48 = vld [vmem:[%s8399_s12 + $0x680] sm:$0xff]  ;;  %v1981_v50 = vld [vmem:[%s8399_s12 + $0x688] sm:$0xff]  ;;  %v1982_v52 = vld [vmem:[%s8399_s12 + $0x690] sm:$0xff] }
  0xf0   : > { %v1787_v53 = vld [vmem:[%s8399_s12 + $0x78] sm:$0xff]  ;;  %v1788_v55 = vld [vmem:[%s8399_s12 + $0x80] sm:$0xff]  ;;  %v1789_v57 = vld [vmem:[%s8399_s12 + $0x88] sm:$0xff] }
  0xf1   : > { %v1983_v54 = vld [vmem:[%s8399_s12 + $0x698] sm:$0xff]  ;;  %v1984_v56 = vld [vmem:[%s8399_s12 + $0x6a0] sm:$0xff]  ;;  %v1985_v58 = vld [vmem:[%s8399_s12 + $0x6a8] sm:$0xff] }
  0xf2   : > { %7466 = vmatpush3.bf16.msra.mxu0 %v7463_v21  ;;  %7481 = vmatpush3.bf16.msra.mxu1 %v7463_v21  ;;  %v1790_v59 = vld [vmem:[%s8399_s12 + $0x90] sm:$0xff]  ;;  %v1791_v61 = vld [vmem:[%s8399_s12 + $0x98] sm:$0xff]  ;;  %v1792_v63 = vld [vmem:[%s8399_s12 + $0xa0] sm:$0xff] }
  0xf3   : > { %7469 = vmatprep.subr.msk.bf16.mxu0 %vm7468_vm3, %v7467_v24  ;;  %7477 = vmatprep.subr.msk.bf16.mxu1 %vm7468_vm3, %v7467_v24  ;;  %v1986_v60 = vld [vmem:[%s8399_s12 + $0x6b0] sm:$0xff]  ;;  %v1987_v62 = vld [vmem:[%s8399_s12 + $0x6b8] sm:$0xff]  ;;  %v1988_v0 = vld [vmem:[%s8399_s12 + $0x6c0] sm:$0xff] }
  0xf4   : > { %v1793_v1 = vld [vmem:[%s8399_s12 + $0xa8] sm:$0xff]  ;;  %v1794_v3 = vld [vmem:[%s8399_s12 + $0xb0] sm:$0xff]  ;;  %v1795_v5 = vld [vmem:[%s8399_s12 + $0xb8] sm:$0xff] }
  0xf5   : > { %v1989_v2 = vld [vmem:[%s8399_s12 + $0x6c8] sm:$0xff]  ;;  %v1990_v4 = vld [vmem:[%s8399_s12 + $0x6d0] sm:$0xff]  ;;  %v1991_v6 = vld [vmem:[%s8399_s12 + $0x6d8] sm:$0xff] }
  0xf6   : > { %7472 = vmatpush3.bf16.msk.msra.mxu0 %vm7468_vm3, %v7467_v24  ;;  %7482 = vmatpush3.bf16.msk.msra.mxu1 %vm7468_vm3, %v7467_v24  ;;  %v1796_v7 = vld [vmem:[%s8399_s12 + $0xc0] sm:$0xff]  ;;  %v1797_v9 = vld [vmem:[%s8399_s12 + $0xc8] sm:$0xff]  ;;  %v1798_v11 = vld [vmem:[%s8399_s12 + $0xd0] sm:$0xff] }
  0xf7   : > { %v1992_v8 = vld [vmem:[%s8399_s12 + $0x6e0] sm:$0xff]  ;;  %v1993_v10 = vld [vmem:[%s8399_s12 + $0x6e8] sm:$0xff]  ;;  %v1994_v12 = vld [vmem:[%s8399_s12 + $0x6f0] sm:$0xff] }
  0xf8   : > { %v1799_v13 = vld [vmem:[%s8399_s12 + $0xd8] sm:$0xff]  ;;  %v1800_v15 = vld [vmem:[%s8399_s12 + $0xe0] sm:$0xff]  ;;  %v1801_v17 = vld [vmem:[%s8399_s12 + $0xe8] sm:$0xff] }
  0xf9   : > { %6864 = vmatmul.mubr.msk.f32.vlgmr.msra.gmra.mrb[0].mxu0 %vm2174_vm0, %v1773_v25  ;;  %7158 = vmatmul.mubr.msk.f32.vlgmr.msra.gmra.mrb[0].mxu1 %vm2174_vm0, %v1969_v26  ;;  %v1995_v14 = vld [vmem:[%s8399_s12 + $0x6f8] sm:$0xff]  ;;  %v1996_v16 = vld [vmem:[%s8399_s12 + $0x700] sm:$0xff]  ;;  %v1997_v18 = vld [vmem:[%s8399_s12 + $0x708] sm:$0xff] }
  0xfa   : > { %6866 = vmatprep.mubr.msk.f32.mxu0 %vm2174_vm0, %v1774_v27  ;;  %7160 = vmatprep.mubr.msk.f32.mxu1 %vm2174_vm0, %v1970_v28  ;;  %v1802_v19 = vld [vmem:[%s8399_s12 + $0xf0] sm:$0xff]  ;;  %v1803_v21 = vld [vmem:[%s8399_s12 + $0xf8] sm:$0xff]  ;;  %v1804_v23 = vld [vmem:[%s8399_s12 + $0x100] sm:$0xff] }
  0xfb   : > { %v1998_v20 = vld [vmem:[%s8399_s12 + $0x710] sm:$0xff]  ;;  %v1999_v22 = vld [vmem:[%s8399_s12 + $0x718] sm:$0xff]  ;;  %v2000_v24 = vld [vmem:[%s8399_s12 + $0x720] sm:$0xff] }
  0xfc   : > { %v1805_v25 = vld [vmem:[%s8399_s12 + $0x108] sm:$0xff]  ;;  %v1806_v27 = vld [vmem:[%s8399_s12 + $0x110] sm:$0xff] }
  0xfd   : > { %6867 = vmatmul.mubr.msk.f32.gmra.mrb[2].mxu0 %vm2174_vm0, %v1775_v29  ;;  %7161 = vmatmul.mubr.msk.f32.gmra.mrb[2].mxu1 %vm2174_vm0, %v1971_v30  ;;  %v2001_v26 = vld [vmem:[%s8399_s12 + $0x728] sm:$0xff]  ;;  %v2002_v28 = vld [vmem:[%s8399_s12 + $0x730] sm:$0xff]  ;;  %v1807_v29 = vld [vmem:[%s8399_s12 + $0x118] sm:$0xff] }
  0xfe   : > { %6869 = vmatprep.mubr.msk.f32.mxu0 %vm2174_vm0, %v1776_v31  ;;  %7163 = vmatprep.mubr.msk.f32.mxu1 %vm2174_vm0, %v1972_v32  ;;  %v2003_v30 = vld [vmem:[%s8399_s12 + $0x738] sm:$0xff]  ;;  %v1808_v31 = vld [vmem:[%s8399_s12 + $0x120] sm:$0xff] }
  0xff   : > { %v2004_v32 = vld [vmem:[%s8399_s12 + $0x740] sm:$0xff] }
 0x101   : > { %6870 = vmatmul.mubr.msk.f32.gmra.mrb[4].mxu0 %vm2174_vm0, %v1777_v33  ;;  %7164 = vmatmul.mubr.msk.f32.gmra.mrb[4].mxu1 %vm2174_vm0, %v1973_v34  ;;  %v1809_v33 = vld [vmem:[%s8399_s12 + $0x128] sm:$0xff] }
 0x102   : > { %6872 = vmatprep.mubr.msk.f32.mxu0 %vm2174_vm0, %v1778_v35  ;;  %7166 = vmatprep.mubr.msk.f32.mxu1 %vm2174_vm0, %v1974_v36  ;;  %v2005_v34 = vld [vmem:[%s8399_s12 + $0x748] sm:$0xff]  ;;  %v1810_v35 = vld [vmem:[%s8399_s12 + $0x130] sm:$0xff] }
 0x103   : > { %v2006_v36 = vld [vmem:[%s8399_s12 + $0x750] sm:$0xff] }
 0x105   : > { %6873 = vmatmul.mubr.msk.f32.gmra.mrb[6].mxu0 %vm2174_vm0, %v1779_v37  ;;  %7167 = vmatmul.mubr.msk.f32.gmra.mrb[6].mxu1 %vm2174_vm0, %v1975_v38  ;;  %v1811_v37 = vld [vmem:[%s8399_s12 + $0x138] sm:$0xff] }
 0x106   : > { %6875 = vmatprep.mubr.msk.f32.mxu0 %vm2174_vm0, %v1780_v39  ;;  %7169 = vmatprep.mubr.msk.f32.mxu1 %vm2174_vm0, %v1976_v40  ;;  %v2007_v38 = vld [vmem:[%s8399_s12 + $0x758] sm:$0xff]  ;;  %v1812_v39 = vld [vmem:[%s8399_s12 + $0x140] sm:$0xff] }
 0x107   : > { %v2008_v40 = vld [vmem:[%s8399_s12 + $0x760] sm:$0xff] }
 0x109   : > { %6876 = vmatmul.mubr.msk.f32.gmra.mrb[8].mxu0 %vm2174_vm0, %v1781_v41  ;;  %7170 = vmatmul.mubr.msk.f32.gmra.mrb[8].mxu1 %vm2174_vm0, %v1977_v42  ;;  %v1813_v41 = vld [vmem:[%s8399_s12 + $0x148] sm:$0xff] }
 0x10a   : > { %6878 = vmatprep.mubr.msk.f32.mxu0 %vm2174_vm0, %v1782_v43  ;;  %7172 = vmatprep.mubr.msk.f32.mxu1 %vm2174_vm0, %v1978_v44  ;;  %v2009_v42 = vld [vmem:[%s8399_s12 + $0x768] sm:$0xff]  ;;  %v1814_v43 = vld [vmem:[%s8399_s12 + $0x150] sm:$0xff] }
 0x10b   : > { %v2010_v44 = vld [vmem:[%s8399_s12 + $0x770] sm:$0xff] }
 0x10d   : > { %6879 = vmatmul.mubr.msk.f32.gmra.mrb[10].mxu0 %vm2174_vm0, %v1783_v45  ;;  %7173 = vmatmul.mubr.msk.f32.gmra.mrb[10].mxu1 %vm2174_vm0, %v1979_v46  ;;  %v1815_v45 = vld [vmem:[%s8399_s12 + $0x158] sm:$0xff] }
 0x10e   : > { %6881 = vmatprep.mubr.msk.f32.mxu0 %vm2174_vm0, %v1784_v47  ;;  %7175 = vmatprep.mubr.msk.f32.mxu1 %vm2174_vm0, %v1980_v48  ;;  %v2011_v46 = vld [vmem:[%s8399_s12 + $0x778] sm:$0xff]  ;;  %v1816_v47 = vld [vmem:[%s8399_s12 + $0x160] sm:$0xff] }
 0x10f   : > { %v2012_v48 = vld [vmem:[%s8399_s12 + $0x780] sm:$0xff] }
 0x111   : > { %6882 = vmatmul.mubr.msk.f32.gmra.mrb[12].mxu0 %vm2174_vm0, %v1785_v49  ;;  %7176 = vmatmul.mubr.msk.f32.gmra.mrb[12].mxu1 %vm2174_vm0, %v1981_v50  ;;  %v1817_v49 = vld [vmem:[%s8399_s12 + $0x168] sm:$0xff] }
 0x112   : > { %6884 = vmatprep.mubr.msk.f32.mxu0 %vm2174_vm0, %v1786_v51  ;;  %7178 = vmatprep.mubr.msk.f32.mxu1 %vm2174_vm0, %v1982_v52  ;;  %v2013_v50 = vld [vmem:[%s8399_s12 + $0x788] sm:$0xff]  ;;  %v1818_v51 = vld [vmem:[%s8399_s12 + $0x170] sm:$0xff] }
 0x113   : > { %v2014_v52 = vld [vmem:[%s8399_s12 + $0x790] sm:$0xff] }
 0x115   : > { %6885 = vmatmul.mubr.msk.f32.gmra.mrb[14].mxu0 %vm2174_vm0, %v1787_v53  ;;  %7179 = vmatmul.mubr.msk.f32.gmra.mrb[14].mxu1 %vm2174_vm0, %v1983_v54  ;;  %v1819_v53 = vld [vmem:[%s8399_s12 + $0x178] sm:$0xff] }
 0x116   : > { %6887 = vmatprep.mubr.msk.f32.mxu0 %vm2174_vm0, %v1788_v55  ;;  %7181 = vmatprep.mubr.msk.f32.mxu1 %vm2174_vm0, %v1984_v56  ;;  %v2015_v54 = vld [vmem:[%s8399_s12 + $0x798] sm:$0xff]  ;;  %v1820_v55 = vld [vmem:[%s8399_s12 + $0x180] sm:$0xff] }
 0x117   : > { %v2016_v56 = vld [vmem:[%s8399_s12 + $0x7a0] sm:$0xff] }
 0x119   : > { %6888 = vmatmul.mubr.msk.f32.gmra.mrb[16].mxu0 %vm2174_vm0, %v1789_v57  ;;  %7182 = vmatmul.mubr.msk.f32.gmra.mrb[16].mxu1 %vm2174_vm0, %v1985_v58  ;;  %v1821_v57 = vld [vmem:[%s8399_s12 + $0x188] sm:$0xff] }
 0x11a   : > { %6890 = vmatprep.mubr.msk.f32.mxu0 %vm2174_vm0, %v1790_v59  ;;  %7184 = vmatprep.mubr.msk.f32.mxu1 %vm2174_vm0, %v1986_v60  ;;  %v2017_v58 = vld [vmem:[%s8399_s12 + $0x7a8] sm:$0xff]  ;;  %v1822_v59 = vld [vmem:[%s8399_s12 + $0x190] sm:$0xff] }
 0x11b   : > { %v2018_v60 = vld [vmem:[%s8399_s12 + $0x7b0] sm:$0xff] }
 0x11d   : > { %6891 = vmatmul.mubr.msk.f32.gmra.mrb[18].mxu0 %vm2174_vm0, %v1791_v61  ;;  %7185 = vmatmul.mubr.msk.f32.gmra.mrb[18].mxu1 %vm2174_vm0, %v1987_v62  ;;  %v1823_v61 = vld [vmem:[%s8399_s12 + $0x198] sm:$0xff] }
 0x11e   : > { %6893 = vmatprep.mubr.msk.f32.mxu0 %vm2174_vm0, %v1792_v63  ;;  %7187 = vmatprep.mubr.msk.f32.mxu1 %vm2174_vm0, %v1988_v0  ;;  %v2019_v62 = vld [vmem:[%s8399_s12 + $0x7b8] sm:$0xff]  ;;  %v1824_v63 = vld [vmem:[%s8399_s12 + $0x1a0] sm:$0xff] }
 0x11f   : > { %v2020_v0 = vld [vmem:[%s8399_s12 + $0x7c0] sm:$0xff] }
 0x121   : > { %6894 = vmatmul.mubr.msk.f32.gmra.mrb[20].mxu0 %vm2174_vm0, %v1793_v1  ;;  %7188 = vmatmul.mubr.msk.f32.gmra.mrb[20].mxu1 %vm2174_vm0, %v1989_v2  ;;  %v1825_v1 = vld [vmem:[%s8399_s12 + $0x1a8] sm:$0xff] }
 0x122   : > { %6896 = vmatprep.mubr.msk.f32.mxu0 %vm2174_vm0, %v1794_v3  ;;  %7190 = vmatprep.mubr.msk.f32.mxu1 %vm2174_vm0, %v1990_v4  ;;  %v2021_v2 = vld [vmem:[%s8399_s12 + $0x7c8] sm:$0xff]  ;;  %v1826_v3 = vld [vmem:[%s8399_s12 + $0x1b0] sm:$0xff] }
 0x123   : > { %v2022_v4 = vld [vmem:[%s8399_s12 + $0x7d0] sm:$0xff] }
 0x125   : > { %6897 = vmatmul.mubr.msk.f32.gmra.mrb[22].mxu0 %vm2174_vm0, %v1795_v5  ;;  %7191 = vmatmul.mubr.msk.f32.gmra.mrb[22].mxu1 %vm2174_vm0, %v1991_v6  ;;  %v1827_v5 = vld [vmem:[%s8399_s12 + $0x1b8] sm:$0xff] }
 0x126   : > { %6899 = vmatprep.mubr.msk.f32.mxu0 %vm2174_vm0, %v1796_v7  ;;  %7193 = vmatprep.mubr.msk.f32.mxu1 %vm2174_vm0, %v1992_v8  ;;  %v2023_v6 = vld [vmem:[%s8399_s12 + $0x7d8] sm:$0xff]  ;;  %v1828_v7 = vld [vmem:[%s8399_s12 + $0x1c0] sm:$0xff] }
 0x127   : > { %v2024_v8 = vld [vmem:[%s8399_s12 + $0x7e0] sm:$0xff] }
 0x129   : > { %6900 = vmatmul.mubr.msk.f32.gmra.mrb[24].mxu0 %vm2174_vm0, %v1797_v9  ;;  %7194 = vmatmul.mubr.msk.f32.gmra.mrb[24].mxu1 %vm2174_vm0, %v1993_v10  ;;  %v1829_v9 = vld [vmem:[%s8399_s12 + $0x1c8] sm:$0xff] }
 0x12a   : > { %6902 = vmatprep.mubr.msk.f32.mxu0 %vm2174_vm0, %v1798_v11  ;;  %7196 = vmatprep.mubr.msk.f32.mxu1 %vm2174_vm0, %v1994_v12  ;;  %v2025_v10 = vld [vmem:[%s8399_s12 + $0x7e8] sm:$0xff]  ;;  %v1830_v11 = vld [vmem:[%s8399_s12 + $0x1d0] sm:$0xff] }
 0x12b   : > { %v2026_v12 = vld [vmem:[%s8399_s12 + $0x7f0] sm:$0xff] }
 0x12d   : > { %6903 = vmatmul.mubr.msk.f32.gmra.mrb[26].mxu0 %vm2174_vm0, %v1799_v13  ;;  %7197 = vmatmul.mubr.msk.f32.gmra.mrb[26].mxu1 %vm2174_vm0, %v1995_v14  ;;  %v1831_v13 = vld [vmem:[%s8399_s12 + $0x1d8] sm:$0xff] }
 0x12e   : > { %6905 = vmatprep.mubr.msk.f32.mxu0 %vm2174_vm0, %v1800_v15  ;;  %7199 = vmatprep.mubr.msk.f32.mxu1 %vm2174_vm0, %v1996_v16  ;;  %v2027_v14 = vld [vmem:[%s8399_s12 + $0x7f8] sm:$0xff]  ;;  %v1832_v15 = vld [vmem:[%s8399_s12 + $0x1e0] sm:$0xff] }
 0x12f   : > { %v2028_v16 = vld [vmem:[%s8399_s12 + $0x800] sm:$0xff] }
 0x131   : > { %6906 = vmatmul.mubr.msk.f32.gmra.mrb[28].mxu0 %vm2174_vm0, %v1801_v17  ;;  %7200 = vmatmul.mubr.msk.f32.gmra.mrb[28].mxu1 %vm2174_vm0, %v1997_v18  ;;  %v1833_v17 = vld [vmem:[%s8399_s12 + $0x1e8] sm:$0xff] }
 0x132   : > { %6908 = vmatprep.mubr.msk.f32.mxu0 %vm2174_vm0, %v1802_v19  ;;  %7202 = vmatprep.mubr.msk.f32.mxu1 %vm2174_vm0, %v1998_v20  ;;  %v2029_v18 = vld [vmem:[%s8399_s12 + $0x808] sm:$0xff]  ;;  %v1834_v19 = vld [vmem:[%s8399_s12 + $0x1f0] sm:$0xff] }
 0x133   : > { %v2030_v20 = vld [vmem:[%s8399_s12 + $0x810] sm:$0xff] }
 0x135   : > { %6909 = vmatmul.mubr.msk.f32.gmra.mrb[30].mxu0 %vm2174_vm0, %v1803_v21  ;;  %7203 = vmatmul.mubr.msk.f32.gmra.mrb[30].mxu1 %vm2174_vm0, %v1999_v22  ;;  %v1835_v21 = vld [vmem:[%s8399_s12 + $0x1f8] sm:$0xff] }
 0x136   : > { %6911 = vmatprep.mubr.msk.f32.mxu0 %vm2174_vm0, %v1804_v23  ;;  %7205 = vmatprep.mubr.msk.f32.mxu1 %vm2174_vm0, %v2000_v24  ;;  %v2031_v22 = vld [vmem:[%s8399_s12 + $0x818] sm:$0xff]  ;;  %v1836_v23 = vld [vmem:[%s8399_s12 + $0x200] sm:$0xff] }
 0x137   : > { %v2032_v24 = vld [vmem:[%s8399_s12 + $0x820] sm:$0xff] }
 0x139   : > { %6912 = vmatmul.mubr.msk.f32.gmra.mrb[32].mxu0 %vm2174_vm0, %v1805_v25  ;;  %7206 = vmatmul.mubr.msk.f32.gmra.mrb[32].mxu1 %vm2174_vm0, %v2001_v26  ;;  %v1837_v25 = vld [vmem:[%s8399_s12 + $0x208] sm:$0xff] }
 0x13a   : > { %6914 = vmatprep.mubr.msk.f32.mxu0 %vm2174_vm0, %v1806_v27  ;;  %7208 = vmatprep.mubr.msk.f32.mxu1 %vm2174_vm0, %v2002_v28  ;;  %v2033_v26 = vld [vmem:[%s8399_s12 + $0x828] sm:$0xff]  ;;  %v1838_v27 = vld [vmem:[%s8399_s12 + $0x210] sm:$0xff] }
 0x13b   : > { %v2034_v28 = vld [vmem:[%s8399_s12 + $0x830] sm:$0xff] }
 0x13d   : > { %6915 = vmatmul.mubr.msk.f32.gmra.mrb[34].mxu0 %vm2174_vm0, %v1807_v29  ;;  %7209 = vmatmul.mubr.msk.f32.gmra.mrb[34].mxu1 %vm2174_vm0, %v2003_v30  ;;  %v1839_v29 = vld [vmem:[%s8399_s12 + $0x218] sm:$0xff] }
 0x13e   : > { %6917 = vmatprep.mubr.msk.f32.mxu0 %vm2174_vm0, %v1808_v31  ;;  %7211 = vmatprep.mubr.msk.f32.mxu1 %vm2174_vm0, %v2004_v32  ;;  %v2035_v30 = vld [vmem:[%s8399_s12 + $0x838] sm:$0xff]  ;;  %v1840_v31 = vld [vmem:[%s8399_s12 + $0x220] sm:$0xff] }
 0x13f   : > { %v2036_v32 = vld [vmem:[%s8399_s12 + $0x840] sm:$0xff] }
 0x141   : > { %6918 = vmatmul.mubr.msk.f32.gmra.mrb[36].mxu0 %vm2174_vm0, %v1809_v33  ;;  %7212 = vmatmul.mubr.msk.f32.gmra.mrb[36].mxu1 %vm2174_vm0, %v2005_v34  ;;  %v1841_v33 = vld [vmem:[%s8399_s12 + $0x228] sm:$0xff] }
 0x142   : > { %6920 = vmatprep.mubr.msk.f32.mxu0 %vm2174_vm0, %v1810_v35  ;;  %7214 = vmatprep.mubr.msk.f32.mxu1 %vm2174_vm0, %v2006_v36  ;;  %v2037_v34 = vld [vmem:[%s8399_s12 + $0x848] sm:$0xff]  ;;  %v1842_v35 = vld [vmem:[%s8399_s12 + $0x230] sm:$0xff] }
 0x143   : > { %v2038_v36 = vld [vmem:[%s8399_s12 + $0x850] sm:$0xff] }
 0x145   : > { %6921 = vmatmul.mubr.msk.f32.gmra.mrb[38].mxu0 %vm2174_vm0, %v1811_v37  ;;  %7215 = vmatmul.mubr.msk.f32.gmra.mrb[38].mxu1 %vm2174_vm0, %v2007_v38  ;;  %v1843_v37 = vld [vmem:[%s8399_s12 + $0x238] sm:$0xff] }
 0x146   : > { %6923 = vmatprep.mubr.msk.f32.mxu0 %vm2174_vm0, %v1812_v39  ;;  %7217 = vmatprep.mubr.msk.f32.mxu1 %vm2174_vm0, %v2008_v40  ;;  %v2039_v38 = vld [vmem:[%s8399_s12 + $0x858] sm:$0xff]  ;;  %v1844_v39 = vld [vmem:[%s8399_s12 + $0x240] sm:$0xff] }
 0x147   : > { %v2040_v40 = vld [vmem:[%s8399_s12 + $0x860] sm:$0xff] }
 0x149   : > { %6924 = vmatmul.mubr.msk.f32.gmra.mrb[40].mxu0 %vm2174_vm0, %v1813_v41  ;;  %7218 = vmatmul.mubr.msk.f32.gmra.mrb[40].mxu1 %vm2174_vm0, %v2009_v42  ;;  %v1845_v41 = vld [vmem:[%s8399_s12 + $0x248] sm:$0xff] }
 0x14a   : > { %6926 = vmatprep.mubr.msk.f32.mxu0 %vm2174_vm0, %v1814_v43  ;;  %7220 = vmatprep.mubr.msk.f32.mxu1 %vm2174_vm0, %v2010_v44  ;;  %v2041_v42 = vld [vmem:[%s8399_s12 + $0x868] sm:$0xff]  ;;  %v1846_v43 = vld [vmem:[%s8399_s12 + $0x250] sm:$0xff] }
 0x14b   : > { %v2042_v44 = vld [vmem:[%s8399_s12 + $0x870] sm:$0xff] }
 0x14d   : > { %6927 = vmatmul.mubr.msk.f32.gmra.mrb[42].mxu0 %vm2174_vm0, %v1815_v45  ;;  %7221 = vmatmul.mubr.msk.f32.gmra.mrb[42].mxu1 %vm2174_vm0, %v2011_v46  ;;  %v1847_v45 = vld [vmem:[%s8399_s12 + $0x258] sm:$0xff] }
 0x14e   : > { %6929 = vmatprep.mubr.msk.f32.mxu0 %vm2174_vm0, %v1816_v47  ;;  %7223 = vmatprep.mubr.msk.f32.mxu1 %vm2174_vm0, %v2012_v48  ;;  %v2043_v46 = vld [vmem:[%s8399_s12 + $0x878] sm:$0xff]  ;;  %v1848_v47 = vld [vmem:[%s8399_s12 + $0x260] sm:$0xff] }
 0x14f   : > { %v2044_v48 = vld [vmem:[%s8399_s12 + $0x880] sm:$0xff] }
 0x151   : > { %6930 = vmatmul.mubr.msk.f32.gmra.mrb[44].mxu0 %vm2174_vm0, %v1817_v49  ;;  %7224 = vmatmul.mubr.msk.f32.gmra.mrb[44].mxu1 %vm2174_vm0, %v2013_v50  ;;  %v1849_v49 = vld [vmem:[%s8399_s12 + $0x268] sm:$0xff] }
 0x152   : > { %6932 = vmatprep.mubr.msk.f32.mxu0 %vm2174_vm0, %v1818_v51  ;;  %7226 = vmatprep.mubr.msk.f32.mxu1 %vm2174_vm0, %v2014_v52  ;;  %v2045_v50 = vld [vmem:[%s8399_s12 + $0x888] sm:$0xff]  ;;  %v1850_v51 = vld [vmem:[%s8399_s12 + $0x270] sm:$0xff] }
 0x153   : > { %v2046_v52 = vld [vmem:[%s8399_s12 + $0x890] sm:$0xff] }
 0x155   : > { %6933 = vmatmul.mubr.msk.f32.gmra.mrb[46].mxu0 %vm2174_vm0, %v1819_v53  ;;  %7227 = vmatmul.mubr.msk.f32.gmra.mrb[46].mxu1 %vm2174_vm0, %v2015_v54  ;;  %v1851_v53 = vld [vmem:[%s8399_s12 + $0x278] sm:$0xff] }
 0x156   : > { %6935 = vmatprep.mubr.msk.f32.mxu0 %vm2174_vm0, %v1820_v55  ;;  %7229 = vmatprep.mubr.msk.f32.mxu1 %vm2174_vm0, %v2016_v56  ;;  %v2047_v54 = vld [vmem:[%s8399_s12 + $0x898] sm:$0xff]  ;;  %v1852_v55 = vld [vmem:[%s8399_s12 + $0x280] sm:$0xff] }
 0x157   : > { %v2048_v56 = vld [vmem:[%s8399_s12 + $0x8a0] sm:$0xff] }
 0x159   : > { %6936 = vmatmul.mubr.msk.f32.gmra.mrb[48].mxu0 %vm2174_vm0, %v1821_v57  ;;  %7230 = vmatmul.mubr.msk.f32.gmra.mrb[48].mxu1 %vm2174_vm0, %v2017_v58  ;;  %v1853_v57 = vld [vmem:[%s8399_s12 + $0x288] sm:$0xff] }
 0x15a   : > { %6938 = vmatprep.mubr.msk.f32.mxu0 %vm2174_vm0, %v1822_v59  ;;  %7232 = vmatprep.mubr.msk.f32.mxu1 %vm2174_vm0, %v2018_v60  ;;  %v2049_v58 = vld [vmem:[%s8399_s12 + $0x8a8] sm:$0xff]  ;;  %v1854_v59 = vld [vmem:[%s8399_s12 + $0x290] sm:$0xff] }
 0x15b   : > { %v2050_v60 = vld [vmem:[%s8399_s12 + $0x8b0] sm:$0xff] }
 0x15d   : > { %6939 = vmatmul.mubr.msk.f32.gmra.mrb[50].mxu0 %vm2174_vm0, %v1823_v61  ;;  %7233 = vmatmul.mubr.msk.f32.gmra.mrb[50].mxu1 %vm2174_vm0, %v2019_v62  ;;  %v1855_v61 = vld [vmem:[%s8399_s12 + $0x298] sm:$0xff] }
 0x15e   : > { %6941 = vmatprep.mubr.msk.f32.mxu0 %vm2174_vm0, %v1824_v63  ;;  %7235 = vmatprep.mubr.msk.f32.mxu1 %vm2174_vm0, %v2020_v0  ;;  %v2051_v62 = vld [vmem:[%s8399_s12 + $0x8b8] sm:$0xff]  ;;  %v1856_v63 = vld [vmem:[%s8399_s12 + $0x2a0] sm:$0xff] }
 0x15f   : > { %v2052_v0 = vld [vmem:[%s8399_s12 + $0x8c0] sm:$0xff] }
 0x161   : > { %6942 = vmatmul.mubr.msk.f32.gmra.mrb[52].mxu0 %vm2174_vm0, %v1825_v1  ;;  %7236 = vmatmul.mubr.msk.f32.gmra.mrb[52].mxu1 %vm2174_vm0, %v2021_v2  ;;  %v1857_v1 = vld [vmem:[%s8399_s12 + $0x2a8] sm:$0xff] }
 0x162   : > { %6944 = vmatprep.mubr.msk.f32.mxu0 %vm2174_vm0, %v1826_v3  ;;  %7238 = vmatprep.mubr.msk.f32.mxu1 %vm2174_vm0, %v2022_v4  ;;  %v2053_v2 = vld [vmem:[%s8399_s12 + $0x8c8] sm:$0xff]  ;;  %v1858_v3 = vld [vmem:[%s8399_s12 + $0x2b0] sm:$0xff] }
 0x163   : > { %v2054_v4 = vld [vmem:[%s8399_s12 + $0x8d0] sm:$0xff] }
 0x165   : > { %6945 = vmatmul.mubr.msk.f32.gmra.mrb[54].mxu0 %vm2174_vm0, %v1827_v5  ;;  %7239 = vmatmul.mubr.msk.f32.gmra.mrb[54].mxu1 %vm2174_vm0, %v2023_v6  ;;  %v1859_v5 = vld [vmem:[%s8399_s12 + $0x2b8] sm:$0xff] }
 0x166   : > { %6947 = vmatprep.mubr.msk.f32.mxu0 %vm2174_vm0, %v1828_v7  ;;  %7241 = vmatprep.mubr.msk.f32.mxu1 %vm2174_vm0, %v2024_v8  ;;  %v2055_v6 = vld [vmem:[%s8399_s12 + $0x8d8] sm:$0xff]  ;;  %v1860_v7 = vld [vmem:[%s8399_s12 + $0x2c0] sm:$0xff] }
 0x167   : > { %v2056_v8 = vld [vmem:[%s8399_s12 + $0x8e0] sm:$0xff] }
 0x169   : > { %6948 = vmatmul.mubr.msk.f32.gmra.mrb[56].mxu0 %vm2174_vm0, %v1829_v9  ;;  %7242 = vmatmul.mubr.msk.f32.gmra.mrb[56].mxu1 %vm2174_vm0, %v2025_v10  ;;  %v1861_v9 = vld [vmem:[%s8399_s12 + $0x2c8] sm:$0xff] }
 0x16a   : > { %6950 = vmatprep.mubr.msk.f32.mxu0 %vm2174_vm0, %v1830_v11  ;;  %7244 = vmatprep.mubr.msk.f32.mxu1 %vm2174_vm0, %v2026_v12  ;;  %v2057_v10 = vld [vmem:[%s8399_s12 + $0x8e8] sm:$0xff]  ;;  %v1862_v11 = vld [vmem:[%s8399_s12 + $0x2d0] sm:$0xff] }
 0x16b   : > { %v2058_v12 = vld [vmem:[%s8399_s12 + $0x8f0] sm:$0xff] }
 0x16d   : > { %6951 = vmatmul.mubr.msk.f32.gmra.mrb[58].mxu0 %vm2174_vm0, %v1831_v13  ;;  %7245 = vmatmul.mubr.msk.f32.gmra.mrb[58].mxu1 %vm2174_vm0, %v2027_v14  ;;  %v1863_v13 = vld [vmem:[%s8399_s12 + $0x2d8] sm:$0xff] }
 0x16e   : > { %6953 = vmatprep.mubr.msk.f32.mxu0 %vm2174_vm0, %v1832_v15  ;;  %7247 = vmatprep.mubr.msk.f32.mxu1 %vm2174_vm0, %v2028_v16  ;;  %v2059_v14 = vld [vmem:[%s8399_s12 + $0x8f8] sm:$0xff]  ;;  %v1864_v15 = vld [vmem:[%s8399_s12 + $0x2e0] sm:$0xff] }
 0x16f   : > { %v2060_v16 = vld [vmem:[%s8399_s12 + $0x900] sm:$0xff] }
 0x171   : > { %6954 = vmatmul.mubr.msk.f32.gmra.mrb[60].mxu0 %vm2174_vm0, %v1833_v17  ;;  %7248 = vmatmul.mubr.msk.f32.gmra.mrb[60].mxu1 %vm2174_vm0, %v2029_v18  ;;  %v1865_v17 = vld [vmem:[%s8399_s12 + $0x2e8] sm:$0xff] }
 0x172   : > { %6956 = vmatprep.mubr.msk.f32.mxu0 %vm2174_vm0, %v1834_v19  ;;  %7250 = vmatprep.mubr.msk.f32.mxu1 %vm2174_vm0, %v2030_v20  ;;  %v2061_v18 = vld [vmem:[%s8399_s12 + $0x908] sm:$0xff]  ;;  %v1866_v19 = vld [vmem:[%s8399_s12 + $0x2f0] sm:$0xff] }
 0x173   : > { %v2062_v20 = vld [vmem:[%s8399_s12 + $0x910] sm:$0xff] }
 0x175   : > { %6957 = vmatmul.mubr.msk.f32.gmra.mrb[62].mxu0 %vm2174_vm0, %v1835_v21  ;;  %7251 = vmatmul.mubr.msk.f32.gmra.mrb[62].mxu1 %vm2174_vm0, %v2031_v22  ;;  %v1867_v21 = vld [vmem:[%s8399_s12 + $0x2f8] sm:$0xff] }
 0x176   : > { %6959 = vmatprep.mubr.msk.f32.mxu0 %vm2174_vm0, %v1836_v23  ;;  %7253 = vmatprep.mubr.msk.f32.mxu1 %vm2174_vm0, %v2032_v24  ;;  %v2063_v22 = vld [vmem:[%s8399_s12 + $0x918] sm:$0xff]  ;;  %v1868_v23 = vld [vmem:[%s8399_s12 + $0x300] sm:$0xff] }
 0x177   : > { %v2064_v24 = vld [vmem:[%s8399_s12 + $0x920] sm:$0xff] }
 0x179   : > { %6960 = vmatmul.mubr.msk.f32.gmra.mrb[64].mxu0 %vm2174_vm0, %v1837_v25  ;;  %7254 = vmatmul.mubr.msk.f32.gmra.mrb[64].mxu1 %vm2174_vm0, %v2033_v26  ;;  %v1869_v25 = vld [vmem:[%s8399_s12 + $0x308] sm:$0xff] }
 0x17a   : > { %6962 = vmatprep.mubr.msk.f32.mxu0 %vm2174_vm0, %v1838_v27  ;;  %7256 = vmatprep.mubr.msk.f32.mxu1 %vm2174_vm0, %v2034_v28  ;;  %v2065_v26 = vld [vmem:[%s8399_s12 + $0x928] sm:$0xff]  ;;  %v1870_v27 = vld [vmem:[%s8399_s12 + $0x310] sm:$0xff] }
 0x17b   : > { %v2066_v28 = vld [vmem:[%s8399_s12 + $0x930] sm:$0xff] }
 0x17d   : > { %6963 = vmatmul.mubr.msk.f32.gmra.mrb[66].mxu0 %vm2174_vm0, %v1839_v29  ;;  %7257 = vmatmul.mubr.msk.f32.gmra.mrb[66].mxu1 %vm2174_vm0, %v2035_v30  ;;  %v1871_v29 = vld [vmem:[%s8399_s12 + $0x318] sm:$0xff] }
 0x17e   : > { %6965 = vmatprep.mubr.msk.f32.mxu0 %vm2174_vm0, %v1840_v31  ;;  %7259 = vmatprep.mubr.msk.f32.mxu1 %vm2174_vm0, %v2036_v32  ;;  %v2067_v30 = vld [vmem:[%s8399_s12 + $0x938] sm:$0xff]  ;;  %v1872_v31 = vld [vmem:[%s8399_s12 + $0x320] sm:$0xff] }
 0x17f   : > { %v2068_v32 = vld [vmem:[%s8399_s12 + $0x940] sm:$0xff] }
 0x181   : > { %6966 = vmatmul.mubr.msk.f32.gmra.mrb[68].mxu0 %vm2174_vm0, %v1841_v33  ;;  %7260 = vmatmul.mubr.msk.f32.gmra.mrb[68].mxu1 %vm2174_vm0, %v2037_v34  ;;  %v1873_v33 = vld [vmem:[%s8399_s12 + $0x328] sm:$0xff] }
 0x182   : > { %6968 = vmatprep.mubr.msk.f32.mxu0 %vm2174_vm0, %v1842_v35  ;;  %7262 = vmatprep.mubr.msk.f32.mxu1 %vm2174_vm0, %v2038_v36  ;;  %v2069_v34 = vld [vmem:[%s8399_s12 + $0x948] sm:$0xff]  ;;  %v1874_v35 = vld [vmem:[%s8399_s12 + $0x330] sm:$0xff] }
 0x183   : > { %v2070_v36 = vld [vmem:[%s8399_s12 + $0x950] sm:$0xff] }
 0x185   : > { %6969 = vmatmul.mubr.msk.f32.gmra.mrb[70].mxu0 %vm2174_vm0, %v1843_v37  ;;  %7263 = vmatmul.mubr.msk.f32.gmra.mrb[70].mxu1 %vm2174_vm0, %v2039_v38  ;;  %v1875_v37 = vld [vmem:[%s8399_s12 + $0x338] sm:$0xff] }
 0x186   : > { %6971 = vmatprep.mubr.msk.f32.mxu0 %vm2174_vm0, %v1844_v39  ;;  %7265 = vmatprep.mubr.msk.f32.mxu1 %vm2174_vm0, %v2040_v40  ;;  %v2071_v38 = vld [vmem:[%s8399_s12 + $0x958] sm:$0xff]  ;;  %v1876_v39 = vld [vmem:[%s8399_s12 + $0x340] sm:$0xff] }
 0x187   : > { %v2072_v40 = vld [vmem:[%s8399_s12 + $0x960] sm:$0xff] }
 0x189   : > { %6972 = vmatmul.mubr.msk.f32.gmra.mrb[72].mxu0 %vm2174_vm0, %v1845_v41  ;;  %7266 = vmatmul.mubr.msk.f32.gmra.mrb[72].mxu1 %vm2174_vm0, %v2041_v42  ;;  %v1877_v41 = vld [vmem:[%s8399_s12 + $0x348] sm:$0xff] }
 0x18a   : > { %6974 = vmatprep.mubr.msk.f32.mxu0 %vm2174_vm0, %v1846_v43  ;;  %7268 = vmatprep.mubr.msk.f32.mxu1 %vm2174_vm0, %v2042_v44  ;;  %v2073_v42 = vld [vmem:[%s8399_s12 + $0x968] sm:$0xff]  ;;  %v1878_v43 = vld [vmem:[%s8399_s12 + $0x350] sm:$0xff] }
 0x18b   : > { %v2074_v44 = vld [vmem:[%s8399_s12 + $0x970] sm:$0xff] }
 0x18d   : > { %6975 = vmatmul.mubr.msk.f32.gmra.mrb[74].mxu0 %vm2174_vm0, %v1847_v45  ;;  %7269 = vmatmul.mubr.msk.f32.gmra.mrb[74].mxu1 %vm2174_vm0, %v2043_v46  ;;  %v1879_v45 = vld [vmem:[%s8399_s12 + $0x358] sm:$0xff] }
 0x18e   : > { %6977 = vmatprep.mubr.msk.f32.mxu0 %vm2174_vm0, %v1848_v47  ;;  %7271 = vmatprep.mubr.msk.f32.mxu1 %vm2174_vm0, %v2044_v48  ;;  %v2075_v46 = vld [vmem:[%s8399_s12 + $0x978] sm:$0xff]  ;;  %v1880_v47 = vld [vmem:[%s8399_s12 + $0x360] sm:$0xff] }
 0x18f   : > { %v2076_v48 = vld [vmem:[%s8399_s12 + $0x980] sm:$0xff] }
 0x191   : > { %6978 = vmatmul.mubr.msk.f32.gmra.mrb[76].mxu0 %vm2174_vm0, %v1849_v49  ;;  %7272 = vmatmul.mubr.msk.f32.gmra.mrb[76].mxu1 %vm2174_vm0, %v2045_v50 }
 0x192   : > { %6980 = vmatprep.mubr.msk.f32.mxu0 %vm2174_vm0, %v1850_v51  ;;  %7274 = vmatprep.mubr.msk.f32.mxu1 %vm2174_vm0, %v2046_v52 }
 0x195   : > { %6981 = vmatmul.mubr.msk.f32.gmra.mrb[78].mxu0 %vm2174_vm0, %v1851_v53  ;;  %7275 = vmatmul.mubr.msk.f32.gmra.mrb[78].mxu1 %vm2174_vm0, %v2047_v54  ;;  %v1881_v53 = vld [vmem:[%s8399_s12 + $0x368] sm:$0xff] }
 0x196   : > { %6983 = vmatprep.mubr.msk.f32.mxu0 %vm2174_vm0, %v1852_v55  ;;  %7277 = vmatprep.mubr.msk.f32.mxu1 %vm2174_vm0, %v2048_v56  ;;  %v2077_v54 = vld [vmem:[%s8399_s12 + $0x988] sm:$0xff]  ;;  %v1882_v55 = vld [vmem:[%s8399_s12 + $0x370] sm:$0xff] }
 0x197   : > { %v2078_v56 = vld [vmem:[%s8399_s12 + $0x990] sm:$0xff] }
 0x199   : > { %6984 = vmatmul.mubr.msk.f32.gmra.mrb[80].mxu0 %vm2174_vm0, %v1853_v57  ;;  %7278 = vmatmul.mubr.msk.f32.gmra.mrb[80].mxu1 %vm2174_vm0, %v2049_v58 }
 0x19a   : > { %6986 = vmatprep.mubr.msk.f32.mxu0 %vm2174_vm0, %v1854_v59  ;;  %7280 = vmatprep.mubr.msk.f32.mxu1 %vm2174_vm0, %v2050_v60 }
 0x19d   : > { %6987 = vmatmul.mubr.msk.f32.gmra.mrb[82].mxu0 %vm2174_vm0, %v1855_v61  ;;  %7281 = vmatmul.mubr.msk.f32.gmra.mrb[82].mxu1 %vm2174_vm0, %v2051_v62  ;;  %v1883_v61 = vld [vmem:[%s8399_s12 + $0x378] sm:$0xff] }
 0x19e   : > { %6989 = vmatprep.mubr.msk.f32.mxu0 %vm2174_vm0, %v1856_v63  ;;  %7283 = vmatprep.mubr.msk.f32.mxu1 %vm2174_vm0, %v2052_v0  ;;  %v2079_v62 = vld [vmem:[%s8399_s12 + $0x998] sm:$0xff]  ;;  %v1884_v63 = vld [vmem:[%s8399_s12 + $0x380] sm:$0xff] }
 0x19f   : > { %v2080_v0 = vld [vmem:[%s8399_s12 + $0x9a0] sm:$0xff] }
 0x1a1   : > { %6990 = vmatmul.mubr.msk.f32.gmra.mrb[84].mxu0 %vm2174_vm0, %v1857_v1  ;;  %7284 = vmatmul.mubr.msk.f32.gmra.mrb[84].mxu1 %vm2174_vm0, %v2053_v2 }
 0x1a2   : > { %6992 = vmatprep.mubr.msk.f32.mxu0 %vm2174_vm0, %v1858_v3  ;;  %7286 = vmatprep.mubr.msk.f32.mxu1 %vm2174_vm0, %v2054_v4 }
 0x1a5   : > { %6993 = vmatmul.mubr.msk.f32.gmra.mrb[86].mxu0 %vm2174_vm0, %v1859_v5  ;;  %7287 = vmatmul.mubr.msk.f32.gmra.mrb[86].mxu1 %vm2174_vm0, %v2055_v6  ;;  %v1885_v5 = vld [vmem:[%s8399_s12 + $0x388] sm:$0xff] }
 0x1a6   : > { %6995 = vmatprep.mubr.msk.f32.mxu0 %vm2174_vm0, %v1860_v7  ;;  %7289 = vmatprep.mubr.msk.f32.mxu1 %vm2174_vm0, %v2056_v8  ;;  %v2081_v6 = vld [vmem:[%s8399_s12 + $0x9a8] sm:$0xff]  ;;  %v1886_v7 = vld [vmem:[%s8399_s12 + $0x390] sm:$0xff] }
 0x1a7   : > { %v2082_v8 = vld [vmem:[%s8399_s12 + $0x9b0] sm:$0xff] }
 0x1a9   : > { %6996 = vmatmul.mubr.msk.f32.gmra.mrb[88].mxu0 %vm2174_vm0, %v1861_v9  ;;  %7290 = vmatmul.mubr.msk.f32.gmra.mrb[88].mxu1 %vm2174_vm0, %v2057_v10 }
 0x1aa   : > { %6998 = vmatprep.mubr.msk.f32.mxu0 %vm2174_vm0, %v1862_v11  ;;  %7292 = vmatprep.mubr.msk.f32.mxu1 %vm2174_vm0, %v2058_v12 }
 0x1ad   : > { %6999 = vmatmul.mubr.msk.f32.gmra.mrb[90].mxu0 %vm2174_vm0, %v1863_v13  ;;  %7293 = vmatmul.mubr.msk.f32.gmra.mrb[90].mxu1 %vm2174_vm0, %v2059_v14  ;;  %v1887_v13 = vld [vmem:[%s8399_s12 + $0x398] sm:$0xff] }
 0x1ae   : > { %7001 = vmatprep.mubr.msk.f32.mxu0 %vm2174_vm0, %v1864_v15  ;;  %7295 = vmatprep.mubr.msk.f32.mxu1 %vm2174_vm0, %v2060_v16  ;;  %v2083_v14 = vld [vmem:[%s8399_s12 + $0x9b8] sm:$0xff]  ;;  %v1888_v15 = vld [vmem:[%s8399_s12 + $0x3a0] sm:$0xff] }
 0x1af   : > { %v2084_v16 = vld [vmem:[%s8399_s12 + $0x9c0] sm:$0xff] }
 0x1b1   : > { %7002 = vmatmul.mubr.msk.f32.gmra.mrb[92].mxu0 %vm2174_vm0, %v1865_v17  ;;  %7296 = vmatmul.mubr.msk.f32.gmra.mrb[92].mxu1 %vm2174_vm0, %v2061_v18 }
 0x1b2   : > { %7004 = vmatprep.mubr.msk.f32.mxu0 %vm2174_vm0, %v1866_v19  ;;  %7298 = vmatprep.mubr.msk.f32.mxu1 %vm2174_vm0, %v2062_v20 }
 0x1b5   : > { %7005 = vmatmul.mubr.msk.f32.gmra.mrb[94].mxu0 %vm2174_vm0, %v1867_v21  ;;  %7299 = vmatmul.mubr.msk.f32.gmra.mrb[94].mxu1 %vm2174_vm0, %v2063_v22  ;;  %v1889_v21 = vld [vmem:[%s8399_s12 + $0x3a8] sm:$0xff] }
 0x1b6   : > { %7007 = vmatprep.mubr.msk.f32.mxu0 %vm2174_vm0, %v1868_v23  ;;  %7301 = vmatprep.mubr.msk.f32.mxu1 %vm2174_vm0, %v2064_v24  ;;  %v2085_v22 = vld [vmem:[%s8399_s12 + $0x9c8] sm:$0xff]  ;;  %v1890_v23 = vld [vmem:[%s8399_s12 + $0x3b0] sm:$0xff] }
 0x1b7   : > { %v2086_v24 = vld [vmem:[%s8399_s12 + $0x9d0] sm:$0xff] }
 0x1b9   : > { %7008 = vmatmul.mubr.msk.f32.gmra.mrb[96].mxu0 %vm2174_vm0, %v1869_v25  ;;  %7302 = vmatmul.mubr.msk.f32.gmra.mrb[96].mxu1 %vm2174_vm0, %v2065_v26 }
 0x1ba   : > { %7010 = vmatprep.mubr.msk.f32.mxu0 %vm2174_vm0, %v1870_v27  ;;  %7304 = vmatprep.mubr.msk.f32.mxu1 %vm2174_vm0, %v2066_v28 }
 0x1bd   : > { %7011 = vmatmul.mubr.msk.f32.gmra.mrb[98].mxu0 %vm2174_vm0, %v1871_v29  ;;  %7305 = vmatmul.mubr.msk.f32.gmra.mrb[98].mxu1 %vm2174_vm0, %v2067_v30  ;;  %v1891_v29 = vld [vmem:[%s8399_s12 + $0x3b8] sm:$0xff] }
 0x1be   : > { %7013 = vmatprep.mubr.msk.f32.mxu0 %vm2174_vm0, %v1872_v31  ;;  %7307 = vmatprep.mubr.msk.f32.mxu1 %vm2174_vm0, %v2068_v32  ;;  %v2087_v30 = vld [vmem:[%s8399_s12 + $0x9d8] sm:$0xff]  ;;  %v1892_v31 = vld [vmem:[%s8399_s12 + $0x3c0] sm:$0xff] }
 0x1bf   : > { %v2088_v32 = vld [vmem:[%s8399_s12 + $0x9e0] sm:$0xff] }
 0x1c1   : > { %7014 = vmatmul.mubr.msk.f32.gmra.mrb[100].mxu0 %vm2174_vm0, %v1873_v33  ;;  %7308 = vmatmul.mubr.msk.f32.gmra.mrb[100].mxu1 %vm2174_vm0, %v2069_v34 }
 0x1c2   : > { %7016 = vmatprep.mubr.msk.f32.mxu0 %vm2174_vm0, %v1874_v35  ;;  %7310 = vmatprep.mubr.msk.f32.mxu1 %vm2174_vm0, %v2070_v36 }
 0x1c5   : > { %7017 = vmatmul.mubr.msk.f32.gmra.mrb[102].mxu0 %vm2174_vm0, %v1875_v37  ;;  %7311 = vmatmul.mubr.msk.f32.gmra.mrb[102].mxu1 %vm2174_vm0, %v2071_v38  ;;  %v1893_v37 = vld [vmem:[%s8399_s12 + $0x3c8] sm:$0xff] }
 0x1c6   : > { %7019 = vmatprep.mubr.msk.f32.mxu0 %vm2174_vm0, %v1876_v39  ;;  %7313 = vmatprep.mubr.msk.f32.mxu1 %vm2174_vm0, %v2072_v40  ;;  %v2089_v38 = vld [vmem:[%s8399_s12 + $0x9e8] sm:$0xff]  ;;  %v1894_v39 = vld [vmem:[%s8399_s12 + $0x3d0] sm:$0xff] }
 0x1c7   : > { %v2090_v40 = vld [vmem:[%s8399_s12 + $0x9f0] sm:$0xff] }
 0x1c9   : > { %7020 = vmatmul.mubr.msk.f32.gmra.mrb[104].mxu0 %vm2174_vm0, %v1877_v41  ;;  %7314 = vmatmul.mubr.msk.f32.gmra.mrb[104].mxu1 %vm2174_vm0, %v2073_v42 }
 0x1ca   : > { %7022 = vmatprep.mubr.msk.f32.mxu0 %vm2174_vm0, %v1878_v43  ;;  %7316 = vmatprep.mubr.msk.f32.mxu1 %vm2174_vm0, %v2074_v44 }
 0x1cc   : > { %v8845_v49 = vpop.f32.mrb[0].mxu0  ;;  %v8847_v50 = vpop.f32.mrb[0].mxu1 }
 0x1cd   : > { %v8849_v51 = vpop.f32.mrb[1].mxu0  ;;  %7023 = vmatmul.mubr.msk.f32.gmra.mrb[106].mxu0 %vm2174_vm0, %v1879_v45  ;;  %v8852_v52 = vpop.f32.mrb[1].mxu1  ;;  %7317 = vmatmul.mubr.msk.f32.gmra.mrb[106].mxu1 %vm2174_vm0, %v2075_v46  ;;  %v1895_v45 = vld [vmem:[%s8399_s12 + $0x3d8] sm:$0xff] }
 0x1ce   : > { %7025 = vmatprep.mubr.msk.f32.mxu0 %vm2174_vm0, %v1880_v47  ;;  %7319 = vmatprep.mubr.msk.f32.mxu1 %vm2174_vm0, %v2076_v48  ;;  %v2091_v46 = vld [vmem:[%s8399_s12 + $0x9f8] sm:$0xff]  ;;  %v1896_v47 = vld [vmem:[%s8399_s12 + $0x3e0] sm:$0xff] }
 0x1cf   : > { %v2092_v48 = vld [vmem:[%s8399_s12 + $0xa00] sm:$0xff] }
 0x1d0   : > { %v8861_v57 = vpop.f32.mrb[2].mxu0  ;;  %v8863_v58 = vpop.f32.mrb[2].mxu1 }
 0x1d1   : > { %v8865_v59 = vpop.f32.mrb[3].mxu0  ;;  %7026 = vmatmul.mubr.msk.f32.gmra.mrb[108].mxu0 %vm2174_vm0, %v1881_v53  ;;  %v8868_v60 = vpop.f32.mrb[3].mxu1  ;;  %7320 = vmatmul.mubr.msk.f32.gmra.mrb[108].mxu1 %vm2174_vm0, %v2077_v54 }
 0x1d2   : > { %7028 = vmatprep.mubr.msk.f32.mxu0 %vm2174_vm0, %v1882_v55  ;;  %7322 = vmatprep.mubr.msk.f32.mxu1 %vm2174_vm0, %v2078_v56 }
 0x1d4   : > { %v8877_v1 = vpop.f32.mrb[4].mxu0  ;;  %v8879_v2 = vpop.f32.mrb[4].mxu1 }
 0x1d5   : > { %v8881_v3 = vpop.f32.mrb[5].mxu0  ;;  %7029 = vmatmul.mubr.msk.f32.gmra.mrb[110].mxu0 %vm2174_vm0, %v1883_v61  ;;  %v8884_v4 = vpop.f32.mrb[5].mxu1  ;;  %7323 = vmatmul.mubr.msk.f32.gmra.mrb[110].mxu1 %vm2174_vm0, %v2079_v62  ;;  %v1897_v61 = vld [vmem:[%s8399_s12 + $0x3e8] sm:$0xff] }
 0x1d6   : > { %7031 = vmatprep.mubr.msk.f32.mxu0 %vm2174_vm0, %v1884_v63  ;;  %7325 = vmatprep.mubr.msk.f32.mxu1 %vm2174_vm0, %v2080_v0  ;;  %v2093_v62 = vld [vmem:[%s8399_s12 + $0xa08] sm:$0xff]  ;;  %v1898_v63 = vld [vmem:[%s8399_s12 + $0x3f0] sm:$0xff] }
 0x1d7   : > { %v2094_v0 = vld [vmem:[%s8399_s12 + $0xa10] sm:$0xff] }
 0x1d8   : > { %v8893_v9 = vpop.f32.mrb[6].mxu0  ;;  %v8895_v10 = vpop.f32.mrb[6].mxu1 }
 0x1d9   : > { %v8897_v11 = vpop.f32.mrb[7].mxu0  ;;  %7032 = vmatmul.mubr.msk.f32.gmra.mrb[112].mxu0 %vm2174_vm0, %v1885_v5  ;;  %v8900_v12 = vpop.f32.mrb[7].mxu1  ;;  %7326 = vmatmul.mubr.msk.f32.gmra.mrb[112].mxu1 %vm2174_vm0, %v2081_v6 }
 0x1da   : > { %7034 = vmatprep.mubr.msk.f32.mxu0 %vm2174_vm0, %v1886_v7  ;;  %7328 = vmatprep.mubr.msk.f32.mxu1 %vm2174_vm0, %v2082_v8 }
 0x1dc   : > { %v8909_v17 = vpop.f32.mrb[8].mxu0  ;;  %v8911_v18 = vpop.f32.mrb[8].mxu1 }
 0x1dd   : > { %v8913_v19 = vpop.f32.mrb[9].mxu0  ;;  %7035 = vmatmul.mubr.msk.f32.gmra.mrb[114].mxu0 %vm2174_vm0, %v1887_v13  ;;  %v8916_v20 = vpop.f32.mrb[9].mxu1  ;;  %7329 = vmatmul.mubr.msk.f32.gmra.mrb[114].mxu1 %vm2174_vm0, %v2083_v14  ;;  %v1899_v13 = vld [vmem:[%s8399_s12 + $0x3f8] sm:$0xff] }
 0x1de   : > { %7037 = vmatprep.mubr.msk.f32.mxu0 %vm2174_vm0, %v1888_v15  ;;  %7331 = vmatprep.mubr.msk.f32.mxu1 %vm2174_vm0, %v2084_v16  ;;  %v2095_v14 = vld [vmem:[%s8399_s12 + $0xa18] sm:$0xff]  ;;  %v1900_v15 = vld [vmem:[%s8399_s12 + $0x400] sm:$0xff] }
 0x1df   : > { %v2096_v16 = vld [vmem:[%s8399_s12 + $0xa20] sm:$0xff] }
 0x1e0   : > { %v8925_v25 = vpop.f32.mrb[10].mxu0  ;;  %v8927_v26 = vpop.f32.mrb[10].mxu1 }
 0x1e1   : > { %v8929_v27 = vpop.f32.mrb[11].mxu0  ;;  %7038 = vmatmul.mubr.msk.f32.gmra.mrb[116].mxu0 %vm2174_vm0, %v1889_v21  ;;  %v8932_v28 = vpop.f32.mrb[11].mxu1  ;;  %7332 = vmatmul.mubr.msk.f32.gmra.mrb[116].mxu1 %vm2174_vm0, %v2085_v22 }
 0x1e2   : > { %7040 = vmatprep.mubr.msk.f32.mxu0 %vm2174_vm0, %v1890_v23  ;;  %7334 = vmatprep.mubr.msk.f32.mxu1 %vm2174_vm0, %v2086_v24 }
 0x1e4   : > { %v8941_v33 = vpop.f32.mrb[12].mxu0  ;;  %v8943_v34 = vpop.f32.mrb[12].mxu1 }
 0x1e5   : > { %v8945_v35 = vpop.f32.mrb[13].mxu0  ;;  %7041 = vmatmul.mubr.msk.f32.gmra.mrb[118].mxu0 %vm2174_vm0, %v1891_v29  ;;  %v8948_v36 = vpop.f32.mrb[13].mxu1  ;;  %7335 = vmatmul.mubr.msk.f32.gmra.mrb[118].mxu1 %vm2174_vm0, %v2087_v30  ;;  %v1901_v29 = vld [vmem:[%s8399_s12 + $0x408] sm:$0xff] }
 0x1e6   : > { %7043 = vmatprep.mubr.msk.f32.mxu0 %vm2174_vm0, %v1892_v31  ;;  %7337 = vmatprep.mubr.msk.f32.mxu1 %vm2174_vm0, %v2088_v32  ;;  %v2097_v30 = vld [vmem:[%s8399_s12 + $0xa28] sm:$0xff]  ;;  %v1902_v31 = vld [vmem:[%s8399_s12 + $0x410] sm:$0xff] }
 0x1e7   : > { %v2098_v32 = vld [vmem:[%s8399_s12 + $0xa30] sm:$0xff] }
 0x1e8   : > { %v8957_v41 = vpop.f32.mrb[14].mxu0  ;;  %v8959_v42 = vpop.f32.mrb[14].mxu1 }
 0x1e9   : > { %v8961_v43 = vpop.f32.mrb[15].mxu0  ;;  %7044 = vmatmul.mubr.msk.f32.gmra.mrb[120].mxu0 %vm2174_vm0, %v1893_v37  ;;  %v8964_v44 = vpop.f32.mrb[15].mxu1  ;;  %7338 = vmatmul.mubr.msk.f32.gmra.mrb[120].mxu1 %vm2174_vm0, %v2089_v38 }
 0x1ea   : > { %7046 = vmatprep.mubr.msk.f32.mxu0 %vm2174_vm0, %v1894_v39  ;;  %7340 = vmatprep.mubr.msk.f32.mxu1 %vm2174_vm0, %v2090_v40 }
 0x1ec   : > { %v8973_v53 = vpop.f32.mrb[16].mxu0  ;;  %v8975_v54 = vpop.f32.mrb[16].mxu1 }
 0x1ed   : > { %v8977_v55 = vpop.f32.mrb[17].mxu0  ;;  %7047 = vmatmul.mubr.msk.f32.gmra.mrb[122].mxu0 %vm2174_vm0, %v1895_v45  ;;  %v8980_v56 = vpop.f32.mrb[17].mxu1  ;;  %7341 = vmatmul.mubr.msk.f32.gmra.mrb[122].mxu1 %vm2174_vm0, %v2091_v46  ;;  %v1903_v45 = vld [vmem:[%s8399_s12 + $0x418] sm:$0xff] }
 0x1ee   : > { %7049 = vmatprep.mubr.msk.f32.mxu0 %vm2174_vm0, %v1896_v47  ;;  %7343 = vmatprep.mubr.msk.f32.mxu1 %vm2174_vm0, %v2092_v48  ;;  %v2099_v46 = vld [vmem:[%s8399_s12 + $0xa38] sm:$0xff]  ;;  %v1904_v47 = vld [vmem:[%s8399_s12 + $0x420] sm:$0xff] }
 0x1ef   : > { %v2100_v48 = vld [vmem:[%s8399_s12 + $0xa40] sm:$0xff] }
 0x1f0   : > { %v8989_v5 = vpop.f32.mrb[18].mxu0  ;;  %v8991_v6 = vpop.f32.mrb[18].mxu1 }
 0x1f1   : > { %v8993_v7 = vpop.f32.mrb[19].mxu0  ;;  %7050 = vmatmul.mubr.msk.f32.gmra.mrb[124].mxu0 %vm2174_vm0, %v1897_v61  ;;  %v8996_v8 = vpop.f32.mrb[19].mxu1  ;;  %7344 = vmatmul.mubr.msk.f32.gmra.mrb[124].mxu1 %vm2174_vm0, %v2093_v62 }
 0x1f2   : > { %7052 = vmatprep.mubr.msk.f32.mxu0 %vm2174_vm0, %v1898_v63  ;;  %7346 = vmatprep.mubr.msk.f32.mxu1 %vm2174_vm0, %v2094_v0 }
 0x1f4   : > { %v9005_v21 = vpop.f32.mrb[20].mxu0  ;;  %v9007_v22 = vpop.f32.mrb[20].mxu1 }
 0x1f5   : > { %v9009_v23 = vpop.f32.mrb[21].mxu0  ;;  %7053 = vmatmul.mubr.msk.f32.gmra.mrb[126].mxu0 %vm2174_vm0, %v1899_v13  ;;  %v9012_v24 = vpop.f32.mrb[21].mxu1  ;;  %7347 = vmatmul.mubr.msk.f32.gmra.mrb[126].mxu1 %vm2174_vm0, %v2095_v14  ;;  %v1905_v13 = vld [vmem:[%s8399_s12 + $0x428] sm:$0xff] }
 0x1f6   : > { %7055 = vmatprep.mubr.msk.f32.mxu0 %vm2174_vm0, %v1900_v15  ;;  %7349 = vmatprep.mubr.msk.f32.mxu1 %vm2174_vm0, %v2096_v16  ;;  %v2101_v14 = vld [vmem:[%s8399_s12 + $0xa48] sm:$0xff]  ;;  %v1906_v15 = vld [vmem:[%s8399_s12 + $0x430] sm:$0xff] }
 0x1f7   : > { %v2102_v16 = vld [vmem:[%s8399_s12 + $0xa50] sm:$0xff] }
 0x1f8   : > { %v9021_v37 = vpop.f32.mrb[22].mxu0  ;;  %v9023_v38 = vpop.f32.mrb[22].mxu1 }
 0x1f9   : > { %v9025_v39 = vpop.f32.mrb[23].mxu0  ;;  %7056 = vmatmul.mubr.msk.f32.gmra.mrb[128].mxu0 %vm2174_vm0, %v1901_v29  ;;  %v9028_v40 = vpop.f32.mrb[23].mxu1  ;;  %7350 = vmatmul.mubr.msk.f32.gmra.mrb[128].mxu1 %vm2174_vm0, %v2097_v30 }
 0x1fa   : > { %7058 = vmatprep.mubr.msk.f32.mxu0 %vm2174_vm0, %v1902_v31  ;;  %7352 = vmatprep.mubr.msk.f32.mxu1 %vm2174_vm0, %v2098_v32 }
 0x1fc   : > { %v9037_v61 = vpop.f32.mrb[24].mxu0  ;;  %v9039_v62 = vpop.f32.mrb[24].mxu1 }
 0x1fd   : > { %v9041_v63 = vpop.f32.mrb[25].mxu0  ;;  %7059 = vmatmul.mubr.msk.f32.gmra.mrb[130].mxu0 %vm2174_vm0, %v1903_v45  ;;  %v9044_v0 = vpop.f32.mrb[25].mxu1  ;;  %7353 = vmatmul.mubr.msk.f32.gmra.mrb[130].mxu1 %vm2174_vm0, %v2099_v46  ;;  %v1907_v45 = vld [vmem:[%s8399_s12 + $0x438] sm:$0xff] }
 0x1fe   : > { %10012 = vst [vmem:[#allocation3_spill] sm:$0xff] %v9041_v63  ;;  %10013 = vst [vmem:[#allocation4_spill] sm:$0xff] %v9044_v0  ;;  %7061 = vmatprep.mubr.msk.f32.mxu0 %vm2174_vm0, %v1904_v47  ;;  %7355 = vmatprep.mubr.msk.f32.mxu1 %vm2174_vm0, %v2100_v48  ;;  %v2103_v46 = vld [vmem:[%s8399_s12 + $0xa58] sm:$0xff]  ;;  %v1908_v47 = vld [vmem:[%s8399_s12 + $0x440] sm:$0xff] }
 0x1ff   : > { %v2104_v48 = vld [vmem:[%s8399_s12 + $0xa60] sm:$0xff] }
 0x200   : > { %v9053_v29 = vpop.f32.mrb[26].mxu0  ;;  %v9055_v30 = vpop.f32.mrb[26].mxu1 }
 0x201   : > { %10014 = vst [vmem:[#allocation5_spill] sm:$0xff] %v9053_v29  ;;  %10015 = vst [vmem:[#allocation6_spill] sm:$0xff] %v9055_v30  ;;  %v9057_v31 = vpop.f32.mrb[27].mxu0  ;;  %7062 = vmatmul.mubr.msk.f32.gmra.mrb[132].mxu0 %vm2174_vm0, %v1905_v13  ;;  %v9060_v32 = vpop.f32.mrb[27].mxu1  ;;  %7356 = vmatmul.mubr.msk.f32.gmra.mrb[132].mxu1 %vm2174_vm0, %v2101_v14 }
 0x202   : > { %10016 = vst [vmem:[#allocation7_spill] sm:$0xff] %v9057_v31  ;;  %10017 = vst [vmem:[#allocation8_spill] sm:$0xff] %v9060_v32  ;;  %7064 = vmatprep.mubr.msk.f32.mxu0 %vm2174_vm0, %v1906_v15  ;;  %7358 = vmatprep.mubr.msk.f32.mxu1 %vm2174_vm0, %v2102_v16  ;;  %v1909_v15 = vld [vmem:[%s8399_s12 + $0x448] sm:$0xff] }
 0x203   : > { %v2105_v16 = vld [vmem:[%s8399_s12 + $0xa68] sm:$0xff] }
 0x204   : > { %v9069_v30 = vpop.f32.mrb[28].mxu0  ;;  %v9071_v31 = vpop.f32.mrb[28].mxu1 }
 0x205   : > { %10018 = vst [vmem:[#allocation9_spill] sm:$0xff] %v9069_v30  ;;  %10019 = vst [vmem:[#allocation10_spill] sm:$0xff] %v9071_v31  ;;  %v9073_v13 = vpop.f32.mrb[29].mxu0  ;;  %7065 = vmatmul.mubr.msk.f32.gmra.mrb[134].mxu0 %vm2174_vm0, %v1907_v45  ;;  %v9076_v14 = vpop.f32.mrb[29].mxu1  ;;  %7359 = vmatmul.mubr.msk.f32.gmra.mrb[134].mxu1 %vm2174_vm0, %v2103_v46  ;;  %v1910_v30 = vld [vmem:[%s8399_s12 + $0x450] sm:$0xff] }
 0x206   : > { %10020 = vst [vmem:[#allocation11_spill] sm:$0xff] %v9073_v13  ;;  %10021 = vst [vmem:[#allocation12_spill] sm:$0xff] %v9076_v14  ;;  %7067 = vmatprep.mubr.msk.f32.mxu0 %vm2174_vm0, %v1908_v47  ;;  %7361 = vmatprep.mubr.msk.f32.mxu1 %vm2174_vm0, %v2104_v48  ;;  %v2106_v31 = vld [vmem:[%s8399_s12 + $0xa70] sm:$0xff]  ;;  %v1911_v47 = vld [vmem:[%s8399_s12 + $0x458] sm:$0xff] }
 0x207   : > { %v2107_v48 = vld [vmem:[%s8399_s12 + $0xa78] sm:$0xff] }
 0x208   : > { %v9085_v32 = vpop.f32.mrb[30].mxu0  ;;  %v9087_v13 = vpop.f32.mrb[30].mxu1 }
 0x209   : > { %10022 = vst [vmem:[#allocation13_spill] sm:$0xff] %v9085_v32  ;;  %10023 = vst [vmem:[#allocation14_spill] sm:$0xff] %v9087_v13  ;;  %v9089_v45 = vpop.f32.mrb[31].mxu0  ;;  %7068 = vmatmul.mubr.msk.f32.gmra.mrb[136].mxu0 %vm2174_vm0, %v1909_v15  ;;  %v9092_v46 = vpop.f32.mrb[31].mxu1  ;;  %7362 = vmatmul.mubr.msk.f32.gmra.mrb[136].mxu1 %vm2174_vm0, %v2105_v16  ;;  %v1912_v32 = vld [vmem:[%s8399_s12 + $0x460] sm:$0xff] }
 0x20a   : > { %10024 = vst [vmem:[#allocation15_spill] sm:$0xff] %v9089_v45  ;;  %10025 = vst [vmem:[#allocation16_spill] sm:$0xff] %v9092_v46  ;;  %7070 = vmatprep.mubr.msk.f32.mxu0 %vm2174_vm0, %v1910_v30  ;;  %7364 = vmatprep.mubr.msk.f32.mxu1 %vm2174_vm0, %v2106_v31  ;;  %v2108_v13 = vld [vmem:[%s8399_s12 + $0xa80] sm:$0xff]  ;;  %v1913_v30 = vld [vmem:[%s8399_s12 + $0x468] sm:$0xff] }
 0x20b   : > { %v2109_v31 = vld [vmem:[%s8399_s12 + $0xa88] sm:$0xff] }
 0x20c   : > { %v9101_v14 = vpop.f32.mrb[32].mxu0  ;;  %v9103_v45 = vpop.f32.mrb[32].mxu1 }
 0x20d   : > { %10026 = vst [vmem:[#allocation17_spill] sm:$0xff] %v9101_v14  ;;  %10027 = vst [vmem:[#allocation18_spill] sm:$0xff] %v9103_v45  ;;  %v9105_v15 = vpop.f32.mrb[33].mxu0  ;;  %7071 = vmatmul.mubr.msk.f32.gmra.mrb[138].mxu0 %vm2174_vm0, %v1911_v47  ;;  %v9108_v16 = vpop.f32.mrb[33].mxu1  ;;  %7365 = vmatmul.mubr.msk.f32.gmra.mrb[138].mxu1 %vm2174_vm0, %v2107_v48  ;;  %v1914_v14 = vld [vmem:[%s8399_s12 + $0x470] sm:$0xff] }
 0x20e   : > { %10028 = vst [vmem:[#allocation19_spill] sm:$0xff] %v9105_v15  ;;  %10029 = vst [vmem:[#allocation20_spill] sm:$0xff] %v9108_v16  ;;  %7073 = vmatprep.mubr.msk.f32.mxu0 %vm2174_vm0, %v1912_v32  ;;  %7367 = vmatprep.mubr.msk.f32.mxu1 %vm2174_vm0, %v2108_v13  ;;  %v2110_v45 = vld [vmem:[%s8399_s12 + $0xa90] sm:$0xff]  ;;  %v1915_v32 = vld [vmem:[%s8399_s12 + $0x478] sm:$0xff] }
 0x20f   : > { %v2111_v13 = vld [vmem:[%s8399_s12 + $0xa98] sm:$0xff] }
 0x210   : > { %v9117_v46 = vpop.f32.mrb[34].mxu0  ;;  %v9119_v15 = vpop.f32.mrb[34].mxu1 }
 0x211   : > { %10030 = vst [vmem:[#allocation21_spill] sm:$0xff] %v9117_v46  ;;  %10031 = vst [vmem:[#allocation22_spill] sm:$0xff] %v9119_v15  ;;  %v9121_v47 = vpop.f32.mrb[35].mxu0  ;;  %7074 = vmatmul.mubr.msk.f32.gmra.mrb[140].mxu0 %vm2174_vm0, %v1913_v30  ;;  %v9124_v48 = vpop.f32.mrb[35].mxu1  ;;  %7368 = vmatmul.mubr.msk.f32.gmra.mrb[140].mxu1 %vm2174_vm0, %v2109_v31  ;;  %v1916_v46 = vld [vmem:[%s8399_s12 + $0x480] sm:$0xff] }
 0x212   : > { %10032 = vst [vmem:[#allocation23_spill] sm:$0xff] %v9121_v47  ;;  %10033 = vst [vmem:[#allocation24_spill] sm:$0xff] %v9124_v48  ;;  %7076 = vmatprep.mubr.msk.f32.mxu0 %vm2174_vm0, %v1914_v14  ;;  %7370 = vmatprep.mubr.msk.f32.mxu1 %vm2174_vm0, %v2110_v45  ;;  %v2112_v15 = vld [vmem:[%s8399_s12 + $0xaa0] sm:$0xff]  ;;  %v1917_v14 = vld [vmem:[%s8399_s12 + $0x488] sm:$0xff] }
 0x213   : > { %v2113_v45 = vld [vmem:[%s8399_s12 + $0xaa8] sm:$0xff] }
 0x214   : > { %v9133_v16 = vpop.f32.mrb[36].mxu0  ;;  %v9135_v47 = vpop.f32.mrb[36].mxu1 }
 0x215   : > { %10034 = vst [vmem:[#allocation25_spill] sm:$0xff] %v9133_v16  ;;  %10035 = vst [vmem:[#allocation26_spill] sm:$0xff] %v9135_v47  ;;  %v9137_v30 = vpop.f32.mrb[37].mxu0  ;;  %7077 = vmatmul.mubr.msk.f32.gmra.mrb[142].mxu0 %vm2174_vm0, %v1915_v32  ;;  %v9140_v31 = vpop.f32.mrb[37].mxu1  ;;  %7371 = vmatmul.mubr.msk.f32.gmra.mrb[142].mxu1 %vm2174_vm0, %v2111_v13  ;;  %v1918_v16 = vld [vmem:[%s8399_s12 + $0x490] sm:$0xff] }
 0x216   : > { %10036 = vst [vmem:[#allocation27_spill] sm:$0xff] %v9137_v30  ;;  %10037 = vst [vmem:[#allocation28_spill] sm:$0xff] %v9140_v31  ;;  %7079 = vmatprep.mubr.msk.f32.mxu0 %vm2174_vm0, %v1916_v46  ;;  %7373 = vmatprep.mubr.msk.f32.mxu1 %vm2174_vm0, %v2112_v15  ;;  %v2114_v47 = vld [vmem:[%s8399_s12 + $0xab0] sm:$0xff]  ;;  %v1919_v46 = vld [vmem:[%s8399_s12 + $0x498] sm:$0xff] }
 0x217   : > { %v2115_v15 = vld [vmem:[%s8399_s12 + $0xab8] sm:$0xff] }
 0x218   : > { %v9149_v48 = vpop.f32.mrb[38].mxu0  ;;  %v9151_v30 = vpop.f32.mrb[38].mxu1 }
 0x219   : > { %10038 = vst [vmem:[#allocation29_spill] sm:$0xff] %v9149_v48  ;;  %10039 = vst [vmem:[#allocation30_spill] sm:$0xff] %v9151_v30  ;;  %v9153_v32 = vpop.f32.mrb[39].mxu0  ;;  %7080 = vmatmul.mubr.msk.f32.gmra.mrb[144].mxu0 %vm2174_vm0, %v1917_v14  ;;  %v9156_v13 = vpop.f32.mrb[39].mxu1  ;;  %7374 = vmatmul.mubr.msk.f32.gmra.mrb[144].mxu1 %vm2174_vm0, %v2113_v45  ;;  %v1920_v48 = vld [vmem:[%s8399_s12 + $0x4a0] sm:$0xff] }
 0x21a   : > { %10040 = vst [vmem:[#allocation31_spill] sm:$0xff] %v9153_v32  ;;  %10041 = vst [vmem:[#allocation32_spill] sm:$0xff] %v9156_v13  ;;  %7082 = vmatprep.mubr.msk.f32.mxu0 %vm2174_vm0, %v1918_v16  ;;  %7376 = vmatprep.mubr.msk.f32.mxu1 %vm2174_vm0, %v2114_v47  ;;  %v2116_v30 = vld [vmem:[%s8399_s12 + $0xac0] sm:$0xff]  ;;  %v1921_v16 = vld [vmem:[%s8399_s12 + $0x4a8] sm:$0xff] }
 0x21b   : > { %v2117_v47 = vld [vmem:[%s8399_s12 + $0xac8] sm:$0xff] }
 0x21c   : > { %v9165_v31 = vpop.f32.mrb[40].mxu0  ;;  %v9167_v32 = vpop.f32.mrb[40].mxu1 }
 0x21d   : > { %10042 = vst [vmem:[#allocation33_spill] sm:$0xff] %v9165_v31  ;;  %10043 = vst [vmem:[#allocation34_spill] sm:$0xff] %v9167_v32  ;;  %v9169_v14 = vpop.f32.mrb[41].mxu0  ;;  %7083 = vmatmul.mubr.msk.f32.gmra.mrb[146].mxu0 %vm2174_vm0, %v1919_v46  ;;  %v9172_v45 = vpop.f32.mrb[41].mxu1  ;;  %7377 = vmatmul.mubr.msk.f32.gmra.mrb[146].mxu1 %vm2174_vm0, %v2115_v15  ;;  %v1922_v31 = vld [vmem:[%s8399_s12 + $0x4b0] sm:$0xff] }
 0x21e   : > { %10044 = vst [vmem:[#allocation35_spill] sm:$0xff] %v9169_v14  ;;  %10045 = vst [vmem:[#allocation36_spill] sm:$0xff] %v9172_v45  ;;  %7085 = vmatprep.mubr.msk.f32.mxu0 %vm2174_vm0, %v1920_v48  ;;  %7379 = vmatprep.mubr.msk.f32.mxu1 %vm2174_vm0, %v2116_v30  ;;  %v2118_v32 = vld [vmem:[%s8399_s12 + $0xad0] sm:$0xff]  ;;  %v1923_v48 = vld [vmem:[%s8399_s12 + $0x4b8] sm:$0xff] }
 0x21f   : > { %v2119_v30 = vld [vmem:[%s8399_s12 + $0xad8] sm:$0xff] }
 0x220   : > { %v9181_v13 = vpop.f32.mrb[42].mxu0  ;;  %v9183_v14 = vpop.f32.mrb[42].mxu1 }
 0x221   : > { %10046 = vst [vmem:[#allocation37_spill] sm:$0xff] %v9181_v13  ;;  %10047 = vst [vmem:[#allocation38_spill] sm:$0xff] %v9183_v14  ;;  %v9185_v46 = vpop.f32.mrb[43].mxu0  ;;  %7086 = vmatmul.mubr.msk.f32.gmra.mrb[148].mxu0 %vm2174_vm0, %v1921_v16  ;;  %v9188_v15 = vpop.f32.mrb[43].mxu1  ;;  %7380 = vmatmul.mubr.msk.f32.gmra.mrb[148].mxu1 %vm2174_vm0, %v2117_v47  ;;  %v1924_v13 = vld [vmem:[%s8399_s12 + $0x4c0] sm:$0xff] }
 0x222   : > { %10048 = vst [vmem:[#allocation39_spill] sm:$0xff] %v9185_v46  ;;  %10049 = vst [vmem:[#allocation40_spill] sm:$0xff] %v9188_v15  ;;  %7088 = vmatprep.mubr.msk.f32.mxu0 %vm2174_vm0, %v1922_v31  ;;  %7382 = vmatprep.mubr.msk.f32.mxu1 %vm2174_vm0, %v2118_v32  ;;  %v2120_v14 = vld [vmem:[%s8399_s12 + $0xae0] sm:$0xff]  ;;  %v1925_v31 = vld [vmem:[%s8399_s12 + $0x4c8] sm:$0xff] }
 0x223   : > { %v2121_v32 = vld [vmem:[%s8399_s12 + $0xae8] sm:$0xff] }
 0x224   : > { %v9197_v45 = vpop.f32.mrb[44].mxu0  ;;  %v9199_v46 = vpop.f32.mrb[44].mxu1 }
 0x225   : > { %10050 = vst [vmem:[#allocation41_spill] sm:$0xff] %v9197_v45  ;;  %10051 = vst [vmem:[#allocation42_spill] sm:$0xff] %v9199_v46  ;;  %v9201_v16 = vpop.f32.mrb[45].mxu0  ;;  %7089 = vmatmul.mubr.msk.f32.gmra.mrb[150].mxu0 %vm2174_vm0, %v1923_v48  ;;  %v9204_v47 = vpop.f32.mrb[45].mxu1  ;;  %7383 = vmatmul.mubr.msk.f32.gmra.mrb[150].mxu1 %vm2174_vm0, %v2119_v30  ;;  %v1926_v45 = vld [vmem:[%s8399_s12 + $0x4d0] sm:$0xff] }
 0x226   : > { %10052 = vst [vmem:[#allocation43_spill] sm:$0xff] %v9201_v16  ;;  %10053 = vst [vmem:[#allocation44_spill] sm:$0xff] %v9204_v47  ;;  %7091 = vmatprep.mubr.msk.f32.mxu0 %vm2174_vm0, %v1924_v13  ;;  %7385 = vmatprep.mubr.msk.f32.mxu1 %vm2174_vm0, %v2120_v14  ;;  %v2122_v46 = vld [vmem:[%s8399_s12 + $0xaf0] sm:$0xff]  ;;  %v1927_v13 = vld [vmem:[%s8399_s12 + $0x4d8] sm:$0xff] }
 0x227   : > { %v2123_v14 = vld [vmem:[%s8399_s12 + $0xaf8] sm:$0xff] }
 0x228   : > { %v9213_v15 = vpop.f32.mrb[46].mxu0  ;;  %v9215_v16 = vpop.f32.mrb[46].mxu1 }
 0x229   : > { %10054 = vst [vmem:[#allocation45_spill] sm:$0xff] %v9213_v15  ;;  %10055 = vst [vmem:[#allocation46_spill] sm:$0xff] %v9215_v16  ;;  %v9217_v48 = vpop.f32.mrb[47].mxu0  ;;  %7092 = vmatmul.mubr.msk.f32.gmra.mrb[152].mxu0 %vm2174_vm0, %v1925_v31  ;;  %v9220_v30 = vpop.f32.mrb[47].mxu1  ;;  %7386 = vmatmul.mubr.msk.f32.gmra.mrb[152].mxu1 %vm2174_vm0, %v2121_v32  ;;  %v1928_v15 = vld [vmem:[%s8399_s12 + $0x4e0] sm:$0xff] }
 0x22a   : > { %10056 = vst [vmem:[#allocation47_spill] sm:$0xff] %v9217_v48  ;;  %10057 = vst [vmem:[#allocation48_spill] sm:$0xff] %v9220_v30  ;;  %7094 = vmatprep.mubr.msk.f32.mxu0 %vm2174_vm0, %v1926_v45  ;;  %7388 = vmatprep.mubr.msk.f32.mxu1 %vm2174_vm0, %v2122_v46  ;;  %v2124_v16 = vld [vmem:[%s8399_s12 + $0xb00] sm:$0xff]  ;;  %v1929_v45 = vld [vmem:[%s8399_s12 + $0x4e8] sm:$0xff] }
 0x22b   : > { %v2125_v46 = vld [vmem:[%s8399_s12 + $0xb08] sm:$0xff] }
 0x22c   : > { %v9229_v47 = vpop.f32.mrb[48].mxu0  ;;  %v9231_v48 = vpop.f32.mrb[48].mxu1 }
 0x22d   : > { %10058 = vst [vmem:[#allocation49_spill] sm:$0xff] %v9229_v47  ;;  %10059 = vst [vmem:[#allocation50_spill] sm:$0xff] %v9231_v48  ;;  %v9233_v31 = vpop.f32.mrb[49].mxu0  ;;  %7095 = vmatmul.mubr.msk.f32.gmra.mrb[154].mxu0 %vm2174_vm0, %v1927_v13  ;;  %v9236_v32 = vpop.f32.mrb[49].mxu1  ;;  %7389 = vmatmul.mubr.msk.f32.gmra.mrb[154].mxu1 %vm2174_vm0, %v2123_v14  ;;  %v1930_v47 = vld [vmem:[%s8399_s12 + $0x4f0] sm:$0xff] }
 0x22e   : > { %10060 = vst [vmem:[#allocation51_spill] sm:$0xff] %v9233_v31  ;;  %10061 = vst [vmem:[#allocation52_spill] sm:$0xff] %v9236_v32  ;;  %7097 = vmatprep.mubr.msk.f32.mxu0 %vm2174_vm0, %v1928_v15  ;;  %7391 = vmatprep.mubr.msk.f32.mxu1 %vm2174_vm0, %v2124_v16  ;;  %v2126_v48 = vld [vmem:[%s8399_s12 + $0xb10] sm:$0xff]  ;;  %v1931_v15 = vld [vmem:[%s8399_s12 + $0x4f8] sm:$0xff] }
 0x22f   : > { %v2127_v16 = vld [vmem:[%s8399_s12 + $0xb18] sm:$0xff] }
 0x230   : > { %v9245_v30 = vpop.f32.mrb[50].mxu0  ;;  %v9247_v31 = vpop.f32.mrb[50].mxu1 }
 0x231   : > { %10062 = vst [vmem:[#allocation53_spill] sm:$0xff] %v9245_v30  ;;  %10063 = vst [vmem:[#allocation54_spill] sm:$0xff] %v9247_v31  ;;  %v9249_v13 = vpop.f32.mrb[51].mxu0  ;;  %7098 = vmatmul.mubr.msk.f32.gmra.mrb[156].mxu0 %vm2174_vm0, %v1929_v45  ;;  %v9252_v14 = vpop.f32.mrb[51].mxu1  ;;  %7392 = vmatmul.mubr.msk.f32.gmra.mrb[156].mxu1 %vm2174_vm0, %v2125_v46  ;;  %v1932_v30 = vld [vmem:[%s8399_s12 + $0x500] sm:$0xff] }
 0x232   : > { %10064 = vst [vmem:[#allocation55_spill] sm:$0xff] %v9249_v13  ;;  %10065 = vst [vmem:[#allocation56_spill] sm:$0xff] %v9252_v14  ;;  %7100 = vmatprep.mubr.msk.f32.mxu0 %vm2174_vm0, %v1930_v47  ;;  %7394 = vmatprep.mubr.msk.f32.mxu1 %vm2174_vm0, %v2126_v48  ;;  %v2128_v31 = vld [vmem:[%s8399_s12 + $0xb20] sm:$0xff]  ;;  %v1933_v47 = vld [vmem:[%s8399_s12 + $0x508] sm:$0xff] }
 0x233   : > { %v2129_v48 = vld [vmem:[%s8399_s12 + $0xb28] sm:$0xff] }
 0x234   : > { %v9261_v32 = vpop.f32.mrb[52].mxu0  ;;  %v9263_v13 = vpop.f32.mrb[52].mxu1 }
 0x235   : > { %10066 = vst [vmem:[#allocation57_spill] sm:$0xff] %v9261_v32  ;;  %10067 = vst [vmem:[#allocation58_spill] sm:$0xff] %v9263_v13  ;;  %v9265_v45 = vpop.f32.mrb[53].mxu0  ;;  %7101 = vmatmul.mubr.msk.f32.gmra.mrb[158].mxu0 %vm2174_vm0, %v1931_v15  ;;  %v9268_v46 = vpop.f32.mrb[53].mxu1  ;;  %7395 = vmatmul.mubr.msk.f32.gmra.mrb[158].mxu1 %vm2174_vm0, %v2127_v16  ;;  %v1934_v32 = vld [vmem:[%s8399_s12 + $0x510] sm:$0xff] }
 0x236   : > { %10068 = vst [vmem:[#allocation59_spill] sm:$0xff] %v9265_v45  ;;  %10069 = vst [vmem:[#allocation60_spill] sm:$0xff] %v9268_v46  ;;  %7103 = vmatprep.mubr.msk.f32.mxu0 %vm2174_vm0, %v1932_v30  ;;  %7397 = vmatprep.mubr.msk.f32.mxu1 %vm2174_vm0, %v2128_v31  ;;  %v2130_v13 = vld [vmem:[%s8399_s12 + $0xb30] sm:$0xff]  ;;  %v1935_v30 = vld [vmem:[%s8399_s12 + $0x518] sm:$0xff] }
 0x237   : > { %v2131_v31 = vld [vmem:[%s8399_s12 + $0xb38] sm:$0xff] }
 0x238   : > { %v9277_v14 = vpop.f32.mrb[54].mxu0  ;;  %v9279_v45 = vpop.f32.mrb[54].mxu1 }
 0x239   : > { %10070 = vst [vmem:[#allocation61_spill] sm:$0xff] %v9277_v14  ;;  %10071 = vst [vmem:[#allocation62_spill] sm:$0xff] %v9279_v45  ;;  %v9281_v15 = vpop.f32.mrb[55].mxu0  ;;  %7104 = vmatmul.mubr.msk.f32.gmra.mrb[160].mxu0 %vm2174_vm0, %v1933_v47  ;;  %v9284_v16 = vpop.f32.mrb[55].mxu1  ;;  %7398 = vmatmul.mubr.msk.f32.gmra.mrb[160].mxu1 %vm2174_vm0, %v2129_v48  ;;  %v1936_v14 = vld [vmem:[%s8399_s12 + $0x520] sm:$0xff] }
 0x23a   : > { %10072 = vst [vmem:[#allocation63_spill] sm:$0xff] %v9281_v15  ;;  %10073 = vst [vmem:[#allocation64_spill] sm:$0xff] %v9284_v16  ;;  %7106 = vmatprep.mubr.msk.f32.mxu0 %vm2174_vm0, %v1934_v32  ;;  %7400 = vmatprep.mubr.msk.f32.mxu1 %vm2174_vm0, %v2130_v13  ;;  %v2132_v45 = vld [vmem:[%s8399_s12 + $0xb40] sm:$0xff]  ;;  %v1937_v32 = vld [vmem:[%s8399_s12 + $0x528] sm:$0xff] }
 0x23b   : > { %v2133_v13 = vld [vmem:[%s8399_s12 + $0xb48] sm:$0xff] }
 0x23c   : > { %v9293_v46 = vpop.f32.mrb[56].mxu0  ;;  %v9295_v15 = vpop.f32.mrb[56].mxu1 }
 0x23d   : > { %10074 = vst [vmem:[#allocation65_spill] sm:$0xff] %v9293_v46  ;;  %10075 = vst [vmem:[#allocation66_spill] sm:$0xff] %v9295_v15  ;;  %v9297_v47 = vpop.f32.mrb[57].mxu0  ;;  %7107 = vmatmul.mubr.msk.f32.gmra.mrb[162].mxu0 %vm2174_vm0, %v1935_v30  ;;  %v9300_v48 = vpop.f32.mrb[57].mxu1  ;;  %7401 = vmatmul.mubr.msk.f32.gmra.mrb[162].mxu1 %vm2174_vm0, %v2131_v31  ;;  %v1938_v46 = vld [vmem:[%s8399_s12 + $0x530] sm:$0xff] }
 0x23e   : > { %10076 = vst [vmem:[#allocation67_spill] sm:$0xff] %v9297_v47  ;;  %10077 = vst [vmem:[#allocation68_spill] sm:$0xff] %v9300_v48  ;;  %7109 = vmatprep.mubr.msk.f32.mxu0 %vm2174_vm0, %v1936_v14  ;;  %7403 = vmatprep.mubr.msk.f32.mxu1 %vm2174_vm0, %v2132_v45  ;;  %v2134_v15 = vld [vmem:[%s8399_s12 + $0xb50] sm:$0xff]  ;;  %v1939_v14 = vld [vmem:[%s8399_s12 + $0x538] sm:$0xff] }
 0x23f   : > { %v2135_v45 = vld [vmem:[%s8399_s12 + $0xb58] sm:$0xff] }
 0x240   : > { %v9309_v16 = vpop.f32.mrb[58].mxu0  ;;  %v9311_v47 = vpop.f32.mrb[58].mxu1 }
 0x241   : > { %10078 = vst [vmem:[#allocation69_spill] sm:$0xff] %v9309_v16  ;;  %10079 = vst [vmem:[#allocation70_spill] sm:$0xff] %v9311_v47  ;;  %v9313_v30 = vpop.f32.mrb[59].mxu0  ;;  %7110 = vmatmul.mubr.msk.f32.gmra.mrb[164].mxu0 %vm2174_vm0, %v1937_v32  ;;  %v9316_v31 = vpop.f32.mrb[59].mxu1  ;;  %7404 = vmatmul.mubr.msk.f32.gmra.mrb[164].mxu1 %vm2174_vm0, %v2133_v13  ;;  %v1940_v16 = vld [vmem:[%s8399_s12 + $0x540] sm:$0xff] }
 0x242   : > { %10080 = vst [vmem:[#allocation71_spill] sm:$0xff] %v9313_v30  ;;  %10081 = vst [vmem:[#allocation72_spill] sm:$0xff] %v9316_v31  ;;  %7112 = vmatprep.mubr.msk.f32.mxu0 %vm2174_vm0, %v1938_v46  ;;  %7406 = vmatprep.mubr.msk.f32.mxu1 %vm2174_vm0, %v2134_v15  ;;  %v2136_v47 = vld [vmem:[%s8399_s12 + $0xb60] sm:$0xff]  ;;  %v1941_v46 = vld [vmem:[%s8399_s12 + $0x548] sm:$0xff] }
 0x243   : > { %v2137_v15 = vld [vmem:[%s8399_s12 + $0xb68] sm:$0xff] }
 0x244   : > { %v9325_v48 = vpop.f32.mrb[60].mxu0  ;;  %v9327_v30 = vpop.f32.mrb[60].mxu1 }
 0x245   : > { %10082 = vst [vmem:[#allocation73_spill] sm:$0xff] %v9325_v48  ;;  %10083 = vst [vmem:[#allocation74_spill] sm:$0xff] %v9327_v30  ;;  %v9329_v32 = vpop.f32.mrb[61].mxu0  ;;  %7113 = vmatmul.mubr.msk.f32.gmra.mrb[166].mxu0 %vm2174_vm0, %v1939_v14  ;;  %v9332_v13 = vpop.f32.mrb[61].mxu1  ;;  %7407 = vmatmul.mubr.msk.f32.gmra.mrb[166].mxu1 %vm2174_vm0, %v2135_v45  ;;  %v1942_v48 = vld [vmem:[%s8399_s12 + $0x550] sm:$0xff] }
 0x246   : > { %10084 = vst [vmem:[#allocation75_spill] sm:$0xff] %v9329_v32  ;;  %10085 = vst [vmem:[#allocation76_spill] sm:$0xff] %v9332_v13  ;;  %7115 = vmatprep.mubr.msk.f32.mxu0 %vm2174_vm0, %v1940_v16  ;;  %7409 = vmatprep.mubr.msk.f32.mxu1 %vm2174_vm0, %v2136_v47  ;;  %v2138_v30 = vld [vmem:[%s8399_s12 + $0xb70] sm:$0xff]  ;;  %v1943_v16 = vld [vmem:[%s8399_s12 + $0x558] sm:$0xff] }
 0x247   : > { %v2139_v47 = vld [vmem:[%s8399_s12 + $0xb78] sm:$0xff] }
 0x248   : > { %v9341_v31 = vpop.f32.mrb[62].mxu0  ;;  %v9343_v32 = vpop.f32.mrb[62].mxu1 }
 0x249   : > { %10086 = vst [vmem:[#allocation77_spill] sm:$0xff] %v9341_v31  ;;  %10087 = vst [vmem:[#allocation78_spill] sm:$0xff] %v9343_v32  ;;  %v9345_v14 = vpop.f32.mrb[63].mxu0  ;;  %7116 = vmatmul.mubr.msk.f32.gmra.mrb[168].mxu0 %vm2174_vm0, %v1941_v46  ;;  %v9348_v45 = vpop.f32.mrb[63].mxu1  ;;  %7410 = vmatmul.mubr.msk.f32.gmra.mrb[168].mxu1 %vm2174_vm0, %v2137_v15  ;;  %v1944_v31 = vld [vmem:[%s8399_s12 + $0x560] sm:$0xff] }
 0x24a   : > { %10088 = vst [vmem:[#allocation79_spill] sm:$0xff] %v9345_v14  ;;  %10089 = vst [vmem:[#allocation80_spill] sm:$0xff] %v9348_v45  ;;  %7118 = vmatprep.mubr.msk.f32.mxu0 %vm2174_vm0, %v1942_v48  ;;  %7412 = vmatprep.mubr.msk.f32.mxu1 %vm2174_vm0, %v2138_v30  ;;  %v2140_v32 = vld [vmem:[%s8399_s12 + $0xb80] sm:$0xff]  ;;  %v1945_v48 = vld [vmem:[%s8399_s12 + $0x568] sm:$0xff] }
 0x24b   : > { %v2141_v30 = vld [vmem:[%s8399_s12 + $0xb88] sm:$0xff] }
 0x24c   : > { %v9357_v13 = vpop.f32.mrb[64].mxu0  ;;  %v9359_v14 = vpop.f32.mrb[64].mxu1 }
 0x24d   : > { %10090 = vst [vmem:[#allocation81_spill] sm:$0xff] %v9357_v13  ;;  %10091 = vst [vmem:[#allocation82_spill] sm:$0xff] %v9359_v14  ;;  %v9361_v46 = vpop.f32.mrb[65].mxu0  ;;  %7119 = vmatmul.mubr.msk.f32.gmra.mrb[170].mxu0 %vm2174_vm0, %v1943_v16  ;;  %v9364_v15 = vpop.f32.mrb[65].mxu1  ;;  %7413 = vmatmul.mubr.msk.f32.gmra.mrb[170].mxu1 %vm2174_vm0, %v2139_v47  ;;  %v1946_v13 = vld [vmem:[%s8399_s12 + $0x570] sm:$0xff] }
 0x24e   : > { %10092 = vst [vmem:[#allocation83_spill] sm:$0xff] %v9361_v46  ;;  %10093 = vst [vmem:[#allocation84_spill] sm:$0xff] %v9364_v15  ;;  %7121 = vmatprep.mubr.msk.f32.mxu0 %vm2174_vm0, %v1944_v31  ;;  %7415 = vmatprep.mubr.msk.f32.mxu1 %vm2174_vm0, %v2140_v32  ;;  %v2142_v14 = vld [vmem:[%s8399_s12 + $0xb90] sm:$0xff]  ;;  %v1947_v31 = vld [vmem:[%s8399_s12 + $0x578] sm:$0xff] }
 0x24f   : > { %v2143_v32 = vld [vmem:[%s8399_s12 + $0xb98] sm:$0xff] }
 0x250   : > { %v9373_v45 = vpop.f32.mrb[66].mxu0  ;;  %v9375_v46 = vpop.f32.mrb[66].mxu1 }
 0x251   : > { %10094 = vst [vmem:[#allocation85_spill] sm:$0xff] %v9373_v45  ;;  %10095 = vst [vmem:[#allocation86_spill] sm:$0xff] %v9375_v46  ;;  %v9377_v16 = vpop.f32.mrb[67].mxu0  ;;  %7122 = vmatmul.mubr.msk.f32.gmra.mrb[172].mxu0 %vm2174_vm0, %v1945_v48  ;;  %v9380_v47 = vpop.f32.mrb[67].mxu1  ;;  %7416 = vmatmul.mubr.msk.f32.gmra.mrb[172].mxu1 %vm2174_vm0, %v2141_v30  ;;  %v1948_v45 = vld [vmem:[%s8399_s12 + $0x580] sm:$0xff] }
 0x252   : > { %10096 = vst [vmem:[#allocation87_spill] sm:$0xff] %v9377_v16  ;;  %10097 = vst [vmem:[#allocation88_spill] sm:$0xff] %v9380_v47  ;;  %7124 = vmatprep.mubr.msk.f32.mxu0 %vm2174_vm0, %v1946_v13  ;;  %7418 = vmatprep.mubr.msk.f32.mxu1 %vm2174_vm0, %v2142_v14  ;;  %v2144_v46 = vld [vmem:[%s8399_s12 + $0xba0] sm:$0xff]  ;;  %v1949_v13 = vld [vmem:[%s8399_s12 + $0x588] sm:$0xff] }
 0x253   : > { %v2145_v14 = vld [vmem:[%s8399_s12 + $0xba8] sm:$0xff] }
 0x254   : > { %v9389_v15 = vpop.f32.mrb[68].mxu0  ;;  %v9391_v16 = vpop.f32.mrb[68].mxu1 }
 0x255   : > { %10098 = vst [vmem:[#allocation89_spill] sm:$0xff] %v9389_v15  ;;  %10099 = vst [vmem:[#allocation90_spill] sm:$0xff] %v9391_v16  ;;  %v9393_v48 = vpop.f32.mrb[69].mxu0  ;;  %7125 = vmatmul.mubr.msk.f32.gmra.mrb[174].mxu0 %vm2174_vm0, %v1947_v31  ;;  %v9396_v30 = vpop.f32.mrb[69].mxu1  ;;  %7419 = vmatmul.mubr.msk.f32.gmra.mrb[174].mxu1 %vm2174_vm0, %v2143_v32  ;;  %v1950_v15 = vld [vmem:[%s8399_s12 + $0x590] sm:$0xff] }
 0x256   : > { %10100 = vst [vmem:[#allocation91_spill] sm:$0xff] %v9393_v48  ;;  %10101 = vst [vmem:[#allocation92_spill] sm:$0xff] %v9396_v30  ;;  %7127 = vmatprep.mubr.msk.f32.mxu0 %vm2174_vm0, %v1948_v45  ;;  %7421 = vmatprep.mubr.msk.f32.mxu1 %vm2174_vm0, %v2144_v46  ;;  %v2146_v16 = vld [vmem:[%s8399_s12 + $0xbb0] sm:$0xff]  ;;  %v1951_v45 = vld [vmem:[%s8399_s12 + $0x598] sm:$0xff] }
 0x257   : > { %v2147_v46 = vld [vmem:[%s8399_s12 + $0xbb8] sm:$0xff] }
 0x258   : > { %v9405_v47 = vpop.f32.mrb[70].mxu0  ;;  %v9407_v48 = vpop.f32.mrb[70].mxu1 }
 0x259   : > { %10102 = vst [vmem:[#allocation93_spill] sm:$0xff] %v9405_v47  ;;  %10103 = vst [vmem:[#allocation94_spill] sm:$0xff] %v9407_v48  ;;  %v9409_v31 = vpop.f32.mrb[71].mxu0  ;;  %7128 = vmatmul.mubr.msk.f32.gmra.mrb[176].mxu0 %vm2174_vm0, %v1949_v13  ;;  %v9412_v32 = vpop.f32.mrb[71].mxu1  ;;  %7422 = vmatmul.mubr.msk.f32.gmra.mrb[176].mxu1 %vm2174_vm0, %v2145_v14  ;;  %v1952_v47 = vld [vmem:[%s8399_s12 + $0x5a0] sm:$0xff] }
 0x25a   : > { %10104 = vst [vmem:[#allocation95_spill] sm:$0xff] %v9409_v31  ;;  %10105 = vst [vmem:[#allocation96_spill] sm:$0xff] %v9412_v32  ;;  %7130 = vmatprep.mubr.msk.f32.mxu0 %vm2174_vm0, %v1950_v15  ;;  %7424 = vmatprep.mubr.msk.f32.mxu1 %vm2174_vm0, %v2146_v16  ;;  %v2148_v48 = vld [vmem:[%s8399_s12 + $0xbc0] sm:$0xff]  ;;  %v1953_v15 = vld [vmem:[%s8399_s12 + $0x5a8] sm:$0xff] }
 0x25b   : > { %v2149_v16 = vld [vmem:[%s8399_s12 + $0xbc8] sm:$0xff] }
 0x25c   : > { %v9421_v30 = vpop.f32.mrb[72].mxu0  ;;  %v9423_v31 = vpop.f32.mrb[72].mxu1 }
 0x25d   : > { %10106 = vst [vmem:[#allocation97_spill] sm:$0xff] %v9421_v30  ;;  %10107 = vst [vmem:[#allocation98_spill] sm:$0xff] %v9423_v31  ;;  %v9425_v13 = vpop.f32.mrb[73].mxu0  ;;  %7131 = vmatmul.mubr.msk.f32.gmra.mrb[178].mxu0 %vm2174_vm0, %v1951_v45  ;;  %v9428_v14 = vpop.f32.mrb[73].mxu1  ;;  %7425 = vmatmul.mubr.msk.f32.gmra.mrb[178].mxu1 %vm2174_vm0, %v2147_v46  ;;  %v1954_v30 = vld [vmem:[%s8399_s12 + $0x5b0] sm:$0xff] }
 0x25e   : > { %10108 = vst [vmem:[#allocation99_spill] sm:$0xff] %v9425_v13  ;;  %10109 = vst [vmem:[#allocation100_spill] sm:$0xff] %v9428_v14  ;;  %7133 = vmatprep.mubr.msk.f32.mxu0 %vm2174_vm0, %v1952_v47  ;;  %7427 = vmatprep.mubr.msk.f32.mxu1 %vm2174_vm0, %v2148_v48  ;;  %v2150_v31 = vld [vmem:[%s8399_s12 + $0xbd0] sm:$0xff]  ;;  %v1955_v47 = vld [vmem:[%s8399_s12 + $0x5b8] sm:$0xff] }
 0x25f   : > { %v2151_v48 = vld [vmem:[%s8399_s12 + $0xbd8] sm:$0xff] }
 0x260   : > { %v9437_v32 = vpop.f32.mrb[74].mxu0  ;;  %v9439_v13 = vpop.f32.mrb[74].mxu1 }
 0x261   : > { %10110 = vst [vmem:[#allocation101_spill] sm:$0xff] %v9437_v32  ;;  %10111 = vst [vmem:[#allocation102_spill] sm:$0xff] %v9439_v13  ;;  %v9441_v45 = vpop.f32.mrb[75].mxu0  ;;  %7134 = vmatmul.mubr.msk.f32.gmra.mrb[180].mxu0 %vm2174_vm0, %v1953_v15  ;;  %v9444_v46 = vpop.f32.mrb[75].mxu1  ;;  %7428 = vmatmul.mubr.msk.f32.gmra.mrb[180].mxu1 %vm2174_vm0, %v2149_v16  ;;  %v1956_v32 = vld [vmem:[%s8399_s12 + $0x5c0] sm:$0xff] }
 0x262   : > { %10112 = vst [vmem:[#allocation103_spill] sm:$0xff] %v9441_v45  ;;  %10113 = vst [vmem:[#allocation104_spill] sm:$0xff] %v9444_v46  ;;  %7136 = vmatprep.mubr.msk.f32.mxu0 %vm2174_vm0, %v1954_v30  ;;  %7430 = vmatprep.mubr.msk.f32.mxu1 %vm2174_vm0, %v2150_v31  ;;  %v2152_v13 = vld [vmem:[%s8399_s12 + $0xbe0] sm:$0xff]  ;;  %v1957_v30 = vld [vmem:[%s8399_s12 + $0x5c8] sm:$0xff] }
 0x263   : > { %v2153_v31 = vld [vmem:[%s8399_s12 + $0xbe8] sm:$0xff] }
 0x264   : > { %v9453_v14 = vpop.f32.mrb[76].mxu0  ;;  %v9455_v45 = vpop.f32.mrb[76].mxu1 }
 0x265   : > { %10114 = vst [vmem:[#allocation105_spill] sm:$0xff] %v9453_v14  ;;  %10115 = vst [vmem:[#allocation106_spill] sm:$0xff] %v9455_v45  ;;  %v9457_v15 = vpop.f32.mrb[77].mxu0  ;;  %7137 = vmatmul.mubr.msk.f32.gmra.mrb[182].mxu0 %vm2174_vm0, %v1955_v47  ;;  %v9460_v16 = vpop.f32.mrb[77].mxu1  ;;  %7431 = vmatmul.mubr.msk.f32.gmra.mrb[182].mxu1 %vm2174_vm0, %v2151_v48  ;;  %v1958_v14 = vld [vmem:[%s8399_s12 + $0x5d0] sm:$0xff] }
 0x266   : > { %10116 = vst [vmem:[#allocation107_spill] sm:$0xff] %v9457_v15  ;;  %10117 = vst [vmem:[#allocation108_spill] sm:$0xff] %v9460_v16  ;;  %7139 = vmatprep.mubr.msk.f32.mxu0 %vm2174_vm0, %v1956_v32  ;;  %7433 = vmatprep.mubr.msk.f32.mxu1 %vm2174_vm0, %v2152_v13  ;;  %v2154_v45 = vld [vmem:[%s8399_s12 + $0xbf0] sm:$0xff]  ;;  %v1959_v32 = vld [vmem:[%s8399_s12 + $0x5d8] sm:$0xff] }
 0x267   : > { %v2155_v13 = vld [vmem:[%s8399_s12 + $0xbf8] sm:$0xff] }
 0x268   : > { %v9469_v46 = vpop.f32.mrb[78].mxu0  ;;  %v9471_v15 = vpop.f32.mrb[78].mxu1 }
 0x269   : > { %10118 = vst [vmem:[#allocation109_spill] sm:$0xff] %v9469_v46  ;;  %10119 = vst [vmem:[#allocation110_spill] sm:$0xff] %v9471_v15  ;;  %v9473_v47 = vpop.f32.mrb[79].mxu0  ;;  %7140 = vmatmul.mubr.msk.f32.gmra.mrb[184].mxu0 %vm2174_vm0, %v1957_v30  ;;  %v9476_v48 = vpop.f32.mrb[79].mxu1  ;;  %7434 = vmatmul.mubr.msk.f32.gmra.mrb[184].mxu1 %vm2174_vm0, %v2153_v31  ;;  %v1960_v46 = vld [vmem:[%s8399_s12 + $0x5e0] sm:$0xff] }
 0x26a   : > { %10120 = vst [vmem:[#allocation111_spill] sm:$0xff] %v9473_v47  ;;  %10121 = vst [vmem:[#allocation112_spill] sm:$0xff] %v9476_v48  ;;  %7142 = vmatprep.mubr.msk.f32.mxu0 %vm2174_vm0, %v1958_v14  ;;  %7436 = vmatprep.mubr.msk.f32.mxu1 %vm2174_vm0, %v2154_v45  ;;  %v2156_v15 = vld [vmem:[%s8399_s12 + $0xc00] sm:$0xff]  ;;  %v1961_v14 = vld [vmem:[%s8399_s12 + $0x5e8] sm:$0xff] }
 0x26b   : > { %v2157_v45 = vld [vmem:[%s8399_s12 + $0xc08] sm:$0xff] }
 0x26c   : > { %v9485_v16 = vpop.f32.mrb[80].mxu0  ;;  %v9487_v47 = vpop.f32.mrb[80].mxu1 }
 0x26d   : > { %10122 = vst [vmem:[#allocation113_spill] sm:$0xff] %v9485_v16  ;;  %10123 = vst [vmem:[#allocation114_spill] sm:$0xff] %v9487_v47  ;;  %v9489_v30 = vpop.f32.mrb[81].mxu0  ;;  %7143 = vmatmul.mubr.msk.f32.gmra.mrb[186].mxu0 %vm2174_vm0, %v1959_v32  ;;  %v9492_v31 = vpop.f32.mrb[81].mxu1  ;;  %7437 = vmatmul.mubr.msk.f32.gmra.mrb[186].mxu1 %vm2174_vm0, %v2155_v13  ;;  %v1962_v16 = vld [vmem:[%s8399_s12 + $0x5f0] sm:$0xff] }
 0x26e   : > { %10124 = vst [vmem:[#allocation115_spill] sm:$0xff] %v9489_v30  ;;  %10125 = vst [vmem:[#allocation116_spill] sm:$0xff] %v9492_v31  ;;  %7145 = vmatprep.mubr.msk.f32.mxu0 %vm2174_vm0, %v1960_v46  ;;  %7439 = vmatprep.mubr.msk.f32.mxu1 %vm2174_vm0, %v2156_v15  ;;  %v2158_v47 = vld [vmem:[%s8399_s12 + $0xc10] sm:$0xff]  ;;  %v1963_v46 = vld [vmem:[%s8399_s12 + $0x5f8] sm:$0xff] }
 0x26f   : > { %v2159_v15 = vld [vmem:[%s8399_s12 + $0xc18] sm:$0xff] }
 0x270   : > { %v9501_v48 = vpop.f32.mrb[82].mxu0  ;;  %v9503_v30 = vpop.f32.mrb[82].mxu1 }
 0x271   : > { %10126 = vst [vmem:[#allocation117_spill] sm:$0xff] %v9501_v48  ;;  %10127 = vst [vmem:[#allocation118_spill] sm:$0xff] %v9503_v30  ;;  %v9505_v32 = vpop.f32.mrb[83].mxu0  ;;  %7146 = vmatmul.mubr.msk.f32.gmra.mrb[188].mxu0 %vm2174_vm0, %v1961_v14  ;;  %v9508_v13 = vpop.f32.mrb[83].mxu1  ;;  %7440 = vmatmul.mubr.msk.f32.gmra.mrb[188].mxu1 %vm2174_vm0, %v2157_v45  ;;  %v1964_v48 = vld [vmem:[%s8399_s12 + $0x600] sm:$0xff] }
 0x272   : > { %10128 = vst [vmem:[#allocation119_spill] sm:$0xff] %v9505_v32  ;;  %10129 = vst [vmem:[#allocation120_spill] sm:$0xff] %v9508_v13  ;;  %7148 = vmatprep.mubr.msk.f32.mxu0 %vm2174_vm0, %v1962_v16  ;;  %7442 = vmatprep.mubr.msk.f32.mxu1 %vm2174_vm0, %v2158_v47  ;;  %v2160_v30 = vld [vmem:[%s8399_s12 + $0xc20] sm:$0xff]  ;;  %v1965_v16 = vld [vmem:[%s8399_s12 + $0x608] sm:$0xff] }
 0x273   : > { %v2161_v47 = vld [vmem:[%s8399_s12 + $0xc28] sm:$0xff]  ;;  %v1966_v13 = vld [vmem:[%s8399_s12 + $0x610] sm:$0xff] }
 0x274   : > { %v9517_v31 = vpop.f32.mrb[84].mxu0  ;;  %v9519_v32 = vpop.f32.mrb[84].mxu1 }
 0x275   : > { %10130 = vst [vmem:[#allocation121_spill] sm:$0xff] %v9517_v31  ;;  %10131 = vst [vmem:[#allocation122_spill] sm:$0xff] %v9519_v32  ;;  %v9521_v14 = vpop.f32.mrb[85].mxu0  ;;  %7149 = vmatmul.mubr.msk.f32.gmra.mrb[190].mxu0 %vm2174_vm0, %v1963_v46  ;;  %v9524_v45 = vpop.f32.mrb[85].mxu1  ;;  %7443 = vmatmul.mubr.msk.f32.gmra.mrb[190].mxu1 %vm2174_vm0, %v2159_v15  ;;  %v2162_v31 = vld [vmem:[%s8399_s12 + $0xc30] sm:$0xff] }
 0x276   : > { %10132 = vst [vmem:[#allocation123_spill] sm:$0xff] %v9521_v14  ;;  %10133 = vst [vmem:[#allocation124_spill] sm:$0xff] %v9524_v45  ;;  %7151 = vmatprep.mubr.msk.f32.mxu0 %vm2174_vm0, %v1964_v48  ;;  %7445 = vmatprep.mubr.msk.f32.mxu1 %vm2174_vm0, %v2160_v30  ;;  %v1967_v48 = vld [vmem:[%s8399_s12 + $0x618] sm:$0xff] }
 0x277   : > { %v2163_v30 = vld [vmem:[%s8399_s12 + $0xc38] sm:$0xff] }
 0x278   : > { %v9533_v29 = vpop.f32.mrb[86].mxu0  ;;  %v9535_v32 = vpop.f32.mrb[86].mxu1 }
 0x279   : > { %10134 = vst [vmem:[#allocation125_spill] sm:$0xff] %v9533_v29  ;;  %10135 = vst [vmem:[#allocation126_spill] sm:$0xff] %v9535_v32  ;;  %v9537_v14 = vpop.f32.mrb[87].mxu0  ;;  %7152 = vmatmul.mubr.msk.f32.gmra.mrb[192].mxu0 %vm2174_vm0, %v1965_v16  ;;  %v9540_v46 = vpop.f32.mrb[87].mxu1  ;;  %7446 = vmatmul.mubr.msk.f32.gmra.mrb[192].mxu1 %vm2174_vm0, %v2161_v47 }
 0x27a   : > { %10136 = vst [vmem:[#allocation127_spill] sm:$0xff] %v9537_v14  ;;  %10137 = vst [vmem:[#allocation128_spill] sm:$0xff] %v9540_v46  ;;  %7154 = vmatprep.mubr.msk.f32.mxu0 %vm2174_vm0, %v1966_v13  ;;  %7448 = vmatprep.mubr.msk.f32.mxu1 %vm2174_vm0, %v2162_v31 }
 0x27c   : > { %v9547_v15 = vpop.f32.mrb[88].mxu0  ;;  %v9549_v29 = vpop.f32.mrb[88].mxu1 }
 0x27d   : > { %10138 = vst [vmem:[#allocation129_spill] sm:$0xff] %v9547_v15  ;;  %10139 = vst [vmem:[#allocation130_spill] sm:$0xff] %v9549_v29  ;;  %v9551_v32 = vpop.f32.mrb[89].mxu0  ;;  %7155 = vmatmul.mubr.msk.f32.gmra.mrb[194].mxu0 %vm2174_vm0, %v1967_v48  ;;  %v9554_v16 = vpop.f32.mrb[89].mxu1  ;;  %7449 = vmatmul.mubr.msk.f32.gmra.mrb[194].mxu1 %vm2174_vm0, %v2163_v30 }
 0x27e   : > { %10140 = vst [vmem:[#allocation131_spill] sm:$0xff] %v9551_v32  ;;  %10141 = vst [vmem:[#allocation132_spill] sm:$0xff] %v9554_v16 }
 0x280   : > { %v9557_v47 = vpop.f32.mrb[90].mxu0  ;;  %v9559_v13 = vpop.f32.mrb[90].mxu1 }
 0x281   : > { %10142 = vst [vmem:[#allocation133_spill] sm:$0xff] %v9557_v47  ;;  %10143 = vst [vmem:[#allocation134_spill] sm:$0xff] %v9559_v13  ;;  %v9561_v31 = vpop.f32.mrb[91].mxu0  ;;  %v9563_v46 = vpop.f32.mrb[91].mxu1 }
 0x282   : > { %10144 = vst [vmem:[#allocation135_spill] sm:$0xff] %v9561_v31  ;;  %10145 = vst [vmem:[#allocation136_spill] sm:$0xff] %v9563_v46 }
 0x284   : > { %v9565_v14 = vpop.f32.mrb[92].mxu0  ;;  %v9567_v15 = vpop.f32.mrb[92].mxu1 }
 0x285   : > { %10146 = vst [vmem:[#allocation137_spill] sm:$0xff] %v9565_v14  ;;  %10147 = vst [vmem:[#allocation138_spill] sm:$0xff] %v9567_v15  ;;  %v9569_v29 = vpop.f32.mrb[93].mxu0  ;;  %v9571_v32 = vpop.f32.mrb[93].mxu1 }
 0x286   : > { %10148 = vst [vmem:[#allocation139_spill] sm:$0xff] %v9569_v29  ;;  %10149 = vst [vmem:[#allocation140_spill] sm:$0xff] %v9571_v32 }
 0x288   : > { %v9575_v48 = vpop.f32.mrb[94].mxu0  ;;  %v9577_v30 = vpop.f32.mrb[94].mxu1 }
 0x289   : > { %10150 = vst [vmem:[#allocation141_spill] sm:$0xff] %v9575_v48  ;;  %10151 = vst [vmem:[#allocation142_spill] sm:$0xff] %v9577_v30  ;;  %v9579_v47 = vpop.f32.mrb[95].mxu0  ;;  %v9581_v13 = vpop.f32.mrb[95].mxu1 }
 0x28a   : > { %10152 = vst [vmem:[#allocation143_spill] sm:$0xff] %v9579_v47  ;;  %10153 = vst [vmem:[#allocation144_spill] sm:$0xff] %v9581_v13  ;;  %v9596_v13 = vld [vmem:[%s10010_s2] ss:$0 sm:$0xff] }
 0x28c   : > { %v9583_v46 = vpop.f32.mrb[96].mxu0  ;;  %v9585_v14 = vpop.f32.mrb[96].mxu1 }
 0x28d   : > { %10154 = vst [vmem:[#allocation145_spill] sm:$0xff] %v9583_v46  ;;  %10155 = vst [vmem:[#allocation146_spill] sm:$0xff] %v9585_v14  ;;  %v9587_v15 = vpop.f32.mrb[97].mxu0  ;;  %v9589_v29 = vpop.f32.mrb[97].mxu1 }
 0x28e   : > { %10156 = vst [vmem:[#allocation147_spill] sm:$0xff] %v9587_v15  ;;  %10157 = vst [vmem:[#allocation148_spill] sm:$0xff] %v9589_v29 }
 0x290   : > { %v7012_v32 = vpop.f32.mrb[98].mxu0  ;;  %v7306_v31 = vpop.f32.mrb[98].mxu1 }
 0x291   : > { %v5381_v48 = vmax.f32 %v8845_v49, %v7012_v32  ;;  %v5479_v30 = vmax.f32 %v8847_v50, %v7306_v31  ;;  %v3911_v16 = vpop.f32.mrb[99].mxu0  ;;  %v4891_v47 = vpop.f32.mrb[99].mxu1 }
 0x292   : > { %v5380_v14 = vmax.f32 %v8849_v51, %v3911_v16  ;;  %v5478_v15 = vmax.f32 %v8852_v52, %v4891_v47 }
 0x293   : > { %v5577_v29 = vmax.f32 %v5381_v48, %v5479_v30 }
 0x294   : > { %v5576_v46 = vmax.f32 %v5380_v14, %v5478_v15  ;;  %v7015_v45 = vpop.f32.mrb[100].mxu0  ;;  %v7309_v0 = vpop.f32.mrb[100].mxu1 }
 0x295   : > { %v5682_v49 = vadd.f32 %v9596_v13, %v5577_v29  ;;  %v5383_v50 = vmax.f32 %v8861_v57, %v7015_v45  ;;  %v5481_v32 = vmax.f32 %v8863_v58, %v7309_v0  ;;  %v3921_v31 = vpop.f32.mrb[101].mxu0  ;;  %v4901_v63 = vpop.f32.mrb[101].mxu1 }
 0x296   : > { %v5681_v51 = vadd.f32 %v9596_v13, %v5576_v46  ;;  %v5382_v52 = vmax.f32 %v8865_v59, %v3921_v31  ;;  %v5480_v14 = vmax.f32 %v8868_v60, %v4901_v63 }
 0x297   : > { %v5780_v29 = vmax.f32 %v5682_v49, 0.0  ;;  %v5579_v15 = vmax.f32 %v5383_v50, %v5481_v32 }
 0x298   : > { %v5779_v57 = vmax.f32 %v5681_v51, 0.0  ;;  %v5578_v45 = vmax.f32 %v5382_v52, %v5480_v14  ;;  %v7018_v58 = vpop.f32.mrb[102].mxu0  ;;  %v7312_v0 = vpop.f32.mrb[102].mxu1 }
 0x299   : > { %5878 = vst [vmem:[%s9606_s5 + $0x8] sm:$0xff] %v5780_v29  ;;  %v5684_v16 = vadd.f32 %v9596_v13, %v5579_v15  ;;  %v5385_v47 = vmax.f32 %v8877_v1, %v7018_v58  ;;  %v5483_v48 = vmax.f32 %v8879_v2, %v7312_v0  ;;  %v3931_v30 = vpop.f32.mrb[103].mxu0  ;;  %v4911_v46 = vpop.f32.mrb[103].mxu1 }
 0x29a   : > { %5877 = vst [vmem:[%s9606_s5] sm:$0xff] %v5779_v57  ;;  %v5683_v59 = vadd.f32 %v9596_v13, %v5578_v45  ;;  %v5384_v60 = vmax.f32 %v8881_v3, %v3931_v30  ;;  %v5482_v63 = vmax.f32 %v8884_v4, %v4911_v46 }
 0x29b   : > { %v5782_v49 = vmax.f32 %v5684_v16, 0.0  ;;  %v5581_v50 = vmax.f32 %v5385_v47, %v5483_v48 }
 0x29c   : > { %v5781_v32 = vmax.f32 %v5683_v59, 0.0  ;;  %v5580_v31 = vmax.f32 %v5384_v60, %v5482_v63  ;;  %v7021_v51 = vpop.f32.mrb[104].mxu0  ;;  %v7315_v52 = vpop.f32.mrb[104].mxu1 }
 0x29d   : > { %5880 = vst [vmem:[%s9606_s5 + $0x18] sm:$0xff] %v5782_v49  ;;  %v5686_v1 = vadd.f32 %v9596_v13, %v5581_v50  ;;  %v5387_v2 = vmax.f32 %v8893_v9, %v7021_v51  ;;  %v5485_v14 = vmax.f32 %v8895_v10, %v7315_v52  ;;  %v3941_v29 = vpop.f32.mrb[105].mxu0  ;;  %v4921_v15 = vpop.f32.mrb[105].mxu1 }
 0x29e   : > { %5879 = vst [vmem:[%s9606_s5 + $0x10] sm:$0xff] %v5781_v32  ;;  %v5685_v3 = vadd.f32 %v9596_v13, %v5580_v31  ;;  %v5386_v4 = vmax.f32 %v8897_v11, %v3941_v29  ;;  %v5484_v57 = vmax.f32 %v8900_v12, %v4921_v15 }
 0x29f   : > { %v5784_v45 = vmax.f32 %v5686_v1, 0.0  ;;  %v5583_v58 = vmax.f32 %v5387_v2, %v5485_v14 }
 0x2a0   : > { %v5783_v0 = vmax.f32 %v5685_v3, 0.0  ;;  %v5582_v16 = vmax.f32 %v5386_v4, %v5484_v57  ;;  %v7024_v47 = vpop.f32.mrb[106].mxu0  ;;  %v7318_v48 = vpop.f32.mrb[106].mxu1 }
 0x2a1   : > { %5882 = vst [vmem:[%s9606_s5 + $0x28] sm:$0xff] %v5784_v45  ;;  %v5688_v9 = vadd.f32 %v9596_v13, %v5583_v58  ;;  %v5389_v10 = vmax.f32 %v8909_v17, %v7024_v47  ;;  %v5487_v30 = vmax.f32 %v8911_v18, %v7318_v48  ;;  %v3951_v46 = vpop.f32.mrb[107].mxu0  ;;  %v4931_v59 = vpop.f32.mrb[107].mxu1 }
 0x2a2   : > { %5881 = vst [vmem:[%s9606_s5 + $0x20] sm:$0xff] %v5783_v0  ;;  %v5687_v11 = vadd.f32 %v9596_v13, %v5582_v16  ;;  %v5388_v12 = vmax.f32 %v8913_v19, %v3951_v46  ;;  %v5486_v60 = vmax.f32 %v8916_v20, %v4931_v59 }
 0x2a3   : > { %v5786_v63 = vmax.f32 %v5688_v9, 0.0  ;;  %v5585_v49 = vmax.f32 %v5389_v10, %v5487_v30 }
 0x2a4   : > { %v5785_v50 = vmax.f32 %v5687_v11, 0.0  ;;  %v5584_v32 = vmax.f32 %v5388_v12, %v5486_v60  ;;  %v7027_v31 = vpop.f32.mrb[108].mxu0  ;;  %v7321_v51 = vpop.f32.mrb[108].mxu1 }
 0x2a5   : > { %5884 = vst [vmem:[%s9606_s5 + $0x38] sm:$0xff] %v5786_v63  ;;  %v5690_v17 = vadd.f32 %v9596_v13, %v5585_v49  ;;  %v5391_v18 = vmax.f32 %v8925_v25, %v7027_v31  ;;  %v5489_v52 = vmax.f32 %v8927_v26, %v7321_v51  ;;  %v3961_v1 = vpop.f32.mrb[109].mxu0  ;;  %v4941_v2 = vpop.f32.mrb[109].mxu1 }
 0x2a6   : > { %5883 = vst [vmem:[%s9606_s5 + $0x30] sm:$0xff] %v5785_v50  ;;  %v5689_v19 = vadd.f32 %v9596_v13, %v5584_v32  ;;  %v5390_v20 = vmax.f32 %v8929_v27, %v3961_v1  ;;  %v5488_v14 = vmax.f32 %v8932_v28, %v4941_v2 }
 0x2a7   : > { %v5788_v29 = vmax.f32 %v5690_v17, 0.0  ;;  %v5587_v15 = vmax.f32 %v5391_v18, %v5489_v52 }
 0x2a8   : > { %v5787_v3 = vmax.f32 %v5689_v19, 0.0  ;;  %v5586_v4 = vmax.f32 %v5390_v20, %v5488_v14  ;;  %v7030_v57 = vpop.f32.mrb[110].mxu0  ;;  %v7324_v45 = vpop.f32.mrb[110].mxu1 }
 0x2a9   : > { %5886 = vst [vmem:[%s9606_s5 + $0x48] sm:$0xff] %v5788_v29  ;;  %v5692_v25 = vadd.f32 %v9596_v13, %v5587_v15  ;;  %v5393_v26 = vmax.f32 %v8941_v33, %v7030_v57  ;;  %v5491_v58 = vmax.f32 %v8943_v34, %v7324_v45  ;;  %v3971_v0 = vpop.f32.mrb[111].mxu0  ;;  %v4951_v16 = vpop.f32.mrb[111].mxu1 }
 0x2aa   : > { %5885 = vst [vmem:[%s9606_s5 + $0x40] sm:$0xff] %v5787_v3  ;;  %v5691_v27 = vadd.f32 %v9596_v13, %v5586_v4  ;;  %v5392_v28 = vmax.f32 %v8945_v35, %v3971_v0  ;;  %v5490_v47 = vmax.f32 %v8948_v36, %v4951_v16 }
 0x2ab   : > { %v5790_v48 = vmax.f32 %v5692_v25, 0.0  ;;  %v5589_v9 = vmax.f32 %v5393_v26, %v5491_v58 }
 0x2ac   : > { %v5789_v10 = vmax.f32 %v5691_v27, 0.0  ;;  %v5588_v30 = vmax.f32 %v5392_v28, %v5490_v47  ;;  %v7033_v46 = vpop.f32.mrb[112].mxu0  ;;  %v7327_v59 = vpop.f32.mrb[112].mxu1 }
 0x2ad   : > { %5888 = vst [vmem:[%s9606_s5 + $0x58] sm:$0xff] %v5790_v48  ;;  %v5694_v33 = vadd.f32 %v9596_v13, %v5589_v9  ;;  %v5395_v34 = vmax.f32 %v8957_v41, %v7033_v46  ;;  %v5493_v11 = vmax.f32 %v8959_v42, %v7327_v59  ;;  %v3981_v12 = vpop.f32.mrb[113].mxu0  ;;  %v4961_v60 = vpop.f32.mrb[113].mxu1 }
 0x2ae   : > { %5887 = vst [vmem:[%s9606_s5 + $0x50] sm:$0xff] %v5789_v10  ;;  %v5693_v35 = vadd.f32 %v9596_v13, %v5588_v30  ;;  %v5394_v36 = vmax.f32 %v8961_v43, %v3981_v12  ;;  %v5492_v63 = vmax.f32 %v8964_v44, %v4961_v60 }
 0x2af   : > { %v5792_v49 = vmax.f32 %v5694_v33, 0.0  ;;  %v5591_v50 = vmax.f32 %v5395_v34, %v5493_v11 }
 0x2b0   : > { %v5791_v32 = vmax.f32 %v5693_v35, 0.0  ;;  %v5590_v31 = vmax.f32 %v5394_v36, %v5492_v63  ;;  %v7036_v51 = vpop.f32.mrb[114].mxu0  ;;  %v7330_v17 = vpop.f32.mrb[114].mxu1 }
 0x2b1   : > { %5890 = vst [vmem:[%s9606_s5 + $0x68] sm:$0xff] %v5792_v49  ;;  %v5696_v41 = vadd.f32 %v9596_v13, %v5591_v50  ;;  %v5397_v42 = vmax.f32 %v8973_v53, %v7036_v51  ;;  %v5495_v18 = vmax.f32 %v8975_v54, %v7330_v17  ;;  %v3991_v52 = vpop.f32.mrb[115].mxu0  ;;  %v4971_v1 = vpop.f32.mrb[115].mxu1 }
 0x2b2   : > { %5889 = vst [vmem:[%s9606_s5 + $0x60] sm:$0xff] %v5791_v32  ;;  %v5695_v43 = vadd.f32 %v9596_v13, %v5590_v31  ;;  %v5396_v44 = vmax.f32 %v8977_v55, %v3991_v52  ;;  %v5494_v2 = vmax.f32 %v8980_v56, %v4971_v1  ;;  %v10159_v52 = vld [vmem:[#allocation4_spill] sm:$0xff] }
 0x2b3   : > { %v5794_v19 = vmax.f32 %v5696_v41, 0.0  ;;  %v5593_v20 = vmax.f32 %v5397_v42, %v5495_v18 }
 0x2b4   : > { %v5793_v14 = vmax.f32 %v5695_v43, 0.0  ;;  %v5592_v29 = vmax.f32 %v5396_v44, %v5494_v2  ;;  %v7039_v15 = vpop.f32.mrb[116].mxu0  ;;  %v7333_v3 = vpop.f32.mrb[116].mxu1 }
 0x2b5   : > { %5892 = vst [vmem:[%s9606_s5 + $0x78] sm:$0xff] %v5794_v19  ;;  %v5698_v53 = vadd.f32 %v9596_v13, %v5593_v20  ;;  %v5399_v54 = vmax.f32 %v8989_v5, %v7039_v15  ;;  %v5497_v4 = vmax.f32 %v8991_v6, %v7333_v3  ;;  %v4001_v57 = vpop.f32.mrb[117].mxu0  ;;  %v4981_v45 = vpop.f32.mrb[117].mxu1  ;;  %v10161_v15 = vld [vmem:[#allocation6_spill] sm:$0xff] }
 0x2b6   : > { %5891 = vst [vmem:[%s9606_s5 + $0x70] sm:$0xff] %v5793_v14  ;;  %v5697_v55 = vadd.f32 %v9596_v13, %v5592_v29  ;;  %v5398_v56 = vmax.f32 %v8993_v7, %v4001_v57  ;;  %v5496_v25 = vmax.f32 %v8996_v8, %v4981_v45  ;;  %v10162_v57 = vld [vmem:[#allocation7_spill] sm:$0xff] }
 0x2b7   : > { %v5796_v26 = vmax.f32 %v5698_v53, 0.0  ;;  %v5595_v58 = vmax.f32 %v5399_v54, %v5497_v4 }
 0x2b8   : > { %v5795_v0 = vmax.f32 %v5697_v55, 0.0  ;;  %v5594_v16 = vmax.f32 %v5398_v56, %v5496_v25  ;;  %v7042_v27 = vpop.f32.mrb[118].mxu0  ;;  %v7336_v28 = vpop.f32.mrb[118].mxu1  ;;  %v10163_v55 = vld [vmem:[#allocation8_spill] sm:$0xff] }
 0x2b9   : > { %5894 = vst [vmem:[%s9606_s5 + $0x88] sm:$0xff] %v5796_v26  ;;  %v5700_v5 = vadd.f32 %v9596_v13, %v5595_v58  ;;  %v5401_v6 = vmax.f32 %v9005_v21, %v7042_v27  ;;  %v5499_v47 = vmax.f32 %v9007_v22, %v7336_v28  ;;  %v4011_v48 = vpop.f32.mrb[119].mxu0  ;;  %v4991_v9 = vpop.f32.mrb[119].mxu1 }
 0x2ba   : > { %5893 = vst [vmem:[%s9606_s5 + $0x80] sm:$0xff] %v5795_v0  ;;  %v5699_v7 = vadd.f32 %v9596_v13, %v5594_v16  ;;  %v5400_v8 = vmax.f32 %v9009_v23, %v4011_v48  ;;  %v5498_v10 = vmax.f32 %v9012_v24, %v4991_v9 }
 0x2bb   : > { %v5798_v30 = vmax.f32 %v5700_v5, 0.0  ;;  %v5597_v46 = vmax.f32 %v5401_v6, %v5499_v47  ;;  %v10164_v5 = vld [vmem:[#allocation9_spill] sm:$0xff]  ;;  %v10165_v47 = vld [vmem:[#allocation10_spill] sm:$0xff] }
 0x2bc   : > { %v5797_v59 = vmax.f32 %v5699_v7, 0.0  ;;  %v5596_v33 = vmax.f32 %v5400_v8, %v5498_v10  ;;  %v7045_v34 = vpop.f32.mrb[120].mxu0  ;;  %v7339_v11 = vpop.f32.mrb[120].mxu1  ;;  %v10166_v10 = vld [vmem:[#allocation11_spill] sm:$0xff] }
 0x2bd   : > { %5896 = vst [vmem:[%s9606_s5 + $0x98] sm:$0xff] %v5798_v30  ;;  %v5702_v21 = vadd.f32 %v9596_v13, %v5597_v46  ;;  %v5403_v22 = vmax.f32 %v9021_v37, %v7045_v34  ;;  %v5501_v12 = vmax.f32 %v9023_v38, %v7339_v11  ;;  %v4021_v60 = vpop.f32.mrb[121].mxu0  ;;  %v5001_v35 = vpop.f32.mrb[121].mxu1  ;;  %v10167_v46 = vld [vmem:[#allocation12_spill] sm:$0xff] }
 0x2be   : > { %5895 = vst [vmem:[%s9606_s5 + $0x90] sm:$0xff] %v5797_v59  ;;  %v5701_v23 = vadd.f32 %v9596_v13, %v5596_v33  ;;  %v5402_v24 = vmax.f32 %v9025_v39, %v4021_v60  ;;  %v5500_v36 = vmax.f32 %v9028_v40, %v5001_v35  ;;  %v10158_v40 = vld [vmem:[#allocation3_spill] sm:$0xff]  ;;  %v10168_v35 = vld [vmem:[#allocation13_spill] sm:$0xff] }
 0x2bf   : > { %v5800_v63 = vmax.f32 %v5702_v21, 0.0  ;;  %v5599_v49 = vmax.f32 %v5403_v22, %v5501_v12 }
 0x2c0   : > { %v5799_v50 = vmax.f32 %v5701_v23, 0.0  ;;  %v5598_v32 = vmax.f32 %v5402_v24, %v5500_v36  ;;  %v7048_v31 = vpop.f32.mrb[122].mxu0  ;;  %v7342_v51 = vpop.f32.mrb[122].mxu1  ;;  %v10169_v24 = vld [vmem:[#allocation14_spill] sm:$0xff] }
 0x2c1   : > { %5898 = vst [vmem:[%s9606_s5 + $0xa8] sm:$0xff] %v5800_v63  ;;  %v5704_v37 = vadd.f32 %v9596_v13, %v5599_v49  ;;  %v5405_v38 = vmax.f32 %v9037_v61, %v7048_v31  ;;  %v5503_v17 = vmax.f32 %v9039_v62, %v7342_v51  ;;  %v4031_v41 = vpop.f32.mrb[123].mxu0  ;;  %v5011_v42 = vpop.f32.mrb[123].mxu1  ;;  %v10160_v62 = vld [vmem:[#allocation5_spill] sm:$0xff]  ;;  %v10171_v51 = vld [vmem:[#allocation16_spill] sm:$0xff] }
 0x2c2   : > { %5897 = vst [vmem:[%s9606_s5 + $0xa0] sm:$0xff] %v5799_v50  ;;  %v5703_v39 = vadd.f32 %v9596_v13, %v5598_v32  ;;  %v5404_v18 = vmax.f32 %v10158_v40, %v4031_v41  ;;  %v5502_v1 = vmax.f32 %v10159_v52, %v5011_v42  ;;  %v10170_v32 = vld [vmem:[#allocation15_spill] sm:$0xff]  ;;  %v10172_v52 = vld [vmem:[#allocation17_spill] sm:$0xff] }
 0x2c3   : > { %v5802_v43 = vmax.f32 %v5704_v37, 0.0  ;;  %v5601_v44 = vmax.f32 %v5405_v38, %v5503_v17 }
 0x2c4   : > { %v5801_v2 = vmax.f32 %v5703_v39, 0.0  ;;  %v5600_v19 = vmax.f32 %v5404_v18, %v5502_v1  ;;  %v7051_v20 = vpop.f32.mrb[124].mxu0  ;;  %v7345_v14 = vpop.f32.mrb[124].mxu1 }
 0x2c5   : > { %5900 = vst [vmem:[%s9606_s5 + $0xb8] sm:$0xff] %v5802_v43  ;;  %v5706_v61 = vadd.f32 %v9596_v13, %v5601_v44  ;;  %v5407_v29 = vmax.f32 %v10160_v62, %v7051_v20  ;;  %v5505_v3 = vmax.f32 %v10161_v15, %v7345_v14  ;;  %v4041_v53 = vpop.f32.mrb[125].mxu0  ;;  %v5021_v54 = vpop.f32.mrb[125].mxu1  ;;  %v10173_v43 = vld [vmem:[#allocation18_spill] sm:$0xff]  ;;  %v10174_v14 = vld [vmem:[#allocation19_spill] sm:$0xff]  ;;  %v10175_v62 = vld [vmem:[#allocation20_spill] sm:$0xff] }
 0x2c6   : > { %5899 = vst [vmem:[%s9606_s5 + $0xb0] sm:$0xff] %v5801_v2  ;;  %v5705_v4 = vadd.f32 %v9596_v13, %v5600_v19  ;;  %v5406_v45 = vmax.f32 %v10162_v57, %v4041_v53  ;;  %v5504_v56 = vmax.f32 %v10163_v55, %v5021_v54  ;;  %v10176_v55 = vld [vmem:[#allocation21_spill] sm:$0xff] }
 0x2c7   : > { %v5804_v25 = vmax.f32 %v5706_v61, 0.0  ;;  %v5603_v26 = vmax.f32 %v5407_v29, %v5505_v3 }
 0x2c8   : > { %v5803_v58 = vmax.f32 %v5705_v4, 0.0  ;;  %v5602_v0 = vmax.f32 %v5406_v45, %v5504_v56  ;;  %v7054_v16 = vpop.f32.mrb[126].mxu0  ;;  %v7348_v27 = vpop.f32.mrb[126].mxu1 }
 0x2c9   : > { %5902 = vst [vmem:[%s9606_s5 + $0xc8] sm:$0xff] %v5804_v25  ;;  %v5708_v28 = vadd.f32 %v9596_v13, %v5603_v26  ;;  %v5409_v6 = vmax.f32 %v10164_v5, %v7054_v16  ;;  %v5507_v48 = vmax.f32 %v10165_v47, %v7348_v27  ;;  %v4051_v9 = vpop.f32.mrb[127].mxu0  ;;  %v5031_v7 = vpop.f32.mrb[127].mxu1  ;;  %v10177_v25 = vld [vmem:[#allocation22_spill] sm:$0xff]  ;;  %v10178_v27 = vld [vmem:[#allocation23_spill] sm:$0xff]  ;;  %v10179_v5 = vld [vmem:[#allocation24_spill] sm:$0xff] }
 0x2ca   : > { %5901 = vst [vmem:[%s9606_s5 + $0xc0] sm:$0xff] %v5803_v58  ;;  %v5707_v8 = vadd.f32 %v9596_v13, %v5602_v0  ;;  %v5408_v30 = vmax.f32 %v10166_v10, %v4051_v9  ;;  %v5506_v59 = vmax.f32 %v10167_v46, %v5031_v7  ;;  %v10180_v46 = vld [vmem:[#allocation25_spill] sm:$0xff] }
 0x2cb   : > { %v5806_v33 = vmax.f32 %v5708_v28, 0.0  ;;  %v5605_v34 = vmax.f32 %v5409_v6, %v5507_v48 }
 0x2cc   : > { %v5805_v11 = vmax.f32 %v5707_v8, 0.0  ;;  %v5604_v21 = vmax.f32 %v5408_v30, %v5506_v59  ;;  %v7057_v22 = vpop.f32.mrb[128].mxu0  ;;  %v7351_v12 = vpop.f32.mrb[128].mxu1 }
 0x2cd   : > { %5904 = vst [vmem:[%s9606_s5 + $0xd8] sm:$0xff] %v5806_v33  ;;  %v5710_v60 = vadd.f32 %v9596_v13, %v5605_v34  ;;  %v5411_v23 = vmax.f32 %v10168_v35, %v7057_v22  ;;  %v5509_v36 = vmax.f32 %v10169_v24, %v7351_v12  ;;  %v4061_v63 = vpop.f32.mrb[129].mxu0  ;;  %v5041_v49 = vpop.f32.mrb[129].mxu1  ;;  %v10181_v33 = vld [vmem:[#allocation26_spill] sm:$0xff]  ;;  %v10182_v12 = vld [vmem:[#allocation27_spill] sm:$0xff]  ;;  %v10183_v35 = vld [vmem:[#allocation28_spill] sm:$0xff] }
 0x2ce   : > { %5903 = vst [vmem:[%s9606_s5 + $0xd0] sm:$0xff] %v5805_v11  ;;  %v5709_v50 = vadd.f32 %v9596_v13, %v5604_v21  ;;  %v5410_v31 = vmax.f32 %v10170_v32, %v4061_v63  ;;  %v5508_v37 = vmax.f32 %v10171_v51, %v5041_v49  ;;  %v10184_v51 = vld [vmem:[#allocation29_spill] sm:$0xff] }
 0x2cf   : > { %v5808_v38 = vmax.f32 %v5710_v60, 0.0  ;;  %v5607_v17 = vmax.f32 %v5411_v23, %v5509_v36 }
 0x2d0   : > { %v5807_v41 = vmax.f32 %v5709_v50, 0.0  ;;  %v5606_v42 = vmax.f32 %v5410_v31, %v5508_v37  ;;  %v7060_v39 = vpop.f32.mrb[130].mxu0  ;;  %v7354_v40 = vpop.f32.mrb[130].mxu1 }
 0x2d1   : > { %5906 = vst [vmem:[%s9606_s5 + $0xe8] sm:$0xff] %v5808_v38  ;;  %v5712_v18 = vadd.f32 %v9596_v13, %v5607_v17  ;;  %v5413_v1 = vmax.f32 %v10172_v52, %v7060_v39  ;;  %v5511_v44 = vmax.f32 %v10173_v43, %v7354_v40  ;;  %v4071_v2 = vpop.f32.mrb[131].mxu0  ;;  %v5051_v19 = vpop.f32.mrb[131].mxu1  ;;  %v10185_v38 = vld [vmem:[#allocation30_spill] sm:$0xff]  ;;  %v10186_v40 = vld [vmem:[#allocation31_spill] sm:$0xff]  ;;  %v10187_v52 = vld [vmem:[#allocation32_spill] sm:$0xff] }
 0x2d2   : > { %5905 = vst [vmem:[%s9606_s5 + $0xe0] sm:$0xff] %v5807_v41  ;;  %v5711_v20 = vadd.f32 %v9596_v13, %v5606_v42  ;;  %v5412_v61 = vmax.f32 %v10174_v14, %v4071_v2  ;;  %v5510_v29 = vmax.f32 %v10175_v62, %v5051_v19  ;;  %v10188_v62 = vld [vmem:[#allocation33_spill] sm:$0xff] }
 0x2d3   : > { %v5810_v15 = vmax.f32 %v5712_v18, 0.0  ;;  %v5609_v3 = vmax.f32 %v5413_v1, %v5511_v44 }
 0x2d4   : > { %v5809_v53 = vmax.f32 %v5711_v20, 0.0  ;;  %v5608_v54 = vmax.f32 %v5412_v61, %v5510_v29  ;;  %v7063_v4 = vpop.f32.mrb[132].mxu0  ;;  %v7357_v57 = vpop.f32.mrb[132].mxu1 }
 0x2d5   : > { %5908 = vst [vmem:[%s9606_s5 + $0xf8] sm:$0xff] %v5810_v15  ;;  %v5714_v45 = vadd.f32 %v9596_v13, %v5609_v3  ;;  %v5415_v56 = vmax.f32 %v10176_v55, %v7063_v4  ;;  %v5513_v26 = vmax.f32 %v10177_v25, %v7357_v57  ;;  %v4081_v58 = vpop.f32.mrb[133].mxu0  ;;  %v5061_v0 = vpop.f32.mrb[133].mxu1  ;;  %v10189_v15 = vld [vmem:[#allocation34_spill] sm:$0xff]  ;;  %v10190_v57 = vld [vmem:[#allocation35_spill] sm:$0xff]  ;;  %v10191_v55 = vld [vmem:[#allocation36_spill] sm:$0xff] }
 0x2d6   : > { %5907 = vst [vmem:[%s9606_s5 + $0xf0] sm:$0xff] %v5809_v53  ;;  %v5713_v16 = vadd.f32 %v9596_v13, %v5608_v54  ;;  %v5414_v28 = vmax.f32 %v10178_v27, %v4081_v58  ;;  %v5512_v6 = vmax.f32 %v10179_v5, %v5061_v0  ;;  %v10192_v5 = vld [vmem:[#allocation37_spill] sm:$0xff] }
 0x2d7   : > { %v5812_v47 = vmax.f32 %v5714_v45, 0.0  ;;  %v5611_v48 = vmax.f32 %v5415_v56, %v5513_v26 }
 0x2d8   : > { %v5811_v9 = vmax.f32 %v5713_v16, 0.0  ;;  %v5610_v7 = vmax.f32 %v5414_v28, %v5512_v6  ;;  %v7066_v8 = vpop.f32.mrb[134].mxu0  ;;  %v7360_v10 = vpop.f32.mrb[134].mxu1 }
 0x2d9   : > { %5910 = vst [vmem:[%s9606_s5 + $0x108] sm:$0xff] %v5812_v47  ;;  %v5716_v30 = vadd.f32 %v9596_v13, %v5611_v48  ;;  %v5417_v59 = vmax.f32 %v10180_v46, %v7066_v8  ;;  %v5515_v34 = vmax.f32 %v10181_v33, %v7360_v10  ;;  %v4091_v11 = vpop.f32.mrb[135].mxu0  ;;  %v5071_v21 = vpop.f32.mrb[135].mxu1  ;;  %v10193_v47 = vld [vmem:[#allocation38_spill] sm:$0xff]  ;;  %v10194_v10 = vld [vmem:[#allocation39_spill] sm:$0xff]  ;;  %v10195_v46 = vld [vmem:[#allocation40_spill] sm:$0xff] }
 0x2da   : > { %5909 = vst [vmem:[%s9606_s5 + $0x100] sm:$0xff] %v5811_v9  ;;  %v5715_v22 = vadd.f32 %v9596_v13, %v5610_v7  ;;  %v5416_v60 = vmax.f32 %v10182_v12, %v4091_v11  ;;  %v5514_v23 = vmax.f32 %v10183_v35, %v5071_v21  ;;  %v10196_v35 = vld [vmem:[#allocation41_spill] sm:$0xff] }
 0x2db   : > { %v5814_v24 = vmax.f32 %v5716_v30, 0.0  ;;  %v5613_v36 = vmax.f32 %v5417_v59, %v5515_v34 }
 0x2dc   : > { %v5813_v63 = vmax.f32 %v5715_v22, 0.0  ;;  %v5612_v49 = vmax.f32 %v5416_v60, %v5514_v23  ;;  %v7069_v50 = vpop.f32.mrb[136].mxu0  ;;  %v7363_v32 = vpop.f32.mrb[136].mxu1 }
 0x2dd   : > { %5912 = vst [vmem:[%s9606_s5 + $0x118] sm:$0xff] %v5814_v24  ;;  %v5718_v31 = vadd.f32 %v9596_v13, %v5613_v36  ;;  %v5419_v37 = vmax.f32 %v10184_v51, %v7069_v50  ;;  %v5517_v17 = vmax.f32 %v10185_v38, %v7363_v32  ;;  %v4101_v41 = vpop.f32.mrb[137].mxu0  ;;  %v5081_v42 = vpop.f32.mrb[137].mxu1  ;;  %v10197_v24 = vld [vmem:[#allocation42_spill] sm:$0xff]  ;;  %v10198_v32 = vld [vmem:[#allocation43_spill] sm:$0xff]  ;;  %v10199_v51 = vld [vmem:[#allocation44_spill] sm:$0xff] }
 0x2de   : > { %5911 = vst [vmem:[%s9606_s5 + $0x110] sm:$0xff] %v5813_v63  ;;  %v5717_v39 = vadd.f32 %v9596_v13, %v5612_v49  ;;  %v5418_v18 = vmax.f32 %v10186_v40, %v4101_v41  ;;  %v5516_v1 = vmax.f32 %v10187_v52, %v5081_v42  ;;  %v10200_v52 = vld [vmem:[#allocation45_spill] sm:$0xff] }
 0x2df   : > { %v5816_v43 = vmax.f32 %v5718_v31, 0.0  ;;  %v5615_v44 = vmax.f32 %v5419_v37, %v5517_v17 }
 0x2e0   : > { %v5815_v2 = vmax.f32 %v5717_v39, 0.0  ;;  %v5614_v19 = vmax.f32 %v5418_v18, %v5516_v1  ;;  %v7072_v20 = vpop.f32.mrb[138].mxu0  ;;  %v7366_v14 = vpop.f32.mrb[138].mxu1 }
 0x2e1   : > { %5914 = vst [vmem:[%s9606_s5 + $0x128] sm:$0xff] %v5816_v43  ;;  %v5720_v61 = vadd.f32 %v9596_v13, %v5615_v44  ;;  %v5421_v29 = vmax.f32 %v10188_v62, %v7072_v20  ;;  %v5519_v3 = vmax.f32 %v10189_v15, %v7366_v14  ;;  %v4111_v53 = vpop.f32.mrb[139].mxu0  ;;  %v5091_v54 = vpop.f32.mrb[139].mxu1  ;;  %v10201_v43 = vld [vmem:[#allocation46_spill] sm:$0xff]  ;;  %v10202_v14 = vld [vmem:[#allocation47_spill] sm:$0xff]  ;;  %v10203_v62 = vld [vmem:[#allocation48_spill] sm:$0xff] }
 0x2e2   : > { %5913 = vst [vmem:[%s9606_s5 + $0x120] sm:$0xff] %v5815_v2  ;;  %v5719_v4 = vadd.f32 %v9596_v13, %v5614_v19  ;;  %v5420_v45 = vmax.f32 %v10190_v57, %v4111_v53  ;;  %v5518_v56 = vmax.f32 %v10191_v55, %v5091_v54  ;;  %v10204_v55 = vld [vmem:[#allocation49_spill] sm:$0xff] }
 0x2e3   : > { %v5818_v25 = vmax.f32 %v5720_v61, 0.0  ;;  %v5617_v26 = vmax.f32 %v5421_v29, %v5519_v3 }
 0x2e4   : > { %v5817_v58 = vmax.f32 %v5719_v4, 0.0  ;;  %v5616_v0 = vmax.f32 %v5420_v45, %v5518_v56  ;;  %v7075_v16 = vpop.f32.mrb[140].mxu0  ;;  %v7369_v27 = vpop.f32.mrb[140].mxu1 }
 0x2e5   : > { %5916 = vst [vmem:[%s9606_s5 + $0x138] sm:$0xff] %v5818_v25  ;;  %v5722_v28 = vadd.f32 %v9596_v13, %v5617_v26  ;;  %v5423_v6 = vmax.f32 %v10192_v5, %v7075_v16  ;;  %v5521_v48 = vmax.f32 %v10193_v47, %v7369_v27  ;;  %v4121_v9 = vpop.f32.mrb[141].mxu0  ;;  %v5101_v7 = vpop.f32.mrb[141].mxu1  ;;  %v10205_v25 = vld [vmem:[#allocation50_spill] sm:$0xff]  ;;  %v10206_v27 = vld [vmem:[#allocation51_spill] sm:$0xff]  ;;  %v10207_v5 = vld [vmem:[#allocation52_spill] sm:$0xff] }
 0x2e6   : > { %5915 = vst [vmem:[%s9606_s5 + $0x130] sm:$0xff] %v5817_v58  ;;  %v5721_v8 = vadd.f32 %v9596_v13, %v5616_v0  ;;  %v5422_v30 = vmax.f32 %v10194_v10, %v4121_v9  ;;  %v5520_v59 = vmax.f32 %v10195_v46, %v5101_v7  ;;  %v10208_v46 = vld [vmem:[#allocation53_spill] sm:$0xff] }
 0x2e7   : > { %v5820_v33 = vmax.f32 %v5722_v28, 0.0  ;;  %v5619_v34 = vmax.f32 %v5423_v6, %v5521_v48 }
 0x2e8   : > { %v5819_v11 = vmax.f32 %v5721_v8, 0.0  ;;  %v5618_v21 = vmax.f32 %v5422_v30, %v5520_v59  ;;  %v7078_v22 = vpop.f32.mrb[142].mxu0  ;;  %v7372_v12 = vpop.f32.mrb[142].mxu1 }
 0x2e9   : > { %5918 = vst [vmem:[%s9606_s5 + $0x148] sm:$0xff] %v5820_v33  ;;  %v5724_v60 = vadd.f32 %v9596_v13, %v5619_v34  ;;  %v5425_v23 = vmax.f32 %v10196_v35, %v7078_v22  ;;  %v5523_v36 = vmax.f32 %v10197_v24, %v7372_v12  ;;  %v4131_v63 = vpop.f32.mrb[143].mxu0  ;;  %v5111_v49 = vpop.f32.mrb[143].mxu1  ;;  %v10209_v33 = vld [vmem:[#allocation54_spill] sm:$0xff]  ;;  %v10210_v12 = vld [vmem:[#allocation55_spill] sm:$0xff]  ;;  %v10211_v35 = vld [vmem:[#allocation56_spill] sm:$0xff] }
 0x2ea   : > { %5917 = vst [vmem:[%s9606_s5 + $0x140] sm:$0xff] %v5819_v11  ;;  %v5723_v50 = vadd.f32 %v9596_v13, %v5618_v21  ;;  %v5424_v31 = vmax.f32 %v10198_v32, %v4131_v63  ;;  %v5522_v37 = vmax.f32 %v10199_v51, %v5111_v49  ;;  %v10212_v51 = vld [vmem:[#allocation57_spill] sm:$0xff] }
 0x2eb   : > { %v5822_v38 = vmax.f32 %v5724_v60, 0.0  ;;  %v5621_v17 = vmax.f32 %v5425_v23, %v5523_v36 }
 0x2ec   : > { %v5821_v41 = vmax.f32 %v5723_v50, 0.0  ;;  %v5620_v42 = vmax.f32 %v5424_v31, %v5522_v37  ;;  %v7081_v39 = vpop.f32.mrb[144].mxu0  ;;  %v7375_v40 = vpop.f32.mrb[144].mxu1 }
 0x2ed   : > { %5920 = vst [vmem:[%s9606_s5 + $0x158] sm:$0xff] %v5822_v38  ;;  %v5726_v18 = vadd.f32 %v9596_v13, %v5621_v17  ;;  %v5427_v1 = vmax.f32 %v10200_v52, %v7081_v39  ;;  %v5525_v44 = vmax.f32 %v10201_v43, %v7375_v40  ;;  %v4141_v2 = vpop.f32.mrb[145].mxu0  ;;  %v5121_v19 = vpop.f32.mrb[145].mxu1  ;;  %v10213_v38 = vld [vmem:[#allocation58_spill] sm:$0xff]  ;;  %v10214_v40 = vld [vmem:[#allocation59_spill] sm:$0xff]  ;;  %v10215_v52 = vld [vmem:[#allocation60_spill] sm:$0xff] }
 0x2ee   : > { %5919 = vst [vmem:[%s9606_s5 + $0x150] sm:$0xff] %v5821_v41  ;;  %v5725_v20 = vadd.f32 %v9596_v13, %v5620_v42  ;;  %v5426_v61 = vmax.f32 %v10202_v14, %v4141_v2  ;;  %v5524_v29 = vmax.f32 %v10203_v62, %v5121_v19  ;;  %v10216_v62 = vld [vmem:[#allocation61_spill] sm:$0xff] }
 0x2ef   : > { %v5824_v15 = vmax.f32 %v5726_v18, 0.0  ;;  %v5623_v3 = vmax.f32 %v5427_v1, %v5525_v44 }
 0x2f0   : > { %v5823_v53 = vmax.f32 %v5725_v20, 0.0  ;;  %v5622_v54 = vmax.f32 %v5426_v61, %v5524_v29  ;;  %v7084_v4 = vpop.f32.mrb[146].mxu0  ;;  %v7378_v57 = vpop.f32.mrb[146].mxu1 }
 0x2f1   : > { %5922 = vst [vmem:[%s9606_s5 + $0x168] sm:$0xff] %v5824_v15  ;;  %v5728_v45 = vadd.f32 %v9596_v13, %v5623_v3  ;;  %v5429_v56 = vmax.f32 %v10204_v55, %v7084_v4  ;;  %v5527_v26 = vmax.f32 %v10205_v25, %v7378_v57  ;;  %v4151_v58 = vpop.f32.mrb[147].mxu0  ;;  %v5131_v0 = vpop.f32.mrb[147].mxu1  ;;  %v10217_v15 = vld [vmem:[#allocation62_spill] sm:$0xff]  ;;  %v10218_v57 = vld [vmem:[#allocation63_spill] sm:$0xff]  ;;  %v10219_v55 = vld [vmem:[#allocation64_spill] sm:$0xff] }
 0x2f2   : > { %5921 = vst [vmem:[%s9606_s5 + $0x160] sm:$0xff] %v5823_v53  ;;  %v5727_v16 = vadd.f32 %v9596_v13, %v5622_v54  ;;  %v5428_v28 = vmax.f32 %v10206_v27, %v4151_v58  ;;  %v5526_v6 = vmax.f32 %v10207_v5, %v5131_v0  ;;  %v10220_v5 = vld [vmem:[#allocation65_spill] sm:$0xff] }
 0x2f3   : > { %v5826_v47 = vmax.f32 %v5728_v45, 0.0  ;;  %v5625_v48 = vmax.f32 %v5429_v56, %v5527_v26 }
 0x2f4   : > { %v5825_v9 = vmax.f32 %v5727_v16, 0.0  ;;  %v5624_v7 = vmax.f32 %v5428_v28, %v5526_v6  ;;  %v7087_v8 = vpop.f32.mrb[148].mxu0  ;;  %v7381_v10 = vpop.f32.mrb[148].mxu1 }
 0x2f5   : > { %5924 = vst [vmem:[%s9606_s5 + $0x178] sm:$0xff] %v5826_v47  ;;  %v5730_v30 = vadd.f32 %v9596_v13, %v5625_v48  ;;  %v5431_v59 = vmax.f32 %v10208_v46, %v7087_v8  ;;  %v5529_v34 = vmax.f32 %v10209_v33, %v7381_v10  ;;  %v4161_v11 = vpop.f32.mrb[149].mxu0  ;;  %v5141_v21 = vpop.f32.mrb[149].mxu1  ;;  %v10221_v47 = vld [vmem:[#allocation66_spill] sm:$0xff]  ;;  %v10222_v10 = vld [vmem:[#allocation67_spill] sm:$0xff]  ;;  %v10223_v46 = vld [vmem:[#allocation68_spill] sm:$0xff] }
 0x2f6   : > { %5923 = vst [vmem:[%s9606_s5 + $0x170] sm:$0xff] %v5825_v9  ;;  %v5729_v22 = vadd.f32 %v9596_v13, %v5624_v7  ;;  %v5430_v60 = vmax.f32 %v10210_v12, %v4161_v11  ;;  %v5528_v23 = vmax.f32 %v10211_v35, %v5141_v21  ;;  %v10224_v35 = vld [vmem:[#allocation69_spill] sm:$0xff] }
 0x2f7   : > { %v5828_v24 = vmax.f32 %v5730_v30, 0.0  ;;  %v5627_v36 = vmax.f32 %v5431_v59, %v5529_v34 }
 0x2f8   : > { %v5827_v63 = vmax.f32 %v5729_v22, 0.0  ;;  %v5626_v49 = vmax.f32 %v5430_v60, %v5528_v23  ;;  %v7090_v50 = vpop.f32.mrb[150].mxu0  ;;  %v7384_v32 = vpop.f32.mrb[150].mxu1 }
 0x2f9   : > { %5926 = vst [vmem:[%s9606_s5 + $0x188] sm:$0xff] %v5828_v24  ;;  %v5732_v31 = vadd.f32 %v9596_v13, %v5627_v36  ;;  %v5433_v37 = vmax.f32 %v10212_v51, %v7090_v50  ;;  %v5531_v17 = vmax.f32 %v10213_v38, %v7384_v32  ;;  %v4171_v41 = vpop.f32.mrb[151].mxu0  ;;  %v5151_v42 = vpop.f32.mrb[151].mxu1  ;;  %v10225_v24 = vld [vmem:[#allocation70_spill] sm:$0xff]  ;;  %v10226_v32 = vld [vmem:[#allocation71_spill] sm:$0xff]  ;;  %v10227_v51 = vld [vmem:[#allocation72_spill] sm:$0xff] }
 0x2fa   : > { %5925 = vst [vmem:[%s9606_s5 + $0x180] sm:$0xff] %v5827_v63  ;;  %v5731_v39 = vadd.f32 %v9596_v13, %v5626_v49  ;;  %v5432_v18 = vmax.f32 %v10214_v40, %v4171_v41  ;;  %v5530_v1 = vmax.f32 %v10215_v52, %v5151_v42  ;;  %v10228_v52 = vld [vmem:[#allocation73_spill] sm:$0xff] }
 0x2fb   : > { %v5830_v43 = vmax.f32 %v5732_v31, 0.0  ;;  %v5629_v44 = vmax.f32 %v5433_v37, %v5531_v17 }
 0x2fc   : > { %v5829_v2 = vmax.f32 %v5731_v39, 0.0  ;;  %v5628_v19 = vmax.f32 %v5432_v18, %v5530_v1  ;;  %v7093_v20 = vpop.f32.mrb[152].mxu0  ;;  %v7387_v14 = vpop.f32.mrb[152].mxu1 }
 0x2fd   : > { %5928 = vst [vmem:[%s9606_s5 + $0x198] sm:$0xff] %v5830_v43  ;;  %v5734_v61 = vadd.f32 %v9596_v13, %v5629_v44  ;;  %v5435_v29 = vmax.f32 %v10216_v62, %v7093_v20  ;;  %v5533_v3 = vmax.f32 %v10217_v15, %v7387_v14  ;;  %v4181_v53 = vpop.f32.mrb[153].mxu0  ;;  %v5161_v54 = vpop.f32.mrb[153].mxu1  ;;  %v10229_v43 = vld [vmem:[#allocation74_spill] sm:$0xff]  ;;  %v10230_v14 = vld [vmem:[#allocation75_spill] sm:$0xff]  ;;  %v10231_v62 = vld [vmem:[#allocation76_spill] sm:$0xff] }
 0x2fe   : > { %5927 = vst [vmem:[%s9606_s5 + $0x190] sm:$0xff] %v5829_v2  ;;  %v5733_v4 = vadd.f32 %v9596_v13, %v5628_v19  ;;  %v5434_v45 = vmax.f32 %v10218_v57, %v4181_v53  ;;  %v5532_v56 = vmax.f32 %v10219_v55, %v5161_v54  ;;  %v10232_v55 = vld [vmem:[#allocation77_spill] sm:$0xff] }
 0x2ff   : > { %v5832_v25 = vmax.f32 %v5734_v61, 0.0  ;;  %v5631_v26 = vmax.f32 %v5435_v29, %v5533_v3 }
 0x300   : > { %v5831_v58 = vmax.f32 %v5733_v4, 0.0  ;;  %v5630_v0 = vmax.f32 %v5434_v45, %v5532_v56  ;;  %v7096_v16 = vpop.f32.mrb[154].mxu0  ;;  %v7390_v27 = vpop.f32.mrb[154].mxu1 }
 0x301   : > { %5930 = vst [vmem:[%s9606_s5 + $0x1a8] sm:$0xff] %v5832_v25  ;;  %v5736_v28 = vadd.f32 %v9596_v13, %v5631_v26  ;;  %v5437_v6 = vmax.f32 %v10220_v5, %v7096_v16  ;;  %v5535_v48 = vmax.f32 %v10221_v47, %v7390_v27  ;;  %v4191_v9 = vpop.f32.mrb[155].mxu0  ;;  %v5171_v7 = vpop.f32.mrb[155].mxu1  ;;  %v10233_v25 = vld [vmem:[#allocation78_spill] sm:$0xff]  ;;  %v10234_v27 = vld [vmem:[#allocation79_spill] sm:$0xff]  ;;  %v10235_v5 = vld [vmem:[#allocation80_spill] sm:$0xff] }
 0x302   : > { %5929 = vst [vmem:[%s9606_s5 + $0x1a0] sm:$0xff] %v5831_v58  ;;  %v5735_v8 = vadd.f32 %v9596_v13, %v5630_v0  ;;  %v5436_v30 = vmax.f32 %v10222_v10, %v4191_v9  ;;  %v5534_v59 = vmax.f32 %v10223_v46, %v5171_v7  ;;  %v10236_v46 = vld [vmem:[#allocation81_spill] sm:$0xff] }
 0x303   : > { %v5834_v33 = vmax.f32 %v5736_v28, 0.0  ;;  %v5633_v34 = vmax.f32 %v5437_v6, %v5535_v48 }
 0x304   : > { %v5833_v11 = vmax.f32 %v5735_v8, 0.0  ;;  %v5632_v21 = vmax.f32 %v5436_v30, %v5534_v59  ;;  %v7099_v22 = vpop.f32.mrb[156].mxu0  ;;  %v7393_v12 = vpop.f32.mrb[156].mxu1 }
 0x305   : > { %5932 = vst [vmem:[%s9606_s5 + $0x1b8] sm:$0xff] %v5834_v33  ;;  %v5738_v60 = vadd.f32 %v9596_v13, %v5633_v34  ;;  %v5439_v23 = vmax.f32 %v10224_v35, %v7099_v22  ;;  %v5537_v36 = vmax.f32 %v10225_v24, %v7393_v12  ;;  %v4201_v63 = vpop.f32.mrb[157].mxu0  ;;  %v5181_v49 = vpop.f32.mrb[157].mxu1  ;;  %v10237_v33 = vld [vmem:[#allocation82_spill] sm:$0xff]  ;;  %v10238_v12 = vld [vmem:[#allocation83_spill] sm:$0xff]  ;;  %v10239_v35 = vld [vmem:[#allocation84_spill] sm:$0xff] }
 0x306   : > { %5931 = vst [vmem:[%s9606_s5 + $0x1b0] sm:$0xff] %v5833_v11  ;;  %v5737_v50 = vadd.f32 %v9596_v13, %v5632_v21  ;;  %v5438_v31 = vmax.f32 %v10226_v32, %v4201_v63  ;;  %v5536_v37 = vmax.f32 %v10227_v51, %v5181_v49  ;;  %v10240_v51 = vld [vmem:[#allocation85_spill] sm:$0xff] }
 0x307   : > { %v5836_v38 = vmax.f32 %v5738_v60, 0.0  ;;  %v5635_v17 = vmax.f32 %v5439_v23, %v5537_v36 }
 0x308   : > { %v5835_v41 = vmax.f32 %v5737_v50, 0.0  ;;  %v5634_v42 = vmax.f32 %v5438_v31, %v5536_v37  ;;  %v7102_v39 = vpop.f32.mrb[158].mxu0  ;;  %v7396_v40 = vpop.f32.mrb[158].mxu1  ;;  %v9863_v31 = vld [vmem:[%s10010_s2] ss:$0 sm:$0xff] }
 0x309   : > { %5934 = vst [vmem:[%s9606_s5 + $0x1c8] sm:$0xff] %v5836_v38  ;;  %v5740_v18 = vadd.f32 %v9596_v13, %v5635_v17  ;;  %v5441_v1 = vmax.f32 %v10228_v52, %v7102_v39  ;;  %v5539_v44 = vmax.f32 %v10229_v43, %v7396_v40  ;;  %v4211_v2 = vpop.f32.mrb[159].mxu0  ;;  %v5191_v19 = vpop.f32.mrb[159].mxu1  ;;  %v10241_v38 = vld [vmem:[#allocation86_spill] sm:$0xff]  ;;  %v10242_v40 = vld [vmem:[#allocation87_spill] sm:$0xff]  ;;  %v10243_v52 = vld [vmem:[#allocation88_spill] sm:$0xff] }
 0x30a   : > { %5933 = vst [vmem:[%s9606_s5 + $0x1c0] sm:$0xff] %v5835_v41  ;;  %v5739_v20 = vadd.f32 %v9596_v13, %v5634_v42  ;;  %v5440_v61 = vmax.f32 %v10230_v14, %v4211_v2  ;;  %v5538_v29 = vmax.f32 %v10231_v62, %v5191_v19  ;;  %v10244_v62 = vld [vmem:[#allocation89_spill] sm:$0xff] }
 0x30b   : > { %v5838_v15 = vmax.f32 %v5740_v18, 0.0  ;;  %v5637_v3 = vmax.f32 %v5441_v1, %v5539_v44 }
 0x30c   : > { %v5837_v53 = vmax.f32 %v5739_v20, 0.0  ;;  %v5636_v54 = vmax.f32 %v5440_v61, %v5538_v29  ;;  %v7105_v4 = vpop.f32.mrb[160].mxu0  ;;  %v7399_v57 = vpop.f32.mrb[160].mxu1 }
 0x30d   : > { %5936 = vst [vmem:[%s9606_s5 + $0x1d8] sm:$0xff] %v5838_v15  ;;  %v5742_v45 = vadd.f32 %v9596_v13, %v5637_v3  ;;  %v5443_v56 = vmax.f32 %v10232_v55, %v7105_v4  ;;  %v5541_v26 = vmax.f32 %v10233_v25, %v7399_v57  ;;  %v4221_v58 = vpop.f32.mrb[161].mxu0  ;;  %v5201_v0 = vpop.f32.mrb[161].mxu1  ;;  %v10245_v15 = vld [vmem:[#allocation90_spill] sm:$0xff]  ;;  %v10246_v57 = vld [vmem:[#allocation91_spill] sm:$0xff]  ;;  %v10247_v55 = vld [vmem:[#allocation92_spill] sm:$0xff] }
 0x30e   : > { %5935 = vst [vmem:[%s9606_s5 + $0x1d0] sm:$0xff] %v5837_v53  ;;  %v5741_v16 = vadd.f32 %v9596_v13, %v5636_v54  ;;  %v5442_v28 = vmax.f32 %v10234_v27, %v4221_v58  ;;  %v5540_v6 = vmax.f32 %v10235_v5, %v5201_v0  ;;  %v10248_v5 = vld [vmem:[#allocation93_spill] sm:$0xff] }
 0x30f   : > { %v5840_v47 = vmax.f32 %v5742_v45, 0.0  ;;  %v5639_v48 = vmax.f32 %v5443_v56, %v5541_v26 }
 0x310   : > { %v5839_v9 = vmax.f32 %v5741_v16, 0.0  ;;  %v5638_v7 = vmax.f32 %v5442_v28, %v5540_v6  ;;  %v7108_v8 = vpop.f32.mrb[162].mxu0  ;;  %v7402_v10 = vpop.f32.mrb[162].mxu1 }
 0x311   : > { %5938 = vst [vmem:[%s9606_s5 + $0x1e8] sm:$0xff] %v5840_v47  ;;  %v5744_v30 = vadd.f32 %v9596_v13, %v5639_v48  ;;  %v5445_v59 = vmax.f32 %v10236_v46, %v7108_v8  ;;  %v5543_v34 = vmax.f32 %v10237_v33, %v7402_v10  ;;  %v4231_v11 = vpop.f32.mrb[163].mxu0  ;;  %v5211_v21 = vpop.f32.mrb[163].mxu1  ;;  %v10249_v47 = vld [vmem:[#allocation94_spill] sm:$0xff]  ;;  %v10250_v10 = vld [vmem:[#allocation95_spill] sm:$0xff]  ;;  %v10251_v46 = vld [vmem:[#allocation96_spill] sm:$0xff] }
 0x312   : > { %5937 = vst [vmem:[%s9606_s5 + $0x1e0] sm:$0xff] %v5839_v9  ;;  %v5743_v22 = vadd.f32 %v9596_v13, %v5638_v7  ;;  %v5444_v60 = vmax.f32 %v10238_v12, %v4231_v11  ;;  %v5542_v23 = vmax.f32 %v10239_v35, %v5211_v21  ;;  %v10252_v35 = vld [vmem:[#allocation97_spill] sm:$0xff] }
 0x313   : > { %v5842_v24 = vmax.f32 %v5744_v30, 0.0  ;;  %v5641_v36 = vmax.f32 %v5445_v59, %v5543_v34 }
 0x314   : > { %v5841_v63 = vmax.f32 %v5743_v22, 0.0  ;;  %v5640_v49 = vmax.f32 %v5444_v60, %v5542_v23  ;;  %v7111_v50 = vpop.f32.mrb[164].mxu0  ;;  %v7405_v32 = vpop.f32.mrb[164].mxu1 }
 0x315   : > { %5940 = vst [vmem:[%s9606_s5 + $0x1f8] sm:$0xff] %v5842_v24  ;;  %v5746_v13 = vadd.f32 %v9863_v31, %v5641_v36  ;;  %v5447_v37 = vmax.f32 %v10240_v51, %v7111_v50  ;;  %v5545_v17 = vmax.f32 %v10241_v38, %v7405_v32  ;;  %v4241_v41 = vpop.f32.mrb[165].mxu0  ;;  %v5221_v42 = vpop.f32.mrb[165].mxu1  ;;  %v10253_v24 = vld [vmem:[#allocation98_spill] sm:$0xff]  ;;  %v10254_v32 = vld [vmem:[#allocation99_spill] sm:$0xff]  ;;  %v10255_v51 = vld [vmem:[#allocation100_spill] sm:$0xff] }
 0x316   : > { %5939 = vst [vmem:[%s9606_s5 + $0x1f0] sm:$0xff] %v5841_v63  ;;  %v5745_v39 = vadd.f32 %v9863_v31, %v5640_v49  ;;  %v5446_v18 = vmax.f32 %v10242_v40, %v4241_v41  ;;  %v5544_v1 = vmax.f32 %v10243_v52, %v5221_v42  ;;  %v10256_v52 = vld [vmem:[#allocation101_spill] sm:$0xff] }
 0x317   : > { %v5844_v43 = vmax.f32 %v5746_v13, 0.0  ;;  %v5643_v44 = vmax.f32 %v5447_v37, %v5545_v17 }
 0x318   : > { %v5843_v2 = vmax.f32 %v5745_v39, 0.0  ;;  %v5642_v19 = vmax.f32 %v5446_v18, %v5544_v1  ;;  %v7114_v20 = vpop.f32.mrb[166].mxu0  ;;  %v7408_v14 = vpop.f32.mrb[166].mxu1 }
 0x319   : > { %5942 = vst [vmem:[%s9606_s5 + $0x208] sm:$0xff] %v5844_v43  ;;  %v5748_v61 = vadd.f32 %v9863_v31, %v5643_v44  ;;  %v5449_v29 = vmax.f32 %v10244_v62, %v7114_v20  ;;  %v5547_v3 = vmax.f32 %v10245_v15, %v7408_v14  ;;  %v4251_v53 = vpop.f32.mrb[167].mxu0  ;;  %v5231_v54 = vpop.f32.mrb[167].mxu1  ;;  %v10257_v43 = vld [vmem:[#allocation102_spill] sm:$0xff]  ;;  %v10258_v14 = vld [vmem:[#allocation103_spill] sm:$0xff]  ;;  %v10259_v62 = vld [vmem:[#allocation104_spill] sm:$0xff] }
 0x31a   : > { %5941 = vst [vmem:[%s9606_s5 + $0x200] sm:$0xff] %v5843_v2  ;;  %v5747_v4 = vadd.f32 %v9863_v31, %v5642_v19  ;;  %v5448_v45 = vmax.f32 %v10246_v57, %v4251_v53  ;;  %v5546_v56 = vmax.f32 %v10247_v55, %v5231_v54  ;;  %v10260_v55 = vld [vmem:[#allocation105_spill] sm:$0xff] }
 0x31b   : > { %v5846_v25 = vmax.f32 %v5748_v61, 0.0  ;;  %v5645_v26 = vmax.f32 %v5449_v29, %v5547_v3 }
 0x31c   : > { %v5845_v58 = vmax.f32 %v5747_v4, 0.0  ;;  %v5644_v0 = vmax.f32 %v5448_v45, %v5546_v56  ;;  %v7117_v16 = vpop.f32.mrb[168].mxu0  ;;  %v7411_v27 = vpop.f32.mrb[168].mxu1 }
 0x31d   : > { %5944 = vst [vmem:[%s9606_s5 + $0x218] sm:$0xff] %v5846_v25  ;;  %v5750_v28 = vadd.f32 %v9863_v31, %v5645_v26  ;;  %v5451_v6 = vmax.f32 %v10248_v5, %v7117_v16  ;;  %v5549_v48 = vmax.f32 %v10249_v47, %v7411_v27  ;;  %v4261_v9 = vpop.f32.mrb[169].mxu0  ;;  %v5241_v7 = vpop.f32.mrb[169].mxu1  ;;  %v10261_v25 = vld [vmem:[#allocation106_spill] sm:$0xff]  ;;  %v10262_v27 = vld [vmem:[#allocation107_spill] sm:$0xff]  ;;  %v10263_v5 = vld [vmem:[#allocation108_spill] sm:$0xff] }
 0x31e   : > { %5943 = vst [vmem:[%s9606_s5 + $0x210] sm:$0xff] %v5845_v58  ;;  %v5749_v8 = vadd.f32 %v9863_v31, %v5644_v0  ;;  %v5450_v30 = vmax.f32 %v10250_v10, %v4261_v9  ;;  %v5548_v59 = vmax.f32 %v10251_v46, %v5241_v7  ;;  %v10264_v46 = vld [vmem:[#allocation109_spill] sm:$0xff] }
 0x31f   : > { %v5848_v33 = vmax.f32 %v5750_v28, 0.0  ;;  %v5647_v34 = vmax.f32 %v5451_v6, %v5549_v48 }
 0x320   : > { %v5847_v11 = vmax.f32 %v5749_v8, 0.0  ;;  %v5646_v21 = vmax.f32 %v5450_v30, %v5548_v59  ;;  %v7120_v22 = vpop.f32.mrb[170].mxu0  ;;  %v7414_v12 = vpop.f32.mrb[170].mxu1 }
 0x321   : > { %5946 = vst [vmem:[%s9606_s5 + $0x228] sm:$0xff] %v5848_v33  ;;  %v5752_v60 = vadd.f32 %v9863_v31, %v5647_v34  ;;  %v5453_v23 = vmax.f32 %v10252_v35, %v7120_v22  ;;  %v5551_v36 = vmax.f32 %v10253_v24, %v7414_v12  ;;  %v4271_v63 = vpop.f32.mrb[171].mxu0  ;;  %v5251_v49 = vpop.f32.mrb[171].mxu1  ;;  %v10265_v33 = vld [vmem:[#allocation110_spill] sm:$0xff]  ;;  %v10266_v12 = vld [vmem:[#allocation111_spill] sm:$0xff]  ;;  %v10267_v35 = vld [vmem:[#allocation112_spill] sm:$0xff] }
 0x322   : > { %5945 = vst [vmem:[%s9606_s5 + $0x220] sm:$0xff] %v5847_v11  ;;  %v5751_v50 = vadd.f32 %v9863_v31, %v5646_v21  ;;  %v5452_v13 = vmax.f32 %v10254_v32, %v4271_v63  ;;  %v5550_v37 = vmax.f32 %v10255_v51, %v5251_v49  ;;  %v10268_v51 = vld [vmem:[#allocation113_spill] sm:$0xff] }
 0x323   : > { %v5850_v38 = vmax.f32 %v5752_v60, 0.0  ;;  %v5649_v17 = vmax.f32 %v5453_v23, %v5551_v36 }
 0x324   : > { %v5849_v41 = vmax.f32 %v5751_v50, 0.0  ;;  %v5648_v42 = vmax.f32 %v5452_v13, %v5550_v37  ;;  %v7123_v39 = vpop.f32.mrb[172].mxu0  ;;  %v7417_v40 = vpop.f32.mrb[172].mxu1 }
 0x325   : > { %5948 = vst [vmem:[%s9606_s5 + $0x238] sm:$0xff] %v5850_v38  ;;  %v5754_v18 = vadd.f32 %v9863_v31, %v5649_v17  ;;  %v5455_v1 = vmax.f32 %v10256_v52, %v7123_v39  ;;  %v5553_v44 = vmax.f32 %v10257_v43, %v7417_v40  ;;  %v4281_v2 = vpop.f32.mrb[173].mxu0  ;;  %v5261_v19 = vpop.f32.mrb[173].mxu1  ;;  %v10269_v38 = vld [vmem:[#allocation114_spill] sm:$0xff]  ;;  %v10270_v40 = vld [vmem:[#allocation115_spill] sm:$0xff]  ;;  %v10271_v52 = vld [vmem:[#allocation116_spill] sm:$0xff] }
 0x326   : > { %5947 = vst [vmem:[%s9606_s5 + $0x230] sm:$0xff] %v5849_v41  ;;  %v5753_v20 = vadd.f32 %v9863_v31, %v5648_v42  ;;  %v5454_v61 = vmax.f32 %v10258_v14, %v4281_v2  ;;  %v5552_v29 = vmax.f32 %v10259_v62, %v5261_v19  ;;  %v10272_v62 = vld [vmem:[#allocation117_spill] sm:$0xff] }
 0x327   : > { %v5852_v15 = vmax.f32 %v5754_v18, 0.0  ;;  %v5651_v3 = vmax.f32 %v5455_v1, %v5553_v44 }
 0x328   : > { %v5851_v53 = vmax.f32 %v5753_v20, 0.0  ;;  %v5650_v54 = vmax.f32 %v5454_v61, %v5552_v29  ;;  %v7126_v4 = vpop.f32.mrb[174].mxu0  ;;  %v7420_v57 = vpop.f32.mrb[174].mxu1 }
 0x329   : > { %5950 = vst [vmem:[%s9606_s5 + $0x248] sm:$0xff] %v5852_v15  ;;  %v5756_v45 = vadd.f32 %v9863_v31, %v5651_v3  ;;  %v5457_v56 = vmax.f32 %v10260_v55, %v7126_v4  ;;  %v5555_v26 = vmax.f32 %v10261_v25, %v7420_v57  ;;  %v4291_v58 = vpop.f32.mrb[175].mxu0  ;;  %v5271_v0 = vpop.f32.mrb[175].mxu1  ;;  %v10273_v15 = vld [vmem:[#allocation118_spill] sm:$0xff]  ;;  %v10274_v57 = vld [vmem:[#allocation119_spill] sm:$0xff]  ;;  %v10275_v55 = vld [vmem:[#allocation120_spill] sm:$0xff] }
 0x32a   : > { %5949 = vst [vmem:[%s9606_s5 + $0x240] sm:$0xff] %v5851_v53  ;;  %v5755_v16 = vadd.f32 %v9863_v31, %v5650_v54  ;;  %v5456_v28 = vmax.f32 %v10262_v27, %v4291_v58  ;;  %v5554_v6 = vmax.f32 %v10263_v5, %v5271_v0  ;;  %v10276_v5 = vld [vmem:[#allocation121_spill] sm:$0xff] }
 0x32b   : > { %v5854_v47 = vmax.f32 %v5756_v45, 0.0  ;;  %v5653_v48 = vmax.f32 %v5457_v56, %v5555_v26 }
 0x32c   : > { %v5853_v9 = vmax.f32 %v5755_v16, 0.0  ;;  %v5652_v7 = vmax.f32 %v5456_v28, %v5554_v6  ;;  %v7129_v8 = vpop.f32.mrb[176].mxu0  ;;  %v7423_v10 = vpop.f32.mrb[176].mxu1 }
 0x32d   : > { %5952 = vst [vmem:[%s9606_s5 + $0x258] sm:$0xff] %v5854_v47  ;;  %v5758_v30 = vadd.f32 %v9863_v31, %v5653_v48  ;;  %v5459_v59 = vmax.f32 %v10264_v46, %v7129_v8  ;;  %v5557_v34 = vmax.f32 %v10265_v33, %v7423_v10  ;;  %v4301_v11 = vpop.f32.mrb[177].mxu0  ;;  %v5281_v21 = vpop.f32.mrb[177].mxu1  ;;  %v10277_v47 = vld [vmem:[#allocation122_spill] sm:$0xff]  ;;  %v10278_v10 = vld [vmem:[#allocation123_spill] sm:$0xff]  ;;  %v10279_v46 = vld [vmem:[#allocation124_spill] sm:$0xff] }
 0x32e   : > { %5951 = vst [vmem:[%s9606_s5 + $0x250] sm:$0xff] %v5853_v9  ;;  %v5757_v22 = vadd.f32 %v9863_v31, %v5652_v7  ;;  %v5458_v60 = vmax.f32 %v10266_v12, %v4301_v11  ;;  %v5556_v23 = vmax.f32 %v10267_v35, %v5281_v21  ;;  %v10280_v35 = vld [vmem:[#allocation125_spill] sm:$0xff] }
 0x32f   : > { %v5856_v24 = vmax.f32 %v5758_v30, 0.0  ;;  %v5655_v36 = vmax.f32 %v5459_v59, %v5557_v34 }
 0x330   : > { %v5855_v63 = vmax.f32 %v5757_v22, 0.0  ;;  %v5654_v49 = vmax.f32 %v5458_v60, %v5556_v23  ;;  %v7132_v50 = vpop.f32.mrb[178].mxu0  ;;  %v7426_v32 = vpop.f32.mrb[178].mxu1 }
 0x331   : > { %5954 = vst [vmem:[%s9606_s5 + $0x268] sm:$0xff] %v5856_v24  ;;  %v5760_v13 = vadd.f32 %v9863_v31, %v5655_v36  ;;  %v5461_v37 = vmax.f32 %v10268_v51, %v7132_v50  ;;  %v5559_v17 = vmax.f32 %v10269_v38, %v7426_v32  ;;  %v4311_v41 = vpop.f32.mrb[179].mxu0  ;;  %v5291_v42 = vpop.f32.mrb[179].mxu1  ;;  %v10281_v24 = vld [vmem:[#allocation126_spill] sm:$0xff]  ;;  %v10282_v32 = vld [vmem:[#allocation127_spill] sm:$0xff]  ;;  %v10283_v51 = vld [vmem:[#allocation128_spill] sm:$0xff] }
 0x332   : > { %5953 = vst [vmem:[%s9606_s5 + $0x260] sm:$0xff] %v5855_v63  ;;  %v5759_v39 = vadd.f32 %v9863_v31, %v5654_v49  ;;  %v5460_v18 = vmax.f32 %v10270_v40, %v4311_v41  ;;  %v5558_v1 = vmax.f32 %v10271_v52, %v5291_v42  ;;  %v10284_v52 = vld [vmem:[#allocation129_spill] sm:$0xff] }
 0x333   : > { %v5858_v43 = vmax.f32 %v5760_v13, 0.0  ;;  %v5657_v44 = vmax.f32 %v5461_v37, %v5559_v17 }
 0x334   : > { %v5857_v2 = vmax.f32 %v5759_v39, 0.0  ;;  %v5656_v19 = vmax.f32 %v5460_v18, %v5558_v1  ;;  %v7135_v20 = vpop.f32.mrb[180].mxu0  ;;  %v7429_v14 = vpop.f32.mrb[180].mxu1 }
 0x335   : > { %5956 = vst [vmem:[%s9606_s5 + $0x278] sm:$0xff] %v5858_v43  ;;  %v5762_v61 = vadd.f32 %v9863_v31, %v5657_v44  ;;  %v5463_v29 = vmax.f32 %v10272_v62, %v7135_v20  ;;  %v5561_v3 = vmax.f32 %v10273_v15, %v7429_v14  ;;  %v4321_v53 = vpop.f32.mrb[181].mxu0  ;;  %v5301_v54 = vpop.f32.mrb[181].mxu1  ;;  %v10285_v43 = vld [vmem:[#allocation130_spill] sm:$0xff]  ;;  %v10286_v14 = vld [vmem:[#allocation131_spill] sm:$0xff]  ;;  %v10287_v62 = vld [vmem:[#allocation132_spill] sm:$0xff] }
 0x336   : > { %5955 = vst [vmem:[%s9606_s5 + $0x270] sm:$0xff] %v5857_v2  ;;  %v5761_v4 = vadd.f32 %v9863_v31, %v5656_v19  ;;  %v5462_v45 = vmax.f32 %v10274_v57, %v4321_v53  ;;  %v5560_v56 = vmax.f32 %v10275_v55, %v5301_v54  ;;  %v10288_v55 = vld [vmem:[#allocation133_spill] sm:$0xff] }
 0x337   : > { %v5860_v25 = vmax.f32 %v5762_v61, 0.0  ;;  %v5659_v26 = vmax.f32 %v5463_v29, %v5561_v3 }
 0x338   : > { %v5859_v58 = vmax.f32 %v5761_v4, 0.0  ;;  %v5658_v0 = vmax.f32 %v5462_v45, %v5560_v56  ;;  %v7138_v16 = vpop.f32.mrb[182].mxu0  ;;  %v7432_v27 = vpop.f32.mrb[182].mxu1 }
 0x339   : > { %5958 = vst [vmem:[%s9606_s5 + $0x288] sm:$0xff] %v5860_v25  ;;  %v5764_v28 = vadd.f32 %v9863_v31, %v5659_v26  ;;  %v5465_v6 = vmax.f32 %v10276_v5, %v7138_v16  ;;  %v5563_v48 = vmax.f32 %v10277_v47, %v7432_v27  ;;  %v4331_v9 = vpop.f32.mrb[183].mxu0  ;;  %v5311_v7 = vpop.f32.mrb[183].mxu1  ;;  %v10289_v25 = vld [vmem:[#allocation134_spill] sm:$0xff]  ;;  %v10290_v27 = vld [vmem:[#allocation135_spill] sm:$0xff]  ;;  %v10291_v5 = vld [vmem:[#allocation136_spill] sm:$0xff] }
 0x33a   : > { %5957 = vst [vmem:[%s9606_s5 + $0x280] sm:$0xff] %v5859_v58  ;;  %v5763_v8 = vadd.f32 %v9863_v31, %v5658_v0  ;;  %v5464_v30 = vmax.f32 %v10278_v10, %v4331_v9  ;;  %v5562_v59 = vmax.f32 %v10279_v46, %v5311_v7  ;;  %v10292_v46 = vld [vmem:[#allocation137_spill] sm:$0xff] }
 0x33b   : > { %v5862_v33 = vmax.f32 %v5764_v28, 0.0  ;;  %v5661_v34 = vmax.f32 %v5465_v6, %v5563_v48 }
 0x33c   : > { %v5861_v11 = vmax.f32 %v5763_v8, 0.0  ;;  %v5660_v21 = vmax.f32 %v5464_v30, %v5562_v59  ;;  %v7141_v22 = vpop.f32.mrb[184].mxu0  ;;  %v7435_v12 = vpop.f32.mrb[184].mxu1 }
 0x33d   : > { %5960 = vst [vmem:[%s9606_s5 + $0x298] sm:$0xff] %v5862_v33  ;;  %v5766_v60 = vadd.f32 %v9863_v31, %v5661_v34  ;;  %v5467_v23 = vmax.f32 %v10280_v35, %v7141_v22  ;;  %v5565_v36 = vmax.f32 %v10281_v24, %v7435_v12  ;;  %v4341_v63 = vpop.f32.mrb[185].mxu0  ;;  %v5321_v49 = vpop.f32.mrb[185].mxu1  ;;  %v10293_v33 = vld [vmem:[#allocation138_spill] sm:$0xff]  ;;  %v10294_v12 = vld [vmem:[#allocation139_spill] sm:$0xff]  ;;  %v10295_v35 = vld [vmem:[#allocation140_spill] sm:$0xff] }
 0x33e   : > { %5959 = vst [vmem:[%s9606_s5 + $0x290] sm:$0xff] %v5861_v11  ;;  %v5765_v50 = vadd.f32 %v9863_v31, %v5660_v21  ;;  %v5466_v13 = vmax.f32 %v10282_v32, %v4341_v63  ;;  %v5564_v37 = vmax.f32 %v10283_v51, %v5321_v49  ;;  %v10296_v51 = vld [vmem:[#allocation141_spill] sm:$0xff] }
 0x33f   : > { %v5864_v38 = vmax.f32 %v5766_v60, 0.0  ;;  %v5663_v17 = vmax.f32 %v5467_v23, %v5565_v36 }
 0x340   : > { %v5863_v41 = vmax.f32 %v5765_v50, 0.0  ;;  %v5662_v42 = vmax.f32 %v5466_v13, %v5564_v37  ;;  %v7144_v39 = vpop.f32.mrb[186].mxu0  ;;  %v7438_v40 = vpop.f32.mrb[186].mxu1 }
 0x341   : > { %5962 = vst [vmem:[%s9606_s5 + $0x2a8] sm:$0xff] %v5864_v38  ;;  %v5768_v18 = vadd.f32 %v9863_v31, %v5663_v17  ;;  %v5469_v1 = vmax.f32 %v10284_v52, %v7144_v39  ;;  %v5567_v44 = vmax.f32 %v10285_v43, %v7438_v40  ;;  %v4351_v2 = vpop.f32.mrb[187].mxu0  ;;  %v5331_v19 = vpop.f32.mrb[187].mxu1  ;;  %v10297_v38 = vld [vmem:[#allocation142_spill] sm:$0xff]  ;;  %v10298_v40 = vld [vmem:[#allocation143_spill] sm:$0xff]  ;;  %v10299_v52 = vld [vmem:[#allocation144_spill] sm:$0xff] }
 0x342   : > { %5961 = vst [vmem:[%s9606_s5 + $0x2a0] sm:$0xff] %v5863_v41  ;;  %v5767_v20 = vadd.f32 %v9863_v31, %v5662_v42  ;;  %v5468_v61 = vmax.f32 %v10286_v14, %v4351_v2  ;;  %v5566_v29 = vmax.f32 %v10287_v62, %v5331_v19  ;;  %v10300_v62 = vld [vmem:[#allocation145_spill] sm:$0xff] }
 0x343   : > { %v5866_v15 = vmax.f32 %v5768_v18, 0.0  ;;  %v5665_v3 = vmax.f32 %v5469_v1, %v5567_v44 }
 0x344   : > { %v5865_v53 = vmax.f32 %v5767_v20, 0.0  ;;  %v5664_v54 = vmax.f32 %v5468_v61, %v5566_v29  ;;  %v7147_v4 = vpop.f32.mrb[188].mxu0  ;;  %v7441_v57 = vpop.f32.mrb[188].mxu1 }
 0x345   : > { %5964 = vst [vmem:[%s9606_s5 + $0x2b8] sm:$0xff] %v5866_v15  ;;  %v5770_v45 = vadd.f32 %v9863_v31, %v5665_v3  ;;  %v5471_v56 = vmax.f32 %v10288_v55, %v7147_v4  ;;  %v5569_v26 = vmax.f32 %v10289_v25, %v7441_v57  ;;  %v4361_v58 = vpop.f32.mrb[189].mxu0  ;;  %v5341_v0 = vpop.f32.mrb[189].mxu1  ;;  %v10301_v15 = vld [vmem:[#allocation146_spill] sm:$0xff]  ;;  %v10302_v57 = vld [vmem:[#allocation147_spill] sm:$0xff]  ;;  %v10303_v55 = vld [vmem:[#allocation148_spill] sm:$0xff] }
 0x346   : > { %5963 = vst [vmem:[%s9606_s5 + $0x2b0] sm:$0xff] %v5865_v53  ;;  %v5769_v16 = vadd.f32 %v9863_v31, %v5664_v54  ;;  %v5470_v28 = vmax.f32 %v10290_v27, %v4361_v58  ;;  %v5568_v6 = vmax.f32 %v10291_v5, %v5341_v0 }
 0x347   : > { %v5868_v47 = vmax.f32 %v5770_v45, 0.0  ;;  %v5667_v48 = vmax.f32 %v5471_v56, %v5569_v26 }
 0x348   : > { %v5867_v9 = vmax.f32 %v5769_v16, 0.0  ;;  %v5666_v7 = vmax.f32 %v5470_v28, %v5568_v6  ;;  %v7150_v8 = vpop.f32.mrb[190].mxu0  ;;  %v7444_v10 = vpop.f32.mrb[190].mxu1 }
 0x349   : > { %5966 = vst [vmem:[%s9606_s5 + $0x2c8] sm:$0xff] %v5868_v47  ;;  %v5772_v30 = vadd.f32 %v9863_v31, %v5667_v48  ;;  %v5473_v59 = vmax.f32 %v10292_v46, %v7150_v8  ;;  %v5571_v34 = vmax.f32 %v10293_v33, %v7444_v10  ;;  %v4371_v11 = vpop.f32.mrb[191].mxu0  ;;  %v5351_v21 = vpop.f32.mrb[191].mxu1 }
 0x34a   : > { %5965 = vst [vmem:[%s9606_s5 + $0x2c0] sm:$0xff] %v5867_v9  ;;  %v5771_v22 = vadd.f32 %v9863_v31, %v5666_v7  ;;  %v5472_v60 = vmax.f32 %v10294_v12, %v4371_v11  ;;  %v5570_v23 = vmax.f32 %v10295_v35, %v5351_v21 }
 0x34b   : > { %v5870_v24 = vmax.f32 %v5772_v30, 0.0  ;;  %v5669_v36 = vmax.f32 %v5473_v59, %v5571_v34 }
 0x34c   : > { %v5869_v63 = vmax.f32 %v5771_v22, 0.0  ;;  %v5668_v49 = vmax.f32 %v5472_v60, %v5570_v23  ;;  %v7153_v50 = vpop.f32.mrb[192].mxu0  ;;  %v7447_v32 = vpop.f32.mrb[192].mxu1 }
 0x34d   : > { %5968 = vst [vmem:[%s9606_s5 + $0x2d8] sm:$0xff] %v5870_v24  ;;  %v5774_v13 = vadd.f32 %v9863_v31, %v5669_v36  ;;  %v5475_v37 = vmax.f32 %v10296_v51, %v7153_v50  ;;  %v5573_v17 = vmax.f32 %v10297_v38, %v7447_v32  ;;  %v4381_v41 = vpop.f32.mrb[193].mxu0  ;;  %v5361_v42 = vpop.f32.mrb[193].mxu1 }
 0x34e   : > { %5967 = vst [vmem:[%s9606_s5 + $0x2d0] sm:$0xff] %v5869_v63  ;;  %v5773_v39 = vadd.f32 %v9863_v31, %v5668_v49  ;;  %v5474_v18 = vmax.f32 %v10298_v40, %v4381_v41  ;;  %v5572_v1 = vmax.f32 %v10299_v52, %v5361_v42 }
 0x34f   : > { %v5872_v43 = vmax.f32 %v5774_v13, 0.0  ;;  %v5671_v44 = vmax.f32 %v5475_v37, %v5573_v17 }
 0x350   : > { %v5871_v2 = vmax.f32 %v5773_v39, 0.0  ;;  %v5670_v19 = vmax.f32 %v5474_v18, %v5572_v1  ;;  %v7156_v20 = vpop.f32.mrb[194].mxu0  ;;  %v7450_v14 = vpop.f32.mrb[194].mxu1 }
 0x351   : > { %5970 = vst [vmem:[%s9606_s5 + $0x2e8] sm:$0xff] %v5872_v43  ;;  %v5776_v61 = vadd.f32 %v9863_v31, %v5671_v44  ;;  %v5477_v29 = vmax.f32 %v10300_v62, %v7156_v20  ;;  %v5575_v3 = vmax.f32 %v10301_v15, %v7450_v14  ;;  %v4391_v53 = vpop.f32.mrb[195].mxu0  ;;  %v5371_v54 = vpop.f32.mrb[195].mxu1 }
 0x352   : > { %5969 = vst [vmem:[%s9606_s5 + $0x2e0] sm:$0xff] %v5871_v2  ;;  %v5775_v4 = vadd.f32 %v9863_v31, %v5670_v19  ;;  %v5476_v45 = vmax.f32 %v10302_v57, %v4391_v53  ;;  %v5574_v56 = vmax.f32 %v10303_v55, %v5371_v54 }
 0x353   : > { %v5874_v25 = vmax.f32 %v5776_v61, 0.0  ;;  %v5673_v26 = vmax.f32 %v5477_v29, %v5575_v3 }
 0x354   : > { %v5873_v58 = vmax.f32 %v5775_v4, 0.0  ;;  %v5672_v0 = vmax.f32 %v5476_v45, %v5574_v56 }
 0x355   : > { %5972 = vst [vmem:[%s9606_s5 + $0x2f8] sm:$0xff] %v5874_v25  ;;  %v5778_v16 = vadd.f32 %v9863_v31, %v5673_v26 }
 0x356   : > { %5971 = vst [vmem:[%s9606_s5 + $0x2f0] sm:$0xff] %v5873_v58  ;;  %v5777_v27 = vadd.f32 %v9863_v31, %v5672_v0 }
 0x357   : > { %v5876_v28 = vmax.f32 %v5778_v16, 0.0 }
 0x358   : > { %v5875_v5 = vmax.f32 %v5777_v27, 0.0 }
 0x359   : > { %5974 = vst [vmem:[%s9606_s5 + $0x308] sm:$0xff] %v5876_v28 }
 0x35a   : > { %5973 = vst [vmem:[%s9606_s5 + $0x300] sm:$0xff] %v5875_v5 }
 0x35b PF: > { %p10_p9 = scmp.ge.s32.totalorder %s7573_s16, 4   ;;  %s10304_s12 = smov %s7529_s13 }
 0x35c   : > { %s10305_s13 = smov %s7582_s19  ;;  %s10306_s14 = smov %s7573_s16 }
 0x35d   :  { %12 = sbr.rel (!%p10_p9) target bundleno = 2 (0x2), region = 105 }

// kernel: net_forward.3
= control target key start
LH: loop header
LB: loop body
LE: loop exit
PB: predicated region body
PF: predicated region fallthrough
CT: control target
= control target key end

     0   :  { %v9066_v0 = vmov 0.0|0.0   ;;  %vm251_vm0 = vcmask 179200   ;;  %v9055_v29 = vmov 0.0   ;;  %vm552_vm1 = vcmask 1045504   ;;  %s9045_s1 = inlined_call_operand.vmem [shape: f32[150,128], index: 1, kind: input, shape index: {}]   ;;  %s9046_s0 = inlined_call_operand.vmem [shape: f32[4,25,8,150], index: 0, kind: input, shape index: {}]   ;;  %s9047_s3 = inlined_call_operand.vmem [shape: f32[25,128,128], index: 3, kind: input, shape index: {}]   ;;  %s9048_s2 = inlined_call_operand.vmem [shape: f32[1,128], index: 2, kind: input, shape index: {}]   ;;  %s9049_s5 = inlined_call_operand.vmem [shape: f32[128,128], index: 5, kind: input, shape index: {}]   ;;  %s9050_s7 = inlined_call_operand.vmem [shape: f32[128,128], index: 7, kind: input, shape index: {}]   ;;  %s9051_s4 = inlined_call_operand.vmem [shape: f32[1,128], index: 4, kind: input, shape index: {}]   ;;  %s9052_s6 = inlined_call_operand.vmem [shape: f32[1,128], index: 6, kind: input, shape index: {}]   ;;  %s9053_s8 = inlined_call_operand.vmem [shape: f32[1,128], index: 8, kind: input, shape index: {}]   ;;  %s9054_s9 = inlined_call_operand.vmem [shape: f32[8,128], index: 9, kind: output, shape index: {}]  }
   0x1   :  { %5544 = vmatprep.subr.bf16.mxu0 %v9066_v0  ;;  %v232_v1 = vld [vmem:[%s9045_s1] sm:$0xff]  ;;  %v233_v2 = vld [vmem:[%s9045_s1 + $0x8] sm:$0xff]  ;;  %v234_v3 = vld [vmem:[%s9045_s1 + $0x10] sm:$0xff]  ;;  %5571 = vmatprep.subr.bf16.mxu1 %v9066_v0  ;;  %vm6226_vm2 = vmmov 0  }
   0x2   :  { %v5545_v4 = vpack.c.bf16 %v233_v2, %v232_v1  ;;  %v235_v5 = vld [vmem:[%s9045_s1 + $0x18] sm:$0xff]  ;;  %v236_v7 = vld [vmem:[%s9045_s1 + $0x20] sm:$0xff]  ;;  %v237_v8 = vld [vmem:[%s9045_s1 + $0x28] sm:$0xff]  ;;  %4631 = vmatprep.mubr.msk.f32.mxu1 %vm6226_vm2, %v9055_v29 }
   0x3   :  { %v5548_v6 = vpack.c.bf16 %v235_v5, %v234_v3  ;;  %v33_v9 = vld [vmem:[%s9046_s0 + $0x8] sm:$0xff]  ;;  %v5551_v10 = vpack.c.bf16 %v237_v8, %v236_v7  ;;  %v238_v11 = vld [vmem:[%s9045_s1 + $0x30] sm:$0xff]  ;;  %v239_v12 = vld [vmem:[%s9045_s1 + $0x38] sm:$0xff] }
   0x4   :  { %5546 = vmatpush1.bf16.msra.mxu0 %v5545_v4  ;;  %3652 = vmatprep.mubr.msk.f32.mxu0 %vm251_vm0, %v33_v9  ;;  %v5554_v13 = vpack.c.bf16 %v239_v12, %v238_v11  ;;  %v240_v14 = vld [vmem:[%s9045_s1 + $0x40] sm:$0xff]  ;;  %v241_v15 = vld [vmem:[%s9045_s1 + $0x48] sm:$0xff]  ;;  %v242_v17 = vld [vmem:[%s9045_s1 + $0x50] sm:$0xff] }
   0x5   :  { %5547 = vmatprep.subr.bf16.mxu0 %v9066_v0  ;;  %v5557_v16 = vpack.c.bf16 %v241_v15, %v240_v14  ;;  %v243_v18 = vld [vmem:[%s9045_s1 + $0x58] sm:$0xff]  ;;  %v244_v20 = vld [vmem:[%s9045_s1 + $0x60] sm:$0xff]  ;;  %v245_v21 = vld [vmem:[%s9045_s1 + $0x68] sm:$0xff] }
   0x6   :  { %v5560_v19 = vpack.c.bf16 %v243_v18, %v242_v17  ;;  %v5563_v22 = vpack.c.bf16 %v245_v21, %v244_v20  ;;  %v246_v23 = vld [vmem:[%s9045_s1 + $0x70] sm:$0xff]  ;;  %v247_v24 = vld [vmem:[%s9045_s1 + $0x78] sm:$0xff]  ;;  %v248_v26 = vld [vmem:[%s9045_s1 + $0x80] sm:$0xff] }
   0x7   :  { %v5566_v25 = vpack.c.bf16 %v247_v24, %v246_v23  ;;  %v249_v27 = vld [vmem:[%s9045_s1 + $0x88] sm:$0xff]  ;;  %v250_v30 = vld [vmem:[%s9045_s1 + $0x90] sm:$0x3f]  ;;  %v32_v31 = vld [vmem:[%s9046_s0] sm:$0xff] }
   0x8   :  { %5549 = vmatpush1.bf16.msra.mxu0 %v5548_v6  ;;  %v5569_v28 = vpack.c.bf16 %v249_v27, %v248_v26  ;;  %v35_v32 = vld [vmem:[%s9046_s0 + $0x18] sm:$0xff]  ;;  %v34_v33 = vld [vmem:[%s9046_s0 + $0x10] sm:$0xff]  ;;  %v37_v34 = vld [vmem:[%s9046_s0 + $0x28] sm:$0xff] }
   0x9   :  { %5550 = vmatprep.subr.bf16.mxu0 %v9066_v0  ;;  %v36_v35 = vld [vmem:[%s9046_s0 + $0x20] sm:$0xff]  ;;  %v39_v36 = vld [vmem:[%s9046_s0 + $0x38] sm:$0xff]  ;;  %v38_v37 = vld [vmem:[%s9046_s0 + $0x30] sm:$0xff] }
   0xa   :  { %v41_v38 = vld [vmem:[%s9046_s0 + $0x48] sm:$0xff]  ;;  %v40_v39 = vld [vmem:[%s9046_s0 + $0x40] sm:$0xff]  ;;  %v43_v40 = vld [vmem:[%s9046_s0 + $0x58] sm:$0xff] }
   0xb   :  { %v42_v41 = vld [vmem:[%s9046_s0 + $0x50] sm:$0xff]  ;;  %v45_v42 = vld [vmem:[%s9046_s0 + $0x68] sm:$0xff]  ;;  %v44_v43 = vld [vmem:[%s9046_s0 + $0x60] sm:$0xff] }
   0xc   :  { %5552 = vmatpush1.bf16.msra.mxu0 %v5551_v10  ;;  %v47_v44 = vld [vmem:[%s9046_s0 + $0x78] sm:$0xff]  ;;  %v46_v45 = vld [vmem:[%s9046_s0 + $0x70] sm:$0xff]  ;;  %v49_v46 = vld [vmem:[%s9046_s0 + $0x88] sm:$0xff] }
   0xd   :  { %5553 = vmatprep.subr.bf16.mxu0 %v9066_v0  ;;  %v48_v47 = vld [vmem:[%s9046_s0 + $0x80] sm:$0xff]  ;;  %v51_v48 = vld [vmem:[%s9046_s0 + $0x98] sm:$0xff]  ;;  %v50_v49 = vld [vmem:[%s9046_s0 + $0x90] sm:$0xff] }
   0xe   :  { %v53_v50 = vld [vmem:[%s9046_s0 + $0xa8] sm:$0xff]  ;;  %v52_v51 = vld [vmem:[%s9046_s0 + $0xa0] sm:$0xff]  ;;  %v55_v52 = vld [vmem:[%s9046_s0 + $0xb8] sm:$0xff] }
   0xf   :  { %v54_v53 = vld [vmem:[%s9046_s0 + $0xb0] sm:$0xff]  ;;  %v57_v54 = vld [vmem:[%s9046_s0 + $0xc8] sm:$0xff]  ;;  %v56_v55 = vld [vmem:[%s9046_s0 + $0xc0] sm:$0xff] }
  0x10   :  { %5555 = vmatpush1.bf16.msra.mxu0 %v5554_v13  ;;  %v59_v56 = vld [vmem:[%s9046_s0 + $0xd8] sm:$0xff]  ;;  %v58_v57 = vld [vmem:[%s9046_s0 + $0xd0] sm:$0xff]  ;;  %v61_v58 = vld [vmem:[%s9046_s0 + $0xe8] sm:$0xff] }
  0x11   :  { %5556 = vmatprep.subr.bf16.mxu0 %v9066_v0  ;;  %v60_v59 = vld [vmem:[%s9046_s0 + $0xe0] sm:$0xff]  ;;  %v63_v60 = vld [vmem:[%s9046_s0 + $0xf8] sm:$0xff]  ;;  %v62_v61 = vld [vmem:[%s9046_s0 + $0xf0] sm:$0xff] }
  0x12   :  { %v65_v62 = vld [vmem:[%s9046_s0 + $0x108] sm:$0xff]  ;;  %v64_v63 = vld [vmem:[%s9046_s0 + $0x100] sm:$0xff]  ;;  %v67_v1 = vld [vmem:[%s9046_s0 + $0x118] sm:$0xff] }
  0x13   :  { %v66_v2 = vld [vmem:[%s9046_s0 + $0x110] sm:$0xff]  ;;  %v69_v3 = vld [vmem:[%s9046_s0 + $0x128] sm:$0xff]  ;;  %v68_v4 = vld [vmem:[%s9046_s0 + $0x120] sm:$0xff] }
  0x14   :  { %5558 = vmatpush1.bf16.msra.mxu0 %v5557_v16  ;;  %v71_v5 = vld [vmem:[%s9046_s0 + $0x138] sm:$0xff]  ;;  %v70_v6 = vld [vmem:[%s9046_s0 + $0x130] sm:$0xff]  ;;  %v73_v7 = vld [vmem:[%s9046_s0 + $0x148] sm:$0xff] }
  0x15   :  { %5559 = vmatprep.subr.bf16.mxu0 %v9066_v0  ;;  %v72_v8 = vld [vmem:[%s9046_s0 + $0x140] sm:$0xff]  ;;  %v75_v9 = vld [vmem:[%s9046_s0 + $0x158] sm:$0xff]  ;;  %v74_v10 = vld [vmem:[%s9046_s0 + $0x150] sm:$0xff] }
  0x16   :  { %v77_v11 = vld [vmem:[%s9046_s0 + $0x168] sm:$0xff]  ;;  %v76_v12 = vld [vmem:[%s9046_s0 + $0x160] sm:$0xff]  ;;  %v79_v13 = vld [vmem:[%s9046_s0 + $0x178] sm:$0xff] }
  0x17   :  { %v78_v14 = vld [vmem:[%s9046_s0 + $0x170] sm:$0xff]  ;;  %v81_v15 = vld [vmem:[%s9046_s0 + $0x188] sm:$0xff]  ;;  %v80_v16 = vld [vmem:[%s9046_s0 + $0x180] sm:$0xff] }
  0x18   :  { %5561 = vmatpush1.bf16.msra.mxu0 %v5560_v19  ;;  %v83_v17 = vld [vmem:[%s9046_s0 + $0x198] sm:$0xff]  ;;  %v82_v18 = vld [vmem:[%s9046_s0 + $0x190] sm:$0xff]  ;;  %v85_v19 = vld [vmem:[%s9046_s0 + $0x1a8] sm:$0xff] }
  0x19   :  { %5562 = vmatprep.subr.bf16.mxu0 %v9066_v0  ;;  %v84_v20 = vld [vmem:[%s9046_s0 + $0x1a0] sm:$0xff]  ;;  %v87_v21 = vld [vmem:[%s9046_s0 + $0x1b8] sm:$0xff]  ;;  %v89_v23 = vld [vmem:[%s9046_s0 + $0x1c8] sm:$0xff] }
  0x1a   :  { %v88_v24 = vld [vmem:[%s9046_s0 + $0x1c0] sm:$0xff]  ;;  %v90_v26 = vld [vmem:[%s9046_s0 + $0x1d0] sm:$0xff]  ;;  %v93_v27 = vld [vmem:[%s9046_s0 + $0x1e8] sm:$0xff] }
  0x1c   :  { %5564 = vmatpush1.bf16.msra.mxu0 %v5563_v22  ;;  %v86_v22 = vld [vmem:[%s9046_s0 + $0x1b0] sm:$0xff] }
  0x1d   :  { %5565 = vmatprep.subr.bf16.mxu0 %v9066_v0 }
  0x20   :  { %5567 = vmatpush1.bf16.msra.mxu0 %v5566_v25  ;;  %v91_v25 = vld [vmem:[%s9046_s0 + $0x1d8] sm:$0xff] }
  0x21   :  { %5568 = vmatprep.subr.bf16.mxu0 %v9066_v0 }
  0x24   :  { %5570 = vmatpush1.bf16.msra.mxu0 %v5569_v28  ;;  %v92_v28 = vld [vmem:[%s9046_s0 + $0x1e0] sm:$0xff] }
  0x25   :  { %592 = vmatprep.subr.mxu0 %v9055_v29 }
  0x28   :  { %3651 = vmatpush1.msk.msra.mxu0 %vm552_vm1, %v250_v30  ;;  %v95_v30 = vld [vmem:[%s9046_s0 + $0x1f8] sm:$0xff] }
  0x29   :  { %621 = vmatmul.mubr.f32.vlgmr.msra.gmra.mrb[0].mxu0 %v32_v31  ;;  %5883 = vmatprep.subr.bf16.mxu0 %v9066_v0  ;;  %v94_v31 = vld [vmem:[%s9046_s0 + $0x1f0] sm:$0xff] }
  0x2a   :  { %3653 = vmatprep.mubr.msk.f32.mxu0 %vm251_vm0, %v35_v32  ;;  %v97_v32 = vld [vmem:[%s9046_s0 + $0x208] sm:$0xff] }
  0x2d   :  { %626 = vmatmul.mubr.f32.gmra.mrb[2].mxu0 %v34_v33  ;;  %v96_v33 = vld [vmem:[%s9046_s0 + $0x200] sm:$0xff] }
  0x2e   :  { %3654 = vmatprep.mubr.msk.f32.mxu0 %vm251_vm0, %v37_v34  ;;  %v99_v34 = vld [vmem:[%s9046_s0 + $0x218] sm:$0xff] }
  0x31   :  { %631 = vmatmul.mubr.f32.gmra.mrb[4].mxu0 %v36_v35  ;;  %v98_v35 = vld [vmem:[%s9046_s0 + $0x210] sm:$0xff] }
  0x32   :  { %3655 = vmatprep.mubr.msk.f32.mxu0 %vm251_vm0, %v39_v36  ;;  %v101_v36 = vld [vmem:[%s9046_s0 + $0x228] sm:$0xff] }
  0x35   :  { %636 = vmatmul.mubr.f32.gmra.mrb[6].mxu0 %v38_v37  ;;  %v100_v37 = vld [vmem:[%s9046_s0 + $0x220] sm:$0xff] }
  0x36   :  { %3656 = vmatprep.mubr.msk.f32.mxu0 %vm251_vm0, %v41_v38  ;;  %v103_v38 = vld [vmem:[%s9046_s0 + $0x238] sm:$0xff] }
  0x39   :  { %641 = vmatmul.mubr.f32.gmra.mrb[8].mxu0 %v40_v39  ;;  %v102_v39 = vld [vmem:[%s9046_s0 + $0x230] sm:$0xff] }
  0x3a   :  { %3657 = vmatprep.mubr.msk.f32.mxu0 %vm251_vm0, %v43_v40  ;;  %v105_v40 = vld [vmem:[%s9046_s0 + $0x248] sm:$0xff] }
  0x3d   :  { %646 = vmatmul.mubr.f32.gmra.mrb[10].mxu0 %v42_v41  ;;  %v104_v41 = vld [vmem:[%s9046_s0 + $0x240] sm:$0xff] }
  0x3e   :  { %3658 = vmatprep.mubr.msk.f32.mxu0 %vm251_vm0, %v45_v42  ;;  %v107_v42 = vld [vmem:[%s9046_s0 + $0x258] sm:$0xff] }
  0x41   :  { %651 = vmatmul.mubr.f32.gmra.mrb[12].mxu0 %v44_v43  ;;  %v106_v43 = vld [vmem:[%s9046_s0 + $0x250] sm:$0xff] }
  0x42   :  { %3659 = vmatprep.mubr.msk.f32.mxu0 %vm251_vm0, %v47_v44  ;;  %v109_v44 = vld [vmem:[%s9046_s0 + $0x268] sm:$0xff] }
  0x45   :  { %656 = vmatmul.mubr.f32.gmra.mrb[14].mxu0 %v46_v45  ;;  %v108_v45 = vld [vmem:[%s9046_s0 + $0x260] sm:$0xff] }
  0x46   :  { %3660 = vmatprep.mubr.msk.f32.mxu0 %vm251_vm0, %v49_v46  ;;  %v111_v46 = vld [vmem:[%s9046_s0 + $0x278] sm:$0xff] }
  0x49   :  { %661 = vmatmul.mubr.f32.gmra.mrb[16].mxu0 %v48_v47  ;;  %v110_v47 = vld [vmem:[%s9046_s0 + $0x270] sm:$0xff] }
  0x4a   :  { %3661 = vmatprep.mubr.msk.f32.mxu0 %vm251_vm0, %v51_v48  ;;  %v113_v48 = vld [vmem:[%s9046_s0 + $0x288] sm:$0xff] }
  0x4d   :  { %666 = vmatmul.mubr.f32.gmra.mrb[18].mxu0 %v50_v49  ;;  %v112_v49 = vld [vmem:[%s9046_s0 + $0x280] sm:$0xff] }
  0x4e   :  { %3662 = vmatprep.mubr.msk.f32.mxu0 %vm251_vm0, %v53_v50  ;;  %v115_v50 = vld [vmem:[%s9046_s0 + $0x298] sm:$0xff] }
  0x51   :  { %671 = vmatmul.mubr.f32.gmra.mrb[20].mxu0 %v52_v51  ;;  %v114_v51 = vld [vmem:[%s9046_s0 + $0x290] sm:$0xff] }
  0x52   :  { %3663 = vmatprep.mubr.msk.f32.mxu0 %vm251_vm0, %v55_v52  ;;  %v117_v52 = vld [vmem:[%s9046_s0 + $0x2a8] sm:$0xff] }
  0x55   :  { %676 = vmatmul.mubr.f32.gmra.mrb[22].mxu0 %v54_v53  ;;  %v116_v53 = vld [vmem:[%s9046_s0 + $0x2a0] sm:$0xff] }
  0x56   :  { %3664 = vmatprep.mubr.msk.f32.mxu0 %vm251_vm0, %v57_v54  ;;  %v119_v54 = vld [vmem:[%s9046_s0 + $0x2b8] sm:$0xff] }
  0x59   :  { %681 = vmatmul.mubr.f32.gmra.mrb[24].mxu0 %v56_v55  ;;  %v118_v55 = vld [vmem:[%s9046_s0 + $0x2b0] sm:$0xff] }
  0x5a   :  { %3665 = vmatprep.mubr.msk.f32.mxu0 %vm251_vm0, %v59_v56  ;;  %v121_v56 = vld [vmem:[%s9046_s0 + $0x2c8] sm:$0xff] }
  0x5d   :  { %686 = vmatmul.mubr.f32.gmra.mrb[26].mxu0 %v58_v57  ;;  %v120_v57 = vld [vmem:[%s9046_s0 + $0x2c0] sm:$0xff] }
  0x5e   :  { %3666 = vmatprep.mubr.msk.f32.mxu0 %vm251_vm0, %v61_v58  ;;  %v123_v58 = vld [vmem:[%s9046_s0 + $0x2d8] sm:$0xff] }
  0x61   :  { %691 = vmatmul.mubr.f32.gmra.mrb[28].mxu0 %v60_v59  ;;  %v122_v59 = vld [vmem:[%s9046_s0 + $0x2d0] sm:$0xff] }
  0x62   :  { %3667 = vmatprep.mubr.msk.f32.mxu0 %vm251_vm0, %v63_v60  ;;  %v125_v60 = vld [vmem:[%s9046_s0 + $0x2e8] sm:$0xff] }
  0x65   :  { %696 = vmatmul.mubr.f32.gmra.mrb[30].mxu0 %v62_v61  ;;  %v124_v61 = vld [vmem:[%s9046_s0 + $0x2e0] sm:$0xff] }
  0x66   :  { %3668 = vmatprep.mubr.msk.f32.mxu0 %vm251_vm0, %v65_v62  ;;  %v127_v62 = vld [vmem:[%s9046_s0 + $0x2f8] sm:$0xff] }
  0x69   :  { %701 = vmatmul.mubr.f32.gmra.mrb[32].mxu0 %v64_v63  ;;  %v126_v63 = vld [vmem:[%s9046_s0 + $0x2f0] sm:$0xff] }
  0x6a   :  { %3669 = vmatprep.mubr.msk.f32.mxu0 %vm251_vm0, %v67_v1  ;;  %v129_v1 = vld [vmem:[%s9046_s0 + $0x308] sm:$0xff] }
  0x6d   :  { %706 = vmatmul.mubr.f32.gmra.mrb[34].mxu0 %v66_v2  ;;  %v128_v2 = vld [vmem:[%s9046_s0 + $0x300] sm:$0xff] }
  0x6e   :  { %3670 = vmatprep.mubr.msk.f32.mxu0 %vm251_vm0, %v69_v3  ;;  %v131_v3 = vld [vmem:[%s9046_s0 + $0x318] sm:$0xff] }
  0x71   :  { %711 = vmatmul.mubr.f32.gmra.mrb[36].mxu0 %v68_v4  ;;  %v130_v4 = vld [vmem:[%s9046_s0 + $0x310] sm:$0xff] }
  0x72   :  { %3671 = vmatprep.mubr.msk.f32.mxu0 %vm251_vm0, %v71_v5  ;;  %v133_v5 = vld [vmem:[%s9046_s0 + $0x328] sm:$0xff] }
  0x75   :  { %716 = vmatmul.mubr.f32.gmra.mrb[38].mxu0 %v70_v6  ;;  %v132_v6 = vld [vmem:[%s9046_s0 + $0x320] sm:$0xff] }
  0x76   :  { %3672 = vmatprep.mubr.msk.f32.mxu0 %vm251_vm0, %v73_v7  ;;  %v135_v7 = vld [vmem:[%s9046_s0 + $0x338] sm:$0xff] }
  0x79   :  { %721 = vmatmul.mubr.f32.gmra.mrb[40].mxu0 %v72_v8  ;;  %v134_v8 = vld [vmem:[%s9046_s0 + $0x330] sm:$0xff] }
  0x7a   :  { %3673 = vmatprep.mubr.msk.f32.mxu0 %vm251_vm0, %v75_v9  ;;  %v137_v9 = vld [vmem:[%s9046_s0 + $0x348] sm:$0xff] }
  0x7d   :  { %726 = vmatmul.mubr.f32.gmra.mrb[42].mxu0 %v74_v10  ;;  %v136_v10 = vld [vmem:[%s9046_s0 + $0x340] sm:$0xff] }
  0x7e   :  { %3674 = vmatprep.mubr.msk.f32.mxu0 %vm251_vm0, %v77_v11  ;;  %v139_v11 = vld [vmem:[%s9046_s0 + $0x358] sm:$0xff] }
  0x81   :  { %731 = vmatmul.mubr.f32.gmra.mrb[44].mxu0 %v76_v12  ;;  %v138_v12 = vld [vmem:[%s9046_s0 + $0x350] sm:$0xff] }
  0x82   :  { %3675 = vmatprep.mubr.msk.f32.mxu0 %vm251_vm0, %v79_v13  ;;  %v141_v13 = vld [vmem:[%s9046_s0 + $0x368] sm:$0xff] }
  0x85   :  { %736 = vmatmul.mubr.f32.gmra.mrb[46].mxu0 %v78_v14 }
  0x86   :  { %3676 = vmatprep.mubr.msk.f32.mxu0 %vm251_vm0, %v81_v15 }
  0x89   :  { %741 = vmatmul.mubr.f32.gmra.mrb[48].mxu0 %v80_v16  ;;  %v140_v16 = vld [vmem:[%s9046_s0 + $0x360] sm:$0xff] }
  0x8a   :  { %3677 = vmatprep.mubr.msk.f32.mxu0 %vm251_vm0, %v83_v17  ;;  %v143_v17 = vld [vmem:[%s9046_s0 + $0x378] sm:$0xff] }
  0x8d   :  { %746 = vmatmul.mubr.f32.gmra.mrb[50].mxu0 %v82_v18 }
  0x8e   :  { %3678 = vmatprep.mubr.msk.f32.mxu0 %vm251_vm0, %v85_v19 }
  0x91   :  { %751 = vmatmul.mubr.f32.gmra.mrb[52].mxu0 %v84_v20  ;;  %v142_v20 = vld [vmem:[%s9046_s0 + $0x370] sm:$0xff] }
  0x92   :  { %3679 = vmatprep.mubr.msk.f32.mxu0 %vm251_vm0, %v87_v21  ;;  %v145_v21 = vld [vmem:[%s9046_s0 + $0x388] sm:$0xff] }
  0x95   :  { %756 = vmatmul.mubr.f32.gmra.mrb[54].mxu0 %v86_v22 }
  0x96   :  { %3680 = vmatprep.mubr.msk.f32.mxu0 %vm251_vm0, %v89_v23 }
  0x99   :  { %761 = vmatmul.mubr.f32.gmra.mrb[56].mxu0 %v88_v24  ;;  %v144_v24 = vld [vmem:[%s9046_s0 + $0x380] sm:$0xff] }
  0x9a   :  { %3681 = vmatprep.mubr.msk.f32.mxu0 %vm251_vm0, %v91_v25  ;;  %v147_v25 = vld [vmem:[%s9046_s0 + $0x398] sm:$0xff] }
  0x9d   :  { %766 = vmatmul.mubr.f32.gmra.mrb[58].mxu0 %v90_v26 }
  0x9e   :  { %3682 = vmatprep.mubr.msk.f32.mxu0 %vm251_vm0, %v93_v27 }
  0xa1   :  { %771 = vmatmul.mubr.f32.gmra.mrb[60].mxu0 %v92_v28  ;;  %v146_v28 = vld [vmem:[%s9046_s0 + $0x390] sm:$0xff] }
  0xa2   :  { %3683 = vmatprep.mubr.msk.f32.mxu0 %vm251_vm0, %v95_v30  ;;  %v149_v30 = vld [vmem:[%s9046_s0 + $0x3a8] sm:$0xff] }
  0xa5   :  { %776 = vmatmul.mubr.f32.gmra.mrb[62].mxu0 %v94_v31 }
  0xa6   :  { %3684 = vmatprep.mubr.msk.f32.mxu0 %vm251_vm0, %v97_v32 }
  0xa9   :  { %781 = vmatmul.mubr.f32.gmra.mrb[64].mxu0 %v96_v33  ;;  %v148_v33 = vld [vmem:[%s9046_s0 + $0x3a0] sm:$0xff] }
  0xaa   :  { %3685 = vmatprep.mubr.msk.f32.mxu0 %vm251_vm0, %v99_v34  ;;  %v151_v34 = vld [vmem:[%s9046_s0 + $0x3b8] sm:$0xff] }
  0xad   :  { %786 = vmatmul.mubr.f32.gmra.mrb[66].mxu0 %v98_v35 }
  0xae   :  { %3686 = vmatprep.mubr.msk.f32.mxu0 %vm251_vm0, %v101_v36 }
  0xb1   :  { %791 = vmatmul.mubr.f32.gmra.mrb[68].mxu0 %v100_v37  ;;  %v150_v37 = vld [vmem:[%s9046_s0 + $0x3b0] sm:$0xff] }
  0xb2   :  { %3687 = vmatprep.mubr.msk.f32.mxu0 %vm251_vm0, %v103_v38  ;;  %v153_v38 = vld [vmem:[%s9046_s0 + $0x3c8] sm:$0xff] }
  0xb5   :  { %796 = vmatmul.mubr.f32.gmra.mrb[70].mxu0 %v102_v39 }
  0xb6   :  { %3688 = vmatprep.mubr.msk.f32.mxu0 %vm251_vm0, %v105_v40 }
  0xb9   :  { %801 = vmatmul.mubr.f32.gmra.mrb[72].mxu0 %v104_v41  ;;  %v152_v41 = vld [vmem:[%s9046_s0 + $0x3c0] sm:$0xff] }
  0xba   :  { %3689 = vmatprep.mubr.msk.f32.mxu0 %vm251_vm0, %v107_v42  ;;  %v155_v42 = vld [vmem:[%s9046_s0 + $0x3d8] sm:$0xff] }
  0xbd   :  { %806 = vmatmul.mubr.f32.gmra.mrb[74].mxu0 %v106_v43 }
  0xbe   :  { %3690 = vmatprep.mubr.msk.f32.mxu0 %vm251_vm0, %v109_v44 }
  0xc1   :  { %811 = vmatmul.mubr.f32.gmra.mrb[76].mxu0 %v108_v45  ;;  %v154_v45 = vld [vmem:[%s9046_s0 + $0x3d0] sm:$0xff] }
  0xc2   :  { %3691 = vmatprep.mubr.msk.f32.mxu0 %vm251_vm0, %v111_v46  ;;  %v157_v46 = vld [vmem:[%s9046_s0 + $0x3e8] sm:$0xff] }
  0xc5   :  { %816 = vmatmul.mubr.f32.gmra.mrb[78].mxu0 %v110_v47 }
  0xc6   :  { %3692 = vmatprep.mubr.msk.f32.mxu0 %vm251_vm0, %v113_v48 }
  0xc9   :  { %821 = vmatmul.mubr.f32.gmra.mrb[80].mxu0 %v112_v49  ;;  %v156_v49 = vld [vmem:[%s9046_s0 + $0x3e0] sm:$0xff] }
  0xca   :  { %3693 = vmatprep.mubr.msk.f32.mxu0 %vm251_vm0, %v115_v50  ;;  %v159_v50 = vld [vmem:[%s9046_s0 + $0x3f8] sm:$0xff] }
  0xcd   :  { %826 = vmatmul.mubr.f32.gmra.mrb[82].mxu0 %v114_v51 }
  0xce   :  { %3694 = vmatprep.mubr.msk.f32.mxu0 %vm251_vm0, %v117_v52 }
  0xd1   :  { %831 = vmatmul.mubr.f32.gmra.mrb[84].mxu0 %v116_v53  ;;  %v158_v53 = vld [vmem:[%s9046_s0 + $0x3f0] sm:$0xff] }
  0xd2   :  { %3695 = vmatprep.mubr.msk.f32.mxu0 %vm251_vm0, %v119_v54  ;;  %v161_v54 = vld [vmem:[%s9046_s0 + $0x408] sm:$0xff] }
  0xd5   :  { %836 = vmatmul.mubr.f32.gmra.mrb[86].mxu0 %v118_v55 }
  0xd6   :  { %3696 = vmatprep.mubr.msk.f32.mxu0 %vm251_vm0, %v121_v56 }
  0xd9   :  { %841 = vmatmul.mubr.f32.gmra.mrb[88].mxu0 %v120_v57  ;;  %v160_v57 = vld [vmem:[%s9046_s0 + $0x400] sm:$0xff] }
  0xda   :  { %3697 = vmatprep.mubr.msk.f32.mxu0 %vm251_vm0, %v123_v58  ;;  %v163_v58 = vld [vmem:[%s9046_s0 + $0x418] sm:$0xff] }
  0xdd   :  { %846 = vmatmul.mubr.f32.gmra.mrb[90].mxu0 %v122_v59 }
  0xde   :  { %3698 = vmatprep.mubr.msk.f32.mxu0 %vm251_vm0, %v125_v60 }
  0xe1   :  { %851 = vmatmul.mubr.f32.gmra.mrb[92].mxu0 %v124_v61  ;;  %v162_v61 = vld [vmem:[%s9046_s0 + $0x410] sm:$0xff] }
  0xe2   :  { %3699 = vmatprep.mubr.msk.f32.mxu0 %vm251_vm0, %v127_v62  ;;  %v165_v62 = vld [vmem:[%s9046_s0 + $0x428] sm:$0xff] }
  0xe5   :  { %856 = vmatmul.mubr.f32.gmra.mrb[94].mxu0 %v126_v63 }
  0xe6   :  { %3700 = vmatprep.mubr.msk.f32.mxu0 %vm251_vm0, %v129_v1 }
  0xe9   :  { %861 = vmatmul.mubr.f32.gmra.mrb[96].mxu0 %v128_v2  ;;  %v164_v2 = vld [vmem:[%s9046_s0 + $0x420] sm:$0xff] }
  0xea   :  { %3701 = vmatprep.mubr.msk.f32.mxu0 %vm251_vm0, %v131_v3  ;;  %v167_v3 = vld [vmem:[%s9046_s0 + $0x438] sm:$0xff] }
  0xed   :  { %866 = vmatmul.mubr.f32.gmra.mrb[98].mxu0 %v130_v4 }
  0xee   :  { %3702 = vmatprep.mubr.msk.f32.mxu0 %vm251_vm0, %v133_v5 }
  0xf1   :  { %871 = vmatmul.mubr.f32.gmra.mrb[100].mxu0 %v132_v6  ;;  %v166_v6 = vld [vmem:[%s9046_s0 + $0x430] sm:$0xff] }
  0xf2   :  { %3703 = vmatprep.mubr.msk.f32.mxu0 %vm251_vm0, %v135_v7  ;;  %v169_v7 = vld [vmem:[%s9046_s0 + $0x448] sm:$0xff] }
  0xf5   :  { %876 = vmatmul.mubr.f32.gmra.mrb[102].mxu0 %v134_v8 }
  0xf6   :  { %3704 = vmatprep.mubr.msk.f32.mxu0 %vm251_vm0, %v137_v9 }
  0xf9   :  { %881 = vmatmul.mubr.f32.gmra.mrb[104].mxu0 %v136_v10  ;;  %v168_v10 = vld [vmem:[%s9046_s0 + $0x440] sm:$0xff] }
  0xfa   :  { %3705 = vmatprep.mubr.msk.f32.mxu0 %vm251_vm0, %v139_v11  ;;  %v171_v11 = vld [vmem:[%s9046_s0 + $0x458] sm:$0xff] }
  0xfc   :  { %v6727_v14 = vpop.f32.mrb[0].mxu0 }
  0xfd   :  { %v624_v15 = vpop.f32.mrb[1].mxu0  ;;  %886 = vmatmul.mubr.f32.gmra.mrb[106].mxu0 %v138_v12 }
  0xfe   :  { %3706 = vmatprep.mubr.msk.f32.mxu0 %vm251_vm0, %v141_v13  ;;  %v170_v15 = vld [vmem:[%s9046_s0 + $0x450] sm:$0xff] }
 0x100   :  { %v6736_v18 = vpop.f32.mrb[2].mxu0 }
 0x101   :  { %v629_v19 = vpop.f32.mrb[3].mxu0  ;;  %891 = vmatmul.mubr.f32.gmra.mrb[108].mxu0 %v140_v16  ;;  %v173_v16 = vld [vmem:[%s9046_s0 + $0x468] sm:$0xff] }
 0x102   :  { %3707 = vmatprep.mubr.msk.f32.mxu0 %vm251_vm0, %v143_v17 }
 0x104   :  { %v6745_v22 = vpop.f32.mrb[4].mxu0 }
 0x105   :  { %v634_v23 = vpop.f32.mrb[5].mxu0  ;;  %896 = vmatmul.mubr.f32.gmra.mrb[110].mxu0 %v142_v20  ;;  %v172_v20 = vld [vmem:[%s9046_s0 + $0x460] sm:$0xff] }
 0x106   :  { %3708 = vmatprep.mubr.msk.f32.mxu0 %vm251_vm0, %v145_v21  ;;  %v175_v21 = vld [vmem:[%s9046_s0 + $0x478] sm:$0xff] }
 0x108   :  { %v6754_v26 = vpop.f32.mrb[6].mxu0 }
 0x109   :  { %v639_v27 = vpop.f32.mrb[7].mxu0  ;;  %901 = vmatmul.mubr.f32.gmra.mrb[112].mxu0 %v144_v24 }
 0x10a   :  { %3709 = vmatprep.mubr.msk.f32.mxu0 %vm251_vm0, %v147_v25  ;;  %v174_v25 = vld [vmem:[%s9046_s0 + $0x470] sm:$0xff]  ;;  %v177_v27 = vld [vmem:[%s9046_s0 + $0x488] sm:$0xff] }
 0x10c   :  { %v6763_v31 = vpop.f32.mrb[8].mxu0 }
 0x10d   :  { %v644_v32 = vpop.f32.mrb[9].mxu0  ;;  %906 = vmatmul.mubr.f32.gmra.mrb[114].mxu0 %v146_v28 }
 0x10e   :  { %3710 = vmatprep.mubr.msk.f32.mxu0 %vm251_vm0, %v149_v30  ;;  %v176_v32 = vld [vmem:[%s9046_s0 + $0x480] sm:$0xff] }
 0x110   :  { %v6772_v35 = vpop.f32.mrb[10].mxu0 }
 0x111   :  { %v649_v36 = vpop.f32.mrb[11].mxu0  ;;  %911 = vmatmul.mubr.f32.gmra.mrb[116].mxu0 %v148_v33  ;;  %v179_v33 = vld [vmem:[%s9046_s0 + $0x498] sm:$0xff] }
 0x112   :  { %3711 = vmatprep.mubr.msk.f32.mxu0 %vm251_vm0, %v151_v34 }
 0x114   :  { %v6781_v39 = vpop.f32.mrb[12].mxu0 }
 0x115   :  { %v654_v40 = vpop.f32.mrb[13].mxu0  ;;  %916 = vmatmul.mubr.f32.gmra.mrb[118].mxu0 %v150_v37  ;;  %v178_v37 = vld [vmem:[%s9046_s0 + $0x490] sm:$0xff] }
 0x116   :  { %3712 = vmatprep.mubr.msk.f32.mxu0 %vm251_vm0, %v153_v38  ;;  %v181_v38 = vld [vmem:[%s9046_s0 + $0x4a8] sm:$0xff] }
 0x118   :  { %v6790_v43 = vpop.f32.mrb[14].mxu0 }
 0x119   :  { %v659_v44 = vpop.f32.mrb[15].mxu0  ;;  %921 = vmatmul.mubr.f32.gmra.mrb[120].mxu0 %v152_v41 }
 0x11a   :  { %3713 = vmatprep.mubr.msk.f32.mxu0 %vm251_vm0, %v155_v42  ;;  %v180_v42 = vld [vmem:[%s9046_s0 + $0x4a0] sm:$0xff]  ;;  %v183_v44 = vld [vmem:[%s9046_s0 + $0x4b8] sm:$0xff] }
 0x11c   :  { %v6799_v47 = vpop.f32.mrb[16].mxu0 }
 0x11d   :  { %v664_v48 = vpop.f32.mrb[17].mxu0  ;;  %926 = vmatmul.mubr.f32.gmra.mrb[122].mxu0 %v154_v45 }
 0x11e   :  { %3714 = vmatprep.mubr.msk.f32.mxu0 %vm251_vm0, %v157_v46  ;;  %v182_v48 = vld [vmem:[%s9046_s0 + $0x4b0] sm:$0xff] }
 0x120   :  { %v6808_v51 = vpop.f32.mrb[18].mxu0 }
 0x121   :  { %v669_v52 = vpop.f32.mrb[19].mxu0  ;;  %931 = vmatmul.mubr.f32.gmra.mrb[124].mxu0 %v156_v49  ;;  %v185_v49 = vld [vmem:[%s9046_s0 + $0x4c8] sm:$0xff] }
 0x122   :  { %3715 = vmatprep.mubr.msk.f32.mxu0 %vm251_vm0, %v159_v50 }
 0x124   :  { %v6817_v55 = vpop.f32.mrb[20].mxu0 }
 0x125   :  { %v674_v56 = vpop.f32.mrb[21].mxu0  ;;  %936 = vmatmul.mubr.f32.gmra.mrb[126].mxu0 %v158_v53  ;;  %v184_v53 = vld [vmem:[%s9046_s0 + $0x4c0] sm:$0xff] }
 0x126   :  { %3716 = vmatprep.mubr.msk.f32.mxu0 %vm251_vm0, %v161_v54  ;;  %v187_v54 = vld [vmem:[%s9046_s0 + $0x4d8] sm:$0xff] }
 0x128   :  { %v6826_v59 = vpop.f32.mrb[22].mxu0 }
 0x129   :  { %v679_v60 = vpop.f32.mrb[23].mxu0  ;;  %941 = vmatmul.mubr.f32.gmra.mrb[128].mxu0 %v160_v57 }
 0x12a   :  { %3717 = vmatprep.mubr.msk.f32.mxu0 %vm251_vm0, %v163_v58  ;;  %v186_v58 = vld [vmem:[%s9046_s0 + $0x4d0] sm:$0xff]  ;;  %v189_v60 = vld [vmem:[%s9046_s0 + $0x4e8] sm:$0xff] }
 0x12c   :  { %v6835_v63 = vpop.f32.mrb[24].mxu0 }
 0x12d   :  { %v684_v1 = vpop.f32.mrb[25].mxu0  ;;  %946 = vmatmul.mubr.f32.gmra.mrb[130].mxu0 %v162_v61 }
 0x12e   :  { %3718 = vmatprep.mubr.msk.f32.mxu0 %vm251_vm0, %v165_v62  ;;  %v188_v1 = vld [vmem:[%s9046_s0 + $0x4e0] sm:$0xff] }
 0x130   :  { %v6844_v4 = vpop.f32.mrb[26].mxu0 }
 0x131   :  { %v689_v5 = vpop.f32.mrb[27].mxu0  ;;  %951 = vmatmul.mubr.f32.gmra.mrb[132].mxu0 %v164_v2  ;;  %v191_v2 = vld [vmem:[%s9046_s0 + $0x4f8] sm:$0xff] }
 0x132   :  { %3719 = vmatprep.mubr.msk.f32.mxu0 %vm251_vm0, %v167_v3 }
 0x134   :  { %v6853_v8 = vpop.f32.mrb[28].mxu0 }
 0x135   :  { %v694_v9 = vpop.f32.mrb[29].mxu0  ;;  %956 = vmatmul.mubr.f32.gmra.mrb[134].mxu0 %v166_v6 }
 0x136   :  { %3720 = vmatprep.mubr.msk.f32.mxu0 %vm251_vm0, %v169_v7  ;;  %v190_v7 = vld [vmem:[%s9046_s0 + $0x4f0] sm:$0xff]  ;;  %v193_v9 = vld [vmem:[%s9046_s0 + $0x508] sm:$0xff] }
 0x138   :  { %v6862_v12 = vpop.f32.mrb[30].mxu0 }
 0x139   :  { %v699_v13 = vpop.f32.mrb[31].mxu0  ;;  %961 = vmatmul.mubr.f32.gmra.mrb[136].mxu0 %v168_v10 }
 0x13a   :  { %3721 = vmatprep.mubr.msk.f32.mxu0 %vm251_vm0, %v171_v11 }
 0x13c   :  { %v6871_v17 = vpop.f32.mrb[32].mxu0 }
 0x13d   :  { %v704_v19 = vpop.f32.mrb[33].mxu0  ;;  %966 = vmatmul.mubr.f32.gmra.mrb[138].mxu0 %v170_v15  ;;  %v192_v15 = vld [vmem:[%s9046_s0 + $0x500] sm:$0xff] }
 0x13e   :  { %3722 = vmatprep.mubr.msk.f32.mxu0 %vm251_vm0, %v173_v16  ;;  %v195_v16 = vld [vmem:[%s9046_s0 + $0x518] sm:$0xff] }
 0x140   :  { %v6880_v23 = vpop.f32.mrb[34].mxu0 }
 0x141   :  { %9076 = vst [vmem:[#allocation2_spill] sm:$0xff] %v6880_v23  ;;  %v709_v24 = vpop.f32.mrb[35].mxu0  ;;  %971 = vmatmul.mubr.f32.gmra.mrb[140].mxu0 %v172_v20 }
 0x142   :  { %3723 = vmatprep.mubr.msk.f32.mxu0 %vm251_vm0, %v175_v21  ;;  %v194_v24 = vld [vmem:[%s9046_s0 + $0x510] sm:$0xff] }
 0x144   :  { %v6889_v28 = vpop.f32.mrb[36].mxu0 }
 0x145   :  { %9077 = vst [vmem:[#allocation3_spill] sm:$0xff] %v6889_v28  ;;  %v714_v30 = vpop.f32.mrb[37].mxu0  ;;  %976 = vmatmul.mubr.f32.gmra.mrb[142].mxu0 %v174_v25  ;;  %v197_v25 = vld [vmem:[%s9046_s0 + $0x528] sm:$0xff] }
 0x146   :  { %3724 = vmatprep.mubr.msk.f32.mxu0 %vm251_vm0, %v177_v27 }
 0x148   :  { %v6898_v34 = vpop.f32.mrb[38].mxu0 }
 0x149   :  { %9078 = vst [vmem:[#allocation4_spill] sm:$0xff] %v6898_v34  ;;  %v719_v36 = vpop.f32.mrb[39].mxu0  ;;  %981 = vmatmul.mubr.f32.gmra.mrb[144].mxu0 %v176_v32 }
 0x14a   :  { %3725 = vmatprep.mubr.msk.f32.mxu0 %vm251_vm0, %v179_v33  ;;  %v196_v33 = vld [vmem:[%s9046_s0 + $0x520] sm:$0xff]  ;;  %v199_v36 = vld [vmem:[%s9046_s0 + $0x538] sm:$0xff] }
 0x14c   :  { %v6907_v40 = vpop.f32.mrb[40].mxu0 }
 0x14d   :  { %9079 = vst [vmem:[#allocation5_spill] sm:$0xff] %v6907_v40  ;;  %v724_v41 = vpop.f32.mrb[41].mxu0  ;;  %986 = vmatmul.mubr.f32.gmra.mrb[146].mxu0 %v178_v37 }
 0x14e   :  { %3726 = vmatprep.mubr.msk.f32.mxu0 %vm251_vm0, %v181_v38 }
 0x150   :  { %v6916_v45 = vpop.f32.mrb[42].mxu0 }
 0x151   :  { %9080 = vst [vmem:[#allocation6_spill] sm:$0xff] %v6916_v45  ;;  %v729_v46 = vpop.f32.mrb[43].mxu0  ;;  %991 = vmatmul.mubr.f32.gmra.mrb[148].mxu0 %v180_v42  ;;  %v198_v42 = vld [vmem:[%s9046_s0 + $0x530] sm:$0xff] }
 0x152   :  { %3727 = vmatprep.mubr.msk.f32.mxu0 %vm251_vm0, %v183_v44  ;;  %v201_v44 = vld [vmem:[%s9046_s0 + $0x548] sm:$0xff] }
 0x154   :  { %v6925_v50 = vpop.f32.mrb[44].mxu0 }
 0x155   :  { %9081 = vst [vmem:[#allocation7_spill] sm:$0xff] %v6925_v50  ;;  %v734_v52 = vpop.f32.mrb[45].mxu0  ;;  %996 = vmatmul.mubr.f32.gmra.mrb[150].mxu0 %v182_v48 }
 0x156   :  { %3728 = vmatprep.mubr.msk.f32.mxu0 %vm251_vm0, %v185_v49  ;;  %v200_v52 = vld [vmem:[%s9046_s0 + $0x540] sm:$0xff] }
 0x158   :  { %v6934_v56 = vpop.f32.mrb[46].mxu0 }
 0x159   :  { %9082 = vst [vmem:[#allocation8_spill] sm:$0xff] %v6934_v56  ;;  %v739_v57 = vpop.f32.mrb[47].mxu0  ;;  %1001 = vmatmul.mubr.f32.gmra.mrb[152].mxu0 %v184_v53  ;;  %v203_v53 = vld [vmem:[%s9046_s0 + $0x558] sm:$0xff] }
 0x15a   :  { %3729 = vmatprep.mubr.msk.f32.mxu0 %vm251_vm0, %v187_v54 }
 0x15c   :  { %v6943_v61 = vpop.f32.mrb[48].mxu0 }
 0x15d   :  { %9083 = vst [vmem:[#allocation9_spill] sm:$0xff] %v6943_v61  ;;  %v744_v62 = vpop.f32.mrb[49].mxu0  ;;  %1006 = vmatmul.mubr.f32.gmra.mrb[154].mxu0 %v186_v58 }
 0x15e   :  { %3730 = vmatprep.mubr.msk.f32.mxu0 %vm251_vm0, %v189_v60  ;;  %v202_v60 = vld [vmem:[%s9046_s0 + $0x550] sm:$0xff]  ;;  %v205_v62 = vld [vmem:[%s9046_s0 + $0x568] sm:$0xff] }
 0x160   :  { %v6952_v3 = vpop.f32.mrb[50].mxu0 }
 0x161   :  { %v749_v6 = vpop.f32.mrb[51].mxu0  ;;  %1011 = vmatmul.mubr.f32.gmra.mrb[156].mxu0 %v188_v1 }
 0x162   :  { %3731 = vmatprep.mubr.msk.f32.mxu0 %vm251_vm0, %v191_v2 }
 0x164   :  { %v6963_v10 = vpop.f32.mrb[52].mxu0 }
 0x165   :  { %v754_v13 = vpop.f32.mrb[53].mxu0  ;;  %1016 = vmatmul.mubr.f32.gmra.mrb[158].mxu0 %v190_v7  ;;  %v204_v7 = vld [vmem:[%s9046_s0 + $0x560] sm:$0xff] }
 0x166   :  { %3732 = vmatprep.mubr.msk.f32.mxu0 %vm251_vm0, %v193_v9  ;;  %v207_v9 = vld [vmem:[%s9046_s0 + $0x578] sm:$0xff] }
 0x168   :  { %v6974_v19 = vpop.f32.mrb[54].mxu0 }
 0x169   :  { %v759_v21 = vpop.f32.mrb[55].mxu0  ;;  %1021 = vmatmul.mubr.f32.gmra.mrb[160].mxu0 %v192_v15  ;;  %v230_v15 = vld [vmem:[%s9046_s0 + $0x630] sm:$0xff] }
 0x16a   :  { %3733 = vmatprep.mubr.msk.f32.mxu0 %vm251_vm0, %v195_v16  ;;  %v206_v21 = vld [vmem:[%s9046_s0 + $0x570] sm:$0xff] }
 0x16c   :  { %v6985_v27 = vpop.f32.mrb[56].mxu0 }
 0x16d   :  { %v764_v32 = vpop.f32.mrb[57].mxu0  ;;  %1026 = vmatmul.mubr.f32.gmra.mrb[162].mxu0 %v194_v24  ;;  %v209_v24 = vld [vmem:[%s9046_s0 + $0x588] sm:$0xff] }
 0x16e   :  { %3734 = vmatprep.mubr.msk.f32.mxu0 %vm251_vm0, %v197_v25  ;;  %v228_v32 = vld [vmem:[%s9046_s0 + $0x620] sm:$0xff] }
 0x170   :  { %v6996_v37 = vpop.f32.mrb[58].mxu0 }
 0x171   :  { %v769_v41 = vpop.f32.mrb[59].mxu0  ;;  %1031 = vmatmul.mubr.f32.gmra.mrb[164].mxu0 %v196_v33 }
 0x172   :  { %3735 = vmatprep.mubr.msk.f32.mxu0 %vm251_vm0, %v199_v36  ;;  %v208_v36 = vld [vmem:[%s9046_s0 + $0x580] sm:$0xff]  ;;  %v211_v41 = vld [vmem:[%s9046_s0 + $0x598] sm:$0xff] }
 0x174   :  { %v7007_v46 = vpop.f32.mrb[60].mxu0 }
 0x175   :  { %v774_v49 = vpop.f32.mrb[61].mxu0  ;;  %1036 = vmatmul.mubr.f32.gmra.mrb[166].mxu0 %v198_v42 }
 0x176   :  { %3736 = vmatprep.mubr.msk.f32.mxu0 %vm251_vm0, %v201_v44  ;;  %v226_v44 = vld [vmem:[%s9046_s0 + $0x610] sm:$0xff] }
 0x178   :  { %v7018_v54 = vpop.f32.mrb[62].mxu0 }
 0x179   :  { %v779_v58 = vpop.f32.mrb[63].mxu0  ;;  %1041 = vmatmul.mubr.f32.gmra.mrb[168].mxu0 %v200_v52  ;;  %v210_v52 = vld [vmem:[%s9046_s0 + $0x590] sm:$0xff] }
 0x17a   :  { %3737 = vmatprep.mubr.msk.f32.mxu0 %vm251_vm0, %v203_v53  ;;  %v213_v53 = vld [vmem:[%s9046_s0 + $0x5a8] sm:$0xff] }
 0x17c   :  { %v7029_v1 = vpop.f32.mrb[64].mxu0 }
 0x17d   :  { %v784_v6 = vpop.f32.mrb[65].mxu0  ;;  %1046 = vmatmul.mubr.f32.gmra.mrb[170].mxu0 %v202_v60  ;;  %v224_v60 = vld [vmem:[%s9046_s0 + $0x600] sm:$0xff] }
 0x17e   :  { %3738 = vmatprep.mubr.msk.f32.mxu0 %vm251_vm0, %v205_v62  ;;  %v212_v6 = vld [vmem:[%s9046_s0 + $0x5a0] sm:$0xff] }
 0x180   :  { %v7040_v13 = vpop.f32.mrb[66].mxu0 }
 0x181   :  { %v789_v16 = vpop.f32.mrb[67].mxu0  ;;  %1051 = vmatmul.mubr.f32.gmra.mrb[172].mxu0 %v204_v7  ;;  %v215_v7 = vld [vmem:[%s9046_s0 + $0x5b8] sm:$0xff] }
 0x182   :  { %3739 = vmatprep.mubr.msk.f32.mxu0 %vm251_vm0, %v207_v9  ;;  %v222_v16 = vld [vmem:[%s9046_s0 + $0x5f0] sm:$0xff] }
 0x184   :  { %v7051_v25 = vpop.f32.mrb[68].mxu0 }
 0x185   :  { %v794_v33 = vpop.f32.mrb[69].mxu0  ;;  %1056 = vmatmul.mubr.f32.gmra.mrb[174].mxu0 %v206_v21 }
 0x186   :  { %3740 = vmatprep.mubr.msk.f32.mxu0 %vm251_vm0, %v209_v24  ;;  %v214_v24 = vld [vmem:[%s9046_s0 + $0x5b0] sm:$0xff]  ;;  %v3753_v33 = vld [vmem:[%s9047_s3 + $0x80] sm:$0xff] }
 0x188   :  { %v7062_v42 = vpop.f32.mrb[70].mxu0 }
 0x189   :  { %v799_v49 = vpop.f32.mrb[71].mxu0  ;;  %1061 = vmatmul.mubr.f32.gmra.mrb[176].mxu0 %v208_v36  ;;  %v3754_v36 = vld [vmem:[%s9047_s3 + $0x88] sm:$0xff] }
 0x18a   :  { %3741 = vmatprep.mubr.msk.f32.mxu0 %vm251_vm0, %v211_v41  ;;  %v217_v41 = vld [vmem:[%s9046_s0 + $0x5c8] sm:$0xff]  ;;  %v5572_v49 = vpack.c.bf16 %v3754_v36, %v3753_v33 }
 0x18c   :  { %v7073_v58 = vpop.f32.mrb[72].mxu0  ;;  %5573 = vmatpush3.bf16.msra.mxu1 %v5572_v49 }
 0x18d   :  { %v804_v62 = vpop.f32.mrb[73].mxu0  ;;  %1066 = vmatmul.mubr.f32.gmra.mrb[178].mxu0 %v210_v52  ;;  %5574 = vmatprep.subr.bf16.mxu1 %v9066_v0 }
 0x18e   :  { %3742 = vmatprep.mubr.msk.f32.mxu0 %vm251_vm0, %v213_v53  ;;  %v220_v53 = vld [vmem:[%s9046_s0 + $0x5e0] sm:$0xff] }
 0x190   :  { %v7084_v9 = vpop.f32.mrb[74].mxu0 }
 0x191   :  { %v809_v21 = vpop.f32.mrb[75].mxu0  ;;  %1071 = vmatmul.mubr.f32.gmra.mrb[180].mxu0 %v212_v6  ;;  %v216_v6 = vld [vmem:[%s9046_s0 + $0x5c0] sm:$0xff] }
 0x192   :  { %3743 = vmatprep.mubr.msk.f32.mxu0 %vm251_vm0, %v215_v7  ;;  %v3755_v7 = vld [vmem:[%s9047_s3 + $0x90] sm:$0xff]  ;;  %v3756_v21 = vld [vmem:[%s9047_s3 + $0x98] sm:$0xff] }
 0x193   :  { %v5575_v33 = vpack.c.bf16 %v3756_v21, %v3755_v7  ;;  %v3757_v7 = vld [vmem:[%s9047_s3 + $0xa0] sm:$0xff]  ;;  %v3758_v21 = vld [vmem:[%s9047_s3 + $0xa8] sm:$0xff] }
 0x194   :  { %v7101_v52 = vpop.f32.mrb[76].mxu0 }
 0x195   :  { %v814_v62 = vpop.f32.mrb[77].mxu0  ;;  %1076 = vmatmul.mubr.f32.gmra.mrb[182].mxu0 %v214_v24  ;;  %v219_v24 = vld [vmem:[%s9046_s0 + $0x5d8] sm:$0xff]  ;;  %5576 = vmatpush3.bf16.msra.mxu1 %v5575_v33  ;;  %v5578_v33 = vpack.c.bf16 %v3758_v21, %v3757_v7  ;;  %v3759_v7 = vld [vmem:[%s9047_s3 + $0xb0] sm:$0xff] }
 0x196   :  { %3744 = vmatprep.mubr.msk.f32.mxu0 %vm251_vm0, %v217_v41  ;;  %v218_v62 = vld [vmem:[%s9046_s0 + $0x5d0] sm:$0xff]  ;;  %5577 = vmatprep.subr.bf16.mxu1 %v9066_v0  ;;  %v3760_v21 = vld [vmem:[%s9047_s3 + $0xb8] sm:$0xff] }
 0x198   :  { %v7119_v36 = vpop.f32.mrb[78].mxu0 }
 0x199   :  { %v819_v49 = vpop.f32.mrb[79].mxu0  ;;  %1081 = vmatmul.mubr.f32.gmra.mrb[184].mxu0 %v216_v6  ;;  %v221_v6 = vld [vmem:[%s9046_s0 + $0x5e8] sm:$0xff]  ;;  %5579 = vmatpush3.bf16.msra.mxu1 %v5578_v33 }
 0x19a   :  { %3745 = vmatprep.mubr.msk.f32.mxu0 %vm251_vm0, %v219_v24  ;;  %5580 = vmatprep.subr.bf16.mxu1 %v9066_v0 }
 0x19c   :  { %v7137_v24 = vpop.f32.mrb[80].mxu0 }
 0x19d   :  { %v824_v41 = vpop.f32.mrb[81].mxu0  ;;  %1086 = vmatmul.mubr.f32.gmra.mrb[186].mxu0 %v218_v62  ;;  %v5581_v62 = vpack.c.bf16 %v3760_v21, %v3759_v7  ;;  %v3761_v7 = vld [vmem:[%s9047_s3 + $0xc0] sm:$0xff]  ;;  %v3762_v21 = vld [vmem:[%s9047_s3 + $0xc8] sm:$0xff] }
 0x19e   :  { %3746 = vmatprep.mubr.msk.f32.mxu0 %vm251_vm0, %v221_v6  ;;  %v223_v41 = vld [vmem:[%s9046_s0 + $0x5f8] sm:$0xff] }
 0x19f   :  { %5582 = vmatpush3.bf16.msra.mxu1 %v5581_v62 }
 0x1a0   :  { %v7155_v6 = vpop.f32.mrb[82].mxu0  ;;  %5583 = vmatprep.subr.bf16.mxu1 %v9066_v0 }
 0x1a1   :  { %9084 = vst [vmem:[#allocation10_spill] sm:$0xff] %v7155_v6  ;;  %v829_v49 = vpop.f32.mrb[83].mxu0  ;;  %1091 = vmatmul.mubr.f32.gmra.mrb[188].mxu0 %v220_v53  ;;  %v225_v53 = vld [vmem:[%s9046_s0 + $0x608] sm:$0xff] }
 0x1a2   :  { %3747 = vmatprep.mubr.msk.f32.mxu0 %vm251_vm0, %v223_v41  ;;  %v5584_v49 = vpack.c.bf16 %v3762_v21, %v3761_v7  ;;  %v3763_v7 = vld [vmem:[%s9047_s3 + $0xd0] sm:$0xff]  ;;  %v3764_v21 = vld [vmem:[%s9047_s3 + $0xd8] sm:$0xff] }
 0x1a4   :  { %v7173_v41 = vpop.f32.mrb[84].mxu0  ;;  %5585 = vmatpush3.bf16.msra.mxu1 %v5584_v49 }
 0x1a5   :  { %9085 = vst [vmem:[#allocation11_spill] sm:$0xff] %v7173_v41  ;;  %v834_v33 = vpop.f32.mrb[85].mxu0  ;;  %1096 = vmatmul.mubr.f32.gmra.mrb[190].mxu0 %v222_v16  ;;  %5586 = vmatprep.subr.bf16.mxu1 %v9066_v0  ;;  %v227_v16 = vld [vmem:[%s9046_s0 + $0x618] sm:$0xff] }
 0x1a6   :  { %3748 = vmatprep.mubr.msk.f32.mxu0 %vm251_vm0, %v225_v53  ;;  %v5587_v33 = vpack.c.bf16 %v3764_v21, %v3763_v7  ;;  %v3765_v7 = vld [vmem:[%s9047_s3 + $0xe0] sm:$0xff]  ;;  %v3766_v21 = vld [vmem:[%s9047_s3 + $0xe8] sm:$0xff] }
 0x1a8   :  { %v7191_v53 = vpop.f32.mrb[86].mxu0  ;;  %5588 = vmatpush3.bf16.msra.mxu1 %v5587_v33 }
 0x1a9   :  { %9086 = vst [vmem:[#allocation12_spill] sm:$0xff] %v7191_v53  ;;  %v839_v62 = vpop.f32.mrb[87].mxu0  ;;  %1101 = vmatmul.mubr.f32.gmra.mrb[192].mxu0 %v224_v60  ;;  %5589 = vmatprep.subr.bf16.mxu1 %v9066_v0  ;;  %v229_v60 = vld [vmem:[%s9046_s0 + $0x628] sm:$0xff] }
 0x1aa   :  { %3749 = vmatprep.mubr.msk.f32.mxu0 %vm251_vm0, %v227_v16  ;;  %v5590_v62 = vpack.c.bf16 %v3766_v21, %v3765_v7  ;;  %v3767_v7 = vld [vmem:[%s9047_s3 + $0xf0] sm:$0xff]  ;;  %v3768_v21 = vld [vmem:[%s9047_s3 + $0xf8] sm:$0xff] }
 0x1ac   :  { %v7209_v16 = vpop.f32.mrb[88].mxu0  ;;  %5591 = vmatpush3.bf16.msra.mxu1 %v5590_v62 }
 0x1ad   :  { %9087 = vst [vmem:[#allocation13_spill] sm:$0xff] %v7209_v16  ;;  %v844_v49 = vpop.f32.mrb[89].mxu0  ;;  %1106 = vmatmul.mubr.f32.gmra.mrb[194].mxu0 %v226_v44  ;;  %5592 = vmatprep.subr.bf16.mxu1 %v9066_v0  ;;  %v231_v44 = vld [vmem:[%s9046_s0 + $0x638] sm:$0xff] }
 0x1ae   :  { %3750 = vmatprep.mubr.msk.f32.mxu0 %vm251_vm0, %v229_v60  ;;  %v5593_v49 = vpack.c.bf16 %v3768_v21, %v3767_v7  ;;  %v3945_v7 = vld [vmem:[%s9047_s3 + $0x680] sm:$0xff] }
 0x1b0   :  { %v7227_v60 = vpop.f32.mrb[90].mxu0  ;;  %5594 = vmatpush3.bf16.msra.mxu1 %v5593_v49 }
 0x1b1   :  { %9088 = vst [vmem:[#allocation14_spill] sm:$0xff] %v7227_v60  ;;  %v849_v33 = vpop.f32.mrb[91].mxu0  ;;  %1111 = vmatmul.mubr.f32.gmra.mrb[196].mxu0 %v228_v32  ;;  %5595 = vmatprep.subr.bf16.mxu1 %v9066_v0 }
 0x1b2   :  { %3751 = vmatprep.mubr.msk.f32.mxu0 %vm251_vm0, %v231_v44 }
 0x1b4   :  { %v7236_v2 = vpop.f32.mrb[92].mxu0 }
 0x1b5   :  { %9089 = vst [vmem:[#allocation15_spill] sm:$0xff] %v7236_v2  ;;  %v854_v33 = vpop.f32.mrb[93].mxu0  ;;  %1116 = vmatmul.mubr.f32.gmra.mrb[198].mxu0 %v230_v15  ;;  %v3948_v15 = vld [vmem:[%s9047_s3 + $0x698] sm:$0xff] }
 0x1b6   :  { %5086 = vmatprep.mubr.msk.f32.mxu0 %vm6226_vm2, %v9055_v29 }
 0x1b8   :  { %v7244_v32 = vpop.f32.mrb[94].mxu0 }
 0x1b9   :  { %9090 = vst [vmem:[#allocation16_spill] sm:$0xff] %v7244_v32  ;;  %v859_v44 = vpop.f32.mrb[95].mxu0 }
 0x1ba   :  { %v3946_v44 = vld [vmem:[%s9047_s3 + $0x688] sm:$0xff] }
 0x1bb   :  { %v5884_v38 = vpack.c.bf16 %v3946_v44, %v3945_v7  ;;  %v3950_v7 = vld [vmem:[%s9047_s3 + $0x6a8] sm:$0xff] }
 0x1bc   :  { %v7248_v49 = vpop.f32.mrb[96].mxu0 }
 0x1bd   :  { %9091 = vst [vmem:[#allocation17_spill] sm:$0xff] %v7248_v49  ;;  %v864_v57 = vpop.f32.mrb[97].mxu0  ;;  %5885 = vmatpush3.bf16.msra.mxu0 %v5884_v38 }
 0x1be   :  { %5886 = vmatprep.subr.bf16.mxu0 %v9066_v0  ;;  %v3947_v57 = vld [vmem:[%s9047_s3 + $0x690] sm:$0xff] }
 0x1bf   :  { %v5887_v29 = vpack.c.bf16 %v3948_v15, %v3947_v57  ;;  %v3952_v15 = vld [vmem:[%s9047_s3 + $0x6b8] sm:$0xff] }
 0x1c0   :  { %v7252_v48 = vpop.f32.mrb[98].mxu0 }
 0x1c1   :  { %9092 = vst [vmem:[#allocation18_spill] sm:$0xff] %v7252_v48  ;;  %v869_v33 = vpop.f32.mrb[99].mxu0  ;;  %5888 = vmatpush3.bf16.msra.mxu0 %v5887_v29 }
 0x1c2   :  { %5889 = vmatprep.subr.bf16.mxu0 %v9066_v0 }
 0x1c4   :  { %v7262_v21 = vpop.f32.mrb[100].mxu0 }
 0x1c5   :  { %v874_v30 = vpop.f32.mrb[101].mxu0 }
 0x1c6   :  { %v3949_v30 = vld [vmem:[%s9047_s3 + $0x6a0] sm:$0xff] }
 0x1c7   :  { %v5890_v20 = vpack.c.bf16 %v3950_v7, %v3949_v30  ;;  %v3953_v30 = vld [vmem:[%s9047_s3 + $0x6c0] sm:$0xff]  ;;  %v3954_v7 = vld [vmem:[%s9047_s3 + $0x6c8] sm:$0xff] }
 0x1c8   :  { %v7268_v33 = vpop.f32.mrb[102].mxu0  ;;  %v5896_v5 = vpack.c.bf16 %v3954_v7, %v3953_v30  ;;  %v3957_v30 = vld [vmem:[%s9047_s3 + $0x6e0] sm:$0xff]  ;;  %v3958_v7 = vld [vmem:[%s9047_s3 + $0x6e8] sm:$0xff] }
 0x1c9   :  { %v879_v62 = vpop.f32.mrb[103].mxu0  ;;  %5891 = vmatpush3.bf16.msra.mxu0 %v5890_v20  ;;  %v5902_v61 = vpack.c.bf16 %v3958_v7, %v3957_v30 }
 0x1ca   :  { %v3951_v62 = vld [vmem:[%s9047_s3 + $0x6b0] sm:$0xff]  ;;  %5892 = vmatprep.subr.bf16.mxu0 %v9066_v0 }
 0x1cb   :  { %v5893_v11 = vpack.c.bf16 %v3952_v15, %v3951_v62  ;;  %v3955_v62 = vld [vmem:[%s9047_s3 + $0x6d0] sm:$0xff]  ;;  %v3956_v15 = vld [vmem:[%s9047_s3 + $0x6d8] sm:$0xff] }
 0x1cc   :  { %v7276_v38 = vpop.f32.mrb[104].mxu0  ;;  %v5899_v48 = vpack.c.bf16 %v3956_v15, %v3955_v62  ;;  %v3959_v62 = vld [vmem:[%s9047_s3 + $0x6f0] sm:$0xff]  ;;  %v3960_v15 = vld [vmem:[%s9047_s3 + $0x6f8] sm:$0xff] }
 0x1cd   :  { %v884_v44 = vpop.f32.mrb[105].mxu0  ;;  %5894 = vmatpush3.bf16.msra.mxu0 %v5893_v11  ;;  %v5905_v49 = vpack.c.bf16 %v3960_v15, %v3959_v62 }
 0x1ce   :  { %5895 = vmatprep.subr.bf16.mxu0 %v9066_v0 }
 0x1d0   :  { %v7285_v29 = vpop.f32.mrb[106].mxu0 }
 0x1d1   :  { %v889_v57 = vpop.f32.mrb[107].mxu0  ;;  %5897 = vmatpush3.bf16.msra.mxu0 %v5896_v5 }
 0x1d2   :  { %5898 = vmatprep.subr.bf16.mxu0 %v9066_v0 }
 0x1d4   :  { %v7294_v20 = vpop.f32.mrb[108].mxu0 }
 0x1d5   :  { %v894_v44 = vpop.f32.mrb[109].mxu0  ;;  %5900 = vmatpush3.bf16.msra.mxu0 %v5899_v48 }
 0x1d6   :  { %5901 = vmatprep.subr.bf16.mxu0 %v9066_v0 }
 0x1d8   :  { %v7303_v11 = vpop.f32.mrb[110].mxu0 }
 0x1d9   :  { %v899_v57 = vpop.f32.mrb[111].mxu0  ;;  %5903 = vmatpush3.bf16.msra.mxu0 %v5902_v61 }
 0x1da   :  { %5904 = vmatprep.subr.bf16.mxu0 %v9066_v0 }
 0x1dc   :  { %v7312_v5 = vpop.f32.mrb[112].mxu0 }
 0x1dd   :  { %v904_v44 = vpop.f32.mrb[113].mxu0  ;;  %5906 = vmatpush3.bf16.msra.mxu0 %v5905_v49 }
 0x1de   :  { %5931 = vmatprep.subr.bf16.mxu0 %v9066_v0 }
 0x1e0   :  { %v7321_v48 = vpop.f32.mrb[114].mxu0 }
 0x1e1   :  { %v909_v57 = vpop.f32.mrb[115].mxu0 }
 0x1e4   :  { %v7327_v56 = vpop.f32.mrb[116].mxu0 }
 0x1e5   :  { %v914_v61 = vpop.f32.mrb[117].mxu0 }
 0x1e8   :  { %v7330_v30 = vpop.f32.mrb[118].mxu0 }
 0x1e9   :  { %v919_v7 = vpop.f32.mrb[119].mxu0 }
 0x1ec   :  { %v7332_v44 = vpop.f32.mrb[120].mxu0 }
 0x1ed   :  { %v924_v32 = vpop.f32.mrb[121].mxu0 }
 0x1f0   :  { %v7334_v50 = vpop.f32.mrb[122].mxu0 }
 0x1f1   :  { %v929_v2 = vpop.f32.mrb[123].mxu0 }
 0x1f4   :  { %v7336_v45 = vpop.f32.mrb[124].mxu0 }
 0x1f5   :  { %v934_v60 = vpop.f32.mrb[125].mxu0 }
 0x1f8   :  { %v7338_v57 = vpop.f32.mrb[126].mxu0 }
 0x1f9   :  { %v939_v49 = vpop.f32.mrb[127].mxu0 }
 0x1fc   :  { %v7340_v62 = vpop.f32.mrb[128].mxu0 }
 0x1fd   :  { %v944_v15 = vpop.f32.mrb[129].mxu0 }
 0x200   :  { %v7342_v0 = vpop.f32.mrb[130].mxu0 }
 0x201   :  { %v949_v61 = vpop.f32.mrb[131].mxu0 }
 0x204   :  { %v7344_v40 = vpop.f32.mrb[132].mxu0 }
 0x205   :  { %v954_v7 = vpop.f32.mrb[133].mxu0 }
 0x208   :  { %v7346_v16 = vpop.f32.mrb[134].mxu0 }
 0x209   :  { %9093 = vst [vmem:[#allocation19_spill] sm:$0xff] %v7346_v16  ;;  %v959_v32 = vpop.f32.mrb[135].mxu0 }
 0x20c   :  { %v7348_v34 = vpop.f32.mrb[136].mxu0 }
 0x20d   :  { %9094 = vst [vmem:[#allocation20_spill] sm:$0xff] %v7348_v34  ;;  %v964_v2 = vpop.f32.mrb[137].mxu0 }
 0x210   :  { %v7350_v53 = vpop.f32.mrb[138].mxu0 }
 0x211   :  { %9095 = vst [vmem:[#allocation21_spill] sm:$0xff] %v7350_v53  ;;  %v969_v60 = vpop.f32.mrb[139].mxu0 }
 0x212   :  { %v9098_v60 = vmax.f32 %v6727_v14, %v6952_v3  ;;  %v7381_v14 = vld [vmem:[%s9048_s2] ss:$0 sm:$0xff] }
 0x214   :  { %v7352_v28 = vpop.f32.mrb[140].mxu0 }
 0x215   :  { %v974_v49 = vpop.f32.mrb[141].mxu0 }
 0x218   :  { %v7354_v41 = vpop.f32.mrb[142].mxu0 }
 0x219   :  { %9096 = vst [vmem:[#allocation22_spill] sm:$0xff] %v7354_v41  ;;  %v979_v15 = vpop.f32.mrb[143].mxu0 }
 0x21c   :  { %v7356_v23 = vpop.f32.mrb[144].mxu0 }
 0x21d   :  { %9097 = vst [vmem:[#allocation23_spill] sm:$0xff] %v7356_v23  ;;  %v984_v61 = vpop.f32.mrb[145].mxu0 }
 0x21e   :  { %v9099_v61 = vmax.f32 %v6736_v18, %v6963_v10 }
 0x220   :  { %v7358_v6 = vpop.f32.mrb[146].mxu0 }
 0x221   :  { %v989_v7 = vpop.f32.mrb[147].mxu0 }
 0x224   :  { %v7360_v16 = vpop.f32.mrb[148].mxu0 }
 0x225   :  { %v994_v32 = vpop.f32.mrb[149].mxu0 }
 0x226   :  { %v1253_v32 = vld [vmem:[%s9047_s3] sm:$0xff] }
 0x228   :  { %v997_v34 = vpop.f32.mrb[150].mxu0 }
 0x229   :  { %v1146_v2 = vmax.f32 %v7262_v21, %v997_v34  ;;  %v999_v53 = vpop.f32.mrb[151].mxu0  ;;  %v1254_v34 = vld [vmem:[%s9047_s3 + $0x8] sm:$0xff] }
 0x22a   :  { %v5596_v10 = vpack.c.bf16 %v1254_v34, %v1253_v32  ;;  %v9100_v53 = vmax.f32 %v6745_v22, %v6974_v19  ;;  %v9101_v32 = vmov 0.0   ;;  %v9102_v22 = vmax.f32 %v6754_v26, %v6985_v27 }
 0x22b   :  { %v7366_v49 = vmax.f32 %v9098_v60, %v1146_v2  ;;  %v1255_v2 = vld [vmem:[%s9047_s3 + $0x10] sm:$0xff]  ;;  %v1256_v60 = vld [vmem:[%s9047_s3 + $0x18] sm:$0xff]  ;;  %v9103_v34 = vmov 0.0|0.0   ;;  %v9104_v26 = vmax.f32 %v6763_v31, %v6996_v37  ;;  %v9105_v31 = vmax.f32 %v6772_v35, %v7007_v46 }
 0x22c   :  { %v1002_v41 = vpop.f32.mrb[152].mxu0  ;;  %v9106_v35 = vmax.f32 %v6781_v39, %v7018_v54  ;;  %v9107_v39 = vmax.f32 %v6790_v43, %v7029_v1  ;;  %v9108_v43 = vmax.f32 %v6799_v47, %v7040_v13  ;;  %v9109_v13 = vmax.f32 %v6808_v51, %v7051_v25 }
 0x22d   :  { %v1147_v15 = vmax.f32 %v7268_v33, %v1002_v41  ;;  %v1004_v23 = vpop.f32.mrb[153].mxu0  ;;  %v1203_v47 = vadd.f32 %v7381_v14, %v7366_v49  ;;  %v9110_v51 = vmax.f32 %v6817_v55, %v7062_v42  ;;  %v9111_v55 = vmax.f32 %v6826_v59, %v7073_v58 }
 0x22e   :  { %v9112_v59 = vmax.f32 %v6835_v63, %v7084_v9  ;;  %v3777_v63 = vld [vmem:[%s9047_s3 + $0x140] sm:$0xff]  ;;  %v9113_v9 = vmax.f32 %v6844_v4, %v7101_v52 }
 0x22f   :  { %v1172_v7 = vmax.f32 %v9099_v61, %v1147_v15 }
 0x230   :  { %v1007_v3 = vpop.f32.mrb[154].mxu0 }
 0x231   :  { %v1148_v23 = vmax.f32 %v7276_v38, %v1007_v3  ;;  %v1009_v41 = vpop.f32.mrb[155].mxu0  ;;  %v1204_v18 = vadd.f32 %v7381_v14, %v1172_v7  ;;  %v5599_v7 = vpack.c.bf16 %v1256_v60, %v1255_v2  ;;  %v1257_v3 = vld [vmem:[%s9047_s3 + $0x20] sm:$0xff] }
 0x233   :  { %v7388_v21 = vmax.f32 %v9100_v53, %v1148_v23  ;;  %v1229_v33 = vmax.f32 %v1204_v18, 0.0  ;;  %v1259_v53 = vld [vmem:[%s9047_s3 + $0x30] sm:$0xff] }
 0x234   :  { %v1012_v15 = vpop.f32.mrb[156].mxu0 }
 0x235   :  { %v1149_v38 = vmax.f32 %v7285_v29, %v1012_v15  ;;  %4632 = vmatmul.mubr.f32.vlgmr.msra.gmra.mrb[0].mxu1 %v1229_v33  ;;  %v1014_v61 = vpop.f32.mrb[157].mxu0  ;;  %v1258_v29 = vld [vmem:[%s9047_s3 + $0x28] sm:$0xff]  ;;  %v1260_v33 = vld [vmem:[%s9047_s3 + $0x38] sm:$0xff] }
 0x236   :  { %5597 = vmatpush3.bf16.msra.mxu1 %v5596_v10  ;;  %4666 = vmatprep.mubr.msk.f32.mxu1 %vm6226_vm2, %v9101_v32  ;;  %v5602_v10 = vpack.c.bf16 %v1258_v29, %v1257_v3  ;;  %v5605_v15 = vpack.c.bf16 %v1260_v33, %v1259_v53  ;;  %v1262_v61 = vld [vmem:[%s9047_s3 + $0x48] sm:$0xff]  ;;  %v1263_v29 = vld [vmem:[%s9047_s3 + $0x50] sm:$0xff] }
 0x237   :  { %v7402_v19 = vmax.f32 %v9102_v22, %v1149_v38  ;;  %5598 = vmatprep.subr.bf16.mxu1 %v9103_v34  ;;  %v1261_v38 = vld [vmem:[%s9047_s3 + $0x40] sm:$0xff]  ;;  %v1266_v53 = vld [vmem:[%s9047_s3 + $0x68] sm:$0xff] }
 0x238   :  { %v1017_v23 = vpop.f32.mrb[158].mxu0  ;;  %v5608_v3 = vpack.c.bf16 %v1262_v61, %v1261_v38 }
 0x239   :  { %v1150_v41 = vmax.f32 %v7294_v20, %v1017_v23  ;;  %v1019_v18 = vpop.f32.mrb[159].mxu0  ;;  %v1264_v23 = vld [vmem:[%s9047_s3 + $0x58] sm:$0xff] }
 0x23a   :  { %5600 = vmatpush3.bf16.msra.mxu1 %v5599_v7 }
 0x23b   :  { %v7415_v27 = vmax.f32 %v9104_v26, %v1150_v41  ;;  %5601 = vmatprep.subr.bf16.mxu1 %v9103_v34  ;;  %v1265_v26 = vld [vmem:[%s9047_s3 + $0x60] sm:$0xff] }
 0x23c   :  { %v1022_v2 = vpop.f32.mrb[160].mxu0 }
 0x23d   :  { %v1151_v20 = vmax.f32 %v7303_v11, %v1022_v2  ;;  %v1024_v60 = vpop.f32.mrb[161].mxu0 }
 0x23e   :  { %5603 = vmatpush3.bf16.msra.mxu1 %v5602_v10  ;;  %v5611_v10 = vpack.c.bf16 %v1264_v23, %v1263_v29  ;;  %v1267_v60 = vld [vmem:[%s9047_s3 + $0x70] sm:$0xff]  ;;  %v1228_v29 = vmax.f32 %v1203_v47, 0.0 }
 0x23f   :  { %v7428_v37 = vmax.f32 %v9105_v31, %v1151_v20  ;;  %5604 = vmatprep.subr.bf16.mxu1 %v9103_v34  ;;  %v5614_v20 = vpack.c.bf16 %v1266_v53, %v1265_v26  ;;  %v3771_v23 = vld [vmem:[%s9047_s3 + $0x110] sm:$0xff] }
 0x240   :  { %v1027_v7 = vpop.f32.mrb[162].mxu0 }
 0x241   :  { %v1152_v11 = vmax.f32 %v7312_v5, %v1027_v7  ;;  %v1029_v22 = vpop.f32.mrb[163].mxu0 }
 0x242   :  { %5606 = vmatpush3.bf16.msra.mxu1 %v5605_v15  ;;  %v1268_v15 = vld [vmem:[%s9047_s3 + $0x78] sm:$0xff] }
 0x243   :  { %v7441_v46 = vmax.f32 %v9106_v35, %v1152_v11  ;;  %5607 = vmatprep.subr.bf16.mxu1 %v9103_v34  ;;  %v5617_v61 = vpack.c.bf16 %v1268_v15, %v1267_v60  ;;  %v3769_v11 = vld [vmem:[%s9047_s3 + $0x100] sm:$0xff] }
 0x244   :  { %v1032_v41 = vpop.f32.mrb[164].mxu0 }
 0x245   :  { %v1153_v5 = vmax.f32 %v7321_v48, %v1032_v41  ;;  %v1034_v18 = vpop.f32.mrb[165].mxu0  ;;  %v3772_v41 = vld [vmem:[%s9047_s3 + $0x118] sm:$0xff] }
 0x246   :  { %5609 = vmatpush3.bf16.msra.mxu1 %v5608_v3 }
 0x247   :  { %v7454_v54 = vmax.f32 %v9107_v39, %v1153_v5  ;;  %5610 = vmatprep.subr.bf16.mxu1 %v9103_v34  ;;  %v3773_v39 = vld [vmem:[%s9047_s3 + $0x120] sm:$0xff] }
 0x248   :  { %v1037_v33 = vpop.f32.mrb[166].mxu0 }
 0x249   :  { %v1154_v48 = vmax.f32 %v7327_v56, %v1037_v33  ;;  %v1039_v2 = vpop.f32.mrb[167].mxu0 }
 0x24a   :  { %5612 = vmatpush3.bf16.msra.mxu1 %v5611_v10  ;;  %v5623_v10 = vpack.c.bf16 %v3772_v41, %v3771_v23  ;;  %v3775_v2 = vld [vmem:[%s9047_s3 + $0x130] sm:$0xff] }
 0x24b   :  { %v7467_v1 = vmax.f32 %v9108_v43, %v1154_v48  ;;  %5613 = vmatprep.subr.bf16.mxu1 %v9103_v34 }
 0x24c   :  { %v1042_v31 = vpop.f32.mrb[168].mxu0 }
 0x24d   :  { %v1155_v56 = vmax.f32 %v7330_v30, %v1042_v31  ;;  %v1044_v38 = vpop.f32.mrb[169].mxu0  ;;  %v3770_v30 = vld [vmem:[%s9047_s3 + $0x108] sm:$0xff] }
 0x24e   :  { %5615 = vmatpush3.bf16.msra.mxu1 %v5614_v20  ;;  %v5620_v49 = vpack.c.bf16 %v3770_v30, %v3769_v11  ;;  %v3776_v20 = vld [vmem:[%s9047_s3 + $0x138] sm:$0xff]  ;;  %v3978_v38 = vld [vmem:[%s9047_s3 + $0x788] sm:$0xff]  ;;  %v3779_v30 = vld [vmem:[%s9047_s3 + $0x150] sm:$0xff] }
 0x24f   :  { %v7482_v7 = vmax.f32 %v9109_v13, %v1155_v56  ;;  %5616 = vmatprep.subr.bf16.mxu1 %v9103_v34  ;;  %v5629_v15 = vpack.c.bf16 %v3776_v20, %v3775_v2  ;;  %v3778_v56 = vld [vmem:[%s9047_s3 + $0x148] sm:$0xff]  ;;  %v3983_v2 = vld [vmem:[%s9047_s3 + $0x7b0] sm:$0xff]  ;;  %v3984_v20 = vld [vmem:[%s9047_s3 + $0x7b8] sm:$0xff] }
 0x250   :  { %v1047_v22 = vpop.f32.mrb[170].mxu0  ;;  %v5632_v13 = vpack.c.bf16 %v3778_v56, %v3777_v63  ;;  %v5941_v63 = vpack.c.bf16 %v3984_v20, %v3983_v2  ;;  %v9119_v56 = vld [vmem:[#allocation2_spill] sm:$0xff]  ;;  %v3990_v2 = vld [vmem:[%s9047_s3 + $0x7e8] sm:$0xff] }
 0x251   :  { %v1156_v3 = vmax.f32 %v7332_v44, %v1047_v22  ;;  %v1049_v35 = vpop.f32.mrb[171].mxu0 }
 0x252   :  { %5618 = vmatpush3.bf16.msra.mxu1 %v5617_v61 }
 0x253   :  { %v7495_v25 = vmax.f32 %v9110_v51, %v1156_v3  ;;  %5619 = vmatprep.subr.bf16.mxu1 %v9103_v34  ;;  %v9114_v3 = vmax.f32 %v6853_v8, %v7119_v36 }
 0x254   :  { %v1052_v44 = vpop.f32.mrb[172].mxu0 }
 0x255   :  { %v1157_v5 = vmax.f32 %v7334_v50, %v1052_v44  ;;  %4667 = vmatmul.mubr.f32.vlgmr.msra.gmra.mrb[2].mxu1 %v1228_v29  ;;  %v1054_v18 = vpop.f32.mrb[173].mxu0  ;;  %v3774_v50 = vld [vmem:[%s9047_s3 + $0x128] sm:$0xff]  ;;  %v3980_v29 = vld [vmem:[%s9047_s3 + $0x798] sm:$0xff]  ;;  %v3781_v44 = vld [vmem:[%s9047_s3 + $0x160] sm:$0xff] }
 0x256   :  { %5621 = vmatpush3.bf16.msra.mxu1 %v5620_v49  ;;  %4701 = vmatprep.mubr.msk.f32.mxu1 %vm6226_vm2, %v9101_v32  ;;  %v5626_v48 = vpack.c.bf16 %v3774_v50, %v3773_v39  ;;  %v3979_v49 = vld [vmem:[%s9047_s3 + $0x790] sm:$0xff] }
 0x257   :  { %v7510_v42 = vmax.f32 %v9111_v55, %v1157_v5  ;;  %5622 = vmatprep.subr.bf16.mxu1 %v9103_v34  ;;  %v5935_v41 = vpack.c.bf16 %v3980_v29, %v3979_v49  ;;  %v9115_v5 = vmax.f32 %v6862_v12, %v7137_v24  ;;  %v3982_v55 = vld [vmem:[%s9047_s3 + $0x7a8] sm:$0xff] }
 0x258   :  { %v1057_v26 = vpop.f32.mrb[174].mxu0  ;;  %v9123_v29 = vld [vmem:[#allocation3_spill] sm:$0xff] }
 0x259   :  { %v1158_v53 = vmax.f32 %v7336_v45, %v1057_v26  ;;  %v1059_v33 = vpop.f32.mrb[175].mxu0 }
 0x25a   :  { %5624 = vmatpush3.bf16.msra.mxu1 %v5623_v10  ;;  %v3981_v10 = vld [vmem:[%s9047_s3 + $0x7a0] sm:$0xff] }
 0x25b   :  { %v7523_v58 = vmax.f32 %v9112_v59, %v1158_v53  ;;  %5625 = vmatprep.subr.bf16.mxu1 %v9103_v34  ;;  %v5938_v26 = vpack.c.bf16 %v3982_v55, %v3981_v10  ;;  %v3783_v53 = vld [vmem:[%s9047_s3 + $0x170] sm:$0xff]  ;;  %v9116_v33 = vld [vmem:[#allocation10_spill] sm:$0xff] }
 0x25c   :  { %v1062_v43 = vpop.f32.mrb[176].mxu0 }
 0x25d   :  { %v1159_v45 = vmax.f32 %v7338_v57, %v1062_v43  ;;  %v1064_v60 = vpop.f32.mrb[177].mxu0  ;;  %v3977_v57 = vld [vmem:[%s9047_s3 + $0x780] sm:$0xff] }
 0x25e   :  { %5627 = vmatpush3.bf16.msra.mxu1 %v5626_v48  ;;  %v5932_v11 = vpack.c.bf16 %v3978_v38, %v3977_v57  ;;  %v9117_v48 = vmax.f32 %v6871_v17, %v9116_v33  ;;  %v9118_v17 = vld [vmem:[#allocation19_spill] sm:$0xff] }
 0x25f   :  { %v1184_v31 = vmax.f32 %v9113_v9, %v1159_v45  ;;  %5628 = vmatprep.subr.bf16.mxu1 %v9103_v34  ;;  %v3785_v9 = vld [vmem:[%s9047_s3 + $0x180] sm:$0xff]  ;;  %v9120_v57 = vld [vmem:[#allocation11_spill] sm:$0xff] }
 0x260   :  { %v1067_v61 = vpop.f32.mrb[178].mxu0  ;;  %v9121_v38 = vmax.f32 %v9119_v56, %v9120_v57  ;;  %v3991_v57 = vld [vmem:[%s9047_s3 + $0x7f0] sm:$0xff] }
 0x261   :  { %v1216_v47 = vadd.f32 %v7381_v14, %v1184_v31  ;;  %v1160_v4 = vmax.f32 %v7340_v62, %v1067_v61  ;;  %v1069_v52 = vpop.f32.mrb[179].mxu0  ;;  %v3780_v62 = vld [vmem:[%s9047_s3 + $0x158] sm:$0xff]  ;;  %v1205_v31 = vadd.f32 %v7381_v14, %v7388_v21  ;;  %v3986_v21 = vld [vmem:[%s9047_s3 + $0x7c8] sm:$0xff] }
 0x262   :  { %5630 = vmatpush3.bf16.msra.mxu1 %v5629_v15  ;;  %v5635_v36 = vpack.c.bf16 %v3780_v62, %v3779_v30  ;;  %v3787_v62 = vld [vmem:[%s9047_s3 + $0x190] sm:$0xff] }
 0x263   :  { %v1241_v22 = vmax.f32 %v1216_v47, 0.0  ;;  %v7557_v35 = vmax.f32 %v9114_v3, %v1160_v4  ;;  %5631 = vmatprep.subr.bf16.mxu1 %v9103_v34  ;;  %v3786_v47 = vld [vmem:[%s9047_s3 + $0x188] sm:$0xff]  ;;  %v3985_v4 = vld [vmem:[%s9047_s3 + $0x7c0] sm:$0xff]  ;;  %v1230_v49 = vmax.f32 %v1205_v31, 0.0 }
 0x264   :  { %v1072_v51 = vpop.f32.mrb[180].mxu0  ;;  %v5944_v3 = vpack.c.bf16 %v3986_v21, %v3985_v4  ;;  %v9133_v4 = vld [vmem:[#allocation22_spill] sm:$0xff] }
 0x265   :  { %v1161_v23 = vmax.f32 %v7342_v0, %v1072_v51  ;;  %5087 = vmatmul.mubr.f32.vlgmr.msra.gmra.mrb[200].mxu0 %v1241_v22  ;;  %v1074_v8 = vpop.f32.mrb[181].mxu0  ;;  %v3782_v0 = vld [vmem:[%s9047_s3 + $0x168] sm:$0xff]  ;;  %v5644_v22 = vpack.c.bf16 %v3786_v47, %v3785_v9  ;;  %v9124_v51 = vld [vmem:[#allocation12_spill] sm:$0xff]  ;;  %v9131_v9 = vld [vmem:[#allocation14_spill] sm:$0xff] }
 0x266   :  { %5633 = vmatpush3.bf16.msra.mxu1 %v5632_v13  ;;  %5933 = vmatpush3.bf16.msra.mxu0 %v5932_v11  ;;  %v5638_v50 = vpack.c.bf16 %v3782_v0, %v3781_v44  ;;  %v9122_v13 = vld [vmem:[#allocation20_spill] sm:$0xff]  ;;  %v3988_v44 = vld [vmem:[%s9047_s3 + $0x7d8] sm:$0xff] }
 0x267   :  { %v7576_v18 = vmax.f32 %v9115_v5, %v1161_v23  ;;  %5634 = vmatprep.subr.bf16.mxu1 %v9103_v34  ;;  %5934 = vmatprep.subr.bf16.mxu0 %v9103_v34  ;;  %v9125_v23 = vmax.f32 %v9123_v29, %v9124_v51  ;;  %v9126_v0 = vld [vmem:[#allocation21_spill] sm:$0xff]  ;;  %v3794_v51 = vld [vmem:[%s9047_s3 + $0x1c8] sm:$0xff] }
 0x268   :  { %v1077_v39 = vpop.f32.mrb[182].mxu0  ;;  %5156 = vmatprep.mubr.msk.f32.mxu0 %vm6226_vm2, %v9101_v32 }
 0x269   :  { %v1162_v12 = vmax.f32 %v7344_v40, %v1077_v39  ;;  %v1079_v24 = vpop.f32.mrb[183].mxu0  ;;  %v3784_v40 = vld [vmem:[%s9047_s3 + $0x178] sm:$0xff] }
 0x26a   :  { %5636 = vmatpush3.bf16.msra.mxu1 %v5635_v36  ;;  %5936 = vmatpush3.bf16.msra.mxu0 %v5935_v41  ;;  %v5641_v15 = vpack.c.bf16 %v3784_v40, %v3783_v53  ;;  %v3788_v36 = vld [vmem:[%s9047_s3 + $0x198] sm:$0xff]  ;;  %v3987_v41 = vld [vmem:[%s9047_s3 + $0x7d0] sm:$0xff]  ;;  %v3789_v24 = vld [vmem:[%s9047_s3 + $0x1a0] sm:$0xff] }
 0x26b   :  { %v7598_v59 = vmax.f32 %v9117_v48, %v1162_v12  ;;  %5637 = vmatprep.subr.bf16.mxu1 %v9103_v34  ;;  %5937 = vmatprep.subr.bf16.mxu0 %v9103_v34  ;;  %v5647_v39 = vpack.c.bf16 %v3788_v36, %v3787_v62  ;;  %v5947_v12 = vpack.c.bf16 %v3988_v44, %v3987_v41  ;;  %v3790_v48 = vld [vmem:[%s9047_s3 + $0x1a8] sm:$0xff]  ;;  %v3989_v40 = vld [vmem:[%s9047_s3 + $0x7e0] sm:$0xff] }
 0x26c   :  { %v1082_v43 = vpop.f32.mrb[184].mxu0  ;;  %v9135_v62 = vld [vmem:[#allocation15_spill] sm:$0xff] }
 0x26d   :  { %v1163_v45 = vmax.f32 %v9118_v17, %v1082_v43  ;;  %v1084_v60 = vpop.f32.mrb[185].mxu0  ;;  %v9137_v41 = vld [vmem:[#allocation23_spill] sm:$0xff] }
 0x26e   :  { %5639 = vmatpush3.bf16.msra.mxu1 %v5638_v50  ;;  %5939 = vmatpush3.bf16.msra.mxu0 %v5938_v26  ;;  %v9127_v50 = vld [vmem:[#allocation4_spill] sm:$0xff]  ;;  %v9128_v26 = vld [vmem:[#allocation13_spill] sm:$0xff]  ;;  %v5950_v60 = vpack.c.bf16 %v3990_v2, %v3989_v40 }
 0x26f   :  { %v7620_v61 = vmax.f32 %v9121_v38, %v1163_v45  ;;  %5640 = vmatprep.subr.bf16.mxu1 %v9103_v34  ;;  %5940 = vmatprep.subr.bf16.mxu0 %v9103_v34  ;;  %v9129_v53 = vmax.f32 %v9127_v50, %v9128_v26  ;;  %v5650_v45 = vpack.c.bf16 %v3790_v48, %v3789_v24  ;;  %v3992_v38 = vld [vmem:[%s9047_s3 + $0x7f8] sm:$0xff]  ;;  %v9139_v24 = vld [vmem:[#allocation16_spill] sm:$0xff] }
 0x270   :  { %v1087_v52 = vpop.f32.mrb[186].mxu0  ;;  %v4011_v48 = vld [vmem:[%s9047_s3 + $0x890] sm:$0xff]  ;;  %v4012_v40 = vld [vmem:[%s9047_s3 + $0x898] sm:$0xff] }
 0x271   :  { %v1164_v11 = vmax.f32 %v9122_v13, %v1087_v52  ;;  %v1089_v30 = vpop.f32.mrb[187].mxu0 }
 0x272   :  { %5642 = vmatpush3.bf16.msra.mxu1 %v5641_v15  ;;  %5942 = vmatpush3.bf16.msra.mxu0 %v5941_v63  ;;  %v3791_v15 = vld [vmem:[%s9047_s3 + $0x1b0] sm:$0xff]  ;;  %v9130_v63 = vld [vmem:[#allocation5_spill] sm:$0xff]  ;;  %v3793_v30 = vld [vmem:[%s9047_s3 + $0x1c0] sm:$0xff] }
 0x273   :  { %v7640_v8 = vmax.f32 %v9125_v23, %v1164_v11  ;;  %5643 = vmatprep.subr.bf16.mxu1 %v9103_v34  ;;  %5943 = vmatprep.subr.bf16.mxu0 %v9103_v34  ;;  %v9132_v31 = vmax.f32 %v9130_v63, %v9131_v9  ;;  %v5953_v11 = vpack.c.bf16 %v3992_v38, %v3991_v57  ;;  %v4009_v23 = vld [vmem:[%s9047_s3 + $0x880] sm:$0xff]  ;;  %v9142_v63 = vld [vmem:[#allocation17_spill] sm:$0xff]  ;;  %v4014_v57 = vld [vmem:[%s9047_s3 + $0x8a8] sm:$0xff] }
 0x274   :  { %v1092_v5 = vpop.f32.mrb[188].mxu0 }
 0x275   :  { %v1165_v10 = vmax.f32 %v9126_v0, %v1092_v5  ;;  %4702 = vmatmul.mubr.f32.vlgmr.msra.gmra.mrb[4].mxu1 %v1230_v49  ;;  %v1094_v55 = vpop.f32.mrb[189].mxu0  ;;  %v5656_v0 = vpack.c.bf16 %v3794_v51, %v3793_v30  ;;  %v9145_v30 = vld [vmem:[#allocation18_spill] sm:$0xff] }
 0x276   :  { %5645 = vmatpush3.bf16.msra.mxu1 %v5644_v22  ;;  %5945 = vmatpush3.bf16.msra.mxu0 %v5944_v3  ;;  %v1218_v22 = vadd.f32 %v7381_v14, %v7576_v18  ;;  %v9134_v3 = vld [vmem:[#allocation6_spill] sm:$0xff]  ;;  %v4010_v18 = vld [vmem:[%s9047_s3 + $0x888] sm:$0xff]  ;;  %v3795_v55 = vld [vmem:[%s9047_s3 + $0x1d0] sm:$0xff] }
 0x277   :  { %v7660_v33 = vmax.f32 %v9129_v53, %v1165_v10  ;;  %5646 = vmatprep.subr.bf16.mxu1 %v9103_v34  ;;  %5946 = vmatprep.subr.bf16.mxu0 %v9103_v34  ;;  %v9136_v49 = vmax.f32 %v9134_v3, %v9135_v62  ;;  %v5980_v10 = vpack.c.bf16 %v4010_v18, %v4009_v23  ;;  %v3796_v53 = vld [vmem:[%s9047_s3 + $0x1d8] sm:$0xff]  ;;  %v4015_v62 = vld [vmem:[%s9047_s3 + $0x8b0] sm:$0xff]  ;;  %v3801_v18 = vld [vmem:[%s9047_s3 + $0x200] sm:$0xff] }
 0x278   :  { %v1097_v20 = vpop.f32.mrb[190].mxu0  ;;  %4736 = vmatprep.mubr.msk.f32.mxu1 %vm6226_vm2, %v9101_v32 }
 0x279   :  { %v1166_v43 = vmax.f32 %v7352_v28, %v1097_v20  ;;  %v1099_v17 = vpop.f32.mrb[191].mxu0  ;;  %v3792_v28 = vld [vmem:[%s9047_s3 + $0x1b8] sm:$0xff] }
 0x27a   :  { %5648 = vmatpush3.bf16.msra.mxu1 %v5647_v39  ;;  %5948 = vmatpush3.bf16.msra.mxu0 %v5947_v12  ;;  %v5653_v13 = vpack.c.bf16 %v3792_v28, %v3791_v15  ;;  %v1243_v39 = vmax.f32 %v1218_v22, 0.0  ;;  %v9138_v12 = vld [vmem:[#allocation7_spill] sm:$0xff]  ;;  %v5659_v17 = vpack.c.bf16 %v3796_v53, %v3795_v55  ;;  %v9141_v15 = vld [vmem:[#allocation8_spill] sm:$0xff]  ;;  %v4013_v28 = vld [vmem:[%s9047_s3 + $0x8a0] sm:$0xff] }
 0x27b   :  { %v7682_v56 = vmax.f32 %v9132_v31, %v1166_v43  ;;  %5649 = vmatprep.subr.bf16.mxu1 %v9103_v34  ;;  %5949 = vmatprep.subr.bf16.mxu0 %v9103_v34  ;;  %v9140_v50 = vmax.f32 %v9138_v12, %v9139_v24  ;;  %v9143_v9 = vmax.f32 %v9141_v15, %v9142_v63  ;;  %v4019_v12 = vld [vmem:[%s9047_s3 + $0x8d0] sm:$0xff]  ;;  %v4020_v24 = vld [vmem:[%s9047_s3 + $0x8d8] sm:$0xff] }
 0x27c   :  { %v1102_v47 = vpop.f32.mrb[192].mxu0  ;;  %v5995_v53 = vpack.c.bf16 %v4020_v24, %v4019_v12  ;;  %v4023_v15 = vld [vmem:[%s9047_s3 + $0x8f0] sm:$0xff]  ;;  %v4024_v63 = vld [vmem:[%s9047_s3 + $0x8f8] sm:$0xff]  ;;  %v1207_v12 = vadd.f32 %v7381_v14, %v7415_v27  ;;  %v3818_v24 = vld [vmem:[%s9047_s3 + $0x288] sm:$0xff] }
 0x27d   :  { %v1167_v21 = vmax.f32 %v9133_v4, %v1102_v47  ;;  %v1104_v52 = vpop.f32.mrb[193].mxu0 }
 0x27e   :  { %5651 = vmatpush3.bf16.msra.mxu1 %v5650_v45  ;;  %5951 = vmatpush3.bf16.msra.mxu0 %v5950_v60  ;;  %v5983_v45 = vpack.c.bf16 %v4012_v40, %v4011_v48  ;;  %v3797_v60 = vld [vmem:[%s9047_s3 + $0x1e0] sm:$0xff]  ;;  %v5986_v52 = vpack.c.bf16 %v4014_v57, %v4013_v28  ;;  %v3806_v40 = vld [vmem:[%s9047_s3 + $0x228] sm:$0xff]  ;;  %v1220_v57 = vadd.f32 %v7381_v14, %v7620_v61 }
 0x27f   :  { %v7704_v29 = vmax.f32 %v9136_v49, %v1167_v21  ;;  %5652 = vmatprep.subr.bf16.mxu1 %v9103_v34  ;;  %5952 = vmatprep.subr.bf16.mxu0 %v9103_v34  ;;  %v4016_v49 = vld [vmem:[%s9047_s3 + $0x8b8] sm:$0xff]  ;;  %v3805_v48 = vld [vmem:[%s9047_s3 + $0x220] sm:$0xff] }
 0x280   :  { %v1107_v36 = vpop.f32.mrb[194].mxu0  ;;  %v5989_v23 = vpack.c.bf16 %v4016_v49, %v4015_v62  ;;  %v3809_v28 = vld [vmem:[%s9047_s3 + $0x240] sm:$0xff] }
 0x281   :  { %v1168_v44 = vmax.f32 %v9137_v41, %v1107_v36  ;;  %v1109_v5 = vpop.f32.mrb[195].mxu0  ;;  %v1206_v36 = vadd.f32 %v7381_v14, %v7402_v19  ;;  %v3802_v41 = vld [vmem:[%s9047_s3 + $0x208] sm:$0xff]  ;;  %v3813_v49 = vld [vmem:[%s9047_s3 + $0x260] sm:$0xff] }
 0x282   :  { %5654 = vmatpush3.bf16.msra.mxu1 %v5653_v13  ;;  %5954 = vmatpush3.bf16.msra.mxu0 %v5953_v11  ;;  %v3799_v13 = vld [vmem:[%s9047_s3 + $0x1f0] sm:$0xff]  ;;  %v9144_v11 = vld [vmem:[#allocation9_spill] sm:$0xff]  ;;  %v4018_v5 = vld [vmem:[%s9047_s3 + $0x8c8] sm:$0xff] }
 0x283   :  { %v7724_v26 = vmax.f32 %v9140_v50, %v1168_v44  ;;  %5655 = vmatprep.subr.bf16.mxu1 %v9103_v34  ;;  %5979 = vmatprep.subr.bf16.mxu0 %v9103_v34  ;;  %v9146_v22 = vmax.f32 %v9144_v11, %v9145_v30  ;;  %v4017_v44 = vld [vmem:[%s9047_s3 + $0x8c0] sm:$0xff]  ;;  %v1231_v55 = vmax.f32 %v1206_v36, 0.0  ;;  %v3812_v11 = vld [vmem:[%s9047_s3 + $0x258] sm:$0xff]  ;;  %v4043_v30 = vld [vmem:[%s9047_s3 + $0x990] sm:$0xff] }
 0x284   :  { %v1112_v2 = vpop.f32.mrb[196].mxu0  ;;  %v5992_v19 = vpack.c.bf16 %v4018_v5, %v4017_v44  ;;  %v3815_v44 = vld [vmem:[%s9047_s3 + $0x270] sm:$0xff]  ;;  %v3816_v5 = vld [vmem:[%s9047_s3 + $0x278] sm:$0xff] }
 0x285   :  { %v1169_v20 = vmax.f32 %v7358_v6, %v1112_v2  ;;  %5157 = vmatmul.mubr.f32.vlgmr.msra.gmra.mrb[202].mxu0 %v1243_v39  ;;  %v1114_v43 = vpop.f32.mrb[197].mxu0  ;;  %v3798_v6 = vld [vmem:[%s9047_s3 + $0x1e8] sm:$0xff]  ;;  %v3804_v39 = vld [vmem:[%s9047_s3 + $0x218] sm:$0xff]  ;;  %v4021_v2 = vld [vmem:[%s9047_s3 + $0x8e0] sm:$0xff] }
 0x286   :  { %5657 = vmatpush3.bf16.msra.mxu1 %v5656_v0  ;;  %5981 = vmatpush3.bf16.msra.mxu0 %v5980_v10  ;;  %v5662_v21 = vpack.c.bf16 %v3798_v6, %v3797_v60  ;;  %v5668_v0 = vpack.c.bf16 %v3802_v41, %v3801_v18  ;;  %v3803_v10 = vld [vmem:[%s9047_s3 + $0x210] sm:$0xff]  ;;  %v5674_v43 = vpack.c.bf16 %v3806_v40, %v3805_v48  ;;  %v3808_v60 = vld [vmem:[%s9047_s3 + $0x238] sm:$0xff]  ;;  %v4046_v18 = vld [vmem:[%s9047_s3 + $0x9a8] sm:$0xff] }
 0x287   :  { %v7744_v31 = vmax.f32 %v9143_v9, %v1169_v20  ;;  %5658 = vmatprep.subr.bf16.mxu1 %v9103_v34  ;;  %5982 = vmatprep.subr.bf16.mxu0 %v9103_v34  ;;  %v5671_v50 = vpack.c.bf16 %v3804_v39, %v3803_v10  ;;  %v4022_v20 = vld [vmem:[%s9047_s3 + $0x8e8] sm:$0xff]  ;;  %v6001_v6 = vpack.c.bf16 %v4024_v63, %v4023_v15  ;;  %v3817_v39 = vld [vmem:[%s9047_s3 + $0x280] sm:$0xff]  ;;  %v3819_v40 = vld [vmem:[%s9047_s3 + $0x290] sm:$0xff] }
 0x288   :  { %v1117_v38 = vpop.f32.mrb[198].mxu0  ;;  %5226 = vmatprep.mubr.msk.f32.mxu0 %vm6226_vm2, %v9101_v32  ;;  %v5689_v10 = vpack.c.bf16 %v3816_v5, %v3815_v44  ;;  %v5692_v48 = vpack.c.bf16 %v3818_v24, %v3817_v39  ;;  %v3821_v15 = vld [vmem:[%s9047_s3 + $0x2a0] sm:$0xff]  ;;  %v3822_v63 = vld [vmem:[%s9047_s3 + $0x2a8] sm:$0xff]  ;;  %v3832_v24 = vld [vmem:[%s9047_s3 + $0x2f8] sm:$0xff] }
 0x289   :  { %v1170_v47 = vmax.f32 %v7360_v16, %v1117_v38  ;;  %v1119_v4 = vpop.f32.mrb[199].mxu0  ;;  %v3800_v16 = vld [vmem:[%s9047_s3 + $0x1f8] sm:$0xff]  ;;  %v3810_v38 = vld [vmem:[%s9047_s3 + $0x248] sm:$0xff]  ;;  %v3829_v5 = vld [vmem:[%s9047_s3 + $0x2e0] sm:$0xff] }
 0x28a   :  { %5660 = vmatpush3.bf16.msra.mxu1 %v5659_v17  ;;  %5984 = vmatpush3.bf16.msra.mxu0 %v5983_v45  ;;  %v5665_v51 = vpack.c.bf16 %v3800_v16, %v3799_v13  ;;  %v5998_v17 = vpack.c.bf16 %v4022_v20, %v4021_v2  ;;  %v3807_v45 = vld [vmem:[%s9047_s3 + $0x230] sm:$0xff]  ;;  %v4042_v4 = vld [vmem:[%s9047_s3 + $0x988] sm:$0xff]  ;;  %v1245_v13 = vmax.f32 %v1220_v57, 0.0  ;;  %v1232_v2 = vmax.f32 %v1207_v12, 0.0  ;;  %v3820_v20 = vld [vmem:[%s9047_s3 + $0x298] sm:$0xff] }
 0x28b   :  { %v7766_v3 = vmax.f32 %v9146_v22, %v1170_v47  ;;  %5661 = vmatprep.subr.bf16.mxu1 %v9103_v34  ;;  %5985 = vmatprep.subr.bf16.mxu0 %v9103_v34  ;;  %v5677_v9 = vpack.c.bf16 %v3808_v60, %v3807_v45  ;;  %v4041_v47 = vld [vmem:[%s9047_s3 + $0x980] sm:$0xff]  ;;  %v4044_v22 = vld [vmem:[%s9047_s3 + $0x998] sm:$0xff]  ;;  %v5695_v45 = vpack.c.bf16 %v3820_v20, %v3819_v40  ;;  %v3831_v12 = vld [vmem:[%s9047_s3 + $0x2f0] sm:$0xff] }
 0x28c   :  { %v6028_v61 = vpack.c.bf16 %v4042_v4, %v4041_v47  ;;  %v6031_v62 = vpack.c.bf16 %v4044_v22, %v4043_v30  ;;  %v3824_v47 = vld [vmem:[%s9047_s3 + $0x2b8] sm:$0xff]  ;;  %v4055_v4 = vld [vmem:[%s9047_s3 + $0x9f0] sm:$0xff]  ;;  %v3826_v30 = vld [vmem:[%s9047_s3 + $0x2c8] sm:$0xff] }
 0x28d   :  { %v4073_v22 = vld [vmem:[%s9047_s3 + $0xa80] sm:$0xff]  ;;  %v3834_v20 = vld [vmem:[%s9047_s3 + $0x308] sm:$0xff] }
 0x28e   :  { %5663 = vmatpush3.bf16.msra.mxu1 %v5662_v21  ;;  %5987 = vmatpush3.bf16.msra.mxu0 %v5986_v52  ;;  %v5680_v21 = vpack.c.bf16 %v3810_v38, %v3809_v28  ;;  %v3811_v52 = vld [vmem:[%s9047_s3 + $0x250] sm:$0xff]  ;;  %v5698_v28 = vpack.c.bf16 %v3822_v63, %v3821_v15  ;;  %v3833_v40 = vld [vmem:[%s9047_s3 + $0x300] sm:$0xff]  ;;  %v3836_v63 = vld [vmem:[%s9047_s3 + $0x318] sm:$0xff] }
 0x28f   :  { %5664 = vmatprep.subr.bf16.mxu1 %v9103_v34  ;;  %5988 = vmatprep.subr.bf16.mxu0 %v9103_v34  ;;  %v5683_v16 = vpack.c.bf16 %v3812_v11, %v3811_v52  ;;  %v3823_v38 = vld [vmem:[%s9047_s3 + $0x2b0] sm:$0xff]  ;;  %v1222_v11 = vadd.f32 %v7381_v14, %v7660_v33 }
 0x292   :  { %5666 = vmatpush3.bf16.msra.mxu1 %v5665_v51  ;;  %5990 = vmatpush3.bf16.msra.mxu0 %v5989_v23  ;;  %v3814_v51 = vld [vmem:[%s9047_s3 + $0x268] sm:$0xff]  ;;  %v4045_v23 = vld [vmem:[%s9047_s3 + $0x9a0] sm:$0xff] }
 0x293   :  { %5667 = vmatprep.subr.bf16.mxu1 %v9103_v34  ;;  %5991 = vmatprep.subr.bf16.mxu0 %v9103_v34  ;;  %v5686_v36 = vpack.c.bf16 %v3814_v51, %v3813_v49  ;;  %v6034_v41 = vpack.c.bf16 %v4046_v18, %v4045_v23  ;;  %v3827_v49 = vld [vmem:[%s9047_s3 + $0x2d0] sm:$0xff]  ;;  %v1247_v51 = vmax.f32 %v1222_v11, 0.0  ;;  %v3828_v23 = vld [vmem:[%s9047_s3 + $0x2d8] sm:$0xff] }
 0x294   :  { %v4075_v18 = vld [vmem:[%s9047_s3 + $0xa90] sm:$0xff]  ;;  %v3840_v11 = vld [vmem:[%s9047_s3 + $0x338] sm:$0xff] }
 0x295   :  { %4737 = vmatmul.mubr.f32.vlgmr.msra.gmra.mrb[6].mxu1 %v1231_v55 }
 0x296   :  { %5669 = vmatpush3.bf16.msra.mxu1 %v5668_v0  ;;  %5993 = vmatpush3.bf16.msra.mxu0 %v5992_v19  ;;  %v4047_v0 = vld [vmem:[%s9047_s3 + $0x9b0] sm:$0xff]  ;;  %v4048_v19 = vld [vmem:[%s9047_s3 + $0x9b8] sm:$0xff] }
 0x297   :  { %5670 = vmatprep.subr.bf16.mxu1 %v9103_v34  ;;  %5994 = vmatprep.subr.bf16.mxu0 %v9103_v34  ;;  %v6037_v55 = vpack.c.bf16 %v4048_v19, %v4047_v0  ;;  %v3830_v0 = vld [vmem:[%s9047_s3 + $0x2e8] sm:$0xff]  ;;  %v4077_v19 = vld [vmem:[%s9047_s3 + $0xaa0] sm:$0xff] }
 0x298   :  { %4771 = vmatprep.mubr.msk.f32.mxu1 %vm6226_vm2, %v9101_v32 }
 0x29a   :  { %5672 = vmatpush3.bf16.msra.mxu1 %v5671_v50  ;;  %5996 = vmatpush3.bf16.msra.mxu0 %v5995_v53  ;;  %v4049_v50 = vld [vmem:[%s9047_s3 + $0x9c0] sm:$0xff]  ;;  %v4050_v53 = vld [vmem:[%s9047_s3 + $0x9c8] sm:$0xff] }
 0x29b   :  { %5673 = vmatprep.subr.bf16.mxu1 %v9103_v34  ;;  %5997 = vmatprep.subr.bf16.mxu0 %v9103_v34  ;;  %v6040_v27 = vpack.c.bf16 %v4050_v53, %v4049_v50  ;;  %v4079_v50 = vld [vmem:[%s9047_s3 + $0xab0] sm:$0xff]  ;;  %v4080_v53 = vld [vmem:[%s9047_s3 + $0xab8] sm:$0xff] }
 0x29e   :  { %5675 = vmatpush3.bf16.msra.mxu1 %v5674_v43  ;;  %5999 = vmatpush3.bf16.msra.mxu0 %v5998_v17  ;;  %v4051_v43 = vld [vmem:[%s9047_s3 + $0x9d0] sm:$0xff]  ;;  %v4052_v17 = vld [vmem:[%s9047_s3 + $0x9d8] sm:$0xff] }
 0x29f   :  { %5676 = vmatprep.subr.bf16.mxu1 %v9103_v34  ;;  %6000 = vmatprep.subr.bf16.mxu0 %v9103_v34  ;;  %v6043_v60 = vpack.c.bf16 %v4052_v17, %v4051_v43  ;;  %v4081_v43 = vld [vmem:[%s9047_s3 + $0xac0] sm:$0xff]  ;;  %v4082_v17 = vld [vmem:[%s9047_s3 + $0xac8] sm:$0xff] }
 0x2a2   :  { %5678 = vmatpush3.bf16.msra.mxu1 %v5677_v9  ;;  %6002 = vmatpush3.bf16.msra.mxu0 %v6001_v6  ;;  %v4053_v9 = vld [vmem:[%s9047_s3 + $0x9e0] sm:$0xff]  ;;  %v4054_v6 = vld [vmem:[%s9047_s3 + $0x9e8] sm:$0xff] }
 0x2a3   :  { %5679 = vmatprep.subr.bf16.mxu1 %v9103_v34  ;;  %6027 = vmatprep.subr.bf16.mxu0 %v9103_v34  ;;  %v6046_v57 = vpack.c.bf16 %v4054_v6, %v4053_v9  ;;  %v4083_v9 = vld [vmem:[%s9047_s3 + $0xad0] sm:$0xff]  ;;  %v4084_v6 = vld [vmem:[%s9047_s3 + $0xad8] sm:$0xff] }
 0x2a5   :  { %5227 = vmatmul.mubr.f32.vlgmr.msra.gmra.mrb[204].mxu0 %v1245_v13  ;;  %v3825_v13 = vld [vmem:[%s9047_s3 + $0x2c0] sm:$0xff] }
 0x2a6   :  { %5681 = vmatpush3.bf16.msra.mxu1 %v5680_v21  ;;  %6029 = vmatpush3.bf16.msra.mxu0 %v6028_v61  ;;  %v4056_v21 = vld [vmem:[%s9047_s3 + $0x9f8] sm:$0xff]  ;;  %v5701_v61 = vpack.c.bf16 %v3824_v47, %v3823_v38  ;;  %v3837_v38 = vld [vmem:[%s9047_s3 + $0x320] sm:$0xff]  ;;  %v3838_v47 = vld [vmem:[%s9047_s3 + $0x328] sm:$0xff] }
 0x2a7   :  { %5682 = vmatprep.subr.bf16.mxu1 %v9103_v34  ;;  %6030 = vmatprep.subr.bf16.mxu0 %v9103_v34  ;;  %v6049_v52 = vpack.c.bf16 %v4056_v21, %v4055_v4  ;;  %v4085_v4 = vld [vmem:[%s9047_s3 + $0xae0] sm:$0xff]  ;;  %v4086_v21 = vld [vmem:[%s9047_s3 + $0xae8] sm:$0xff] }
 0x2a8   :  { %5296 = vmatprep.mubr.msk.f32.mxu0 %vm6226_vm2, %v9101_v32 }
 0x2aa   :  { %5684 = vmatpush3.bf16.msra.mxu1 %v5683_v16  ;;  %6032 = vmatpush3.bf16.msra.mxu0 %v6031_v62  ;;  %v4074_v16 = vld [vmem:[%s9047_s3 + $0xa88] sm:$0xff]  ;;  %v5704_v62 = vpack.c.bf16 %v3826_v30, %v3825_v13  ;;  %v3839_v13 = vld [vmem:[%s9047_s3 + $0x330] sm:$0xff] }
 0x2ab   :  { %5685 = vmatprep.subr.bf16.mxu1 %v9103_v34  ;;  %6033 = vmatprep.subr.bf16.mxu0 %v9103_v34  ;;  %v6076_v33 = vpack.c.bf16 %v4074_v16, %v4073_v22  ;;  %v4087_v30 = vld [vmem:[%s9047_s3 + $0xaf0] sm:$0xff]  ;;  %v4088_v22 = vld [vmem:[%s9047_s3 + $0xaf8] sm:$0xff]  ;;  %v5725_v16 = vpack.c.bf16 %v3840_v11, %v3839_v13  ;;  %v4117_v13 = vld [vmem:[%s9047_s3 + $0xbe0] sm:$0xff] }
 0x2ac   :  { %v4118_v11 = vld [vmem:[%s9047_s3 + $0xbe8] sm:$0xff] }
 0x2ae   :  { %5687 = vmatpush3.bf16.msra.mxu1 %v5686_v36  ;;  %6035 = vmatpush3.bf16.msra.mxu0 %v6034_v41  ;;  %v4076_v36 = vld [vmem:[%s9047_s3 + $0xa98] sm:$0xff]  ;;  %v5707_v41 = vpack.c.bf16 %v3828_v23, %v3827_v49  ;;  %v1224_v49 = vadd.f32 %v7381_v14, %v7704_v29  ;;  %v4105_v23 = vld [vmem:[%s9047_s3 + $0xb80] sm:$0xff]  ;;  %v3843_v29 = vld [vmem:[%s9047_s3 + $0x350] sm:$0xff] }
 0x2af   :  { %5688 = vmatprep.subr.bf16.mxu1 %v9103_v34  ;;  %6036 = vmatprep.subr.bf16.mxu0 %v9103_v34  ;;  %v6079_v44 = vpack.c.bf16 %v4076_v36, %v4075_v18  ;;  %v4106_v18 = vld [vmem:[%s9047_s3 + $0xb88] sm:$0xff] }
 0x2b2   :  { %5690 = vmatpush3.bf16.msra.mxu1 %v5689_v10  ;;  %6038 = vmatpush3.bf16.msra.mxu0 %v6037_v55  ;;  %v4078_v10 = vld [vmem:[%s9047_s3 + $0xaa8] sm:$0xff]  ;;  %v5710_v55 = vpack.c.bf16 %v3830_v0, %v3829_v5  ;;  %v4107_v5 = vld [vmem:[%s9047_s3 + $0xb90] sm:$0xff]  ;;  %v4108_v0 = vld [vmem:[%s9047_s3 + $0xb98] sm:$0xff] }
 0x2b3   :  { %5691 = vmatprep.subr.bf16.mxu1 %v9103_v34  ;;  %6039 = vmatprep.subr.bf16.mxu0 %v9103_v34  ;;  %v6082_v39 = vpack.c.bf16 %v4078_v10, %v4077_v19  ;;  %v6127_v10 = vpack.c.bf16 %v4108_v0, %v4107_v5  ;;  %v3861_v0 = vld [vmem:[%s9047_s3 + $0x3e0] sm:$0xff] }
 0x2b5   :  { %4772 = vmatmul.mubr.f32.vlgmr.msra.gmra.mrb[8].mxu1 %v1232_v2  ;;  %v1208_v2 = vadd.f32 %v7381_v14, %v7428_v37  ;;  %v6088_v37 = vpack.c.bf16 %v4082_v17, %v4081_v43  ;;  %v6124_v14 = vpack.c.bf16 %v4106_v18, %v4105_v23  ;;  %v3849_v17 = vld [vmem:[%s9047_s3 + $0x380] sm:$0xff] }
 0x2b6   :  { %5693 = vmatpush3.bf16.msra.mxu1 %v5692_v48  ;;  %6041 = vmatpush3.bf16.msra.mxu0 %v6040_v27  ;;  %v5713_v48 = vpack.c.bf16 %v3832_v24, %v3831_v12  ;;  %v6085_v27 = vpack.c.bf16 %v4080_v53, %v4079_v50  ;;  %v4109_v12 = vld [vmem:[%s9047_s3 + $0xba0] sm:$0xff]  ;;  %v4110_v24 = vld [vmem:[%s9047_s3 + $0xba8] sm:$0xff] }
 0x2b7   :  { %5694 = vmatprep.subr.bf16.mxu1 %v9103_v34  ;;  %6042 = vmatprep.subr.bf16.mxu0 %v9103_v34  ;;  %v1233_v15 = vmax.f32 %v1208_v2, 0.0  ;;  %v6130_v53 = vpack.c.bf16 %v4110_v24, %v4109_v12  ;;  %v4112_v2 = vld [vmem:[%s9047_s3 + $0xbb8] sm:$0xff]  ;;  %v3863_v12 = vld [vmem:[%s9047_s3 + $0x3f0] sm:$0xff] }
 0x2b8   :  { %4806 = vmatprep.mubr.msk.f32.mxu1 %vm6226_vm2, %v9101_v32  ;;  %v3864_v24 = vld [vmem:[%s9047_s3 + $0x3f8] sm:$0xff] }
 0x2ba   :  { %5696 = vmatpush3.bf16.msra.mxu1 %v5695_v45  ;;  %6044 = vmatpush3.bf16.msra.mxu0 %v6043_v60  ;;  %v5716_v45 = vpack.c.bf16 %v3834_v20, %v3833_v40  ;;  %v3835_v60 = vld [vmem:[%s9047_s3 + $0x310] sm:$0xff] }
 0x2bb   :  { %5697 = vmatprep.subr.bf16.mxu1 %v9103_v34  ;;  %6045 = vmatprep.subr.bf16.mxu0 %v9103_v34  ;;  %v4111_v40 = vld [vmem:[%s9047_s3 + $0xbb0] sm:$0xff] }
 0x2bc   :  { %v6133_v43 = vpack.c.bf16 %v4112_v2, %v4111_v40 }
 0x2be   :  { %5699 = vmatpush3.bf16.msra.mxu1 %v5698_v28  ;;  %6047 = vmatpush3.bf16.msra.mxu0 %v6046_v57  ;;  %v5719_v28 = vpack.c.bf16 %v3836_v63, %v3835_v60  ;;  %v6091_v57 = vpack.c.bf16 %v4084_v6, %v4083_v9  ;;  %v3850_v60 = vld [vmem:[%s9047_s3 + $0x388] sm:$0xff]  ;;  %v3851_v6 = vld [vmem:[%s9047_s3 + $0x390] sm:$0xff] }
 0x2bf   :  { %5700 = vmatprep.subr.bf16.mxu1 %v9103_v34  ;;  %6048 = vmatprep.subr.bf16.mxu0 %v9103_v34  ;;  %v4114_v63 = vld [vmem:[%s9047_s3 + $0xbc8] sm:$0xff]  ;;  %v5740_v9 = vpack.c.bf16 %v3850_v60, %v3849_v17  ;;  %v3869_v17 = vld [vmem:[%s9047_s3 + $0x420] sm:$0xff] }
 0x2c2   :  { %5702 = vmatpush3.bf16.msra.mxu1 %v5701_v61  ;;  %6050 = vmatpush3.bf16.msra.mxu0 %v6049_v52  ;;  %v5722_v61 = vpack.c.bf16 %v3838_v47, %v3837_v38  ;;  %v6094_v52 = vpack.c.bf16 %v4086_v21, %v4085_v4  ;;  %v4115_v38 = vld [vmem:[%s9047_s3 + $0xbd0] sm:$0xff]  ;;  %v4116_v47 = vld [vmem:[%s9047_s3 + $0xbd8] sm:$0xff] }
 0x2c3   :  { %5703 = vmatprep.subr.bf16.mxu1 %v9103_v34  ;;  %6075 = vmatprep.subr.bf16.mxu0 %v9103_v34  ;;  %v6139_v21 = vpack.c.bf16 %v4116_v47, %v4115_v38  ;;  %v3876_v38 = vld [vmem:[%s9047_s3 + $0x458] sm:$0xff] }
 0x2c5   :  { %5297 = vmatmul.mubr.f32.vlgmr.msra.gmra.mrb[206].mxu0 %v1247_v51  ;;  %v3842_v51 = vld [vmem:[%s9047_s3 + $0x348] sm:$0xff] }
 0x2c6   :  { %5705 = vmatpush3.bf16.msra.mxu1 %v5704_v62  ;;  %6077 = vmatpush3.bf16.msra.mxu0 %v6076_v33  ;;  %v6097_v62 = vpack.c.bf16 %v4088_v22, %v4087_v30  ;;  %v3841_v33 = vld [vmem:[%s9047_s3 + $0x340] sm:$0xff]  ;;  %v6142_v22 = vpack.c.bf16 %v4118_v11, %v4117_v13 }
 0x2c7   :  { %5706 = vmatprep.subr.bf16.mxu1 %v9103_v34  ;;  %6078 = vmatprep.subr.bf16.mxu0 %v9103_v34  ;;  %v5728_v36 = vpack.c.bf16 %v3842_v51, %v3841_v33  ;;  %v4119_v33 = vld [vmem:[%s9047_s3 + $0xbf0] sm:$0xff] }
 0x2c8   :  { %5366 = vmatprep.mubr.msk.f32.mxu0 %vm6226_vm2, %v9101_v32 }
 0x2ca   :  { %5708 = vmatpush3.bf16.msra.mxu1 %v5707_v41  ;;  %6080 = vmatpush3.bf16.msra.mxu0 %v6079_v44  ;;  %v1249_v41 = vmax.f32 %v1224_v49, 0.0  ;;  %v3844_v44 = vld [vmem:[%s9047_s3 + $0x358] sm:$0xff] }
 0x2cb   :  { %5709 = vmatprep.subr.bf16.mxu1 %v9103_v34  ;;  %6081 = vmatprep.subr.bf16.mxu0 %v9103_v34  ;;  %v5731_v19 = vpack.c.bf16 %v3844_v44, %v3843_v29  ;;  %v4120_v49 = vld [vmem:[%s9047_s3 + $0xbf8] sm:$0xff] }
 0x2cc   :  { %v6145_v23 = vpack.c.bf16 %v4120_v49, %v4119_v33  ;;  %v3860_v44 = vld [vmem:[%s9047_s3 + $0x3d8] sm:$0xff]  ;;  %v3881_v33 = vld [vmem:[%s9047_s3 + $0x480] sm:$0xff]  ;;  %v3882_v49 = vld [vmem:[%s9047_s3 + $0x488] sm:$0xff] }
 0x2ce   :  { %5711 = vmatpush3.bf16.msra.mxu1 %v5710_v55  ;;  %6083 = vmatpush3.bf16.msra.mxu0 %v6082_v39  ;;  %v3845_v55 = vld [vmem:[%s9047_s3 + $0x360] sm:$0xff]  ;;  %v3846_v39 = vld [vmem:[%s9047_s3 + $0x368] sm:$0xff] }
 0x2cf   :  { %5712 = vmatprep.subr.bf16.mxu1 %v9103_v34  ;;  %6084 = vmatprep.subr.bf16.mxu0 %v9103_v34  ;;  %v5734_v50 = vpack.c.bf16 %v3846_v39, %v3845_v55 }
 0x2d2   :  { %5714 = vmatpush3.bf16.msra.mxu1 %v5713_v48  ;;  %6086 = vmatpush3.bf16.msra.mxu0 %v6085_v27  ;;  %v3847_v48 = vld [vmem:[%s9047_s3 + $0x370] sm:$0xff]  ;;  %v3848_v27 = vld [vmem:[%s9047_s3 + $0x378] sm:$0xff] }
 0x2d3   :  { %5715 = vmatprep.subr.bf16.mxu1 %v9103_v34  ;;  %6087 = vmatprep.subr.bf16.mxu0 %v9103_v34  ;;  %v5737_v20 = vpack.c.bf16 %v3848_v27, %v3847_v48  ;;  %v3865_v48 = vld [vmem:[%s9047_s3 + $0x400] sm:$0xff]  ;;  %v3866_v27 = vld [vmem:[%s9047_s3 + $0x408] sm:$0xff] }
 0x2d4   :  { %v5764_v40 = vpack.c.bf16 %v3866_v27, %v3865_v48  ;;  %v3894_v48 = vld [vmem:[%s9047_s3 + $0x4e8] sm:$0xff] }
 0x2d5   :  { %4807 = vmatmul.mubr.f32.vlgmr.msra.gmra.mrb[10].mxu1 %v1233_v15  ;;  %v4113_v15 = vld [vmem:[%s9047_s3 + $0xbc0] sm:$0xff] }
 0x2d6   :  { %5717 = vmatpush3.bf16.msra.mxu1 %v5716_v45  ;;  %6089 = vmatpush3.bf16.msra.mxu0 %v6088_v37  ;;  %v8145_v45 = vld [vmem:[%s9048_s2] ss:$0 sm:$0xff] }
 0x2d7   :  { %5718 = vmatprep.subr.bf16.mxu1 %v9103_v34  ;;  %6090 = vmatprep.subr.bf16.mxu0 %v9103_v34  ;;  %v1209_v37 = vadd.f32 %v8145_v45, %v7441_v46  ;;  %v6136_v46 = vpack.c.bf16 %v4114_v63, %v4113_v15  ;;  %v1226_v18 = vadd.f32 %v8145_v45, %v7744_v31  ;;  %v3859_v31 = vld [vmem:[%s9047_s3 + $0x3d0] sm:$0xff]  ;;  %v3872_v63 = vld [vmem:[%s9047_s3 + $0x438] sm:$0xff] }
 0x2d8   :  { %4841 = vmatprep.mubr.msk.f32.mxu1 %vm6226_vm2, %v9101_v32  ;;  %v5755_v5 = vpack.c.bf16 %v3860_v44, %v3859_v31  ;;  %v3871_v15 = vld [vmem:[%s9047_s3 + $0x430] sm:$0xff] }
 0x2da   :  { %5720 = vmatpush3.bf16.msra.mxu1 %v5719_v28  ;;  %6092 = vmatpush3.bf16.msra.mxu0 %v6091_v57  ;;  %v1234_v28 = vmax.f32 %v1209_v37, 0.0  ;;  %v3852_v57 = vld [vmem:[%s9047_s3 + $0x398] sm:$0xff]  ;;  %v3870_v37 = vld [vmem:[%s9047_s3 + $0x428] sm:$0xff] }
 0x2db   :  { %5721 = vmatprep.subr.bf16.mxu1 %v9103_v34  ;;  %6093 = vmatprep.subr.bf16.mxu0 %v9103_v34  ;;  %v5743_v4 = vpack.c.bf16 %v3852_v57, %v3851_v6  ;;  %v5770_v60 = vpack.c.bf16 %v3870_v37, %v3869_v17  ;;  %v3874_v6 = vld [vmem:[%s9047_s3 + $0x448] sm:$0xff]  ;;  %v3875_v57 = vld [vmem:[%s9047_s3 + $0x450] sm:$0xff]  ;;  %v1212_v37 = vadd.f32 %v8145_v45, %v7482_v7  ;;  %v3900_v7 = vld [vmem:[%s9047_s3 + $0x518] sm:$0xff] }
 0x2dc   :  { %v5779_v47 = vpack.c.bf16 %v3876_v38, %v3875_v57  ;;  %v3902_v57 = vld [vmem:[%s9047_s3 + $0x528] sm:$0xff] }
 0x2de   :  { %5723 = vmatpush3.bf16.msra.mxu1 %v5722_v61  ;;  %6095 = vmatpush3.bf16.msra.mxu0 %v6094_v52  ;;  %v3853_v61 = vld [vmem:[%s9047_s3 + $0x3a0] sm:$0xff]  ;;  %v3854_v52 = vld [vmem:[%s9047_s3 + $0x3a8] sm:$0xff] }
 0x2df   :  { %5724 = vmatprep.subr.bf16.mxu1 %v9103_v34  ;;  %6096 = vmatprep.subr.bf16.mxu0 %v9103_v34  ;;  %v5746_v30 = vpack.c.bf16 %v3854_v52, %v3853_v61 }
 0x2e2   :  { %5726 = vmatpush3.bf16.msra.mxu1 %v5725_v16  ;;  %6098 = vmatpush3.bf16.msra.mxu0 %v6097_v62  ;;  %v3855_v16 = vld [vmem:[%s9047_s3 + $0x3b0] sm:$0xff]  ;;  %v3856_v62 = vld [vmem:[%s9047_s3 + $0x3b8] sm:$0xff] }
 0x2e3   :  { %5727 = vmatprep.subr.bf16.mxu1 %v9103_v34  ;;  %6123 = vmatprep.subr.bf16.mxu0 %v9103_v34  ;;  %v5749_v51 = vpack.c.bf16 %v3856_v62, %v3855_v16  ;;  %v1211_v62 = vadd.f32 %v8145_v45, %v7467_v1  ;;  %v3884_v1 = vld [vmem:[%s9047_s3 + $0x498] sm:$0xff] }
 0x2e5   :  { %5367 = vmatmul.mubr.f32.vlgmr.msra.gmra.mrb[208].mxu0 %v1249_v41  ;;  %v1251_v41 = vmax.f32 %v1226_v18, 0.0  ;;  %v3883_v18 = vld [vmem:[%s9047_s3 + $0x490] sm:$0xff] }
 0x2e6   :  { %5729 = vmatpush3.bf16.msra.mxu1 %v5728_v36  ;;  %6125 = vmatpush3.bf16.msra.mxu0 %v6124_v14  ;;  %v3857_v36 = vld [vmem:[%s9047_s3 + $0x3c0] sm:$0xff]  ;;  %v3858_v14 = vld [vmem:[%s9047_s3 + $0x3c8] sm:$0xff] }
 0x2e7   :  { %5730 = vmatprep.subr.bf16.mxu1 %v9103_v34  ;;  %6126 = vmatprep.subr.bf16.mxu0 %v9103_v34  ;;  %v5752_v29 = vpack.c.bf16 %v3858_v14, %v3857_v36  ;;  %v5791_v36 = vpack.c.bf16 %v3884_v1, %v3883_v18  ;;  %v3885_v14 = vld [vmem:[%s9047_s3 + $0x4a0] sm:$0xff] }
 0x2e8   :  { %5436 = vmatprep.mubr.msk.f32.mxu0 %vm6226_vm2, %v9101_v32 }
 0x2ea   :  { %5732 = vmatpush3.bf16.msra.mxu1 %v5731_v19  ;;  %6128 = vmatpush3.bf16.msra.mxu0 %v6127_v10  ;;  %v3862_v19 = vld [vmem:[%s9047_s3 + $0x3e8] sm:$0xff] }
 0x2eb   :  { %5733 = vmatprep.subr.bf16.mxu1 %v9103_v34  ;;  %6129 = vmatprep.subr.bf16.mxu0 %v9103_v34  ;;  %v5758_v39 = vpack.c.bf16 %v3862_v19, %v3861_v0  ;;  %v3888_v0 = vld [vmem:[%s9047_s3 + $0x4b8] sm:$0xff] }
 0x2ee   :  { %5735 = vmatpush3.bf16.msra.mxu1 %v5734_v50  ;;  %6131 = vmatpush3.bf16.msra.mxu0 %v6130_v53  ;;  %v5761_v50 = vpack.c.bf16 %v3864_v24, %v3863_v12  ;;  %v1210_v53 = vadd.f32 %v8145_v45, %v7454_v54  ;;  %v3868_v54 = vld [vmem:[%s9047_s3 + $0x418] sm:$0xff]  ;;  %v3891_v12 = vld [vmem:[%s9047_s3 + $0x4d0] sm:$0xff] }
 0x2ef   :  { %5736 = vmatprep.subr.bf16.mxu1 %v9103_v34  ;;  %6132 = vmatprep.subr.bf16.mxu0 %v9103_v34  ;;  %v3892_v24 = vld [vmem:[%s9047_s3 + $0x4d8] sm:$0xff] }
 0x2f0   :  { %v1235_v2 = vmax.f32 %v1210_v53, 0.0  ;;  %v3893_v53 = vld [vmem:[%s9047_s3 + $0x4e0] sm:$0xff] }
 0x2f2   :  { %5738 = vmatpush3.bf16.msra.mxu1 %v5737_v20  ;;  %6134 = vmatpush3.bf16.msra.mxu0 %v6133_v43  ;;  %v3867_v20 = vld [vmem:[%s9047_s3 + $0x410] sm:$0xff] }
 0x2f3   :  { %5739 = vmatprep.subr.bf16.mxu1 %v9103_v34  ;;  %6135 = vmatprep.subr.bf16.mxu0 %v9103_v34  ;;  %v5767_v43 = vpack.c.bf16 %v3868_v54, %v3867_v20  ;;  %v5806_v20 = vpack.c.bf16 %v3894_v48, %v3893_v53  ;;  %v3895_v54 = vld [vmem:[%s9047_s3 + $0x4f0] sm:$0xff] }
 0x2f4   :  { %v3919_v48 = vld [vmem:[%s9047_s3 + $0x5b0] sm:$0xff] }
 0x2f5   :  { %4842 = vmatmul.mubr.f32.vlgmr.msra.gmra.mrb[12].mxu1 %v1234_v28 }
 0x2f6   :  { %5741 = vmatpush3.bf16.msra.mxu1 %v5740_v9  ;;  %6137 = vmatpush3.bf16.msra.mxu0 %v6136_v46  ;;  %v5773_v9 = vpack.c.bf16 %v3872_v63, %v3871_v15  ;;  %v3873_v46 = vld [vmem:[%s9047_s3 + $0x440] sm:$0xff]  ;;  %v3898_v15 = vld [vmem:[%s9047_s3 + $0x508] sm:$0xff] }
 0x2f7   :  { %5742 = vmatprep.subr.bf16.mxu1 %v9103_v34  ;;  %6138 = vmatprep.subr.bf16.mxu0 %v9103_v34  ;;  %v5776_v28 = vpack.c.bf16 %v3874_v6, %v3873_v46  ;;  %v3899_v46 = vld [vmem:[%s9047_s3 + $0x510] sm:$0xff] }
 0x2f8   :  { %4876 = vmatprep.mubr.msk.f32.mxu1 %vm6226_vm2, %v9101_v32  ;;  %v5815_v6 = vpack.c.bf16 %v3900_v7, %v3899_v46 }
 0x2fa   :  { %5744 = vmatpush3.bf16.msra.mxu1 %v5743_v4  ;;  %6140 = vmatpush3.bf16.msra.mxu0 %v6139_v21  ;;  %v3877_v4 = vld [vmem:[%s9047_s3 + $0x460] sm:$0xff]  ;;  %v3878_v21 = vld [vmem:[%s9047_s3 + $0x468] sm:$0xff] }
 0x2fb   :  { %5745 = vmatprep.subr.bf16.mxu1 %v9103_v34  ;;  %6141 = vmatprep.subr.bf16.mxu0 %v9103_v34  ;;  %v5782_v11 = vpack.c.bf16 %v3878_v21, %v3877_v4  ;;  %v3903_v21 = vld [vmem:[%s9047_s3 + $0x530] sm:$0xff] }
 0x2fe   :  { %5747 = vmatpush3.bf16.msra.mxu1 %v5746_v30  ;;  %6143 = vmatpush3.bf16.msra.mxu0 %v6142_v22  ;;  %v3879_v30 = vld [vmem:[%s9047_s3 + $0x470] sm:$0xff]  ;;  %v3880_v22 = vld [vmem:[%s9047_s3 + $0x478] sm:$0xff] }
 0x2ff   :  { %5748 = vmatprep.subr.bf16.mxu1 %v9103_v34  ;;  %6144 = vmatprep.subr.bf16.mxu0 %v9103_v34  ;;  %v5785_v16 = vpack.c.bf16 %v3880_v22, %v3879_v30  ;;  %v3907_v22 = vld [vmem:[%s9047_s3 + $0x550] sm:$0xff] }
 0x302   :  { %5750 = vmatpush3.bf16.msra.mxu1 %v5749_v51  ;;  %6146 = vmatpush3.bf16.msra.mxu0 %v6145_v23  ;;  %v5788_v51 = vpack.c.bf16 %v3882_v49, %v3881_v33  ;;  %v1236_v23 = vmax.f32 %v1211_v62, 0.0  ;;  %v3909_v33 = vld [vmem:[%s9047_s3 + $0x560] sm:$0xff]  ;;  %v3910_v49 = vld [vmem:[%s9047_s3 + $0x568] sm:$0xff] }
 0x303   :  { %5751 = vmatprep.subr.bf16.mxu1 %v9103_v34  ;;  %6171 = vmatprep.subr.bf16.mxu0 %v9103_v34  ;;  %v5830_v1 = vpack.c.bf16 %v3910_v49, %v3909_v33  ;;  %v3935_v49 = vld [vmem:[%s9047_s3 + $0x630] sm:$0xff] }
 0x305   :  { %5437 = vmatmul.mubr.f32.vlgmr.msra.gmra.mrb[210].mxu0 %v1251_v41 }
 0x306   :  { %5753 = vmatpush3.bf16.msra.mxu1 %v5752_v29  ;;  %5506 = vmatprep.mubr.msk.f32.mxu0 %vm6226_vm2, %v9101_v32  ;;  %v3886_v29 = vld [vmem:[%s9047_s3 + $0x4a8] sm:$0xff] }
 0x307   :  { %5754 = vmatprep.subr.bf16.mxu1 %v9103_v34  ;;  %v5794_v44 = vpack.c.bf16 %v3886_v29, %v3885_v14  ;;  %v3912_v14 = vld [vmem:[%s9047_s3 + $0x578] sm:$0xff] }
 0x308   :  { %v1352_v10 = vpop.f32.mrb[0].mxu1 }
 0x309   :  { %v4633_v55 = vpop.f32.mrb[1].mxu1 }
 0x30a   :  { %5756 = vmatpush3.bf16.msra.mxu1 %v5755_v5  ;;  %v3887_v5 = vld [vmem:[%s9047_s3 + $0x4b0] sm:$0xff]  ;;  %v3890_v55 = vld [vmem:[%s9047_s3 + $0x4c8] sm:$0xff] }
 0x30b   :  { %5757 = vmatprep.subr.bf16.mxu1 %v9103_v34  ;;  %v5797_v19 = vpack.c.bf16 %v3888_v0, %v3887_v5  ;;  %v3914_v5 = vld [vmem:[%s9047_s3 + $0x588] sm:$0xff] }
 0x30e   :  { %5759 = vmatpush3.bf16.msra.mxu1 %v5758_v39 }
 0x30f   :  { %5760 = vmatprep.subr.bf16.mxu1 %v9103_v34 }
 0x312   :  { %5762 = vmatpush3.bf16.msra.mxu1 %v5761_v50  ;;  %v5803_v50 = vpack.c.bf16 %v3892_v24, %v3891_v12  ;;  %v3918_v12 = vld [vmem:[%s9047_s3 + $0x5a8] sm:$0xff] }
 0x313   :  { %5763 = vmatprep.subr.bf16.mxu1 %v9103_v34 }
 0x315   :  { %4877 = vmatmul.mubr.f32.vlgmr.msra.gmra.mrb[14].mxu1 %v1235_v2 }
 0x316   :  { %5765 = vmatpush3.bf16.msra.mxu1 %v5764_v40  ;;  %4911 = vmatprep.mubr.msk.f32.mxu1 %vm6226_vm2, %v9101_v32 }
 0x317   :  { %5766 = vmatprep.subr.bf16.mxu1 %v9103_v34 }
 0x31a   :  { %5768 = vmatpush3.bf16.msra.mxu1 %v5767_v43  ;;  %v3896_v43 = vld [vmem:[%s9047_s3 + $0x4f8] sm:$0xff] }
 0x31b   :  { %5769 = vmatprep.subr.bf16.mxu1 %v9103_v34  ;;  %v5809_v17 = vpack.c.bf16 %v3896_v43, %v3895_v54  ;;  %v3923_v43 = vld [vmem:[%s9047_s3 + $0x5d0] sm:$0xff] }
 0x31e   :  { %5771 = vmatpush3.bf16.msra.mxu1 %v5770_v60  ;;  %v3897_v60 = vld [vmem:[%s9047_s3 + $0x500] sm:$0xff] }
 0x31f   :  { %5772 = vmatprep.subr.bf16.mxu1 %v9103_v34  ;;  %v5812_v63 = vpack.c.bf16 %v3898_v15, %v3897_v60  ;;  %v3925_v60 = vld [vmem:[%s9047_s3 + $0x5e0] sm:$0xff]  ;;  %v3926_v15 = vld [vmem:[%s9047_s3 + $0x5e8] sm:$0xff] }
 0x320   :  { %v5854_v7 = vpack.c.bf16 %v3926_v15, %v3925_v60  ;;  %v3967_v15 = vld [vmem:[%s9047_s3 + $0x730] sm:$0xff] }
 0x322   :  { %5774 = vmatpush3.bf16.msra.mxu1 %v5773_v9  ;;  %v1237_v9 = vmax.f32 %v1212_v37, 0.0 }
 0x323   :  { %5775 = vmatprep.subr.bf16.mxu1 %v9103_v34 }
 0x326   :  { %5777 = vmatpush3.bf16.msra.mxu1 %v5776_v28  ;;  %v3901_v28 = vld [vmem:[%s9047_s3 + $0x520] sm:$0xff] }
 0x327   :  { %5778 = vmatprep.subr.bf16.mxu1 %v9103_v34  ;;  %v5818_v4 = vpack.c.bf16 %v3902_v57, %v3901_v28  ;;  %v3928_v28 = vld [vmem:[%s9047_s3 + $0x5f8] sm:$0xff] }
 0x328   :  { %v1422_v61 = vpop.f32.mrb[2].mxu1 }
 0x329   :  { %v1423_v52 = vadd.f32 %v1422_v61, %v1352_v10  ;;  %v4668_v13 = vpop.f32.mrb[3].mxu1  ;;  %v3889_v10 = vld [vmem:[%s9047_s3 + $0x4c0] sm:$0xff]  ;;  %v3904_v61 = vld [vmem:[%s9047_s3 + $0x538] sm:$0xff] }
 0x32a   :  { %5780 = vmatpush3.bf16.msra.mxu1 %v5779_v47  ;;  %v5800_v39 = vpack.c.bf16 %v3890_v55, %v3889_v10  ;;  %v3905_v13 = vld [vmem:[%s9047_s3 + $0x540] sm:$0xff]  ;;  %v3915_v10 = vld [vmem:[%s9047_s3 + $0x590] sm:$0xff] }
 0x32b   :  { %5781 = vmatprep.subr.bf16.mxu1 %v9103_v34 }
 0x32e   :  { %5783 = vmatpush3.bf16.msra.mxu1 %v5782_v11  ;;  %v3906_v11 = vld [vmem:[%s9047_s3 + $0x548] sm:$0xff] }
 0x32f   :  { %5784 = vmatprep.subr.bf16.mxu1 %v9103_v34  ;;  %v5824_v30 = vpack.c.bf16 %v3906_v11, %v3905_v13  ;;  %v3931_v13 = vld [vmem:[%s9047_s3 + $0x610] sm:$0xff] }
 0x332   :  { %5786 = vmatpush3.bf16.msra.mxu1 %v5785_v16  ;;  %v3908_v16 = vld [vmem:[%s9047_s3 + $0x558] sm:$0xff] }
 0x333   :  { %5787 = vmatprep.subr.bf16.mxu1 %v9103_v34  ;;  %v5827_v62 = vpack.c.bf16 %v3908_v16, %v3907_v22  ;;  %v3934_v22 = vld [vmem:[%s9047_s3 + $0x628] sm:$0xff] }
 0x335   :  { %4912 = vmatmul.mubr.f32.vlgmr.msra.gmra.mrb[16].mxu1 %v1236_v23 }
 0x336   :  { %5789 = vmatpush3.bf16.msra.mxu1 %v5788_v51  ;;  %4946 = vmatprep.mubr.msk.f32.mxu1 %vm6226_vm2, %v9101_v32 }
 0x337   :  { %5790 = vmatprep.subr.bf16.mxu1 %v9103_v34 }
 0x338   :  { %v8323_v41 = vpop.f32.mrb[200].mxu0 }
 0x339   :  { %v5088_v31 = vpop.f32.mrb[201].mxu0 }
 0x33a   :  { %5792 = vmatpush3.bf16.msra.mxu1 %v5791_v36  ;;  %v3911_v36 = vld [vmem:[%s9047_s3 + $0x570] sm:$0xff]  ;;  %v1213_v31 = vadd.f32 %v8145_v45, %v7495_v25  ;;  %v3916_v25 = vld [vmem:[%s9047_s3 + $0x598] sm:$0xff] }
 0x33b   :  { %5793 = vmatprep.subr.bf16.mxu1 %v9103_v34  ;;  %v5833_v29 = vpack.c.bf16 %v3912_v14, %v3911_v36  ;;  %v5839_v55 = vpack.c.bf16 %v3916_v25, %v3915_v10  ;;  %v3939_v14 = vld [vmem:[%s9047_s3 + $0x650] sm:$0xff] }
 0x33e   :  { %5795 = vmatpush3.bf16.msra.mxu1 %v5794_v44  ;;  %v3913_v44 = vld [vmem:[%s9047_s3 + $0x580] sm:$0xff] }
 0x33f   :  { %5796 = vmatprep.subr.bf16.mxu1 %v9103_v34  ;;  %v5836_v0 = vpack.c.bf16 %v3914_v5, %v3913_v44  ;;  %v3941_v44 = vld [vmem:[%s9047_s3 + $0x660] sm:$0xff]  ;;  %v3942_v5 = vld [vmem:[%s9047_s3 + $0x668] sm:$0xff] }
 0x340   :  { %v5878_v25 = vpack.c.bf16 %v3942_v5, %v3941_v44  ;;  %v3999_v5 = vld [vmem:[%s9047_s3 + $0x830] sm:$0xff] }
 0x342   :  { %5798 = vmatpush3.bf16.msra.mxu1 %v5797_v19  ;;  %v1238_v19 = vmax.f32 %v1213_v31, 0.0 }
 0x343   :  { %5799 = vmatprep.subr.bf16.mxu1 %v9103_v34 }
 0x346   :  { %5801 = vmatpush3.bf16.msra.mxu1 %v5800_v39  ;;  %v3917_v39 = vld [vmem:[%s9047_s3 + $0x5a0] sm:$0xff] }
 0x347   :  { %5802 = vmatprep.subr.bf16.mxu1 %v9103_v34  ;;  %v5842_v53 = vpack.c.bf16 %v3918_v12, %v3917_v39  ;;  %v3944_v39 = vld [vmem:[%s9047_s3 + $0x678] sm:$0xff] }
 0x348   :  { %v1509_v27 = vpop.f32.mrb[4].mxu1 }
 0x349   :  { %v1513_v40 = vadd.f32 %v1509_v27, %v1423_v52  ;;  %v4703_v2 = vpop.f32.mrb[5].mxu1  ;;  %v5821_v52 = vpack.c.bf16 %v3904_v61, %v3903_v21  ;;  %v3920_v27 = vld [vmem:[%s9047_s3 + $0x5b8] sm:$0xff]  ;;  %v3930_v21 = vld [vmem:[%s9047_s3 + $0x608] sm:$0xff] }
 0x34a   :  { %5804 = vmatpush3.bf16.msra.mxu1 %v5803_v50  ;;  %v3921_v2 = vld [vmem:[%s9047_s3 + $0x5c0] sm:$0xff] }
 0x34b   :  { %5805 = vmatprep.subr.bf16.mxu1 %v9103_v34 }
 0x34e   :  { %5807 = vmatpush3.bf16.msra.mxu1 %v5806_v20  ;;  %v3922_v20 = vld [vmem:[%s9047_s3 + $0x5c8] sm:$0xff] }
 0x34f   :  { %5808 = vmatprep.subr.bf16.mxu1 %v9103_v34  ;;  %v5848_v54 = vpack.c.bf16 %v3922_v20, %v3921_v2  ;;  %v3963_v2 = vld [vmem:[%s9047_s3 + $0x710] sm:$0xff] }
 0x352   :  { %5810 = vmatpush3.bf16.msra.mxu1 %v5809_v17  ;;  %v3924_v17 = vld [vmem:[%s9047_s3 + $0x5d8] sm:$0xff] }
 0x353   :  { %5811 = vmatprep.subr.bf16.mxu1 %v9103_v34  ;;  %v5851_v37 = vpack.c.bf16 %v3924_v17, %v3923_v43  ;;  %v3966_v43 = vld [vmem:[%s9047_s3 + $0x728] sm:$0xff] }
 0x355   :  { %4947 = vmatmul.mubr.f32.vlgmr.msra.gmra.mrb[18].mxu1 %v1237_v9 }
 0x356   :  { %5813 = vmatpush3.bf16.msra.mxu1 %v5812_v63  ;;  %4981 = vmatprep.mubr.msk.f32.mxu1 %vm6226_vm2, %v9101_v32 }
 0x357   :  { %5814 = vmatprep.subr.bf16.mxu1 %v9103_v34 }
 0x358   :  { %v8385_v38 = vpop.f32.mrb[202].mxu0 }
 0x359   :  { %v5158_v47 = vpop.f32.mrb[203].mxu0 }
 0x35a   :  { %5816 = vmatpush3.bf16.msra.mxu1 %v5815_v6  ;;  %v3927_v6 = vld [vmem:[%s9047_s3 + $0x5f0] sm:$0xff]  ;;  %v1214_v47 = vadd.f32 %v8145_v45, %v7510_v42  ;;  %v3932_v42 = vld [vmem:[%s9047_s3 + $0x618] sm:$0xff] }
 0x35b   :  { %5817 = vmatprep.subr.bf16.mxu1 %v9103_v34  ;;  %v5857_v57 = vpack.c.bf16 %v3928_v28, %v3927_v6  ;;  %v5863_v11 = vpack.c.bf16 %v3932_v42, %v3931_v13  ;;  %v3971_v28 = vld [vmem:[%s9047_s3 + $0x750] sm:$0xff] }
 0x35e   :  { %5819 = vmatpush3.bf16.msra.mxu1 %v5818_v4  ;;  %v3929_v4 = vld [vmem:[%s9047_s3 + $0x600] sm:$0xff] }
 0x35f   :  { %5820 = vmatprep.subr.bf16.mxu1 %v9103_v34  ;;  %v5860_v61 = vpack.c.bf16 %v3930_v21, %v3929_v4  ;;  %v3973_v4 = vld [vmem:[%s9047_s3 + $0x760] sm:$0xff]  ;;  %v3974_v21 = vld [vmem:[%s9047_s3 + $0x768] sm:$0xff] }
 0x360   :  { %v5926_v42 = vpack.c.bf16 %v3974_v21, %v3973_v4  ;;  %v4032_v4 = vld [vmem:[%s9047_s3 + $0x938] sm:$0xff] }
 0x362   :  { %5822 = vmatpush3.bf16.msra.mxu1 %v5821_v52  ;;  %v1239_v52 = vmax.f32 %v1214_v47, 0.0 }
 0x363   :  { %5823 = vmatprep.subr.bf16.mxu1 %v9103_v34 }
 0x366   :  { %5825 = vmatpush3.bf16.msra.mxu1 %v5824_v30  ;;  %v3933_v30 = vld [vmem:[%s9047_s3 + $0x620] sm:$0xff] }
 0x367   :  { %5826 = vmatprep.subr.bf16.mxu1 %v9103_v34  ;;  %v5866_v33 = vpack.c.bf16 %v3934_v22, %v3933_v30  ;;  %v3976_v30 = vld [vmem:[%s9047_s3 + $0x778] sm:$0xff] }
 0x368   :  { %v1597_v51 = vpop.f32.mrb[6].mxu1 }
 0x369   :  { %v1601_v23 = vadd.f32 %v1597_v51, %v1513_v40  ;;  %v4738_v18 = vpop.f32.mrb[7].mxu1  ;;  %v5845_v40 = vpack.c.bf16 %v3920_v27, %v3919_v48  ;;  %v3936_v51 = vld [vmem:[%s9047_s3 + $0x638] sm:$0xff]  ;;  %v3962_v48 = vld [vmem:[%s9047_s3 + $0x708] sm:$0xff] }
 0x36a   :  { %5828 = vmatpush3.bf16.msra.mxu1 %v5827_v62  ;;  %v3937_v18 = vld [vmem:[%s9047_s3 + $0x640] sm:$0xff] }
 0x36b   :  { %5829 = vmatprep.subr.bf16.mxu1 %v9103_v34 }
 0x36e   :  { %5831 = vmatpush3.bf16.msra.mxu1 %v5830_v1  ;;  %v3938_v1 = vld [vmem:[%s9047_s3 + $0x648] sm:$0xff] }
 0x36f   :  { %5832 = vmatprep.subr.bf16.mxu1 %v9103_v34  ;;  %v5872_v36 = vpack.c.bf16 %v3938_v1, %v3937_v18  ;;  %v3995_v18 = vld [vmem:[%s9047_s3 + $0x810] sm:$0xff] }
 0x372   :  { %5834 = vmatpush3.bf16.msra.mxu1 %v5833_v29  ;;  %v3940_v29 = vld [vmem:[%s9047_s3 + $0x658] sm:$0xff] }
 0x373   :  { %5835 = vmatprep.subr.bf16.mxu1 %v9103_v34  ;;  %v5875_v31 = vpack.c.bf16 %v3940_v29, %v3939_v14  ;;  %v3998_v14 = vld [vmem:[%s9047_s3 + $0x828] sm:$0xff] }
 0x375   :  { %4982 = vmatmul.mubr.f32.vlgmr.msra.gmra.mrb[20].mxu1 %v1238_v19 }
 0x376   :  { %5837 = vmatpush3.bf16.msra.mxu1 %v5836_v0  ;;  %5016 = vmatprep.mubr.msk.f32.mxu1 %vm6226_vm2, %v9101_v32 }
 0x377   :  { %5838 = vmatprep.subr.bf16.mxu1 %v9103_v34 }
 0x378   :  { %v8447_v24 = vpop.f32.mrb[204].mxu0 }
 0x379   :  { %v5228_v50 = vpop.f32.mrb[205].mxu0 }
 0x37a   :  { %5840 = vmatpush3.bf16.msra.mxu1 %v5839_v55  ;;  %v3943_v55 = vld [vmem:[%s9047_s3 + $0x670] sm:$0xff]  ;;  %v1215_v50 = vadd.f32 %v8145_v45, %v7523_v58  ;;  %v3964_v58 = vld [vmem:[%s9047_s3 + $0x718] sm:$0xff] }
 0x37b   :  { %5841 = vmatprep.subr.bf16.mxu1 %v9103_v34  ;;  %v5881_v12 = vpack.c.bf16 %v3944_v39, %v3943_v55  ;;  %v5911_v20 = vpack.c.bf16 %v3964_v58, %v3963_v2  ;;  %v4003_v39 = vld [vmem:[%s9047_s3 + $0x850] sm:$0xff] }
 0x37e   :  { %5843 = vmatpush3.bf16.msra.mxu1 %v5842_v53  ;;  %v3961_v53 = vld [vmem:[%s9047_s3 + $0x700] sm:$0xff] }
 0x37f   :  { %5844 = vmatprep.subr.bf16.mxu1 %v9103_v34  ;;  %v5908_v27 = vpack.c.bf16 %v3962_v48, %v3961_v53  ;;  %v4005_v53 = vld [vmem:[%s9047_s3 + $0x860] sm:$0xff]  ;;  %v4006_v48 = vld [vmem:[%s9047_s3 + $0x868] sm:$0xff] }
 0x380   :  { %v5974_v58 = vpack.c.bf16 %v4006_v48, %v4005_v53  ;;  %v4065_v53 = vld [vmem:[%s9047_s3 + $0xa40] sm:$0xff]  ;;  %v4066_v48 = vld [vmem:[%s9047_s3 + $0xa48] sm:$0xff] }
 0x382   :  { %5846 = vmatpush3.bf16.msra.mxu1 %v5845_v40  ;;  %v1240_v40 = vmax.f32 %v1215_v50, 0.0 }
 0x383   :  { %5847 = vmatprep.subr.bf16.mxu1 %v9103_v34 }
 0x386   :  { %5849 = vmatpush3.bf16.msra.mxu1 %v5848_v54  ;;  %v3965_v54 = vld [vmem:[%s9047_s3 + $0x720] sm:$0xff] }
 0x387   :  { %5850 = vmatprep.subr.bf16.mxu1 %v9103_v34  ;;  %v5914_v60 = vpack.c.bf16 %v3966_v43, %v3965_v54  ;;  %v4008_v54 = vld [vmem:[%s9047_s3 + $0x878] sm:$0xff] }
 0x388   :  { %v1685_v63 = vpop.f32.mrb[8].mxu1 }
 0x389   :  { %v1689_v9 = vadd.f32 %v1685_v63, %v1601_v23  ;;  %v4773_v46 = vpop.f32.mrb[9].mxu1  ;;  %v5869_v23 = vpack.c.bf16 %v3936_v51, %v3935_v49  ;;  %v3968_v63 = vld [vmem:[%s9047_s3 + $0x738] sm:$0xff]  ;;  %v3994_v49 = vld [vmem:[%s9047_s3 + $0x808] sm:$0xff] }
 0x38a   :  { %5852 = vmatpush3.bf16.msra.mxu1 %v5851_v37  ;;  %v3969_v46 = vld [vmem:[%s9047_s3 + $0x740] sm:$0xff] }
 0x38b   :  { %5853 = vmatprep.subr.bf16.mxu1 %v9103_v34 }
 0x38e   :  { %5855 = vmatpush3.bf16.msra.mxu1 %v5854_v7  ;;  %v3970_v7 = vld [vmem:[%s9047_s3 + $0x748] sm:$0xff] }
 0x38f   :  { %5856 = vmatprep.subr.bf16.mxu1 %v9103_v34  ;;  %v5920_v6 = vpack.c.bf16 %v3970_v7, %v3969_v46  ;;  %v4027_v46 = vld [vmem:[%s9047_s3 + $0x910] sm:$0xff] }
 0x392   :  { %5858 = vmatpush3.bf16.msra.mxu1 %v5857_v57  ;;  %v3972_v57 = vld [vmem:[%s9047_s3 + $0x758] sm:$0xff] }
 0x393   :  { %5859 = vmatprep.subr.bf16.mxu1 %v9103_v34  ;;  %v5923_v47 = vpack.c.bf16 %v3972_v57, %v3971_v28  ;;  %v4030_v28 = vld [vmem:[%s9047_s3 + $0x928] sm:$0xff] }
 0x395   :  { %5017 = vmatmul.mubr.f32.vlgmr.msra.gmra.mrb[22].mxu1 %v1239_v52 }
 0x396   :  { %5861 = vmatpush3.bf16.msra.mxu1 %v5860_v61  ;;  %5051 = vmatprep.mubr.msk.f32.mxu1 %vm6226_vm2, %v9101_v32 }
 0x397   :  { %5862 = vmatprep.subr.bf16.mxu1 %v9103_v34 }
 0x398   :  { %v8509_v16 = vpop.f32.mrb[206].mxu0 }
 0x399   :  { %v5298_v62 = vpop.f32.mrb[207].mxu0 }
 0x39a   :  { %5864 = vmatpush3.bf16.msra.mxu1 %v5863_v11  ;;  %v3975_v11 = vld [vmem:[%s9047_s3 + $0x770] sm:$0xff]  ;;  %v1217_v62 = vadd.f32 %v8145_v45, %v7557_v35  ;;  %v3996_v35 = vld [vmem:[%s9047_s3 + $0x818] sm:$0xff] }
 0x39b   :  { %5865 = vmatprep.subr.bf16.mxu1 %v9103_v34  ;;  %v5929_v22 = vpack.c.bf16 %v3976_v30, %v3975_v11  ;;  %v5959_v1 = vpack.c.bf16 %v3996_v35, %v3995_v18  ;;  %v4036_v11 = vld [vmem:[%s9047_s3 + $0x958] sm:$0xff]  ;;  %v4039_v18 = vld [vmem:[%s9047_s3 + $0x970] sm:$0xff] }
 0x39c   :  { %v4040_v35 = vld [vmem:[%s9047_s3 + $0x978] sm:$0xff] }
 0x39e   :  { %5867 = vmatpush3.bf16.msra.mxu1 %v5866_v33  ;;  %v3993_v33 = vld [vmem:[%s9047_s3 + $0x800] sm:$0xff] }
 0x39f   :  { %5868 = vmatprep.subr.bf16.mxu1 %v9103_v34  ;;  %v5956_v51 = vpack.c.bf16 %v3994_v49, %v3993_v33 }
 0x3a2   :  { %5870 = vmatpush3.bf16.msra.mxu1 %v5869_v23  ;;  %v1242_v23 = vmax.f32 %v1217_v62, 0.0  ;;  %v4038_v62 = vld [vmem:[%s9047_s3 + $0x968] sm:$0xff] }
 0x3a3   :  { %5871 = vmatprep.subr.bf16.mxu1 %v9103_v34 }
 0x3a6   :  { %5873 = vmatpush3.bf16.msra.mxu1 %v5872_v36  ;;  %v3997_v36 = vld [vmem:[%s9047_s3 + $0x820] sm:$0xff] }
 0x3a7   :  { %5874 = vmatprep.subr.bf16.mxu1 %v9103_v34  ;;  %v5962_v44 = vpack.c.bf16 %v3998_v14, %v3997_v36  ;;  %v1221_v36 = vadd.f32 %v8145_v45, %v7640_v8  ;;  %v4057_v14 = vld [vmem:[%s9047_s3 + $0xa00] sm:$0xff]  ;;  %v4060_v8 = vld [vmem:[%s9047_s3 + $0xa18] sm:$0xff] }
 0x3a8   :  { %v1773_v0 = vpop.f32.mrb[10].mxu1 }
 0x3a9   :  { %v1777_v19 = vadd.f32 %v1773_v0, %v1689_v9  ;;  %v4808_v10 = vpop.f32.mrb[11].mxu1  ;;  %v5917_v9 = vpack.c.bf16 %v3968_v63, %v3967_v15  ;;  %v4000_v0 = vld [vmem:[%s9047_s3 + $0x838] sm:$0xff]  ;;  %v4026_v15 = vld [vmem:[%s9047_s3 + $0x908] sm:$0xff] }
 0x3aa   :  { %5876 = vmatpush3.bf16.msra.mxu1 %v5875_v31  ;;  %v4001_v10 = vld [vmem:[%s9047_s3 + $0x840] sm:$0xff] }
 0x3ab   :  { %5877 = vmatprep.subr.bf16.mxu1 %v9103_v34 }
 0x3ae   :  { %5879 = vmatpush3.bf16.msra.mxu1 %v5878_v25  ;;  %v4002_v25 = vld [vmem:[%s9047_s3 + $0x848] sm:$0xff] }
 0x3af   :  { %5880 = vmatprep.subr.bf16.mxu1 %v9103_v34  ;;  %v5968_v55 = vpack.c.bf16 %v4002_v25, %v4001_v10  ;;  %v4061_v10 = vld [vmem:[%s9047_s3 + $0xa20] sm:$0xff]  ;;  %v4062_v25 = vld [vmem:[%s9047_s3 + $0xa28] sm:$0xff] }
 0x3b2   :  { %5882 = vmatpush3.bf16.msra.mxu1 %v5881_v12  ;;  %v4004_v12 = vld [vmem:[%s9047_s3 + $0x858] sm:$0xff] }
 0x3b3   :  { %5907 = vmatprep.subr.bf16.mxu1 %v9103_v34  ;;  %v5971_v50 = vpack.c.bf16 %v4004_v12, %v4003_v39  ;;  %v4063_v39 = vld [vmem:[%s9047_s3 + $0xa30] sm:$0xff]  ;;  %v4064_v12 = vld [vmem:[%s9047_s3 + $0xa38] sm:$0xff] }
 0x3b5   :  { %5052 = vmatmul.mubr.f32.vlgmr.msra.gmra.mrb[24].mxu1 %v1240_v40 }
 0x3b6   :  { %5909 = vmatpush3.bf16.msra.mxu1 %v5908_v27  ;;  %5121 = vmatprep.mubr.msk.f32.mxu1 %vm6226_vm2, %v9101_v32 }
 0x3b7   :  { %5910 = vmatprep.subr.bf16.mxu1 %v9103_v34 }
 0x3b8   :  { %v8571_v17 = vpop.f32.mrb[208].mxu0 }
 0x3b9   :  { %v5368_v37 = vpop.f32.mrb[209].mxu0 }
 0x3ba   :  { %5912 = vmatpush3.bf16.msra.mxu1 %v5911_v20  ;;  %v4007_v20 = vld [vmem:[%s9047_s3 + $0x870] sm:$0xff]  ;;  %v1219_v37 = vadd.f32 %v8145_v45, %v7598_v59  ;;  %v4028_v59 = vld [vmem:[%s9047_s3 + $0x918] sm:$0xff] }
 0x3bb   :  { %5913 = vmatprep.subr.bf16.mxu1 %v9103_v34  ;;  %v5977_v43 = vpack.c.bf16 %v4008_v54, %v4007_v20  ;;  %v6007_v7 = vpack.c.bf16 %v4028_v59, %v4027_v46  ;;  %v4069_v20 = vld [vmem:[%s9047_s3 + $0xa60] sm:$0xff]  ;;  %v4070_v54 = vld [vmem:[%s9047_s3 + $0xa68] sm:$0xff]  ;;  %v1223_v59 = vadd.f32 %v8145_v45, %v7682_v56  ;;  %v4092_v56 = vld [vmem:[%s9047_s3 + $0xb18] sm:$0xff] }
 0x3be   :  { %5915 = vmatpush3.bf16.msra.mxu1 %v5914_v60  ;;  %v4025_v60 = vld [vmem:[%s9047_s3 + $0x900] sm:$0xff] }
 0x3bf   :  { %5916 = vmatprep.subr.bf16.mxu1 %v9103_v34  ;;  %v6004_v63 = vpack.c.bf16 %v4026_v15, %v4025_v60  ;;  %v6070_v15 = vpack.c.bf16 %v4070_v54, %v4069_v20  ;;  %v4131_v54 = vld [vmem:[%s9047_s3 + $0xc50] sm:$0xff] }
 0x3c2   :  { %5918 = vmatpush3.bf16.msra.mxu1 %v5917_v9  ;;  %v1244_v9 = vmax.f32 %v1219_v37, 0.0 }
 0x3c3   :  { %5919 = vmatprep.subr.bf16.mxu1 %v9103_v34 }
 0x3c6   :  { %5921 = vmatpush3.bf16.msra.mxu1 %v5920_v6  ;;  %v4029_v6 = vld [vmem:[%s9047_s3 + $0x920] sm:$0xff] }
 0x3c7   :  { %5922 = vmatprep.subr.bf16.mxu1 %v9103_v34  ;;  %v6010_v57 = vpack.c.bf16 %v4030_v28, %v4029_v6  ;;  %v4090_v6 = vld [vmem:[%s9047_s3 + $0xb08] sm:$0xff] }
 0x3c8   :  { %v1861_v61 = vpop.f32.mrb[12].mxu1 }
 0x3c9   :  { %v1865_v52 = vadd.f32 %v1861_v61, %v1777_v19  ;;  %v4843_v13 = vpop.f32.mrb[13].mxu1  ;;  %v5965_v19 = vpack.c.bf16 %v4000_v0, %v3999_v5  ;;  %v4033_v61 = vld [vmem:[%s9047_s3 + $0x940] sm:$0xff]  ;;  %v1246_v5 = vmax.f32 %v1221_v36, 0.0  ;;  %v4059_v0 = vld [vmem:[%s9047_s3 + $0xa10] sm:$0xff] }
 0x3ca   :  { %5924 = vmatpush3.bf16.msra.mxu1 %v5923_v47  ;;  %v4031_v47 = vld [vmem:[%s9047_s3 + $0x930] sm:$0xff] }
 0x3cb   :  { %5925 = vmatprep.subr.bf16.mxu1 %v9103_v34  ;;  %v6013_v21 = vpack.c.bf16 %v4032_v4, %v4031_v47  ;;  %v4091_v47 = vld [vmem:[%s9047_s3 + $0xb10] sm:$0xff]  ;;  %v4093_v4 = vld [vmem:[%s9047_s3 + $0xb20] sm:$0xff] }
 0x3cc   :  { %v6103_v45 = vpack.c.bf16 %v4092_v56, %v4091_v47 }
 0x3ce   :  { %5927 = vmatpush3.bf16.msra.mxu1 %v5926_v42  ;;  %v4035_v42 = vld [vmem:[%s9047_s3 + $0x950] sm:$0xff] }
 0x3cf   :  { %5928 = vmatprep.subr.bf16.mxu1 %v9103_v34  ;;  %v6019_v30 = vpack.c.bf16 %v4036_v11, %v4035_v42  ;;  %v4097_v11 = vld [vmem:[%s9047_s3 + $0xb40] sm:$0xff] }
 0x3d2   :  { %5930 = vmatpush3.bf16.msra.mxu1 %v5929_v22  ;;  %v4037_v22 = vld [vmem:[%s9047_s3 + $0x960] sm:$0xff] }
 0x3d3   :  { %5955 = vmatprep.subr.bf16.mxu1 %v9103_v34 }
 0x3d5   :  { %5122 = vmatmul.mubr.f32.vlgmr.msra.gmra.mrb[26].mxu1 %v1242_v23  ;;  %v6022_v23 = vpack.c.bf16 %v4038_v62, %v4037_v22  ;;  %v4099_v62 = vld [vmem:[%s9047_s3 + $0xb50] sm:$0xff] }
 0x3d6   :  { %5957 = vmatpush3.bf16.msra.mxu1 %v5956_v51  ;;  %5191 = vmatprep.mubr.msk.f32.mxu1 %vm6226_vm2, %v9101_v32 }
 0x3d7   :  { %5958 = vmatprep.subr.bf16.mxu1 %v9103_v34 }
 0x3d8   :  { %v8633_v29 = vpop.f32.mrb[210].mxu0 }
 0x3d9   :  { %v5438_v31 = vpop.f32.mrb[211].mxu0 }
 0x3da   :  { %5960 = vmatpush3.bf16.msra.mxu1 %v5959_v1  ;;  %v6025_v1 = vpack.c.bf16 %v4040_v35, %v4039_v18  ;;  %v4058_v31 = vld [vmem:[%s9047_s3 + $0xa08] sm:$0xff] }
 0x3db   :  { %5961 = vmatprep.subr.bf16.mxu1 %v9103_v34 }
 0x3de   :  { %5963 = vmatpush3.bf16.msra.mxu1 %v5962_v44  ;;  %v6052_v44 = vpack.c.bf16 %v4058_v31, %v4057_v14  ;;  %v4103_v14 = vld [vmem:[%s9047_s3 + $0xb70] sm:$0xff]  ;;  %v4104_v31 = vld [vmem:[%s9047_s3 + $0xb78] sm:$0xff] }
 0x3df   :  { %5964 = vmatprep.subr.bf16.mxu1 %v9103_v34 }
 0x3e2   :  { %5966 = vmatpush3.bf16.msra.mxu1 %v5965_v19  ;;  %v6055_v19 = vpack.c.bf16 %v4060_v8, %v4059_v0  ;;  %v4121_v8 = vld [vmem:[%s9047_s3 + $0xc00] sm:$0xff] }
 0x3e3   :  { %5967 = vmatprep.subr.bf16.mxu1 %v9103_v34 }
 0x3e6   :  { %5969 = vmatpush3.bf16.msra.mxu1 %v5968_v55  ;;  %v6058_v55 = vpack.c.bf16 %v4062_v25, %v4061_v10 }
 0x3e7   :  { %5970 = vmatprep.subr.bf16.mxu1 %v9103_v34 }
 0x3e8   :  { %v1949_v27 = vpop.f32.mrb[14].mxu1 }
 0x3e9   :  { %v1953_v40 = vadd.f32 %v1949_v27, %v1865_v52  ;;  %v4878_v2 = vpop.f32.mrb[15].mxu1  ;;  %v4034_v52 = vld [vmem:[%s9047_s3 + $0x948] sm:$0xff]  ;;  %v6064_v27 = vpack.c.bf16 %v4066_v48, %v4065_v53  ;;  %v4127_v48 = vld [vmem:[%s9047_s3 + $0xc30] sm:$0xff] }
 0x3ea   :  { %5972 = vmatpush3.bf16.msra.mxu1 %v5971_v50  ;;  %v6016_v13 = vpack.c.bf16 %v4034_v52, %v4033_v61  ;;  %v6061_v50 = vpack.c.bf16 %v4064_v12, %v4063_v39  ;;  %v4068_v2 = vld [vmem:[%s9047_s3 + $0xa58] sm:$0xff]  ;;  %v4095_v52 = vld [vmem:[%s9047_s3 + $0xb30] sm:$0xff]  ;;  %v4125_v12 = vld [vmem:[%s9047_s3 + $0xc20] sm:$0xff] }
 0x3eb   :  { %5973 = vmatprep.subr.bf16.mxu1 %v9103_v34 }
 0x3ee   :  { %5975 = vmatpush3.bf16.msra.mxu1 %v5974_v58 }
 0x3ef   :  { %5976 = vmatprep.subr.bf16.mxu1 %v9103_v34 }
 0x3f2   :  { %5978 = vmatpush3.bf16.msra.mxu1 %v5977_v43 }
 0x3f3   :  { %6003 = vmatprep.subr.bf16.mxu1 %v9103_v34 }
 0x3f5   :  { %5192 = vmatmul.mubr.f32.vlgmr.msra.gmra.mrb[28].mxu1 %v1244_v9  ;;  %v4072_v9 = vld [vmem:[%s9047_s3 + $0xa78] sm:$0xff] }
 0x3f6   :  { %6005 = vmatpush3.bf16.msra.mxu1 %v6004_v63  ;;  %5261 = vmatprep.mubr.msk.f32.mxu1 %vm6226_vm2, %v9101_v32  ;;  %v4071_v63 = vld [vmem:[%s9047_s3 + $0xa70] sm:$0xff] }
 0x3f7   :  { %6006 = vmatprep.subr.bf16.mxu1 %v9103_v34  ;;  %v6073_v46 = vpack.c.bf16 %v4072_v9, %v4071_v63 }
 0x3fa   :  { %6008 = vmatpush3.bf16.msra.mxu1 %v6007_v7  ;;  %v4089_v7 = vld [vmem:[%s9047_s3 + $0xb00] sm:$0xff] }
 0x3fb   :  { %6009 = vmatprep.subr.bf16.mxu1 %v9103_v34  ;;  %v6100_v28 = vpack.c.bf16 %v4090_v6, %v4089_v7  ;;  %v4135_v7 = vld [vmem:[%s9047_s3 + $0xc70] sm:$0xff]  ;;  %v4136_v6 = vld [vmem:[%s9047_s3 + $0xc78] sm:$0xff] }
 0x3fe   :  { %6011 = vmatpush3.bf16.msra.mxu1 %v6010_v57  ;;  %v1248_v57 = vmax.f32 %v1223_v59, 0.0 }
 0x3ff   :  { %6012 = vmatprep.subr.bf16.mxu1 %v9103_v34 }
 0x402   :  { %6014 = vmatpush3.bf16.msra.mxu1 %v6013_v21  ;;  %v4094_v21 = vld [vmem:[%s9047_s3 + $0xb28] sm:$0xff] }
 0x403   :  { %6015 = vmatprep.subr.bf16.mxu1 %v9103_v34  ;;  %v6106_v61 = vpack.c.bf16 %v4094_v21, %v4093_v4 }
 0x406   :  { %6017 = vmatpush3.bf16.msra.mxu1 %v6016_v13  ;;  %v4096_v13 = vld [vmem:[%s9047_s3 + $0xb38] sm:$0xff] }
 0x407   :  { %6018 = vmatprep.subr.bf16.mxu1 %v9103_v34  ;;  %v6109_v42 = vpack.c.bf16 %v4096_v13, %v4095_v52 }
 0x408   :  { %v2037_v33 = vpop.f32.mrb[16].mxu1 }
 0x409   :  { %v2041_v49 = vadd.f32 %v2037_v33, %v1953_v40  ;;  %v4913_v51 = vpop.f32.mrb[17].mxu1  ;;  %v4067_v40 = vld [vmem:[%s9047_s3 + $0xa50] sm:$0xff]  ;;  %v4100_v33 = vld [vmem:[%s9047_s3 + $0xb58] sm:$0xff] }
 0x40a   :  { %6020 = vmatpush3.bf16.msra.mxu1 %v6019_v30  ;;  %v6067_v58 = vpack.c.bf16 %v4068_v2, %v4067_v40  ;;  %v4098_v30 = vld [vmem:[%s9047_s3 + $0xb48] sm:$0xff]  ;;  %v4101_v51 = vld [vmem:[%s9047_s3 + $0xb60] sm:$0xff] }
 0x40b   :  { %6021 = vmatprep.subr.bf16.mxu1 %v9103_v34  ;;  %v6112_v22 = vpack.c.bf16 %v4098_v30, %v4097_v11  ;;  %v4129_v2 = vld [vmem:[%s9047_s3 + $0xc40] sm:$0xff] }
 0x40e   :  { %6023 = vmatpush3.bf16.msra.mxu1 %v6022_v23  ;;  %v4102_v23 = vld [vmem:[%s9047_s3 + $0xb68] sm:$0xff] }
 0x40f   :  { %6024 = vmatprep.subr.bf16.mxu1 %v9103_v34  ;;  %v6118_v36 = vpack.c.bf16 %v4102_v23, %v4101_v51  ;;  %v3466_v51 = vld [vmem:[%s9049_s5 + $0x38] sm:$0xff] }
 0x412   :  { %6026 = vmatpush3.bf16.msra.mxu1 %v6025_v1 }
 0x413   :  { %6051 = vmatprep.subr.bf16.mxu1 %v9103_v34 }
 0x415   :  { %5262 = vmatmul.mubr.f32.vlgmr.msra.gmra.mrb[30].mxu1 %v1246_v5  ;;  %v6223_v5 = vld [vmem:[%s9048_s2] ss:$0 sm:$0xff] }
 0x416   :  { %6053 = vmatpush3.bf16.msra.mxu1 %v6052_v44  ;;  %5331 = vmatprep.mubr.msk.f32.mxu1 %vm6226_vm2, %v9101_v32  ;;  %v6121_v44 = vpack.c.bf16 %v4104_v31, %v4103_v14  ;;  %v1225_v0 = vadd.f32 %v6223_v5, %v7724_v26  ;;  %v4124_v26 = vld [vmem:[%s9047_s3 + $0xc18] sm:$0xff] }
 0x417   :  { %6054 = vmatprep.subr.bf16.mxu1 %v9103_v34  ;;  %v3470_v14 = vld [vmem:[%s9049_s5 + $0x58] sm:$0xff] }
 0x418   :  { %v1250_v25 = vmax.f32 %v1225_v0, 0.0 }
 0x41a   :  { %6056 = vmatpush3.bf16.msra.mxu1 %v6055_v19  ;;  %v4122_v19 = vld [vmem:[%s9047_s3 + $0xc08] sm:$0xff] }
 0x41b   :  { %6057 = vmatprep.subr.bf16.mxu1 %v9103_v34  ;;  %v6148_v10 = vpack.c.bf16 %v4122_v19, %v4121_v8 }
 0x41e   :  { %6059 = vmatpush3.bf16.msra.mxu1 %v6058_v55  ;;  %v4123_v55 = vld [vmem:[%s9047_s3 + $0xc10] sm:$0xff] }
 0x41f   :  { %6060 = vmatprep.subr.bf16.mxu1 %v9103_v34  ;;  %v6151_v39 = vpack.c.bf16 %v4124_v26, %v4123_v55  ;;  %v3474_v55 = vld [vmem:[%s9049_s5 + $0x78] sm:$0xff] }
 0x422   :  { %6062 = vmatpush3.bf16.msra.mxu1 %v6061_v50  ;;  %v4126_v50 = vld [vmem:[%s9047_s3 + $0xc28] sm:$0xff] }
 0x423   :  { %6063 = vmatprep.subr.bf16.mxu1 %v9103_v34  ;;  %v6154_v53 = vpack.c.bf16 %v4126_v50, %v4125_v12  ;;  %v3553_v12 = vld [vmem:[%s9050_s7] sm:$0xff]  ;;  %v3554_v50 = vld [vmem:[%s9050_s7 + $0x8] sm:$0xff] }
 0x426   :  { %6065 = vmatpush3.bf16.msra.mxu1 %v6064_v27  ;;  %v4128_v27 = vld [vmem:[%s9047_s3 + $0xc38] sm:$0xff] }
 0x427   :  { %6066 = vmatprep.subr.bf16.mxu1 %v9103_v34  ;;  %v6157_v40 = vpack.c.bf16 %v4128_v27, %v4127_v48  ;;  %v6196_v48 = vpack.c.bf16 %v3554_v50, %v3553_v12  ;;  %v3556_v27 = vld [vmem:[%s9050_s7 + $0x18] sm:$0xff] }
 0x428   :  { %v2125_v43 = vpop.f32.mrb[18].mxu1 }
 0x429   :  { %v2129_v37 = vadd.f32 %v2125_v43, %v2041_v49  ;;  %v4948_v60 = vpop.f32.mrb[19].mxu1  ;;  %v6115_v49 = vpack.c.bf16 %v4100_v33, %v4099_v62  ;;  %v4132_v43 = vld [vmem:[%s9047_s3 + $0xc58] sm:$0xff]  ;;  %v3463_v62 = vld [vmem:[%s9049_s5 + $0x20] sm:$0xff]  ;;  %v3464_v33 = vld [vmem:[%s9049_s5 + $0x28] sm:$0xff] }
 0x42a   :  { %6068 = vmatpush3.bf16.msra.mxu1 %v6067_v58  ;;  %v4130_v58 = vld [vmem:[%s9047_s3 + $0xc48] sm:$0xff]  ;;  %v4133_v60 = vld [vmem:[%s9047_s3 + $0xc60] sm:$0xff] }
 0x42b   :  { %6069 = vmatprep.subr.bf16.mxu1 %v9103_v34  ;;  %v6160_v20 = vpack.c.bf16 %v4130_v58, %v4129_v2  ;;  %v3558_v2 = vld [vmem:[%s9050_s7 + $0x28] sm:$0xff] }
 0x42e   :  { %6071 = vmatpush3.bf16.msra.mxu1 %v6070_v15  ;;  %v4134_v15 = vld [vmem:[%s9047_s3 + $0xc68] sm:$0xff] }
 0x42f   :  { %6072 = vmatprep.subr.bf16.mxu1 %v9103_v34  ;;  %v6166_v59 = vpack.c.bf16 %v4134_v15, %v4133_v60  ;;  %v3562_v60 = vld [vmem:[%s9050_s7 + $0x48] sm:$0xff] }
 0x432   :  { %6074 = vmatpush3.bf16.msra.mxu1 %v6073_v46 }
 0x433   :  { %6099 = vmatprep.subr.bf16.mxu1 %v9103_v34 }
 0x435   :  { %5332 = vmatmul.mubr.f32.vlgmr.msra.gmra.mrb[32].mxu1 %v1248_v57  ;;  %v1227_v57 = vadd.f32 %v6223_v5, %v7766_v3  ;;  %v3459_v3 = vld [vmem:[%s9049_s5] sm:$0xff]  ;;  %v3472_v5 = vld [vmem:[%s9049_s5 + $0x68] sm:$0xff] }
 0x436   :  { %6101 = vmatpush3.bf16.msra.mxu1 %v6100_v28  ;;  %5401 = vmatprep.mubr.msk.f32.mxu1 %vm6226_vm2, %v9101_v32  ;;  %v6169_v28 = vpack.c.bf16 %v4136_v6, %v4135_v7  ;;  %v3566_v7 = vld [vmem:[%s9050_s7 + $0x68] sm:$0xff] }
 0x437   :  { %6102 = vmatprep.subr.bf16.mxu1 %v9103_v34  ;;  %v1252_v47 = vmax.f32 %v1227_v57, 0.0 }
 0x43a   :  { %6104 = vmatpush3.bf16.msra.mxu1 %v6103_v45 }
 0x43b   :  { %6105 = vmatprep.subr.bf16.mxu1 %v9103_v34 }
 0x43e   :  { %6107 = vmatpush3.bf16.msra.mxu1 %v6106_v61 }
 0x43f   :  { %6108 = vmatprep.subr.bf16.mxu1 %v9103_v34 }
 0x442   :  { %6110 = vmatpush3.bf16.msra.mxu1 %v6109_v42  ;;  %v3460_v42 = vld [vmem:[%s9049_s5 + $0x8] sm:$0xff] }
 0x443   :  { %6111 = vmatprep.subr.bf16.mxu1 %v9103_v34  ;;  %v6172_v30 = vpack.c.bf16 %v3460_v42, %v3459_v3 }
 0x445   :  { %6173 = vmatpush3.bf16.msra.mxu0 %v6172_v30 }
 0x446   :  { %6113 = vmatpush3.bf16.msra.mxu1 %v6112_v22  ;;  %6174 = vmatprep.subr.bf16.mxu0 %v9103_v34 }
 0x447   :  { %6114 = vmatprep.subr.bf16.mxu1 %v9103_v34 }
 0x448   :  { %v2213_v18 = vpop.f32.mrb[20].mxu1 }
 0x449   :  { %v2217_v35 = vadd.f32 %v2213_v18, %v2129_v37  ;;  %v4983_v1 = vpop.f32.mrb[21].mxu1  ;;  %v6163_v37 = vpack.c.bf16 %v4132_v43, %v4131_v54  ;;  %v3467_v18 = vld [vmem:[%s9049_s5 + $0x40] sm:$0xff]  ;;  %v3560_v54 = vld [vmem:[%s9050_s7 + $0x38] sm:$0xff] }
 0x44a   :  { %6116 = vmatpush3.bf16.msra.mxu1 %v6115_v49  ;;  %v6178_v49 = vpack.c.bf16 %v3464_v33, %v3463_v62 }
 0x44b   :  { %6117 = vmatprep.subr.bf16.mxu1 %v9103_v34 }
 0x44e   :  { %6119 = vmatpush3.bf16.msra.mxu1 %v6118_v36  ;;  %v3469_v36 = vld [vmem:[%s9049_s5 + $0x50] sm:$0xff] }
 0x44f   :  { %6120 = vmatprep.subr.bf16.mxu1 %v9103_v34  ;;  %v6187_v31 = vpack.c.bf16 %v3470_v14, %v3469_v36 }
 0x452   :  { %6122 = vmatpush3.bf16.msra.mxu1 %v6121_v44  ;;  %v3471_v44 = vld [vmem:[%s9049_s5 + $0x60] sm:$0xff] }
 0x453   :  { %6147 = vmatprep.subr.bf16.mxu1 %v9103_v34  ;;  %v6190_v0 = vpack.c.bf16 %v3472_v5, %v3471_v44 }
 0x455   :  { %5402 = vmatmul.mubr.f32.vlgmr.msra.gmra.mrb[34].mxu1 %v1250_v25  ;;  %v3473_v25 = vld [vmem:[%s9049_s5 + $0x70] sm:$0xff] }
 0x456   :  { %6149 = vmatpush3.bf16.msra.mxu1 %v6148_v10  ;;  %5471 = vmatprep.mubr.msk.f32.mxu1 %vm6226_vm2, %v9101_v32  ;;  %v6193_v26 = vpack.c.bf16 %v3474_v55, %v3473_v25 }
 0x457   :  { %6150 = vmatprep.subr.bf16.mxu1 %v9103_v34 }
 0x45a   :  { %6152 = vmatpush3.bf16.msra.mxu1 %v6151_v39 }
 0x45b   :  { %6153 = vmatprep.subr.bf16.mxu1 %v9103_v34 }
 0x45e   :  { %6155 = vmatpush3.bf16.msra.mxu1 %v6154_v53  ;;  %v3555_v53 = vld [vmem:[%s9050_s7 + $0x10] sm:$0xff] }
 0x45f   :  { %6156 = vmatprep.subr.bf16.mxu1 %v9103_v34 }
 0x462   :  { %6158 = vmatpush3.bf16.msra.mxu1 %v6157_v40  ;;  %v3557_v40 = vld [vmem:[%s9050_s7 + $0x20] sm:$0xff] }
 0x463   :  { %6159 = vmatprep.subr.bf16.mxu1 %v9103_v34  ;;  %v6202_v58 = vpack.c.bf16 %v3558_v2, %v3557_v40 }
 0x466   :  { %6161 = vmatpush3.bf16.msra.mxu1 %v6160_v20  ;;  %v3559_v20 = vld [vmem:[%s9050_s7 + $0x30] sm:$0xff] }
 0x467   :  { %6162 = vmatprep.subr.bf16.mxu1 %v9103_v34  ;;  %v6205_v43 = vpack.c.bf16 %v3560_v54, %v3559_v20 }
 0x468   :  { %v2301_v63 = vpop.f32.mrb[22].mxu1 }
 0x469   :  { %v2305_v9 = vadd.f32 %v2301_v63, %v2217_v35  ;;  %v5018_v46 = vpop.f32.mrb[23].mxu1  ;;  %v3468_v35 = vld [vmem:[%s9049_s5 + $0x48] sm:$0xff]  ;;  %v3563_v63 = vld [vmem:[%s9050_s7 + $0x50] sm:$0xff] }
 0x46a   :  { %6164 = vmatpush3.bf16.msra.mxu1 %v6163_v37  ;;  %v6184_v1 = vpack.c.bf16 %v3468_v35, %v3467_v18  ;;  %v3561_v37 = vld [vmem:[%s9050_s7 + $0x40] sm:$0xff] }
 0x46b   :  { %6165 = vmatprep.subr.bf16.mxu1 %v9103_v34  ;;  %v6208_v15 = vpack.c.bf16 %v3562_v60, %v3561_v37 }
 0x46e   :  { %6167 = vmatpush3.bf16.msra.mxu1 %v6166_v59  ;;  %v3565_v59 = vld [vmem:[%s9050_s7 + $0x60] sm:$0xff] }
 0x46f   :  { %6168 = vmatprep.subr.bf16.mxu1 %v9103_v34  ;;  %v6214_v6 = vpack.c.bf16 %v3566_v7, %v3565_v59 }
 0x472   :  { %6170 = vmatpush3.bf16.msra.mxu1 %v6169_v28 }
 0x473   :  { %6195 = vmatprep.subr.bf16.mxu1 %v9103_v34 }
 0x475   :  { %5472 = vmatmul.mubr.f32.vlgmr.msra.gmra.mrb[36].mxu1 %v1252_v47 }
 0x476   :  { %5541 = vmatprep.mubr.msk.f32.mxu1 %vm6226_vm2, %v9101_v32  ;;  %v3461_v32 = vld [vmem:[%s9049_s5 + $0x10] sm:$0xff]  ;;  %6197 = vmatpush3.bf16.msra.mxu1 %v6196_v48 }
 0x477   :  { %6198 = vmatprep.subr.bf16.mxu1 %v9103_v34 }
 0x488   :  { %v2389_v56 = vpop.f32.mrb[24].mxu1 }
 0x489   :  { %v2393_v45 = vadd.f32 %v2389_v56, %v2305_v9  ;;  %v5053_v4 = vpop.f32.mrb[25].mxu1  ;;  %v3564_v9 = vld [vmem:[%s9050_s7 + $0x58] sm:$0xff] }
 0x48a   :  { %v6211_v46 = vpack.c.bf16 %v3564_v9, %v3563_v63 }
 0x48b   :  { %v2481_v21 = vadd.f32 %v8323_v41, %v2393_v45  ;;  %v3462_v41 = vld [vmem:[%s9049_s5 + $0x18] sm:$0xff] }
 0x48c   :  { %v6175_v22 = vpack.c.bf16 %v3462_v41, %v3461_v32 }
 0x48e   :  { %6176 = vmatpush3.bf16.msra.mxu0 %v6175_v22 }
 0x48f   :  { %6177 = vmatprep.subr.bf16.mxu0 %v9103_v34 }
 0x492   :  { %6179 = vmatpush3.bf16.msra.mxu0 %v6178_v49 }
 0x493   :  { %6180 = vmatprep.subr.bf16.mxu0 %v9103_v34 }
 0x4a8   :  { %v2565_v61 = vpop.f32.mrb[26].mxu1 }
 0x4a9   :  { %v2569_v52 = vadd.f32 %v2565_v61, %v2481_v21  ;;  %v5123_v13 = vpop.f32.mrb[27].mxu1 }
 0x4ab   :  { %v2657_v11 = vadd.f32 %v8385_v38, %v2569_v52  ;;  %v3465_v38 = vld [vmem:[%s9049_s5 + $0x30] sm:$0xff] }
 0x4ac   :  { %v6181_v23 = vpack.c.bf16 %v3466_v51, %v3465_v38 }
 0x4ae   :  { %6182 = vmatpush3.bf16.msra.mxu0 %v6181_v23  ;;  %v4139_v23 = vld [vmem:[%s9053_s8] ss:$0 sm:$0xff] }
 0x4af   :  { %6183 = vmatprep.subr.bf16.mxu0 %v9103_v34 }
 0x4b2   :  { %6185 = vmatpush3.bf16.msra.mxu0 %v6184_v1 }
 0x4b3   :  { %6186 = vmatprep.subr.bf16.mxu0 %v9103_v34 }
 0x4b6   :  { %6188 = vmatpush3.bf16.msra.mxu0 %v6187_v31 }
 0x4b7   :  { %6189 = vmatprep.subr.bf16.mxu0 %v9103_v34 }
 0x4ba   :  { %6191 = vmatpush3.bf16.msra.mxu0 %v6190_v0 }
 0x4bb   :  { %6192 = vmatprep.subr.bf16.mxu0 %v9103_v34 }
 0x4be   :  { %6194 = vmatpush3.bf16.msra.mxu0 %v6193_v26 }
 0x4c8   :  { %v2741_v8 = vpop.f32.mrb[28].mxu1 }
 0x4c9   :  { %v2745_v19 = vadd.f32 %v2741_v8, %v2657_v11  ;;  %v5193_v10 = vpop.f32.mrb[29].mxu1  ;;  %v4137_v11 = vld [vmem:[%s9051_s4] ss:$0 sm:$0xff] }
 0x4cb   :  { %v2833_v39 = vadd.f32 %v8447_v24, %v2745_v19  ;;  %v6199_v24 = vpack.c.bf16 %v3556_v27, %v3555_v53 }
 0x4cd   :  { %6200 = vmatpush3.bf16.msra.mxu1 %v6199_v24 }
 0x4ce   :  { %6201 = vmatprep.subr.bf16.mxu1 %v9103_v34 }
 0x4d1   :  { %6203 = vmatpush3.bf16.msra.mxu1 %v6202_v58 }
 0x4d2   :  { %6204 = vmatprep.subr.bf16.mxu1 %v9103_v34 }
 0x4d5   :  { %6206 = vmatpush3.bf16.msra.mxu1 %v6205_v43 }
 0x4d6   :  { %6207 = vmatprep.subr.bf16.mxu1 %v9103_v34 }
 0x4d9   :  { %6209 = vmatpush3.bf16.msra.mxu1 %v6208_v15 }
 0x4da   :  { %6210 = vmatprep.subr.bf16.mxu1 %v9103_v34 }
 0x4dd   :  { %6212 = vmatpush3.bf16.msra.mxu1 %v6211_v46 }
 0x4de   :  { %6213 = vmatprep.subr.bf16.mxu1 %v9103_v34 }
 0x4e1   :  { %6215 = vmatpush3.bf16.msra.mxu1 %v6214_v6 }
 0x4e2   :  { %6216 = vmatprep.subr.bf16.mxu1 %v9103_v34  ;;  %v3567_v34 = vld [vmem:[%s9050_s7 + $0x70] sm:$0xff] }
 0x4e8   :  { %v2917_v28 = vpop.f32.mrb[30].mxu1 }
 0x4e9   :  { %v2921_v57 = vadd.f32 %v2917_v28, %v2833_v39  ;;  %v5263_v47 = vpop.f32.mrb[31].mxu1 }
 0x4eb   :  { %v3009_v56 = vadd.f32 %v8509_v16, %v2921_v57 }
 0x508   :  { %v3093_v45 = vpop.f32.mrb[32].mxu1 }
 0x509   :  { %v3097_v4 = vadd.f32 %v3093_v45, %v3009_v56  ;;  %v5333_v21 = vpop.f32.mrb[33].mxu1 }
 0x50b   :  { %v3185_v61 = vadd.f32 %v8571_v17, %v3097_v4  ;;  %v3568_v17 = vld [vmem:[%s9050_s7 + $0x78] sm:$0xff] }
 0x50c   :  { %v6217_v62 = vpack.c.bf16 %v3568_v17, %v3567_v34 }
 0x50e   :  { %6218 = vmatpush3.bf16.msra.mxu1 %v6217_v62 }
 0x528   :  { %v3269_v52 = vpop.f32.mrb[34].mxu1 }
 0x529   :  { %v3273_v13 = vadd.f32 %v3269_v52, %v3185_v61  ;;  %v5403_v3 = vpop.f32.mrb[35].mxu1 }
 0x52b   :  { %v3361_v42 = vadd.f32 %v8633_v29, %v3273_v13  ;;  %v4138_v29 = vld [vmem:[%s9052_s6] ss:$0 sm:$0xff] }
 0x548   :  { %v3445_v32 = vpop.f32.mrb[36].mxu1 }
 0x549   :  { %v3449_v30 = vadd.f32 %v3445_v32, %v3361_v42  ;;  %v5473_v16 = vpop.f32.mrb[37].mxu1 }
 0x54b   :  { %v3457_v41 = vadd.f32 %v4137_v11, %v3449_v30 }
 0x54d   :  { %v3458_v22 = vmax.f32 %v3457_v41, 0.0 }
 0x54f   :  { %5507 = vmatmul.mubr.f32.vlgmr.msra.gmra.mrb[212].mxu0 %v3458_v22 }
 0x622   :  { %v3548_v33 = vpop.f32.mrb[212].mxu0 }
 0x623   :  { %v3549_v49 = vadd.f32 %v4138_v29, %v3548_v33  ;;  %v5508_v38 = vpop.f32.mrb[213].mxu0 }
 0x625   :  { %v3552_v51 = vmax.f32 %v3549_v49, 0.0 }
 0x627   :  { %5542 = vmatmul.mubr.f32.vlgmr.msra.gmra.mrb[38].mxu1 %v3552_v51 }
 0x6fa   :  { %v3642_v18 = vpop.f32.mrb[38].mxu1 }
 0x6fb   :  { %v3643_v35 = vadd.f32 %v4139_v23, %v3642_v18  ;;  %v5543_v1 = vpop.f32.mrb[39].mxu1 }
 0x6fd   :  { %3646 = vst [vmem:[%s9054_s9] sm:$0xff] %v3643_v35 }

</bundles_post_ra>
